<compile_context>
chip_gen: v5e
topology: v5e:2x2
jax: 0.10.0
libtpu: 0.0.40
codegen_flags: <defaults>
</compile_context>

<pallas_src>
import math
import jax
import jax.numpy as jnp
from jax.experimental import pallas as pl
from jax.experimental.pallas import tpu as pltpu


def _round_up(n: int, m: int) -> int:
    return ((n + m - 1) // m) * m


def wnet_kernel(x_ref, w1_ref, b1_ref, w2_ref, b2_ref, out_ref):
    # f32 operands -> exact-parity MXU passes; bf16 operands -> native bf16 MXU.
    is_f32 = x_ref.dtype == jnp.float32
    prec = jax.lax.Precision.HIGHEST if is_f32 else jax.lax.Precision.DEFAULT

    # linear1: [tb, In] @ [In, H] + [1, H]  (bias broadcasts over batch; f32 accumulate)
    h = jnp.dot(x_ref[...], w1_ref[...],
                preferred_element_type=jnp.float32, precision=prec)
    h = jnp.maximum(h + b1_ref[...], 0.0)                      # ReLU (f32)

    # linear2: [tb, H] @ [H, Out] + [1, Out]
    h = h.astype(w2_ref.dtype)
    o = jnp.dot(h, w2_ref[...],
                preferred_element_type=jnp.float32, precision=prec)
    o = o + b2_ref[...]

    # sigmoid (exp + reciprocal land on the EUP slot)
    out_ref[...] = jax.nn.sigmoid(o).astype(out_ref.dtype)


def wnet_forward(x, w1, b1, w2, b2, *, tile_b: int = 512, use_bf16: bool = False):
    """x: [B, In], w1: [In, H], b1: [H], w2: [H, Out], b2: [Out] -> [B, Out] (float32)."""
    B, In = x.shape
    In_w, H = w1.shape
    H_w, Out = w2.shape
    assert In_w == In and H_w == H, "weight shapes inconsistent with input"

    # Batch tile: multiple of 8 (sublane) and capped at the (8-aligned) batch size.
    B8 = _round_up(B, 8)
    tb = max(8, min(_round_up(tile_b, 8), B8))
    B_p = _round_up(B8, tb)

    compute_dtype = jnp.bfloat16 if use_bf16 else jnp.float32
    xk = x.astype(compute_dtype)
    if B_p != B:  # pad rows only when the tile does not divide B (no-op otherwise)
        xk = jnp.zeros((B_p, In), compute_dtype).at[:B].set(xk)

    w1k = w1.astype(compute_dtype)
    w2k = w2.astype(compute_dtype)
    b1k = b1.astype(jnp.float32).reshape(1, H)
    b2k = b2.astype(jnp.float32).reshape(1, Out)

    out = pl.pallas_call(
        wnet_kernel,
        out_shape=jax.ShapeDtypeStruct((B_p, Out), jnp.float32),
        grid_spec=pl.GridSpec(
            grid=(B_p // tb,),
            in_specs=[
                pl.BlockSpec((tb, In), lambda i: (i, 0)),   # x tile follows batch axis
                pl.BlockSpec((In, H), lambda i: (0, 0)),    # weights/biases VMEM-resident
                pl.BlockSpec((1, H), lambda i: (0, 0)),
                pl.BlockSpec((H, Out), lambda i: (0, 0)),
                pl.BlockSpec((1, Out), lambda i: (0, 0)),
            ],
            out_specs=pl.BlockSpec((tb, Out), lambda i: (i, 0)),
        ),
        compiler_params=pltpu.CompilerParams(
            dimension_semantics=("parallel",),   # batch steps independent -> megacore OK
        ),
    )(xk, w1k, b1k, w2k, b2k)

    return out if B_p == B else out[:B]


def init_linear_params(key, in_features, out_features):
    """Deterministic init mirroring nn.Linear defaults (uniform in +-1/sqrt(fan_in)).
    Returns W as [in, out] (transposed vs PyTorch)."""
    k_w, k_b = jax.random.split(key)
    bound = 1.0 / math.sqrt(in_features)
    w = jax.random.uniform(k_w, (in_features, out_features),
                           minval=-bound, maxval=bound, dtype=jnp.float32)
    b = jax.random.uniform(k_b, (out_features,),
                           minval=-bound, maxval=bound, dtype=jnp.float32)
    return w, b


if __name__ == "__main__":
    # Shapes consistent with WNet(input, hidden, output).
    batch, in_dim, hidden, out_dim = 512, 16, 32, 4

    key = jax.random.PRNGKey(0)
    k_x, k_l1, k_l2 = jax.random.split(key, 3)

    x = jax.random.normal(k_x, (batch, in_dim), dtype=jnp.float32)
    w1, b1 = init_linear_params(k_l1, in_dim, hidden)
    w2, b2 = init_linear_params(k_l2, in_dim if False else hidden, out_dim)

    # Reference (same semantics as the PyTorch forward), exact-precision dots.
    hi = jax.lax.Precision.HIGHEST
    ref = jax.nn.sigmoid(
        jnp.dot(jnp.maximum(jnp.dot(x, w1, precision=hi) + b1, 0.0), w2, precision=hi) + b2
    )

    # 1) Default path: f32, single grid step (tile_b >= B).
    out = jax.block_until_ready(wnet_forward(x, w1, b1, w2, b2))
    assert out.shape == (batch, out_dim)
    assert jnp.allclose(out, ref, atol=1e-5, rtol=1e-5)

    # 2) Batch-tiled path: grid=(4,), exercises the multi-step pipeline.
    out_t = jax.block_until_ready(wnet_forward(x, w1, b1, w2, b2, tile_b=128))
    assert jnp.allclose(out_t, ref, atol=1e-5, rtol=1e-5)

    # 3) Optional bf16-operand path (f32 accumulate): looser tolerance.
    out_bf = jax.block_until_ready(wnet_forward(x, w1, b1, w2, b2, use_bf16=True))
    assert jnp.allclose(out_bf, ref, atol=5e-3, rtol=5e-3)

    print("KERNEL_OK")
</pallas_src>

<mosaic_0001>
module attributes {stable_mosaic.version = 11 : i64} {
  func.func @wnet_kernel(%arg0: i32, %arg1: memref<512x16xf32, #tpu.memory_space<vmem>>, %arg2: memref<16x32xf32, #tpu.memory_space<vmem>>, %arg3: memref<1x32xf32, #tpu.memory_space<vmem>>, %arg4: memref<32x4xf32, #tpu.memory_space<vmem>>, %arg5: memref<1x4xf32, #tpu.memory_space<vmem>>, %arg6: memref<512x4xf32, #tpu.memory_space<vmem>>) attributes {dimension_semantics = [#tpu.dimension_semantics<parallel>], iteration_bounds = array<i64: 1>, scalar_prefetch = 0 : i64, scratch_operands = 0 : i64, tpu.core_type = #tpu.core_type<tc>, window_params = [{transform_indices = @transform_0, window_bounds = array<i64: 512, 16>}, {pipeline_mode = #tpu.pipeline_mode<synchronous>, transform_indices = @transform_1, window_bounds = array<i64: 16, 32>}, {pipeline_mode = #tpu.pipeline_mode<synchronous>, transform_indices = @transform_2, window_bounds = array<i64: 1, 32>}, {pipeline_mode = #tpu.pipeline_mode<synchronous>, transform_indices = @transform_3, window_bounds = array<i64: 32, 4>}, {pipeline_mode = #tpu.pipeline_mode<synchronous>, transform_indices = @transform_4, window_bounds = array<i64: 1, 4>}, {transform_indices = @transform_5, window_bounds = array<i64: 512, 4>}]} {
    %c0 = arith.constant 0 : index
    %c0_0 = arith.constant 0 : index
    %0 = vector.load %arg1[%c0, %c0_0] : memref<512x16xf32, #tpu.memory_space<vmem>>, vector<512x16xf32>
    %c0_1 = arith.constant 0 : index
    %c0_2 = arith.constant 0 : index
    %1 = vector.load %arg2[%c0_1, %c0_2] : memref<16x32xf32, #tpu.memory_space<vmem>>, vector<16x32xf32>
    %cst = arith.constant dense<0.000000e+00> : vector<512x32xf32>
    %2 = tpu.matmul %0, %1, %cst {dimension_numbers = #tpu.dot_dimension_numbers<[1], [0], [0], [1], [0, 0, 1, 1], [], []>, precision = #tpu.contract_precision<fp32>} : vector<512x16xf32>, vector<16x32xf32>, vector<512x32xf32> -> vector<512x32xf32>
    %c0_3 = arith.constant 0 : index
    %c0_4 = arith.constant 0 : index
    %3 = vector.load %arg3[%c0_3, %c0_4] : memref<1x32xf32, #tpu.memory_space<vmem>>, vector<1x32xf32>
    %4 = vector.broadcast %3 : vector<1x32xf32> to vector<512x32xf32>
    %5 = arith.addf %2, %4 : vector<512x32xf32>
    %cst_5 = arith.constant 0.000000e+00 : f32
    %6 = vector.broadcast %cst_5 : f32 to vector<512x32xf32>
    %7 = arith.maximumf %5, %6 : vector<512x32xf32>
    %c0_6 = arith.constant 0 : index
    %c0_7 = arith.constant 0 : index
    %8 = vector.load %arg4[%c0_6, %c0_7] : memref<32x4xf32, #tpu.memory_space<vmem>>, vector<32x4xf32>
    %cst_8 = arith.constant dense<0.000000e+00> : vector<512x4xf32>
    %9 = tpu.matmul %7, %8, %cst_8 {dimension_numbers = #tpu.dot_dimension_numbers<[1], [0], [0], [1], [0, 0, 1, 1], [], []>, precision = #tpu.contract_precision<fp32>} : vector<512x32xf32>, vector<32x4xf32>, vector<512x4xf32> -> vector<512x4xf32>
    %c0_9 = arith.constant 0 : index
    %c0_10 = arith.constant 0 : index
    %10 = vector.load %arg5[%c0_9, %c0_10] : memref<1x4xf32, #tpu.memory_space<vmem>>, vector<1x4xf32>
    %11 = vector.broadcast %10 : vector<1x4xf32> to vector<512x4xf32>
    %12 = arith.addf %9, %11 : vector<512x4xf32>
    %13 = arith.negf %12 : vector<512x4xf32>
    %14 = math.exp %13 : vector<512x4xf32>
    %cst_11 = arith.constant 1.000000e+00 : f32
    %15 = vector.broadcast %cst_11 : f32 to vector<512x4xf32>
    %16 = arith.addf %15, %14 : vector<512x4xf32>
    %17 = arith.divf %15, %16 : vector<512x4xf32>
    %c0_12 = arith.constant 0 : index
    %c0_13 = arith.constant 0 : index
    %18 = vector.load %arg6[%c0_12, %c0_13] : memref<512x4xf32, #tpu.memory_space<vmem>>, vector<512x4xf32>
    tpu.vector_store %arg6[%c0_12, %c0_13], %17 {strides = array<i32>} : memref<512x4xf32, #tpu.memory_space<vmem>>, vector<512x4xf32>,
    return
  }
  func.func @transform_0(%arg0: i32) -> (i32, i32) {
    %c0_i32 = arith.constant 0 : i32
    %c0_i32_0 = arith.constant 0 : i32
    return %arg0, %c0_i32 : i32, i32
  }
  func.func @transform_1(%arg0: i32) -> (i32, i32) {
    %c0_i32 = arith.constant 0 : i32
    %c0_i32_0 = arith.constant 0 : i32
    %c0_i32_1 = arith.constant 0 : i32
    return %c0_i32, %c0_i32_0 : i32, i32
  }
  func.func @transform_2(%arg0: i32) -> (i32, i32) {
    %c0_i32 = arith.constant 0 : i32
    %c0_i32_0 = arith.constant 0 : i32
    %c0_i32_1 = arith.constant 0 : i32
    return %c0_i32, %c0_i32_0 : i32, i32
  }
  func.func @transform_3(%arg0: i32) -> (i32, i32) {
    %c0_i32 = arith.constant 0 : i32
    %c0_i32_0 = arith.constant 0 : i32
    %c0_i32_1 = arith.constant 0 : i32
    return %c0_i32, %c0_i32_0 : i32, i32
  }
  func.func @transform_4(%arg0: i32) -> (i32, i32) {
    %c0_i32 = arith.constant 0 : i32
    %c0_i32_0 = arith.constant 0 : i32
    %c0_i32_1 = arith.constant 0 : i32
    return %c0_i32, %c0_i32_0 : i32, i32
  }
  func.func @transform_5(%arg0: i32) -> (i32, i32) {
    %c0_i32 = arith.constant 0 : i32
    %c0_i32_0 = arith.constant 0 : i32
    return %arg0, %c0_i32 : i32, i32
  }
}

</mosaic_0001>

<bundles_post_ra>
// kernel: tpu_custom_call.1
= control target key start
LH: loop header
LB: loop body
LE: loop exit
PB: predicated region body
PF: predicated region fallthrough
CT: control target
= control target key end

     0   :  { %vm90_vm0 = vcmask 130048   ;;  %vm2467_vm1 = vcmask 261120   ;;  %vm6014_vm5 = vcmask 31744   ;;  %s9750_s1 = inlined_call_operand.vmem [shape: f32[16,32], index: 1, kind: input, shape index: {}]   ;;  %s9751_s0 = inlined_call_operand.vmem [shape: f32[512,16], index: 0, kind: input, shape index: {}]   ;;  %s9752_s2 = inlined_call_operand.vmem [shape: f32[1,32], index: 2, kind: input, shape index: {}]   ;;  %s9753_s3 = inlined_call_operand.vmem [shape: f32[32,4], index: 3, kind: input, shape index: {}]   ;;  %s9754_s4 = inlined_call_operand.vmem [shape: f32[1,4], index: 4, kind: input, shape index: {}]   ;;  %s9755_s5 = inlined_call_operand.vmem [shape: f32[512,4], index: 5, kind: output, shape index: {}]  }
   0x1   :  { %v85_v0 = vld [vmem:[%s9750_s1 + $0x8] sm:$0xff]  ;;  %v84_v1 = vld [vmem:[%s9750_s1] sm:$0xff]  ;;  %v22_v9 = vld [vmem:[%s9751_s0 + $0x10] sm:$0xff] }
   0x2   :  { %v20_v2 = vld [vmem:[%s9751_s0] sm:$0xff]  ;;  %v297_v3 = vand.u32 4294901760, %v85_v0  ;;  %v299_v4 = vand.u32 4294901760, %v84_v1  ;;  %v21_v6 = vld [vmem:[%s9751_s0 + $0x8] sm:$0xff]  ;;  %v98_v17 = vsel %vm90_vm0, %v22_v9, 0  ;;  %v23_v27 = vld [vmem:[%s9751_s0 + $0x18] sm:$0xff] }
   0x3   :  { %v92_v5 = vsel %vm90_vm0, %v20_v2, 0  ;;  %v95_v8 = vsel %vm90_vm0, %v21_v6, 0  ;;  %v6464_v23 = vand.u32 4294901760, %v98_v17  ;;  %v101_v30 = vsel %vm90_vm0, %v23_v27, 0  ;;  %v24_v34 = vld [vmem:[%s9751_s0 + $0x20] sm:$0xff]  ;;  %v25_v41 = vld [vmem:[%s9751_s0 + $0x28] sm:$0xff] }
   0x4   :  { %v6453_v7 = vand.u32 4294901760, %v92_v5  ;;  %v829_v10 = vsub.f32 %v85_v0, %v297_v3  ;;  %298 = vmatpush.msra.mxu0 %v297_v3  ;;  %v835_v11 = vsub.f32 %v84_v1, %v299_v4  ;;  %1453 = vmatpush.msra.mxu3 %v297_v3  ;;  %v6459_v12 = vand.u32 4294901760, %v95_v8  ;;  %v26_v48 = vld [vmem:[%s9751_s0 + $0x30] sm:$0xff]  ;;  %v27_v55 = vld [vmem:[%s9751_s0 + $0x38] sm:$0xff]  ;;  %v28_v62 = vld [vmem:[%s9751_s0 + $0x40] sm:$0xff] }
   0x5   :  { %v318_v29 = vsub.f32 %v98_v17, %v6464_v23  ;;  %v6472_v33 = vand.u32 4294901760, %v101_v30  ;;  %v104_v37 = vsel %vm90_vm0, %v24_v34, 0  ;;  %v107_v44 = vsel %vm90_vm0, %v25_v41, 0 }
   0x6   :  { %v302_v13 = vsub.f32 %v92_v5, %v6453_v7  ;;  %1113 = vmatpush.msra.mxu2 %v829_v10  ;;  %300 = vmatpush.msra.mxu0 %v299_v4  ;;  %v830_v14 = vand.u32 4294901760, %v829_v10  ;;  %v836_v15 = vand.u32 4294901760, %v835_v11  ;;  %v310_v16 = vsub.f32 %v95_v8, %v6459_v12  ;;  %v29_v5 = vld [vmem:[%s9751_s0 + $0x48] sm:$0xff] }
   0x7   :  { %1455 = vmatpush.msra.mxu3 %v299_v4  ;;  %v319_v32 = vand.u32 4294901760, %v318_v29  ;;  %v326_v36 = vsub.f32 %v101_v30, %v6472_v33  ;;  %v6480_v40 = vand.u32 4294901760, %v104_v37  ;;  %v6488_v47 = vand.u32 4294901760, %v107_v44 }
   0x8   :  { %v303_v18 = vand.u32 4294901760, %v302_v13  ;;  %1116 = vmatpush.msra.mxu2 %v835_v11  ;;  %v831_v19 = vsub.f32 %v829_v10, %v830_v14  ;;  %1858 = vmatpush.msrb.mxu0 %v830_v14  ;;  %v837_v20 = vsub.f32 %v835_v11, %v836_v15  ;;  %v311_v22 = vand.u32 4294901760, %v310_v16  ;;  %v30_v14 = vld [vmem:[%s9751_s0 + $0x50] sm:$0xff] }
   0x9   :  { %1119 = vmatmul.f32.vlgmr.msra.gmra.mxu2 %v302_v13  ;;  %v320_v35 = vsub.f32 %v318_v29, %v319_v32  ;;  %v327_v39 = vand.u32 4294901760, %v326_v36  ;;  %v334_v43 = vsub.f32 %v104_v37, %v6480_v40  ;;  %v342_v50 = vsub.f32 %v107_v44, %v6488_v47  ;;  %v33_v37 = vld [vmem:[%s9751_s0 + $0x68] sm:$0xff] }
   0xa   :  { %v304_v21 = vsub.f32 %v302_v13, %v303_v18  ;;  %1459 = vmatmul.f32.vlgmr.msra.gmra.mxu3 %v303_v18  ;;  %v832_v24 = vand.u32 4294901760, %v831_v19  ;;  %v838_v25 = vand.u32 4294901760, %v837_v20  ;;  %1862 = vmatpush.msrb.mxu0 %v836_v15  ;;  %v312_v28 = vsub.f32 %v310_v16, %v311_v22 }
   0xb   :  { %v321_v38 = vand.u32 4294901760, %v320_v35  ;;  %v328_v42 = vsub.f32 %v326_v36, %v327_v39  ;;  %v335_v46 = vand.u32 4294901760, %v334_v43  ;;  %v110_v51 = vsel %vm90_vm0, %v26_v48, 0 }
   0xc   :  { %v305_v26 = vand.u32 4294901760, %v304_v21  ;;  %833 = vmatpush.msra.mxu1 %v832_v24  ;;  %v313_v31 = vand.u32 4294901760, %v312_v28  ;;  %v343_v53 = vand.u32 4294901760, %v342_v50  ;;  %v6496_v54 = vand.u32 4294901760, %v110_v51  ;;  %v31_v21 = vld [vmem:[%s9751_s0 + $0x58] sm:$0xff] }
   0xd   :  { %v329_v45 = vand.u32 4294901760, %v328_v42  ;;  %v336_v49 = vsub.f32 %v334_v43, %v335_v46  ;;  %v113_v58 = vsel %vm90_vm0, %v27_v55, 0  ;;  %v116_v1 = vsel %vm90_vm0, %v28_v62, 0  ;;  %v36_v62 = vld [vmem:[%s9751_s0 + $0x80] sm:$0xff] }
   0xe   :  { %306 = vmatmul.f32.vlgmr.msra.gmra.mxu0 %v305_v26  ;;  %839 = vmatpush.msra.mxu1 %v838_v25  ;;  %v344_v56 = vsub.f32 %v342_v50, %v343_v53  ;;  %v350_v57 = vsub.f32 %v110_v51, %v6496_v54  ;;  %v6504_v61 = vand.u32 4294901760, %v113_v58  ;;  %v119_v9 = vsel %vm90_vm0, %v29_v5, 0 }
   0xf   :  { %841 = vmatmul.f32.vlgmr.msra.gmra.mxu1 %v6453_v7  ;;  %v337_v52 = vand.u32 4294901760, %v336_v49  ;;  %v6520_v13 = vand.u32 4294901760, %v119_v9  ;;  %v122_v17 = vsel %vm90_vm0, %v30_v14, 0  ;;  %v125_v25 = vsel %vm90_vm0, %v31_v21, 0  ;;  %v38_v21 = vld [vmem:[%s9751_s0 + $0x90] sm:$0xff] }
  0x10   :  { %2135 = vmatpush.msrb.mxu1 %v297_v3  ;;  %v345_v59 = vand.u32 4294901760, %v344_v56  ;;  %v351_v60 = vand.u32 4294901760, %v350_v57  ;;  %v358_v0 = vsub.f32 %v113_v58, %v6504_v61  ;;  %v6528_v20 = vand.u32 4294901760, %v122_v17 }
  0x11   :  { %1124 = vmatmul.f32.gmra.mxu2 %v310_v16  ;;  %v374_v16 = vsub.f32 %v119_v9, %v6520_v13  ;;  %v6536_v28 = vand.u32 4294901760, %v125_v25  ;;  %v131_v41 = vsel %vm90_vm0, %v33_v37, 0  ;;  %v39_v37 = vld [vmem:[%s9751_s0 + $0x98] sm:$0xff] }
  0x12   :  { %1465 = vmatmul.f32.gmra.mxu3 %v311_v22  ;;  %2137 = vmatpush.msrb.mxu1 %v299_v4  ;;  %v352_v63 = vsub.f32 %v350_v57, %v351_v60  ;;  %v359_v3 = vand.u32 4294901760, %v358_v0  ;;  %v6512_v4 = vand.u32 4294901760, %v116_v1  ;;  %v382_v24 = vsub.f32 %v122_v17, %v6528_v20 }
  0x13   :  { %v375_v19 = vand.u32 4294901760, %v374_v16  ;;  %v6552_v44 = vand.u32 4294901760, %v131_v41 }
  0x14   :  { %v353_v2 = vand.u32 4294901760, %v352_v63  ;;  %v360_v6 = vsub.f32 %v358_v0, %v359_v3  ;;  %v366_v8 = vsub.f32 %v116_v1, %v6512_v4  ;;  %v383_v27 = vand.u32 4294901760, %v382_v24 }
  0x15   :  { %v376_v22 = vsub.f32 %v374_v16, %v375_v19  ;;  %v406_v48 = vsub.f32 %v131_v41, %v6552_v44  ;;  %v140_v1 = vsel %vm90_vm0, %v36_v62, 0 }
  0x16   :  { %314 = vmatmul.f32.gmra.mxu0 %v313_v31  ;;  %v361_v10 = vand.u32 4294901760, %v360_v6  ;;  %v367_v11 = vand.u32 4294901760, %v366_v8  ;;  %v384_v30 = vsub.f32 %v382_v24, %v383_v27  ;;  %v390_v31 = vsub.f32 %v125_v25, %v6536_v28  ;;  %v37_v6 = vld [vmem:[%s9751_s0 + $0x88] sm:$0xff] }
  0x17   :  { %845 = vmatmul.f32.gmra.mxu1 %v6459_v12  ;;  %v377_v26 = vand.u32 4294901760, %v376_v22  ;;  %v407_v51 = vand.u32 4294901760, %v406_v48  ;;  %v6576_v5 = vand.u32 4294901760, %v140_v1 }
  0x18   :  { %v368_v15 = vsub.f32 %v366_v8, %v367_v11  ;;  %v385_v34 = vand.u32 4294901760, %v384_v30  ;;  %v391_v35 = vand.u32 4294901760, %v390_v31 }
  0x19   :  { %1129 = vmatmul.f32.gmra.mxu2 %v318_v29  ;;  %v32_v29 = vld [vmem:[%s9751_s0 + $0x60] sm:$0xff]  ;;  %v408_v55 = vsub.f32 %v406_v48, %v407_v51  ;;  %v430_v9 = vsub.f32 %v140_v1, %v6576_v5 }
  0x1a   :  { %1471 = vmatmul.f32.gmra.mxu3 %v319_v32  ;;  %v369_v18 = vand.u32 4294901760, %v368_v15  ;;  %v128_v32 = vsel %vm90_vm0, %v32_v29, 0  ;;  %v6610_v29 = vld [vmem:[%s9752_s2] ss:$0 sm:$0xff] }
  0x1b   :  { %v409_v58 = vand.u32 4294901760, %v408_v55  ;;  %v431_v17 = vand.u32 4294901760, %v430_v9 }
  0x1e   :  { %322 = vmatmul.f32.gmra.mxu0 %v321_v38  ;;  %v392_v38 = vsub.f32 %v390_v31, %v391_v35 }
  0x1f   :  { %849 = vmatmul.f32.gmra.mxu1 %v6464_v23 }
  0x20   :  { %v393_v42 = vand.u32 4294901760, %v392_v38 }
  0x21   :  { %1134 = vmatmul.f32.gmra.mxu2 %v326_v36  ;;  %v6544_v36 = vand.u32 4294901760, %v128_v32 }
  0x22   :  { %1477 = vmatmul.f32.gmra.mxu3 %v327_v39 }
  0x23   :  { %v398_v39 = vsub.f32 %v128_v32, %v6544_v36 }
  0x26   :  { %330 = vmatmul.f32.gmra.mxu0 %v329_v45  ;;  %v34_v45 = vld [vmem:[%s9751_s0 + $0x70] sm:$0xff] }
  0x27   :  { %853 = vmatmul.f32.gmra.mxu1 %v6472_v33  ;;  %v134_v49 = vsel %vm90_vm0, %v34_v45, 0 }
  0x29   :  { %1139 = vmatmul.f32.gmra.mxu2 %v334_v43  ;;  %v399_v43 = vand.u32 4294901760, %v398_v39 }
  0x2a   :  { %1483 = vmatmul.f32.gmra.mxu3 %v335_v46 }
  0x2b   :  { %v400_v46 = vsub.f32 %v398_v39, %v399_v43 }
  0x2e   :  { %338 = vmatmul.f32.gmra.mxu0 %v337_v52  ;;  %v6560_v52 = vand.u32 4294901760, %v134_v49 }
  0x2f   :  { %857 = vmatmul.f32.gmra.mxu1 %v6480_v40 }
  0x30   :  { %v414_v56 = vsub.f32 %v134_v49, %v6560_v52 }
  0x31   :  { %1144 = vmatmul.f32.gmra.mxu2 %v342_v50  ;;  %v401_v50 = vand.u32 4294901760, %v400_v46  ;;  %v149_v46 = vsel %vm90_vm0, %v39_v37, 0 }
  0x32   :  { %1489 = vmatmul.f32.gmra.mxu3 %v343_v53  ;;  %v35_v53 = vld [vmem:[%s9751_s0 + $0x78] sm:$0xff] }
  0x36   :  { %346 = vmatmul.f32.gmra.mxu0 %v345_v59  ;;  %v415_v59 = vand.u32 4294901760, %v414_v56 }
  0x37   :  { %861 = vmatmul.f32.gmra.mxu1 %v6488_v47 }
  0x38   :  { %v416_v63 = vsub.f32 %v414_v56, %v415_v59 }
  0x39   :  { %1149 = vmatmul.f32.gmra.mxu2 %v350_v57  ;;  %v137_v57 = vsel %vm90_vm0, %v35_v53, 0  ;;  %v6623_v53 = vand.u32 4294901760, %v149_v46 }
  0x3a   :  { %1495 = vmatmul.f32.gmra.mxu3 %v351_v60  ;;  %v6568_v60 = vand.u32 4294901760, %v137_v57 }
  0x3b   :  { %v454_v1 = vsub.f32 %v149_v46, %v6623_v53 }
  0x3e   :  { %354 = vmatmul.f32.gmra.mxu0 %v353_v2  ;;  %v417_v2 = vand.u32 4294901760, %v416_v63 }
  0x3f   :  { %865 = vmatmul.f32.gmra.mxu1 %v6496_v54 }
  0x41   :  { %1154 = vmatmul.f32.gmra.mxu2 %v358_v0  ;;  %v422_v0 = vsub.f32 %v137_v57, %v6568_v60  ;;  %v40_v57 = vld [vmem:[%s9751_s0 + $0xa0] sm:$0xff] }
  0x42   :  { %1501 = vmatmul.f32.gmra.mxu3 %v359_v3 }
  0x43   :  { %v423_v3 = vand.u32 4294901760, %v422_v0 }
  0x46   :  { %362 = vmatmul.f32.gmra.mxu0 %v361_v10  ;;  %v2462_v10 = vld [vmem:[%s9753_s3 + $0x18] sm:$0xff] }
  0x47   :  { %869 = vmatmul.f32.gmra.mxu1 %v6504_v61  ;;  %v6586_v14 = vand.u32 4294901760, %v2462_v10 }
  0x49   :  { %1159 = vmatmul.f32.gmra.mxu2 %v366_v8  ;;  %v424_v8 = vsub.f32 %v422_v0, %v423_v3  ;;  %v6591_v15 = vsub.f32 %v2462_v10, %v6586_v14  ;;  %3844 = vmatpush.msra.mxu1 %v6586_v14 }
  0x4a   :  { %1507 = vmatmul.f32.gmra.mxu3 %v367_v11  ;;  %v143_v11 = vsel %vm90_vm0, %v37_v6, 0  ;;  %2673 = vmatpush.msrb.mxu2 %v6586_v14 }
  0x4b   :  { %3500 = vmatpush.msra.mxu0 %v6591_v15 }
  0x4e   :  { %370 = vmatmul.f32.gmra.mxu0 %v369_v18  ;;  %v6594_v18 = vand.u32 4294901760, %v143_v11 }
  0x4f   :  { %873 = vmatmul.f32.gmra.mxu1 %v6512_v4 }
  0x50   :  { %v438_v25 = vsub.f32 %v143_v11, %v6594_v18 }
  0x51   :  { %1164 = vmatmul.f32.gmra.mxu2 %v374_v16  ;;  %v425_v16 = vand.u32 4294901760, %v424_v8 }
  0x52   :  { %1513 = vmatmul.f32.gmra.mxu3 %v375_v19  ;;  %v9756_v19 = vand.u32 4294901760, %v6591_v15 }
  0x54   :  { %v3208_v22 = vsub.f32 %v6591_v15, %v9756_v19 }
  0x56   :  { %378 = vmatmul.f32.gmra.mxu0 %v377_v26  ;;  %v146_v26 = vsel %vm90_vm0, %v38_v21, 0 }
  0x57   :  { %877 = vmatmul.f32.gmra.mxu1 %v6520_v13  ;;  %v6612_v32 = vand.u32 4294901760, %v146_v26 }
  0x59   :  { %1169 = vmatmul.f32.gmra.mxu2 %v382_v24  ;;  %v432_v24 = vsub.f32 %v430_v9, %v431_v17  ;;  %v446_v45 = vsub.f32 %v146_v26, %v6612_v32 }
  0x5a   :  { %1519 = vmatmul.f32.gmra.mxu3 %v383_v27  ;;  %v3209_v27 = vand.u32 4294901760, %v3208_v22 }
  0x5b   :  { %v433_v30 = vand.u32 4294901760, %v432_v24 }
  0x5c   :  { %3210 = vmatpush.msrb.mxu3 %v3209_v27 }
  0x5e   :  { %386 = vmatmul.f32.gmra.mxu0 %v385_v34 }
  0x5f   :  { %881 = vmatmul.f32.gmra.mxu1 %v6528_v20 }
  0x61   :  { %1174 = vmatmul.f32.gmra.mxu2 %v390_v31  ;;  %v439_v31 = vand.u32 4294901760, %v438_v25 }
  0x62   :  { %1525 = vmatmul.f32.gmra.mxu3 %v391_v35 }
  0x66   :  { %394 = vmatmul.f32.gmra.mxu0 %v393_v42 }
  0x67   :  { %885 = vmatmul.f32.gmra.mxu1 %v6536_v28 }
  0x69   :  { %1179 = vmatmul.f32.gmra.mxu2 %v398_v39 }
  0x6a   :  { %1531 = vmatmul.f32.gmra.mxu3 %v399_v43  ;;  %v440_v43 = vsub.f32 %v438_v25, %v439_v31 }
  0x6e   :  { %402 = vmatmul.f32.gmra.mxu0 %v401_v50  ;;  %v441_v50 = vand.u32 4294901760, %v440_v43 }
  0x6f   :  { %889 = vmatmul.f32.gmra.mxu1 %v6544_v36 }
  0x71   :  { %1184 = vmatmul.f32.gmra.mxu2 %v406_v48 }
  0x72   :  { %1537 = vmatmul.f32.gmra.mxu3 %v407_v51  ;;  %v447_v51 = vand.u32 4294901760, %v446_v45 }
  0x76   :  { %410 = vmatmul.f32.gmra.mxu0 %v409_v58 }
  0x77   :  { %893 = vmatmul.f32.gmra.mxu1 %v6552_v44 }
  0x79   :  { %1189 = vmatmul.f32.gmra.mxu2 %v414_v56 }
  0x7a   :  { %1543 = vmatmul.f32.gmra.mxu3 %v415_v59 }
  0x7e   :  { %418 = vmatmul.f32.gmra.mxu0 %v417_v2  ;;  %v152_v2 = vsel %vm90_vm0, %v40_v57, 0 }
  0x7f   :  { %897 = vmatmul.f32.gmra.mxu1 %v6560_v52  ;;  %v6634_v10 = vand.u32 4294901760, %v152_v2 }
  0x81   :  { %1194 = vmatmul.f32.gmra.mxu2 %v422_v0  ;;  %v448_v0 = vsub.f32 %v446_v45, %v447_v51  ;;  %v462_v27 = vsub.f32 %v152_v2, %v6634_v10 }
  0x82   :  { %1549 = vmatmul.f32.gmra.mxu3 %v423_v3 }
  0x83   :  { %v449_v8 = vand.u32 4294901760, %v448_v0  ;;  %v463_v37 = vand.u32 4294901760, %v462_v27 }
  0x86   :  { %426 = vmatmul.f32.gmra.mxu0 %v425_v16 }
  0x87   :  { %901 = vmatmul.f32.gmra.mxu1 %v6568_v60 }
  0x89   :  { %1199 = vmatmul.f32.gmra.mxu2 %v430_v9  ;;  %v455_v9 = vand.u32 4294901760, %v454_v1 }
  0x8a   :  { %1555 = vmatmul.f32.gmra.mxu3 %v431_v17  ;;  %v41_v17 = vld [vmem:[%s9751_s0 + $0xa8] sm:$0xff] }
  0x8b   :  { %v307_v34 = vpop.f32.mrf.mxu0  ;;  %v456_v26 = vsub.f32 %v454_v1, %v455_v9 }
  0x8c   :  { %v308_v35 = vadd.f32 %v6610_v29, %v307_v34  ;;  %v842_v38 = vpop.f32.mrf.mxu1  ;;  %v1120_v39 = vpop.f32.mrf.mxu2 }
  0x8d   :  { %v1460_v42 = vpop.f32.mrf.mxu3 }
  0x8e   :  { %v843_v41 = vadd.f32 %v842_v38, %v308_v35  ;;  %434 = vmatmul.f32.gmra.mxu0 %v433_v30  ;;  %v155_v30 = vsel %vm90_vm0, %v41_v17, 0  ;;  %v457_v35 = vand.u32 4294901760, %v456_v26 }
  0x8f   :  { %905 = vmatmul.f32.gmra.mxu1 %v6576_v5  ;;  %v6645_v38 = vand.u32 4294901760, %v155_v30 }
  0x90   :  { %v1121_v48 = vadd.f32 %v1120_v39, %v843_v41 }
  0x91   :  { %1204 = vmatmul.f32.gmra.mxu2 %v438_v25 }
  0x92   :  { %v6621_v49 = vadd.f32 %v1460_v42, %v1121_v48  ;;  %1561 = vmatmul.f32.gmra.mxu3 %v439_v31  ;;  %v42_v42 = vld [vmem:[%s9751_s0 + $0xb0] sm:$0xff] }
  0x93   :  { %v315_v55 = vpop.f32.mrf.mxu0 }
  0x94   :  { %v316_v56 = vadd.f32 %v6610_v29, %v315_v55  ;;  %v846_v58 = vpop.f32.mrf.mxu1  ;;  %v1125_v59 = vpop.f32.mrf.mxu2  ;;  %v158_v55 = vsel %vm90_vm0, %v42_v42, 0 }
  0x95   :  { %v1466_v63 = vpop.f32.mrf.mxu3 }
  0x96   :  { %v847_v62 = vadd.f32 %v846_v58, %v316_v56  ;;  %442 = vmatmul.f32.gmra.mxu0 %v441_v50  ;;  %v464_v50 = vsub.f32 %v462_v27, %v463_v37 }
  0x97   :  { %909 = vmatmul.f32.gmra.mxu1 %v6594_v18 }
  0x98   :  { %v1126_v3 = vadd.f32 %v1125_v59, %v847_v62  ;;  %v465_v58 = vand.u32 4294901760, %v464_v50  ;;  %v6656_v62 = vand.u32 4294901760, %v158_v55 }
  0x99   :  { %1209 = vmatmul.f32.gmra.mxu2 %v446_v45 }
  0x9a   :  { %v6632_v6 = vadd.f32 %v1466_v63, %v1126_v3  ;;  %1567 = vmatmul.f32.gmra.mxu3 %v447_v51  ;;  %v470_v51 = vsub.f32 %v155_v30, %v6645_v38 }
  0x9b   :  { %v323_v11 = vpop.f32.mrf.mxu0 }
  0x9c   :  { %v324_v16 = vadd.f32 %v6610_v29, %v323_v11  ;;  %v850_v21 = vpop.f32.mrf.mxu1  ;;  %v1130_v22 = vpop.f32.mrf.mxu2  ;;  %v471_v59 = vand.u32 4294901760, %v470_v51 }
  0x9d   :  { %v1472_v25 = vpop.f32.mrf.mxu3 }
  0x9e   :  { %v851_v24 = vadd.f32 %v850_v21, %v324_v16  ;;  %450 = vmatmul.f32.gmra.mxu0 %v449_v8  ;;  %v472_v11 = vsub.f32 %v470_v51, %v471_v59  ;;  %v478_v16 = vsub.f32 %v158_v55, %v6656_v62 }
  0x9f   :  { %913 = vmatmul.f32.gmra.mxu1 %v6612_v32 }
  0xa0   :  { %v1131_v31 = vadd.f32 %v1130_v22, %v851_v24  ;;  %v473_v24 = vand.u32 4294901760, %v472_v11 }
  0xa1   :  { %1214 = vmatmul.f32.gmra.mxu2 %v454_v1  ;;  %v43_v1 = vld [vmem:[%s9751_s0 + $0xb8] sm:$0xff] }
  0xa2   :  { %v6643_v34 = vadd.f32 %v1472_v25, %v1131_v31  ;;  %1573 = vmatmul.f32.gmra.mxu3 %v455_v9  ;;  %v161_v17 = vsel %vm90_vm0, %v43_v1, 0  ;;  %v479_v25 = vand.u32 4294901760, %v478_v16  ;;  %v44_v31 = vld [vmem:[%s9751_s0 + $0xc0] sm:$0xff] }
  0xa3   :  { %v331_v39 = vpop.f32.mrf.mxu0  ;;  %v6667_v26 = vand.u32 4294901760, %v161_v17 }
  0xa4   :  { %v332_v41 = vadd.f32 %v6610_v29, %v331_v39  ;;  %v854_v43 = vpop.f32.mrf.mxu1  ;;  %v1135_v45 = vpop.f32.mrf.mxu2  ;;  %v480_v42 = vsub.f32 %v478_v16, %v479_v25 }
  0xa5   :  { %v1478_v48 = vpop.f32.mrf.mxu3 }
  0xa6   :  { %v855_v46 = vadd.f32 %v854_v43, %v332_v41  ;;  %458 = vmatmul.f32.gmra.mxu0 %v457_v35  ;;  %v486_v43 = vsub.f32 %v161_v17, %v6667_v26  ;;  %v481_v50 = vand.u32 4294901760, %v480_v42 }
  0xa7   :  { %917 = vmatmul.f32.gmra.mxu1 %v6623_v53 }
  0xa8   :  { %v1136_v56 = vadd.f32 %v1135_v45, %v855_v46  ;;  %v164_v45 = vsel %vm90_vm0, %v44_v31, 0 }
  0xa9   :  { %1219 = vmatmul.f32.gmra.mxu2 %v462_v27  ;;  %v6678_v55 = vand.u32 4294901760, %v164_v45 }
  0xaa   :  { %v6654_v57 = vadd.f32 %v1478_v48, %v1136_v56  ;;  %1579 = vmatmul.f32.gmra.mxu3 %v463_v37 }
  0xab   :  { %v339_v63 = vpop.f32.mrf.mxu0 }
  0xac   :  { %v340_v0 = vadd.f32 %v6610_v29, %v339_v63  ;;  %v858_v2 = vpop.f32.mrf.mxu1  ;;  %v1140_v3 = vpop.f32.mrf.mxu2 }
  0xad   :  { %v1484_v9 = vpop.f32.mrf.mxu3 }
  0xae   :  { %v859_v8 = vadd.f32 %v858_v2, %v340_v0  ;;  %466 = vmatmul.f32.gmra.mxu0 %v465_v58 }
  0xaf   :  { %921 = vmatmul.f32.gmra.mxu1 %v6634_v10 }
  0xb0   :  { %v1141_v21 = vadd.f32 %v1140_v3, %v859_v8  ;;  %v494_v8 = vsub.f32 %v164_v45, %v6678_v55 }
  0xb1   :  { %1224 = vmatmul.f32.gmra.mxu2 %v470_v51  ;;  %v487_v51 = vand.u32 4294901760, %v486_v43 }
  0xb2   :  { %v6665_v22 = vadd.f32 %v1484_v9, %v1141_v21  ;;  %1585 = vmatmul.f32.gmra.mxu3 %v471_v59  ;;  %v45_v59 = vld [vmem:[%s9751_s0 + $0xc8] sm:$0xff]  ;;  %v495_v21 = vand.u32 4294901760, %v494_v8 }
  0xb3   :  { %v347_v27 = vpop.f32.mrf.mxu0  ;;  %v488_v3 = vsub.f32 %v486_v43, %v487_v51  ;;  %v167_v9 = vsel %vm90_vm0, %v45_v59, 0 }
  0xb4   :  { %v348_v30 = vadd.f32 %v6610_v29, %v347_v27  ;;  %v862_v35 = vpop.f32.mrf.mxu1  ;;  %v1145_v37 = vpop.f32.mrf.mxu2 }
  0xb5   :  { %v1490_v41 = vpop.f32.mrf.mxu3  ;;  %v489_v17 = vand.u32 4294901760, %v488_v3 }
  0xb6   :  { %v863_v39 = vadd.f32 %v862_v35, %v348_v30  ;;  %474 = vmatmul.f32.gmra.mxu0 %v473_v24  ;;  %v6689_v24 = vand.u32 4294901760, %v167_v9  ;;  %v46_v30 = vld [vmem:[%s9751_s0 + $0xd0] sm:$0xff] }
  0xb7   :  { %925 = vmatmul.f32.gmra.mxu1 %v6645_v38 }
  0xb8   :  { %v1146_v46 = vadd.f32 %v1145_v37, %v863_v39  ;;  %10109 = vst [vmem:[#allocation2_spill] sm:$0xff] %v6689_v24  ;;  %v502_v42 = vsub.f32 %v167_v9, %v6689_v24 }
  0xb9   :  { %1229 = vmatmul.f32.gmra.mxu2 %v478_v16 }
  0xba   :  { %v6676_v48 = vadd.f32 %v1490_v41, %v1146_v46  ;;  %1591 = vmatmul.f32.gmra.mxu3 %v479_v25  ;;  %v496_v41 = vsub.f32 %v494_v8, %v495_v21 }
  0xbb   :  { %v355_v56 = vpop.f32.mrf.mxu0 }
  0xbc   :  { %v356_v58 = vadd.f32 %v6610_v29, %v355_v56  ;;  %v866_v63 = vpop.f32.mrf.mxu1  ;;  %v1150_v0 = vpop.f32.mrf.mxu2 }
  0xbd   :  { %v1496_v2 = vpop.f32.mrf.mxu3 }
  0xbe   :  { %v867_v1 = vadd.f32 %v866_v63, %v356_v58  ;;  %482 = vmatmul.f32.gmra.mxu0 %v481_v50  ;;  %v497_v50 = vand.u32 4294901760, %v496_v41  ;;  %v47_v63 = vld [vmem:[%s9751_s0 + $0xd8] sm:$0xff] }
  0xbf   :  { %929 = vmatmul.f32.gmra.mxu1 %v6656_v62 }
  0xc0   :  { %v1151_v11 = vadd.f32 %v1150_v0, %v867_v1 }
  0xc1   :  { %1234 = vmatmul.f32.gmra.mxu2 %v486_v43  ;;  %v170_v43 = vsel %vm90_vm0, %v46_v30, 0 }
  0xc2   :  { %v6687_v16 = vadd.f32 %v1496_v2, %v1151_v11  ;;  %1597 = vmatmul.f32.gmra.mxu3 %v487_v51  ;;  %v503_v51 = vand.u32 4294901760, %v502_v42  ;;  %v6700_v56 = vand.u32 4294901760, %v170_v43  ;;  %v173_v11 = vsel %vm90_vm0, %v47_v63, 0 }
  0xc3   :  { %v363_v25 = vpop.f32.mrf.mxu0  ;;  %v6711_v30 = vand.u32 4294901760, %v173_v11 }
  0xc4   :  { %v364_v27 = vadd.f32 %v6610_v29, %v363_v25  ;;  %v870_v31 = vpop.f32.mrf.mxu1  ;;  %v1155_v35 = vpop.f32.mrf.mxu2  ;;  %10110 = vst [vmem:[#allocation3_spill] sm:$0xff] %v6700_v56  ;;  %v504_v9 = vsub.f32 %v502_v42, %v503_v51 }
  0xc5   :  { %v1502_v39 = vpop.f32.mrf.mxu3  ;;  %10111 = vst [vmem:[#allocation4_spill] sm:$0xff] %v6711_v30 }
  0xc6   :  { %v871_v37 = vadd.f32 %v870_v31, %v364_v27  ;;  %490 = vmatmul.f32.gmra.mxu0 %v489_v17  ;;  %v505_v25 = vand.u32 4294901760, %v504_v9  ;;  %v49_v9 = vld [vmem:[%s9751_s0 + $0xe8] sm:$0xff] }
  0xc7   :  { %933 = vmatmul.f32.gmra.mxu1 %v6667_v26 }
  0xc8   :  { %v1156_v45 = vadd.f32 %v1155_v35, %v871_v37  ;;  %v48_v37 = vld [vmem:[%s9751_s0 + $0xe0] sm:$0xff] }
  0xc9   :  { %1239 = vmatmul.f32.gmra.mxu2 %v494_v8  ;;  %v510_v8 = vsub.f32 %v170_v43, %v6700_v56 }
  0xca   :  { %v6698_v46 = vadd.f32 %v1502_v39, %v1156_v45  ;;  %1603 = vmatmul.f32.gmra.mxu3 %v495_v21 }
  0xcb   :  { %v371_v58 = vpop.f32.mrf.mxu0  ;;  %v511_v27 = vand.u32 4294901760, %v510_v8 }
  0xcc   :  { %v372_v59 = vadd.f32 %v6610_v29, %v371_v58  ;;  %v874_v0 = vpop.f32.mrf.mxu1  ;;  %v1160_v1 = vpop.f32.mrf.mxu2 }
  0xcd   :  { %v1508_v3 = vpop.f32.mrf.mxu3 }
  0xce   :  { %v875_v2 = vadd.f32 %v874_v0, %v372_v59  ;;  %498 = vmatmul.f32.gmra.mxu0 %v497_v50  ;;  %v512_v50 = vsub.f32 %v510_v8, %v511_v27 }
  0xcf   :  { %937 = vmatmul.f32.gmra.mxu1 %v6678_v55 }
  0xd0   :  { %v1161_v17 = vadd.f32 %v1160_v1, %v875_v2  ;;  %v513_v63 = vand.u32 4294901760, %v512_v50 }
  0xd1   :  { %1244 = vmatmul.f32.gmra.mxu2 %v502_v42  ;;  %v518_v42 = vsub.f32 %v173_v11, %v6711_v30 }
  0xd2   :  { %v6709_v21 = vadd.f32 %v1508_v3, %v1161_v17  ;;  %1609 = vmatmul.f32.gmra.mxu3 %v503_v51  ;;  %v176_v51 = vsel %vm90_vm0, %v48_v37, 0 }
  0xd3   :  { %v379_v31 = vpop.f32.mrf.mxu0  ;;  %v519_v0 = vand.u32 4294901760, %v518_v42  ;;  %v6722_v1 = vand.u32 4294901760, %v176_v51 }
  0xd4   :  { %v380_v35 = vadd.f32 %v6610_v29, %v379_v31  ;;  %v878_v39 = vpop.f32.mrf.mxu1  ;;  %v1165_v41 = vpop.f32.mrf.mxu2 }
  0xd5   :  { %v1514_v45 = vpop.f32.mrf.mxu3  ;;  %10113 = vst [vmem:[#allocation6_spill] sm:$0xff] %v6722_v1 }
  0xd6   :  { %v879_v43 = vadd.f32 %v878_v39, %v380_v35  ;;  %506 = vmatmul.f32.gmra.mxu0 %v505_v25  ;;  %v520_v35 = vsub.f32 %v518_v42, %v519_v0 }
  0xd7   :  { %941 = vmatmul.f32.gmra.mxu1 %v6689_v24 }
  0xd8   :  { %v1166_v58 = vadd.f32 %v1165_v41, %v879_v43  ;;  %v521_v41 = vand.u32 4294901760, %v520_v35 }
  0xd9   :  { %1249 = vmatmul.f32.gmra.mxu2 %v510_v8  ;;  %v526_v8 = vsub.f32 %v176_v51, %v6722_v1  ;;  %v50_v51 = vld [vmem:[%s9751_s0 + $0xf0] sm:$0xff] }
  0xda   :  { %v6720_v59 = vadd.f32 %v1514_v45, %v1166_v58  ;;  %1615 = vmatmul.f32.gmra.mxu3 %v511_v27  ;;  %v179_v27 = vsel %vm90_vm0, %v49_v9, 0 }
  0xdb   :  { %v387_v2 = vpop.f32.mrf.mxu0  ;;  %v527_v43 = vand.u32 4294901760, %v526_v8  ;;  %v6733_v45 = vand.u32 4294901760, %v179_v27 }
  0xdc   :  { %10112 = vst [vmem:[#allocation5_spill] sm:$0xff] %v6720_v59  ;;  %v388_v3 = vadd.f32 %v6610_v29, %v387_v2  ;;  %v882_v11 = vpop.f32.mrf.mxu1  ;;  %v1170_v17 = vpop.f32.mrf.mxu2 }
  0xdd   :  { %v1520_v31 = vpop.f32.mrf.mxu3  ;;  %10115 = vst [vmem:[#allocation8_spill] sm:$0xff] %v6733_v45 }
  0xde   :  { %v883_v25 = vadd.f32 %v882_v11, %v388_v3  ;;  %514 = vmatmul.f32.gmra.mxu0 %v513_v63  ;;  %v528_v11 = vsub.f32 %v526_v8, %v527_v43 }
  0xdf   :  { %945 = vmatmul.f32.gmra.mxu1 %v6700_v56 }
  0xe0   :  { %v1171_v37 = vadd.f32 %v1170_v17, %v883_v25 }
  0xe1   :  { %1254 = vmatmul.f32.gmra.mxu2 %v518_v42  ;;  %v534_v42 = vsub.f32 %v179_v27, %v6733_v45  ;;  %v51_v27 = vld [vmem:[%s9751_s0 + $0xf8] sm:$0xff] }
  0xe2   :  { %v6731_v39 = vadd.f32 %v1520_v31, %v1171_v37  ;;  %1621 = vmatmul.f32.gmra.mxu3 %v519_v0  ;;  %v182_v0 = vsel %vm90_vm0, %v50_v51, 0  ;;  %v529_v31 = vand.u32 4294901760, %v528_v11 }
  0xe3   :  { %v395_v50 = vpop.f32.mrf.mxu0  ;;  %v535_v35 = vand.u32 4294901760, %v534_v42  ;;  %v6744_v37 = vand.u32 4294901760, %v182_v0 }
  0xe4   :  { %10114 = vst [vmem:[#allocation7_spill] sm:$0xff] %v6731_v39  ;;  %v396_v58 = vadd.f32 %v6610_v29, %v395_v50  ;;  %v886_v63 = vpop.f32.mrf.mxu1  ;;  %v1175_v2 = vpop.f32.mrf.mxu2 }
  0xe5   :  { %v1526_v9 = vpop.f32.mrf.mxu3  ;;  %10117 = vst [vmem:[#allocation10_spill] sm:$0xff] %v6744_v37 }
  0xe6   :  { %v887_v3 = vadd.f32 %v886_v63, %v396_v58  ;;  %522 = vmatmul.f32.gmra.mxu0 %v521_v41 }
  0xe7   :  { %949 = vmatmul.f32.gmra.mxu1 %v6711_v30 }
  0xe8   :  { %v1176_v17 = vadd.f32 %v1175_v2, %v887_v3  ;;  %v536_v3 = vsub.f32 %v534_v42, %v535_v35 }
  0xe9   :  { %1259 = vmatmul.f32.gmra.mxu2 %v526_v8  ;;  %v542_v8 = vsub.f32 %v182_v0, %v6744_v37  ;;  %v52_v0 = vld [vmem:[%s9751_s0 + $0x100] sm:$0xff] }
  0xea   :  { %v6742_v25 = vadd.f32 %v1526_v9, %v1176_v17  ;;  %1627 = vmatmul.f32.gmra.mxu3 %v527_v43  ;;  %v185_v43 = vsel %vm90_vm0, %v51_v27, 0  ;;  %v537_v17 = vand.u32 4294901760, %v536_v3 }
  0xeb   :  { %v403_v50 = vpop.f32.mrf.mxu0  ;;  %v6755_v19 = vand.u32 4294901760, %v185_v43 }
  0xec   :  { %10116 = vst [vmem:[#allocation9_spill] sm:$0xff] %v6742_v25  ;;  %v404_v41 = vadd.f32 %v6610_v29, %v403_v50  ;;  %v890_v58 = vpop.f32.mrf.mxu1  ;;  %v1180_v51 = vpop.f32.mrf.mxu2  ;;  %v543_v50 = vand.u32 4294901760, %v542_v8 }
  0xed   :  { %v1532_v2 = vpop.f32.mrf.mxu3  ;;  %10119 = vst [vmem:[#allocation12_spill] sm:$0xff] %v6755_v19 }
  0xee   :  { %v891_v63 = vadd.f32 %v890_v58, %v404_v41  ;;  %530 = vmatmul.f32.gmra.mxu0 %v529_v31 }
  0xef   :  { %953 = vmatmul.f32.gmra.mxu1 %v6722_v1 }
  0xf0   :  { %v1181_v9 = vadd.f32 %v1180_v51, %v891_v63  ;;  %v544_v63 = vsub.f32 %v542_v8, %v543_v50 }
  0xf1   :  { %1264 = vmatmul.f32.gmra.mxu2 %v534_v42  ;;  %v550_v42 = vsub.f32 %v185_v43, %v6755_v19  ;;  %v53_v43 = vld [vmem:[%s9751_s0 + $0x108] sm:$0xff] }
  0xf2   :  { %v6753_v11 = vadd.f32 %v1532_v2, %v1181_v9  ;;  %1633 = vmatmul.f32.gmra.mxu3 %v535_v35  ;;  %v188_v35 = vsel %vm90_vm0, %v52_v0, 0 }
  0xf3   :  { %v411_v30 = vpop.f32.mrf.mxu0  ;;  %v551_v9 = vand.u32 4294901760, %v550_v42  ;;  %v6766_v1 = vand.u32 4294901760, %v188_v35 }
  0xf4   :  { %10118 = vst [vmem:[#allocation11_spill] sm:$0xff] %v6753_v11  ;;  %v412_v31 = vadd.f32 %v6610_v29, %v411_v30  ;;  %v894_v41 = vpop.f32.mrf.mxu1  ;;  %v1185_v27 = vpop.f32.mrf.mxu2  ;;  %v545_v30 = vand.u32 4294901760, %v544_v63 }
  0xf5   :  { %v1538_v51 = vpop.f32.mrf.mxu3  ;;  %10121 = vst [vmem:[#allocation14_spill] sm:$0xff] %v6766_v1 }
  0xf6   :  { %v895_v58 = vadd.f32 %v894_v41, %v412_v31  ;;  %538 = vmatmul.f32.gmra.mxu0 %v537_v17 }
  0xf7   :  { %957 = vmatmul.f32.gmra.mxu1 %v6733_v45 }
  0xf8   :  { %v1186_v2 = vadd.f32 %v1185_v27, %v895_v58  ;;  %v552_v58 = vsub.f32 %v550_v42, %v551_v9 }
  0xf9   :  { %1269 = vmatmul.f32.gmra.mxu2 %v542_v8  ;;  %v558_v8 = vsub.f32 %v188_v35, %v6766_v1 }
  0xfa   :  { %v6764_v3 = vadd.f32 %v1538_v51, %v1186_v2  ;;  %1639 = vmatmul.f32.gmra.mxu3 %v543_v50  ;;  %v2461_v50 = vld [vmem:[%s9753_s3 + $0x10] sm:$0xff]  ;;  %v191_v51 = vsel %vm90_vm0, %v53_v43, 0  ;;  %v553_v35 = vand.u32 4294901760, %v552_v58 }
  0xfb   :  { %v419_v11 = vpop.f32.mrf.mxu0  ;;  %v6777_v63 = vand.u32 4294901760, %v2461_v50 }
  0xfc   :  { %10120 = vst [vmem:[#allocation13_spill] sm:$0xff] %v6764_v3  ;;  %v420_v17 = vadd.f32 %v6610_v29, %v419_v11  ;;  %v898_v31 = vpop.f32.mrf.mxu1  ;;  %v1190_v0 = vpop.f32.mrf.mxu2 }
  0xfd   :  { %v1544_v27 = vpop.f32.mrf.mxu3  ;;  %2675 = vmatpush.msrb.mxu2 %v6777_v63  ;;  %v6782_v2 = vsub.f32 %v2461_v50, %v6777_v63  ;;  %3846 = vmatpush.msra.mxu1 %v6777_v63  ;;  %v54_v50 = vld [vmem:[%s9751_s0 + $0x110] sm:$0xff] }
  0xfe   :  { %v899_v41 = vadd.f32 %v898_v31, %v420_v17  ;;  %546 = vmatmul.f32.gmra.mxu0 %v545_v30  ;;  %v559_v17 = vand.u32 4294901760, %v558_v8  ;;  %v6787_v31 = vand.u32 4294901760, %v191_v51  ;;  %v194_v45 = vsel %vm90_vm0, %v54_v50, 0 }
  0xff   :  { %961 = vmatmul.f32.gmra.mxu1 %v6744_v37  ;;  %3503 = vmatpush.msra.mxu0 %v6782_v2 }
 0x100   :  { %v1191_v11 = vadd.f32 %v1190_v0, %v899_v41  ;;  %10123 = vst [vmem:[#allocation16_spill] sm:$0xff] %v6787_v31  ;;  %v9767_v0 = vand.u32 4294901760, %v6782_v2 }
 0x101   :  { %1274 = vmatmul.f32.gmra.mxu2 %v550_v42 }
 0x102   :  { %v6785_v30 = vadd.f32 %v1544_v27, %v1191_v11  ;;  %1645 = vmatmul.f32.gmra.mxu3 %v551_v9  ;;  %v3214_v42 = vsub.f32 %v6782_v2, %v9767_v0  ;;  %v560_v11 = vsub.f32 %v558_v8, %v559_v17  ;;  %v6803_v0 = vand.u32 4294901760, %v194_v45 }
 0x103   :  { %v427_v43 = vpop.f32.mrf.mxu0 }
 0x104   :  { %10122 = vst [vmem:[#allocation15_spill] sm:$0xff] %v6785_v30  ;;  %v428_v41 = vadd.f32 %v6610_v29, %v427_v43  ;;  %v902_v37 = vpop.f32.mrf.mxu1  ;;  %v1195_v27 = vpop.f32.mrf.mxu2  ;;  %v566_v30 = vsub.f32 %v191_v51, %v6787_v31  ;;  %v3215_v3 = vand.u32 4294901760, %v3214_v42  ;;  %v561_v56 = vand.u32 4294901760, %v560_v11  ;;  %v55_v51 = vld [vmem:[%s9751_s0 + $0x118] sm:$0xff] }
 0x105   :  { %v1550_v58 = vpop.f32.mrf.mxu3  ;;  %10125 = vst [vmem:[#allocation18_spill] sm:$0xff] %v6803_v0 }
 0x106   :  { %v903_v9 = vadd.f32 %v902_v37, %v428_v41  ;;  %554 = vmatmul.f32.gmra.mxu0 %v553_v35  ;;  %3216 = vmatpush.msrb.mxu3 %v3215_v3  ;;  %v567_v39 = vand.u32 4294901760, %v566_v30 }
 0x107   :  { %965 = vmatmul.f32.gmra.mxu1 %v6755_v19 }
 0x108   :  { %v1196_v43 = vadd.f32 %v1195_v27, %v903_v9  ;;  %v568_v42 = vsub.f32 %v566_v30, %v567_v39 }
 0x109   :  { %1279 = vmatmul.f32.gmra.mxu2 %v558_v8  ;;  %v574_v8 = vsub.f32 %v194_v45, %v6803_v0  ;;  %v56_v45 = vld [vmem:[%s9751_s0 + $0x120] sm:$0xff] }
 0x10a   :  { %v6801_v25 = vadd.f32 %v1550_v58, %v1196_v43  ;;  %1651 = vmatmul.f32.gmra.mxu3 %v559_v17  ;;  %v197_v17 = vsel %vm90_vm0, %v55_v51, 0  ;;  %v569_v11 = vand.u32 4294901760, %v568_v42 }
 0x10b   :  { %v435_v37 = vpop.f32.mrf.mxu0  ;;  %v575_v43 = vand.u32 4294901760, %v574_v8 }
 0x10c   :  { %10124 = vst [vmem:[#allocation17_spill] sm:$0xff] %v6801_v25  ;;  %v436_v35 = vadd.f32 %v6610_v29, %v435_v37  ;;  %v906_v41 = vpop.f32.mrf.mxu1  ;;  %v1200_v50 = vpop.f32.mrf.mxu2  ;;  %v6814_v37 = vand.u32 4294901760, %v197_v17 }
 0x10d   :  { %v1556_v3 = vpop.f32.mrf.mxu3 }
 0x10e   :  { %v907_v27 = vadd.f32 %v906_v41, %v436_v35  ;;  %562 = vmatmul.f32.gmra.mxu0 %v561_v56  ;;  %10127 = vst [vmem:[#allocation20_spill] sm:$0xff] %v6814_v37 }
 0x10f   :  { %969 = vmatmul.f32.gmra.mxu1 %v6766_v1 }
 0x110   :  { %v1201_v9 = vadd.f32 %v1200_v50, %v907_v27  ;;  %v576_v27 = vsub.f32 %v574_v8, %v575_v43 }
 0x111   :  { %1284 = vmatmul.f32.gmra.mxu2 %v566_v30  ;;  %v582_v30 = vsub.f32 %v197_v17, %v6814_v37  ;;  %v57_v17 = vld [vmem:[%s9751_s0 + $0x128] sm:$0xff] }
 0x112   :  { %v6812_v58 = vadd.f32 %v1556_v3, %v1201_v9  ;;  %1657 = vmatmul.f32.gmra.mxu3 %v567_v39  ;;  %v200_v39 = vsel %vm90_vm0, %v56_v45, 0 }
 0x113   :  { %v443_v19 = vpop.f32.mrf.mxu0  ;;  %v583_v9 = vand.u32 4294901760, %v582_v30  ;;  %v6825_v1 = vand.u32 4294901760, %v200_v39 }
 0x114   :  { %10126 = vst [vmem:[#allocation19_spill] sm:$0xff] %v6812_v58  ;;  %v444_v56 = vadd.f32 %v6610_v29, %v443_v19  ;;  %v910_v35 = vpop.f32.mrf.mxu1  ;;  %v1205_v51 = vpop.f32.mrf.mxu2  ;;  %v577_v19 = vand.u32 4294901760, %v576_v27 }
 0x115   :  { %v1562_v50 = vpop.f32.mrf.mxu3  ;;  %10129 = vst [vmem:[#allocation22_spill] sm:$0xff] %v6825_v1 }
 0x116   :  { %v911_v41 = vadd.f32 %v910_v35, %v444_v56  ;;  %570 = vmatmul.f32.gmra.mxu0 %v569_v11 }
 0x117   :  { %973 = vmatmul.f32.gmra.mxu1 %v6787_v31 }
 0x118   :  { %v1206_v3 = vadd.f32 %v1205_v51, %v911_v41  ;;  %v584_v41 = vsub.f32 %v582_v30, %v583_v9 }
 0x119   :  { %1289 = vmatmul.f32.gmra.mxu2 %v574_v8  ;;  %v590_v8 = vsub.f32 %v200_v39, %v6825_v1  ;;  %v58_v39 = vld [vmem:[%s9751_s0 + $0x130] sm:$0xff] }
 0x11a   :  { %v6823_v42 = vadd.f32 %v1562_v50, %v1206_v3  ;;  %1663 = vmatmul.f32.gmra.mxu3 %v575_v43  ;;  %v203_v43 = vsel %vm90_vm0, %v57_v17, 0 }
 0x11b   :  { %v451_v58 = vpop.f32.mrf.mxu0  ;;  %v591_v3 = vand.u32 4294901760, %v590_v8  ;;  %v6836_v31 = vand.u32 4294901760, %v203_v43 }
 0x11c   :  { %10128 = vst [vmem:[#allocation21_spill] sm:$0xff] %v6823_v42  ;;  %v452_v11 = vadd.f32 %v6610_v29, %v451_v58  ;;  %v914_v56 = vpop.f32.mrf.mxu1  ;;  %v1210_v45 = vpop.f32.mrf.mxu2  ;;  %v585_v58 = vand.u32 4294901760, %v584_v41 }
 0x11d   :  { %v1568_v51 = vpop.f32.mrf.mxu3  ;;  %10131 = vst [vmem:[#allocation24_spill] sm:$0xff] %v6836_v31 }
 0x11e   :  { %v915_v35 = vadd.f32 %v914_v56, %v452_v11  ;;  %578 = vmatmul.f32.gmra.mxu0 %v577_v19 }
 0x11f   :  { %977 = vmatmul.f32.gmra.mxu1 %v6803_v0 }
 0x120   :  { %v1211_v50 = vadd.f32 %v1210_v45, %v915_v35  ;;  %v592_v35 = vsub.f32 %v590_v8, %v591_v3 }
 0x121   :  { %1294 = vmatmul.f32.gmra.mxu2 %v582_v30  ;;  %v598_v30 = vsub.f32 %v203_v43, %v6836_v31  ;;  %v59_v43 = vld [vmem:[%s9751_s0 + $0x138] sm:$0xff] }
 0x122   :  { %v6834_v27 = vadd.f32 %v1568_v51, %v1211_v50  ;;  %1669 = vmatmul.f32.gmra.mxu3 %v583_v9  ;;  %v206_v9 = vsel %vm90_vm0, %v58_v39, 0 }
 0x123   :  { %v459_v42 = vpop.f32.mrf.mxu0  ;;  %v599_v50 = vand.u32 4294901760, %v598_v30  ;;  %v6847_v0 = vand.u32 4294901760, %v206_v9 }
 0x124   :  { %10130 = vst [vmem:[#allocation23_spill] sm:$0xff] %v6834_v27  ;;  %v460_v19 = vadd.f32 %v6610_v29, %v459_v42  ;;  %v918_v11 = vpop.f32.mrf.mxu1  ;;  %v1215_v17 = vpop.f32.mrf.mxu2  ;;  %v593_v42 = vand.u32 4294901760, %v592_v35 }
 0x125   :  { %v1574_v45 = vpop.f32.mrf.mxu3  ;;  %10133 = vst [vmem:[#allocation26_spill] sm:$0xff] %v6847_v0 }
 0x126   :  { %v919_v56 = vadd.f32 %v918_v11, %v460_v19  ;;  %586 = vmatmul.f32.gmra.mxu0 %v585_v58 }
 0x127   :  { %981 = vmatmul.f32.gmra.mxu1 %v6814_v37 }
 0x128   :  { %v1216_v51 = vadd.f32 %v1215_v17, %v919_v56  ;;  %v600_v56 = vsub.f32 %v598_v30, %v599_v50 }
 0x129   :  { %1299 = vmatmul.f32.gmra.mxu2 %v590_v8  ;;  %v606_v8 = vsub.f32 %v206_v9, %v6847_v0  ;;  %v60_v9 = vld [vmem:[%s9751_s0 + $0x140] sm:$0xff] }
 0x12a   :  { %v6845_v41 = vadd.f32 %v1574_v45, %v1216_v51  ;;  %1675 = vmatmul.f32.gmra.mxu3 %v591_v3  ;;  %v209_v3 = vsel %vm90_vm0, %v59_v43, 0 }
 0x12b   :  { %v467_v27 = vpop.f32.mrf.mxu0  ;;  %v607_v51 = vand.u32 4294901760, %v606_v8  ;;  %v6858_v37 = vand.u32 4294901760, %v209_v3 }
 0x12c   :  { %10132 = vst [vmem:[#allocation25_spill] sm:$0xff] %v6845_v41  ;;  %v468_v58 = vadd.f32 %v6610_v29, %v467_v27  ;;  %v922_v19 = vpop.f32.mrf.mxu1  ;;  %v1220_v39 = vpop.f32.mrf.mxu2  ;;  %v601_v27 = vand.u32 4294901760, %v600_v56 }
 0x12d   :  { %v1580_v17 = vpop.f32.mrf.mxu3  ;;  %10135 = vst [vmem:[#allocation28_spill] sm:$0xff] %v6858_v37 }
 0x12e   :  { %v923_v11 = vadd.f32 %v922_v19, %v468_v58  ;;  %594 = vmatmul.f32.gmra.mxu0 %v593_v42 }
 0x12f   :  { %985 = vmatmul.f32.gmra.mxu1 %v6825_v1 }
 0x130   :  { %v1221_v45 = vadd.f32 %v1220_v39, %v923_v11  ;;  %v608_v11 = vsub.f32 %v606_v8, %v607_v51 }
 0x131   :  { %1304 = vmatmul.f32.gmra.mxu2 %v598_v30  ;;  %v614_v30 = vsub.f32 %v209_v3, %v6858_v37  ;;  %v61_v3 = vld [vmem:[%s9751_s0 + $0x148] sm:$0xff] }
 0x132   :  { %v6856_v35 = vadd.f32 %v1580_v17, %v1221_v45  ;;  %1681 = vmatmul.f32.gmra.mxu3 %v599_v50  ;;  %v212_v50 = vsel %vm90_vm0, %v60_v9, 0 }
 0x133   :  { %v475_v41 = vpop.f32.mrf.mxu0  ;;  %v615_v45 = vand.u32 4294901760, %v614_v30  ;;  %v6869_v1 = vand.u32 4294901760, %v212_v50 }
 0x134   :  { %10134 = vst [vmem:[#allocation27_spill] sm:$0xff] %v6856_v35  ;;  %v476_v42 = vadd.f32 %v6610_v29, %v475_v41  ;;  %v926_v58 = vpop.f32.mrf.mxu1  ;;  %v1225_v43 = vpop.f32.mrf.mxu2  ;;  %v609_v41 = vand.u32 4294901760, %v608_v11 }
 0x135   :  { %v1586_v39 = vpop.f32.mrf.mxu3  ;;  %10137 = vst [vmem:[#allocation30_spill] sm:$0xff] %v6869_v1 }
 0x136   :  { %v927_v19 = vadd.f32 %v926_v58, %v476_v42  ;;  %602 = vmatmul.f32.gmra.mxu0 %v601_v27 }
 0x137   :  { %989 = vmatmul.f32.gmra.mxu1 %v6836_v31 }
 0x138   :  { %v1226_v17 = vadd.f32 %v1225_v43, %v927_v19  ;;  %v616_v19 = vsub.f32 %v614_v30, %v615_v45 }
 0x139   :  { %1309 = vmatmul.f32.gmra.mxu2 %v606_v8  ;;  %v622_v8 = vsub.f32 %v212_v50, %v6869_v1  ;;  %v62_v50 = vld [vmem:[%s9751_s0 + $0x150] sm:$0xff] }
 0x13a   :  { %v6867_v56 = vadd.f32 %v1586_v39, %v1226_v17  ;;  %1687 = vmatmul.f32.gmra.mxu3 %v607_v51  ;;  %v215_v51 = vsel %vm90_vm0, %v61_v3, 0 }
 0x13b   :  { %v483_v35 = vpop.f32.mrf.mxu0  ;;  %v623_v17 = vand.u32 4294901760, %v622_v8  ;;  %v6880_v31 = vand.u32 4294901760, %v215_v51 }
 0x13c   :  { %10136 = vst [vmem:[#allocation29_spill] sm:$0xff] %v6867_v56  ;;  %v484_v27 = vadd.f32 %v6610_v29, %v483_v35  ;;  %v930_v42 = vpop.f32.mrf.mxu1  ;;  %v1230_v9 = vpop.f32.mrf.mxu2  ;;  %v617_v35 = vand.u32 4294901760, %v616_v19 }
 0x13d   :  { %v1592_v43 = vpop.f32.mrf.mxu3  ;;  %10139 = vst [vmem:[#allocation32_spill] sm:$0xff] %v6880_v31 }
 0x13e   :  { %v931_v58 = vadd.f32 %v930_v42, %v484_v27  ;;  %610 = vmatmul.f32.gmra.mxu0 %v609_v41 }
 0x13f   :  { %993 = vmatmul.f32.gmra.mxu1 %v6847_v0 }
 0x140   :  { %v1231_v39 = vadd.f32 %v1230_v9, %v931_v58  ;;  %v624_v58 = vsub.f32 %v622_v8, %v623_v17 }
 0x141   :  { %1314 = vmatmul.f32.gmra.mxu2 %v614_v30  ;;  %v630_v30 = vsub.f32 %v215_v51, %v6880_v31  ;;  %v63_v51 = vld [vmem:[%s9751_s0 + $0x158] sm:$0xff] }
 0x142   :  { %v6878_v11 = vadd.f32 %v1592_v43, %v1231_v39  ;;  %1693 = vmatmul.f32.gmra.mxu3 %v615_v45  ;;  %v218_v45 = vsel %vm90_vm0, %v62_v50, 0 }
 0x143   :  { %v491_v56 = vpop.f32.mrf.mxu0  ;;  %v631_v39 = vand.u32 4294901760, %v630_v30  ;;  %v6891_v0 = vand.u32 4294901760, %v218_v45 }
 0x144   :  { %10138 = vst [vmem:[#allocation31_spill] sm:$0xff] %v6878_v11  ;;  %v492_v41 = vadd.f32 %v6610_v29, %v491_v56  ;;  %v934_v27 = vpop.f32.mrf.mxu1  ;;  %v1235_v3 = vpop.f32.mrf.mxu2  ;;  %v625_v56 = vand.u32 4294901760, %v624_v58 }
 0x145   :  { %v1598_v9 = vpop.f32.mrf.mxu3  ;;  %10141 = vst [vmem:[#allocation34_spill] sm:$0xff] %v6891_v0 }
 0x146   :  { %v935_v42 = vadd.f32 %v934_v27, %v492_v41  ;;  %618 = vmatmul.f32.gmra.mxu0 %v617_v35 }
 0x147   :  { %997 = vmatmul.f32.gmra.mxu1 %v6858_v37 }
 0x148   :  { %v1236_v43 = vadd.f32 %v1235_v3, %v935_v42  ;;  %v632_v42 = vsub.f32 %v630_v30, %v631_v39 }
 0x149   :  { %1319 = vmatmul.f32.gmra.mxu2 %v622_v8  ;;  %v638_v8 = vsub.f32 %v218_v45, %v6891_v0  ;;  %v64_v45 = vld [vmem:[%s9751_s0 + $0x160] sm:$0xff] }
 0x14a   :  { %v6889_v19 = vadd.f32 %v1598_v9, %v1236_v43  ;;  %1699 = vmatmul.f32.gmra.mxu3 %v623_v17  ;;  %v221_v17 = vsel %vm90_vm0, %v63_v51, 0 }
 0x14b   :  { %v499_v11 = vpop.f32.mrf.mxu0  ;;  %v639_v43 = vand.u32 4294901760, %v638_v8  ;;  %v6902_v37 = vand.u32 4294901760, %v221_v17 }
 0x14c   :  { %10140 = vst [vmem:[#allocation33_spill] sm:$0xff] %v6889_v19  ;;  %v500_v35 = vadd.f32 %v6610_v29, %v499_v11  ;;  %v938_v41 = vpop.f32.mrf.mxu1  ;;  %v1240_v50 = vpop.f32.mrf.mxu2  ;;  %v633_v11 = vand.u32 4294901760, %v632_v42 }
 0x14d   :  { %v1604_v3 = vpop.f32.mrf.mxu3  ;;  %10143 = vst [vmem:[#allocation36_spill] sm:$0xff] %v6902_v37 }
 0x14e   :  { %v939_v27 = vadd.f32 %v938_v41, %v500_v35  ;;  %626 = vmatmul.f32.gmra.mxu0 %v625_v56 }
 0x14f   :  { %1001 = vmatmul.f32.gmra.mxu1 %v6869_v1 }
 0x150   :  { %v1241_v9 = vadd.f32 %v1240_v50, %v939_v27  ;;  %v640_v27 = vsub.f32 %v638_v8, %v639_v43 }
 0x151   :  { %1324 = vmatmul.f32.gmra.mxu2 %v630_v30  ;;  %v646_v30 = vsub.f32 %v221_v17, %v6902_v37 }
 0x152   :  { %v6900_v58 = vadd.f32 %v1604_v3, %v1241_v9  ;;  %1705 = vmatmul.f32.gmra.mxu3 %v631_v39  ;;  %v224_v39 = vsel %vm90_vm0, %v64_v45, 0 }
 0x153   :  { %v507_v19 = vpop.f32.mrf.mxu0  ;;  %v6913_v9 = vand.u32 4294901760, %v224_v39 }
 0x154   :  { %10142 = vst [vmem:[#allocation35_spill] sm:$0xff] %v6900_v58  ;;  %v508_v56 = vadd.f32 %v6610_v29, %v507_v19  ;;  %v942_v35 = vpop.f32.mrf.mxu1  ;;  %v1245_v51 = vpop.f32.mrf.mxu2  ;;  %v641_v29 = vand.u32 4294901760, %v640_v27  ;;  %v647_v19 = vand.u32 4294901760, %v646_v30 }
 0x155   :  { %v1610_v50 = vpop.f32.mrf.mxu3  ;;  %10145 = vst [vmem:[#allocation38_spill] sm:$0xff] %v6913_v9 }
 0x156   :  { %v943_v41 = vadd.f32 %v942_v35, %v508_v56  ;;  %634 = vmatmul.f32.gmra.mxu0 %v633_v11  ;;  %v6918_v11 = vld [vmem:[%s9752_s2] ss:$0 sm:$0xff]  ;;  %v65_v56 = vld [vmem:[%s9751_s0 + $0x168] sm:$0xff] }
 0x157   :  { %1005 = vmatmul.f32.gmra.mxu1 %v6880_v31 }
 0x158   :  { %v1246_v3 = vadd.f32 %v1245_v51, %v943_v41  ;;  %v648_v51 = vsub.f32 %v646_v30, %v647_v19  ;;  %v654_v41 = vsub.f32 %v224_v39, %v6913_v9  ;;  %v66_v39 = vld [vmem:[%s9751_s0 + $0x170] sm:$0xff] }
 0x159   :  { %1329 = vmatmul.f32.gmra.mxu2 %v638_v8 }
 0x15a   :  { %v6911_v42 = vadd.f32 %v1610_v50, %v1246_v3  ;;  %1711 = vmatmul.f32.gmra.mxu3 %v639_v43  ;;  %v227_v50 = vsel %vm90_vm0, %v65_v56, 0  ;;  %v655_v31 = vand.u32 4294901760, %v654_v41 }
 0x15b   :  { %v515_v1 = vpop.f32.mrf.mxu0 }
 0x15c   :  { %10144 = vst [vmem:[#allocation37_spill] sm:$0xff] %v6911_v42  ;;  %v516_v17 = vadd.f32 %v6918_v11, %v515_v1  ;;  %v946_v45 = vpop.f32.mrf.mxu1  ;;  %v1250_v35 = vpop.f32.mrf.mxu2  ;;  %v649_v1 = vand.u32 4294901760, %v648_v51  ;;  %v6929_v42 = vand.u32 4294901760, %v227_v50 }
 0x15d   :  { %v1616_v43 = vpop.f32.mrf.mxu3 }
 0x15e   :  { %v947_v8 = vadd.f32 %v946_v45, %v516_v17  ;;  %642 = vmatmul.f32.gmra.mxu0 %v641_v29  ;;  %10147 = vst [vmem:[#allocation40_spill] sm:$0xff] %v6929_v42 }
 0x15f   :  { %1009 = vmatmul.f32.gmra.mxu1 %v6891_v0 }
 0x160   :  { %v1251_v27 = vadd.f32 %v1250_v35, %v947_v8  ;;  %v656_v8 = vsub.f32 %v654_v41, %v655_v31 }
 0x161   :  { %1334 = vmatmul.f32.gmra.mxu2 %v646_v30  ;;  %v662_v30 = vsub.f32 %v227_v50, %v6929_v42  ;;  %v67_v50 = vld [vmem:[%s9751_s0 + $0x178] sm:$0xff] }
 0x162   :  { %v6927_v3 = vadd.f32 %v1616_v43, %v1251_v27  ;;  %1717 = vmatmul.f32.gmra.mxu3 %v647_v19  ;;  %v230_v19 = vsel %vm90_vm0, %v66_v39, 0 }
 0x163   :  { %v523_v58 = vpop.f32.mrf.mxu0  ;;  %v663_v27 = vand.u32 4294901760, %v662_v30  ;;  %v6940_v0 = vand.u32 4294901760, %v230_v19 }
 0x164   :  { %10146 = vst [vmem:[#allocation39_spill] sm:$0xff] %v6927_v3  ;;  %v524_v29 = vadd.f32 %v6918_v11, %v523_v58  ;;  %v950_v17 = vpop.f32.mrf.mxu1  ;;  %v1255_v56 = vpop.f32.mrf.mxu2  ;;  %v657_v58 = vand.u32 4294901760, %v656_v8 }
 0x165   :  { %v1622_v35 = vpop.f32.mrf.mxu3  ;;  %10149 = vst [vmem:[#allocation42_spill] sm:$0xff] %v6940_v0 }
 0x166   :  { %v951_v45 = vadd.f32 %v950_v17, %v524_v29  ;;  %650 = vmatmul.f32.gmra.mxu0 %v649_v1 }
 0x167   :  { %1013 = vmatmul.f32.gmra.mxu1 %v6902_v37 }
 0x168   :  { %v1256_v43 = vadd.f32 %v1255_v56, %v951_v45  ;;  %v664_v45 = vsub.f32 %v662_v30, %v663_v27 }
 0x169   :  { %1339 = vmatmul.f32.gmra.mxu2 %v654_v41  ;;  %v670_v41 = vsub.f32 %v230_v19, %v6940_v0  ;;  %v68_v19 = vld [vmem:[%s9751_s0 + $0x180] sm:$0xff] }
 0x16a   :  { %v6938_v51 = vadd.f32 %v1622_v35, %v1256_v43  ;;  %1723 = vmatmul.f32.gmra.mxu3 %v655_v31  ;;  %v233_v31 = vsel %vm90_vm0, %v67_v50, 0 }
 0x16b   :  { %v531_v3 = vpop.f32.mrf.mxu0  ;;  %v671_v43 = vand.u32 4294901760, %v670_v41  ;;  %v6951_v37 = vand.u32 4294901760, %v233_v31 }
 0x16c   :  { %10148 = vst [vmem:[#allocation41_spill] sm:$0xff] %v6938_v51  ;;  %v532_v1 = vadd.f32 %v6918_v11, %v531_v3  ;;  %v954_v29 = vpop.f32.mrf.mxu1  ;;  %v1260_v39 = vpop.f32.mrf.mxu2  ;;  %v665_v3 = vand.u32 4294901760, %v664_v45 }
 0x16d   :  { %v1628_v56 = vpop.f32.mrf.mxu3  ;;  %10151 = vst [vmem:[#allocation44_spill] sm:$0xff] %v6951_v37 }
 0x16e   :  { %v955_v17 = vadd.f32 %v954_v29, %v532_v1  ;;  %658 = vmatmul.f32.gmra.mxu0 %v657_v58 }
 0x16f   :  { %1017 = vmatmul.f32.gmra.mxu1 %v6913_v9 }
 0x170   :  { %v1261_v35 = vadd.f32 %v1260_v39, %v955_v17  ;;  %v672_v17 = vsub.f32 %v670_v41, %v671_v43 }
 0x171   :  { %1344 = vmatmul.f32.gmra.mxu2 %v662_v30  ;;  %v678_v30 = vsub.f32 %v233_v31, %v6951_v37  ;;  %v69_v31 = vld [vmem:[%s9751_s0 + $0x188] sm:$0xff] }
 0x172   :  { %v6949_v8 = vadd.f32 %v1628_v56, %v1261_v35  ;;  %1729 = vmatmul.f32.gmra.mxu3 %v663_v27  ;;  %v236_v27 = vsel %vm90_vm0, %v68_v19, 0 }
 0x173   :  { %v539_v51 = vpop.f32.mrf.mxu0  ;;  %v679_v35 = vand.u32 4294901760, %v678_v30  ;;  %v6962_v9 = vand.u32 4294901760, %v236_v27 }
 0x174   :  { %10150 = vst [vmem:[#allocation43_spill] sm:$0xff] %v6949_v8  ;;  %v540_v58 = vadd.f32 %v6918_v11, %v539_v51  ;;  %v958_v1 = vpop.f32.mrf.mxu1  ;;  %v1265_v50 = vpop.f32.mrf.mxu2  ;;  %v673_v51 = vand.u32 4294901760, %v672_v17 }
 0x175   :  { %v1634_v39 = vpop.f32.mrf.mxu3  ;;  %10153 = vst [vmem:[#allocation46_spill] sm:$0xff] %v6962_v9 }
 0x176   :  { %v959_v29 = vadd.f32 %v958_v1, %v540_v58  ;;  %666 = vmatmul.f32.gmra.mxu0 %v665_v3 }
 0x177   :  { %1021 = vmatmul.f32.gmra.mxu1 %v6929_v42 }
 0x178   :  { %v1266_v56 = vadd.f32 %v1265_v50, %v959_v29  ;;  %v680_v29 = vsub.f32 %v678_v30, %v679_v35 }
 0x179   :  { %1349 = vmatmul.f32.gmra.mxu2 %v670_v41  ;;  %v686_v41 = vsub.f32 %v236_v27, %v6962_v9 }
 0x17a   :  { %v6960_v45 = vadd.f32 %v1634_v39, %v1266_v56  ;;  %1735 = vmatmul.f32.gmra.mxu3 %v671_v43  ;;  %v2460_v43 = vld [vmem:[%s9753_s3 + $0x8] sm:$0xff]  ;;  %v239_v39 = vsel %vm90_vm0, %v69_v31, 0  ;;  %v681_v27 = vand.u32 4294901760, %v680_v29 }
 0x17b   :  { %v547_v8 = vpop.f32.mrf.mxu0  ;;  %v6973_v17 = vand.u32 4294901760, %v2460_v43 }
 0x17c   :  { %10152 = vst [vmem:[#allocation45_spill] sm:$0xff] %v6960_v45  ;;  %v548_v3 = vadd.f32 %v6918_v11, %v547_v8  ;;  %v962_v58 = vpop.f32.mrf.mxu1  ;;  %v1270_v19 = vpop.f32.mrf.mxu2 }
 0x17d   :  { %v1640_v50 = vpop.f32.mrf.mxu3  ;;  %2677 = vmatpush.msrb.mxu2 %v6973_v17  ;;  %v6978_v56 = vsub.f32 %v2460_v43, %v6973_v17  ;;  %3848 = vmatpush.msra.mxu1 %v6973_v17  ;;  %v70_v43 = vld [vmem:[%s9751_s0 + $0x190] sm:$0xff] }
 0x17e   :  { %v963_v1 = vadd.f32 %v962_v58, %v548_v3  ;;  %674 = vmatmul.f32.gmra.mxu0 %v673_v51  ;;  %v687_v3 = vand.u32 4294901760, %v686_v41  ;;  %v6983_v58 = vand.u32 4294901760, %v239_v39  ;;  %v242_v42 = vsel %vm90_vm0, %v70_v43, 0 }
 0x17f   :  { %1025 = vmatmul.f32.gmra.mxu1 %v6940_v0  ;;  %3506 = vmatpush.msra.mxu0 %v6978_v56 }
 0x180   :  { %v1271_v8 = vadd.f32 %v1270_v19, %v963_v1  ;;  %10155 = vst [vmem:[#allocation48_spill] sm:$0xff] %v6983_v58  ;;  %v9802_v19 = vand.u32 4294901760, %v6978_v56 }
 0x181   :  { %1354 = vmatmul.f32.gmra.mxu2 %v678_v30 }
 0x182   :  { %v6981_v51 = vadd.f32 %v1640_v50, %v1271_v8  ;;  %1741 = vmatmul.f32.gmra.mxu3 %v679_v35  ;;  %v3220_v30 = vsub.f32 %v6978_v56, %v9802_v19  ;;  %v688_v8 = vsub.f32 %v686_v41, %v687_v3  ;;  %v6999_v19 = vand.u32 4294901760, %v242_v42 }
 0x183   :  { %v555_v31 = vpop.f32.mrf.mxu0 }
 0x184   :  { %10154 = vst [vmem:[#allocation47_spill] sm:$0xff] %v6981_v51  ;;  %v556_v1 = vadd.f32 %v6918_v11, %v555_v31  ;;  %v966_v0 = vpop.f32.mrf.mxu1  ;;  %v1275_v50 = vpop.f32.mrf.mxu2  ;;  %v694_v51 = vsub.f32 %v239_v39, %v6983_v58  ;;  %v3221_v45 = vand.u32 4294901760, %v3220_v30  ;;  %v689_v24 = vand.u32 4294901760, %v688_v8  ;;  %v71_v39 = vld [vmem:[%s9751_s0 + $0x198] sm:$0xff] }
 0x185   :  { %v1646_v29 = vpop.f32.mrf.mxu3  ;;  %10156 = vst [vmem:[#allocation49_spill] sm:$0xff] %v6999_v19 }
 0x186   :  { %v967_v35 = vadd.f32 %v966_v0, %v556_v1  ;;  %682 = vmatmul.f32.gmra.mxu0 %v681_v27  ;;  %3222 = vmatpush.msrb.mxu3 %v3221_v45  ;;  %v695_v59 = vand.u32 4294901760, %v694_v51 }
 0x187   :  { %1029 = vmatmul.f32.gmra.mxu1 %v6951_v37 }
 0x188   :  { %v1276_v31 = vadd.f32 %v1275_v50, %v967_v35  ;;  %v696_v30 = vsub.f32 %v694_v51, %v695_v59 }
 0x189   :  { %1359 = vmatmul.f32.gmra.mxu2 %v686_v41  ;;  %v702_v41 = vsub.f32 %v242_v42, %v6999_v19  ;;  %v72_v42 = vld [vmem:[%s9751_s0 + $0x1a0] sm:$0xff] }
 0x18a   :  { %v6997_v25 = vadd.f32 %v1646_v29, %v1276_v31  ;;  %1747 = vmatmul.f32.gmra.mxu3 %v687_v3  ;;  %v245_v3 = vsel %vm90_vm0, %v71_v39, 0  ;;  %v697_v8 = vand.u32 4294901760, %v696_v30 }
 0x18b   :  { %v563_v0 = vpop.f32.mrf.mxu0  ;;  %v703_v31 = vand.u32 4294901760, %v702_v41 }
 0x18c   :  { %v564_v27 = vadd.f32 %v6918_v11, %v563_v0  ;;  %v970_v1 = vpop.f32.mrf.mxu1  ;;  %v1280_v43 = vpop.f32.mrf.mxu2  ;;  %v7010_v0 = vand.u32 4294901760, %v245_v3 }
 0x18d   :  { %v1652_v45 = vpop.f32.mrf.mxu3 }
 0x18e   :  { %v971_v50 = vadd.f32 %v970_v1, %v564_v27  ;;  %690 = vmatmul.f32.gmra.mxu0 %v689_v24  ;;  %10158 = vst [vmem:[#allocation51_spill] sm:$0xff] %v7010_v0 }
 0x18f   :  { %1033 = vmatmul.f32.gmra.mxu1 %v6962_v9 }
 0x190   :  { %v1281_v35 = vadd.f32 %v1280_v43, %v971_v50  ;;  %v704_v50 = vsub.f32 %v702_v41, %v703_v31 }
 0x191   :  { %1364 = vmatmul.f32.gmra.mxu2 %v694_v51  ;;  %v710_v51 = vsub.f32 %v245_v3, %v7010_v0  ;;  %v73_v3 = vld [vmem:[%s9751_s0 + $0x1a8] sm:$0xff] }
 0x192   :  { %v7008_v29 = vadd.f32 %v1652_v45, %v1281_v35  ;;  %1753 = vmatmul.f32.gmra.mxu3 %v695_v59  ;;  %v248_v59 = vsel %vm90_vm0, %v72_v42, 0 }
 0x193   :  { %v571_v37 = vpop.f32.mrf.mxu0  ;;  %v711_v35 = vand.u32 4294901760, %v710_v51  ;;  %v7021_v9 = vand.u32 4294901760, %v248_v59 }
 0x194   :  { %10157 = vst [vmem:[#allocation50_spill] sm:$0xff] %v7008_v29  ;;  %v572_v24 = vadd.f32 %v6918_v11, %v571_v37  ;;  %v974_v27 = vpop.f32.mrf.mxu1  ;;  %v1285_v39 = vpop.f32.mrf.mxu2  ;;  %v705_v37 = vand.u32 4294901760, %v704_v50 }
 0x195   :  { %v1658_v43 = vpop.f32.mrf.mxu3  ;;  %10160 = vst [vmem:[#allocation53_spill] sm:$0xff] %v7021_v9 }
 0x196   :  { %v975_v1 = vadd.f32 %v974_v27, %v572_v24  ;;  %698 = vmatmul.f32.gmra.mxu0 %v697_v8 }
 0x197   :  { %1037 = vmatmul.f32.gmra.mxu1 %v6983_v58 }
 0x198   :  { %v1286_v45 = vadd.f32 %v1285_v39, %v975_v1  ;;  %v712_v1 = vsub.f32 %v710_v51, %v711_v35 }
 0x199   :  { %1369 = vmatmul.f32.gmra.mxu2 %v702_v41  ;;  %v718_v41 = vsub.f32 %v248_v59, %v7021_v9  ;;  %v74_v59 = vld [vmem:[%s9751_s0 + $0x1b0] sm:$0xff] }
 0x19a   :  { %v7019_v30 = vadd.f32 %v1658_v43, %v1286_v45  ;;  %1759 = vmatmul.f32.gmra.mxu3 %v703_v31  ;;  %v251_v31 = vsel %vm90_vm0, %v73_v3, 0 }
 0x19b   :  { %v579_v29 = vpop.f32.mrf.mxu0  ;;  %v719_v45 = vand.u32 4294901760, %v718_v41  ;;  %v7032_v58 = vand.u32 4294901760, %v251_v31 }
 0x19c   :  { %10159 = vst [vmem:[#allocation52_spill] sm:$0xff] %v7019_v30  ;;  %v580_v8 = vadd.f32 %v6918_v11, %v579_v29  ;;  %v978_v24 = vpop.f32.mrf.mxu1  ;;  %v1290_v42 = vpop.f32.mrf.mxu2  ;;  %v713_v29 = vand.u32 4294901760, %v712_v1 }
 0x19d   :  { %v1664_v39 = vpop.f32.mrf.mxu3  ;;  %10162 = vst [vmem:[#allocation55_spill] sm:$0xff] %v7032_v58 }
 0x19e   :  { %v979_v27 = vadd.f32 %v978_v24, %v580_v8  ;;  %706 = vmatmul.f32.gmra.mxu0 %v705_v37 }
 0x19f   :  { %1041 = vmatmul.f32.gmra.mxu1 %v6999_v19 }
 0x1a0   :  { %v1291_v43 = vadd.f32 %v1290_v42, %v979_v27  ;;  %v720_v27 = vsub.f32 %v718_v41, %v719_v45 }
 0x1a1   :  { %1374 = vmatmul.f32.gmra.mxu2 %v710_v51  ;;  %v726_v51 = vsub.f32 %v251_v31, %v7032_v58  ;;  %v75_v31 = vld [vmem:[%s9751_s0 + $0x1b8] sm:$0xff] }
 0x1a2   :  { %v7030_v50 = vadd.f32 %v1664_v39, %v1291_v43  ;;  %1765 = vmatmul.f32.gmra.mxu3 %v711_v35  ;;  %v254_v35 = vsel %vm90_vm0, %v74_v59, 0 }
 0x1a3   :  { %v587_v30 = vpop.f32.mrf.mxu0  ;;  %v727_v43 = vand.u32 4294901760, %v726_v51  ;;  %v7043_v19 = vand.u32 4294901760, %v254_v35 }
 0x1a4   :  { %10161 = vst [vmem:[#allocation54_spill] sm:$0xff] %v7030_v50  ;;  %v588_v37 = vadd.f32 %v6918_v11, %v587_v30  ;;  %v982_v8 = vpop.f32.mrf.mxu1  ;;  %v1295_v3 = vpop.f32.mrf.mxu2  ;;  %v721_v30 = vand.u32 4294901760, %v720_v27 }
 0x1a5   :  { %v1670_v42 = vpop.f32.mrf.mxu3  ;;  %10164 = vst [vmem:[#allocation57_spill] sm:$0xff] %v7043_v19 }
 0x1a6   :  { %v983_v24 = vadd.f32 %v982_v8, %v588_v37  ;;  %714 = vmatmul.f32.gmra.mxu0 %v713_v29 }
 0x1a7   :  { %1045 = vmatmul.f32.gmra.mxu1 %v7010_v0 }
 0x1a8   :  { %v1296_v39 = vadd.f32 %v1295_v3, %v983_v24  ;;  %v728_v24 = vsub.f32 %v726_v51, %v727_v43 }
 0x1a9   :  { %1379 = vmatmul.f32.gmra.mxu2 %v718_v41  ;;  %v734_v41 = vsub.f32 %v254_v35, %v7043_v19  ;;  %v76_v35 = vld [vmem:[%s9751_s0 + $0x1c0] sm:$0xff] }
 0x1aa   :  { %v7041_v1 = vadd.f32 %v1670_v42, %v1296_v39  ;;  %1771 = vmatmul.f32.gmra.mxu3 %v719_v45  ;;  %v257_v45 = vsel %vm90_vm0, %v75_v31, 0 }
 0x1ab   :  { %v595_v50 = vpop.f32.mrf.mxu0  ;;  %v735_v39 = vand.u32 4294901760, %v734_v41  ;;  %v7054_v0 = vand.u32 4294901760, %v257_v45 }
 0x1ac   :  { %10163 = vst [vmem:[#allocation56_spill] sm:$0xff] %v7041_v1  ;;  %v596_v29 = vadd.f32 %v6918_v11, %v595_v50  ;;  %v986_v37 = vpop.f32.mrf.mxu1  ;;  %v1300_v59 = vpop.f32.mrf.mxu2  ;;  %v729_v50 = vand.u32 4294901760, %v728_v24 }
 0x1ad   :  { %v1676_v3 = vpop.f32.mrf.mxu3 }
 0x1ae   :  { %v987_v8 = vadd.f32 %v986_v37, %v596_v29  ;;  %722 = vmatmul.f32.gmra.mxu0 %v721_v30 }
 0x1af   :  { %1049 = vmatmul.f32.gmra.mxu1 %v7021_v9 }
 0x1b0   :  { %v1301_v42 = vadd.f32 %v1300_v59, %v987_v8  ;;  %v736_v8 = vsub.f32 %v734_v41, %v735_v39 }
 0x1b1   :  { %1384 = vmatmul.f32.gmra.mxu2 %v726_v51  ;;  %v742_v51 = vsub.f32 %v257_v45, %v7054_v0  ;;  %v77_v45 = vld [vmem:[%s9751_s0 + $0x1c8] sm:$0xff] }
 0x1b2   :  { %v7052_v27 = vadd.f32 %v1676_v3, %v1301_v42  ;;  %1777 = vmatmul.f32.gmra.mxu3 %v727_v43  ;;  %v260_v43 = vsel %vm90_vm0, %v76_v35, 0 }
 0x1b3   :  { %v603_v1 = vpop.f32.mrf.mxu0  ;;  %v743_v42 = vand.u32 4294901760, %v742_v51  ;;  %v7065_v9 = vand.u32 4294901760, %v260_v43 }
 0x1b4   :  { %10165 = vst [vmem:[#allocation58_spill] sm:$0xff] %v7052_v27  ;;  %v604_v30 = vadd.f32 %v6918_v11, %v603_v1  ;;  %v990_v29 = vpop.f32.mrf.mxu1  ;;  %v1305_v31 = vpop.f32.mrf.mxu2  ;;  %v737_v1 = vand.u32 4294901760, %v736_v8 }
 0x1b5   :  { %v1682_v59 = vpop.f32.mrf.mxu3  ;;  %10167 = vst [vmem:[#allocation60_spill] sm:$0xff] %v7065_v9 }
 0x1b6   :  { %v991_v37 = vadd.f32 %v990_v29, %v604_v30  ;;  %730 = vmatmul.f32.gmra.mxu0 %v729_v50 }
 0x1b7   :  { %1053 = vmatmul.f32.gmra.mxu1 %v7032_v58 }
 0x1b8   :  { %v1306_v3 = vadd.f32 %v1305_v31, %v991_v37  ;;  %v744_v37 = vsub.f32 %v742_v51, %v743_v42 }
 0x1b9   :  { %1389 = vmatmul.f32.gmra.mxu2 %v734_v41  ;;  %v750_v41 = vsub.f32 %v260_v43, %v7065_v9  ;;  %v78_v43 = vld [vmem:[%s9751_s0 + $0x1d0] sm:$0xff] }
 0x1ba   :  { %v7063_v24 = vadd.f32 %v1682_v59, %v1306_v3  ;;  %1783 = vmatmul.f32.gmra.mxu3 %v735_v39  ;;  %v263_v39 = vsel %vm90_vm0, %v77_v45, 0 }
 0x1bb   :  { %v611_v27 = vpop.f32.mrf.mxu0  ;;  %v751_v3 = vand.u32 4294901760, %v750_v41  ;;  %v7076_v58 = vand.u32 4294901760, %v263_v39 }
 0x1bc   :  { %10166 = vst [vmem:[#allocation59_spill] sm:$0xff] %v7063_v24  ;;  %v612_v50 = vadd.f32 %v6918_v11, %v611_v27  ;;  %v994_v30 = vpop.f32.mrf.mxu1  ;;  %v1310_v35 = vpop.f32.mrf.mxu2  ;;  %v745_v27 = vand.u32 4294901760, %v744_v37 }
 0x1bd   :  { %v1688_v31 = vpop.f32.mrf.mxu3  ;;  %10168 = vst [vmem:[#allocation61_spill] sm:$0xff] %v7076_v58 }
 0x1be   :  { %v995_v29 = vadd.f32 %v994_v30, %v612_v50  ;;  %738 = vmatmul.f32.gmra.mxu0 %v737_v1 }
 0x1bf   :  { %1057 = vmatmul.f32.gmra.mxu1 %v7043_v19 }
 0x1c0   :  { %v1311_v59 = vadd.f32 %v1310_v35, %v995_v29  ;;  %v752_v35 = vsub.f32 %v750_v41, %v751_v3  ;;  %v758_v29 = vsub.f32 %v263_v39, %v7076_v58  ;;  %v79_v39 = vld [vmem:[%s9751_s0 + $0x1d8] sm:$0xff] }
 0x1c1   :  { %1394 = vmatmul.f32.gmra.mxu2 %v742_v51 }
 0x1c2   :  { %v7074_v8 = vadd.f32 %v1688_v31, %v1311_v59  ;;  %1789 = vmatmul.f32.gmra.mxu3 %v743_v42  ;;  %v266_v42 = vsel %vm90_vm0, %v78_v43, 0 }
 0x1c3   :  { %v619_v24 = vpop.f32.mrf.mxu0  ;;  %v7087_v59 = vand.u32 4294901760, %v266_v42 }
 0x1c4   :  { %v620_v1 = vadd.f32 %v6918_v11, %v619_v24  ;;  %v998_v50 = vpop.f32.mrf.mxu1  ;;  %v1315_v45 = vpop.f32.mrf.mxu2  ;;  %v753_v11 = vand.u32 4294901760, %v752_v35  ;;  %v759_v24 = vand.u32 4294901760, %v758_v29  ;;  %v80_v35 = vld [vmem:[%s9751_s0 + $0x1e0] sm:$0xff] }
 0x1c5   :  { %v1694_v51 = vpop.f32.mrf.mxu3  ;;  %10169 = vst [vmem:[#allocation62_spill] sm:$0xff] %v7087_v59  ;;  %v766_v43 = vsub.f32 %v266_v42, %v7087_v59 }
 0x1c6   :  { %v999_v30 = vadd.f32 %v998_v50, %v620_v1  ;;  %746 = vmatmul.f32.gmra.mxu0 %v745_v27  ;;  %v760_v1 = vsub.f32 %v758_v29, %v759_v24  ;;  %v269_v50 = vsel %vm90_vm0, %v79_v39, 0 }
 0x1c7   :  { %1061 = vmatmul.f32.gmra.mxu1 %v7054_v0 }
 0x1c8   :  { %v1316_v31 = vadd.f32 %v1315_v45, %v999_v30  ;;  %v7099_v45 = vand.u32 4294901760, %v269_v50 }
 0x1c9   :  { %1399 = vmatmul.f32.gmra.mxu2 %v750_v41  ;;  %v761_v41 = vand.u32 4294901760, %v760_v1 }
 0x1ca   :  { %v7085_v37 = vadd.f32 %v1694_v51, %v1316_v31  ;;  %1795 = vmatmul.f32.gmra.mxu3 %v751_v3  ;;  %v767_v3 = vand.u32 4294901760, %v766_v43  ;;  %10170 = vst [vmem:[#allocation63_spill] sm:$0xff] %v7099_v45  ;;  %v774_v31 = vsub.f32 %v269_v50, %v7099_v45 }
 0x1cb   :  { %v7089_v19 = vpop.f32.mrf.mxu0 }
 0x1cc   :  { %v7094_v27 = vpop.f32.mrf.mxu1  ;;  %v768_v42 = vsub.f32 %v766_v43, %v767_v3 }
 0x1ce   :  { %754 = vmatmul.f32.gmra.mxu0 %v753_v11  ;;  %v272_v11 = vsel %vm90_vm0, %v80_v35, 0 }
 0x1cf   :  { %1065 = vmatmul.f32.gmra.mxu1 %v7065_v9  ;;  %v7111_v39 = vand.u32 4294901760, %v272_v11  ;;  %v81_v9 = vld [vmem:[%s9751_s0 + $0x1e8] sm:$0xff] }
 0x1d1   :  { %1404 = vmatmul.f32.gmra.mxu2 %v758_v29  ;;  %v769_v29 = vand.u32 4294901760, %v768_v42  ;;  %10172 = vst [vmem:[#allocation65_spill] sm:$0xff] %v7111_v39  ;;  %v782_v35 = vsub.f32 %v272_v11, %v7111_v39 }
 0x1d2   :  { %1801 = vmatmul.f32.gmra.mxu3 %v759_v24  ;;  %v775_v24 = vand.u32 4294901760, %v774_v31 }
 0x1d3   :  { %v7101_v30 = vpop.f32.mrf.mxu0 }
 0x1d4   :  { %v7106_v51 = vpop.f32.mrf.mxu1  ;;  %v776_v50 = vsub.f32 %v774_v31, %v775_v24 }
 0x1d5   :  { %10171 = vst [vmem:[#allocation64_spill] sm:$0xff] %v7106_v51 }
 0x1d6   :  { %762 = vmatmul.f32.gmra.mxu0 %v761_v41 }
 0x1d7   :  { %1069 = vmatmul.f32.gmra.mxu1 %v7076_v58  ;;  %v275_v58 = vsel %vm90_vm0, %v81_v9, 0 }
 0x1d8   :  { %v7123_v42 = vand.u32 4294901760, %v275_v58 }
 0x1d9   :  { %1409 = vmatmul.f32.gmra.mxu2 %v766_v43  ;;  %v777_v43 = vand.u32 4294901760, %v776_v50 }
 0x1da   :  { %1807 = vmatmul.f32.gmra.mxu3 %v767_v3  ;;  %v783_v3 = vand.u32 4294901760, %v782_v35  ;;  %10175 = vst [vmem:[#allocation68_spill] sm:$0xff] %v7123_v42  ;;  %v790_v9 = vsub.f32 %v275_v58, %v7123_v42 }
 0x1db   :  { %v7113_v1 = vpop.f32.mrf.mxu0 }
 0x1dc   :  { %10173 = vst [vmem:[#allocation66_spill] sm:$0xff] %v7113_v1  ;;  %v7118_v41 = vpop.f32.mrf.mxu1  ;;  %v784_v11 = vsub.f32 %v782_v35, %v783_v3 }
 0x1dd   :  { %10174 = vst [vmem:[#allocation67_spill] sm:$0xff] %v7118_v41  ;;  %v82_v41 = vld [vmem:[%s9751_s0 + $0x1f0] sm:$0xff] }
 0x1de   :  { %770 = vmatmul.f32.gmra.mxu0 %v769_v29 }
 0x1df   :  { %1073 = vmatmul.f32.gmra.mxu1 %v7087_v59  ;;  %v278_v59 = vsel %vm90_vm0, %v82_v41, 0 }
 0x1e0   :  { %v7135_v50 = vand.u32 4294901760, %v278_v59 }
 0x1e1   :  { %1414 = vmatmul.f32.gmra.mxu2 %v774_v31  ;;  %v785_v31 = vand.u32 4294901760, %v784_v11 }
 0x1e2   :  { %1813 = vmatmul.f32.gmra.mxu3 %v775_v24  ;;  %v791_v24 = vand.u32 4294901760, %v790_v9  ;;  %10178 = vst [vmem:[#allocation71_spill] sm:$0xff] %v7135_v50  ;;  %v798_v41 = vsub.f32 %v278_v59, %v7135_v50 }
 0x1e3   :  { %v7125_v1 = vpop.f32.mrf.mxu0 }
 0x1e4   :  { %10176 = vst [vmem:[#allocation69_spill] sm:$0xff] %v7125_v1  ;;  %v7130_v29 = vpop.f32.mrf.mxu1  ;;  %v792_v58 = vsub.f32 %v790_v9, %v791_v24 }
 0x1e5   :  { %10177 = vst [vmem:[#allocation70_spill] sm:$0xff] %v7130_v29  ;;  %v83_v29 = vld [vmem:[%s9751_s0 + $0x1f8] sm:$0xff] }
 0x1e6   :  { %778 = vmatmul.f32.gmra.mxu0 %v777_v43 }
 0x1e7   :  { %1077 = vmatmul.f32.gmra.mxu1 %v7099_v45  ;;  %v281_v45 = vsel %vm90_vm0, %v83_v29, 0 }
 0x1e8   :  { %v7147_v11 = vand.u32 4294901760, %v281_v45 }
 0x1e9   :  { %1419 = vmatmul.f32.gmra.mxu2 %v782_v35  ;;  %v793_v35 = vand.u32 4294901760, %v792_v58 }
 0x1ea   :  { %1819 = vmatmul.f32.gmra.mxu3 %v783_v3  ;;  %v799_v3 = vand.u32 4294901760, %v798_v41 }
 0x1eb   :  { %v7137_v1 = vpop.f32.mrf.mxu0 }
 0x1ec   :  { %10179 = vst [vmem:[#allocation72_spill] sm:$0xff] %v7137_v1  ;;  %v7142_v43 = vpop.f32.mrf.mxu1 }
 0x1ed   :  { %10180 = vst [vmem:[#allocation73_spill] sm:$0xff] %v7142_v43  ;;  %v800_v43 = vsub.f32 %v798_v41, %v799_v3 }
 0x1ee   :  { %786 = vmatmul.f32.gmra.mxu0 %v785_v31  ;;  %v806_v31 = vsub.f32 %v281_v45, %v7147_v11 }
 0x1ef   :  { %1081 = vmatmul.f32.gmra.mxu1 %v7111_v39  ;;  %v801_v59 = vand.u32 4294901760, %v800_v43  ;;  %v2459_v39 = vld [vmem:[%s9753_s3] sm:$0xff] }
 0x1f0   :  { %v807_v29 = vand.u32 4294901760, %v806_v31 }
 0x1f1   :  { %1424 = vmatmul.f32.gmra.mxu2 %v790_v9 }
 0x1f2   :  { %1825 = vmatmul.f32.gmra.mxu3 %v791_v24  ;;  %v808_v58 = vsub.f32 %v806_v31, %v807_v29 }
 0x1f3   :  { %v7149_v1 = vpop.f32.mrf.mxu0 }
 0x1f4   :  { %v7151_v51 = vpop.f32.mrf.mxu1  ;;  %v809_v43 = vand.u32 4294901760, %v808_v58 }
 0x1f6   :  { %794 = vmatmul.f32.gmra.mxu0 %v793_v35  ;;  %v2678_v35 = vand.u32 4294901760, %v2459_v39 }
 0x1f7   :  { %1085 = vmatmul.f32.gmra.mxu1 %v7123_v42  ;;  %v10183_v42 = vand.u32 4294901760, %v6591_v15 }
 0x1f8   :  { %2679 = vmatpush.msrb.mxu2 %v2678_v35  ;;  %v3224_v45 = vsub.f32 %v2459_v39, %v2678_v35  ;;  %3850 = vmatpush.msra.mxu1 %v2678_v35  ;;  %v10185_v39 = vand.u32 4294901760, %v6978_v56 }
 0x1f9   :  { %1429 = vmatmul.f32.gmra.mxu2 %v798_v41 }
 0x1fa   :  { %1831 = vmatmul.f32.gmra.mxu3 %v799_v3  ;;  %v3225_v3 = vand.u32 4294901760, %v3224_v45  ;;  %4251 = vmatpush.msra.mxu2 %v10183_v42 }
 0x1fb   :  { %v7155_v9 = vpop.f32.mrf.mxu0  ;;  %3509 = vmatpush.msra.mxu0 %v3224_v45 }
 0x1fc   :  { %10181 = vst [vmem:[#allocation74_spill] sm:$0xff] %v7155_v9  ;;  %v7157_v24 = vpop.f32.mrf.mxu1  ;;  %v10184_v9 = vand.u32 4294901760, %v6782_v2 }
 0x1fd   :  { %10182 = vst [vmem:[#allocation75_spill] sm:$0xff] %v7157_v24  ;;  %v3226_v24 = vsub.f32 %v3224_v45, %v3225_v3 }
 0x1fe   :  { %802 = vmatmul.f32.gmra.mxu0 %v801_v59  ;;  %4255 = vmatpush.msra.mxu2 %v10184_v9 }
 0x1ff   :  { %1089 = vmatmul.f32.gmra.mxu1 %v7135_v50  ;;  %v3227_v50 = vand.u32 4294901760, %v3226_v24 }
 0x200   :  { %4259 = vmatpush.msra.mxu2 %v10185_v39 }
 0x201   :  { %1434 = vmatmul.f32.gmra.mxu2 %v806_v31  ;;  %3228 = vmatpush.msrb.mxu3 %v3227_v50  ;;  %v7201_v50 = vpop.f32.mrf.mxu3 }
 0x202   :  { %1837 = vmatmul.f32.gmra.mxu3 %v807_v29  ;;  %4263 = vmatpush.msra.mxu2 %v3225_v3  ;;  %v7209_v29 = vpop.f32.mrf.mxu2 }
 0x203   :  { %v7163_v41 = vpop.f32.mrf.mxu0  ;;  %4534 = vmatpush.msra.mxu3 %v6586_v14 }
 0x204   :  { %v7167_v59 = vpop.f32.mrf.mxu1 }
 0x205   :  { %4536 = vmatpush.msra.mxu3 %v6777_v63 }
 0x206   :  { %810 = vmatmul.f32.gmra.mxu0 %v809_v43 }
 0x207   :  { %1093 = vmatmul.f32.gmra.mxu1 %v7147_v11  ;;  %4538 = vmatpush.msra.mxu3 %v6973_v17 }
 0x209   :  { %4540 = vmatpush.msra.mxu3 %v2678_v35  ;;  %v7213_v9 = vpop.f32.mrf.mxu3 }
 0x20a   :  { %v7221_v58 = vpop.f32.mrf.mxu2 }
 0x20b   :  { %v7175_v15 = vpop.f32.mrf.mxu0 }
 0x20c   :  { %v7178_v42 = vpop.f32.mrf.mxu1 }
 0x20e   :  { %1864 = vmatmul.f32.vlgmr.msrb.gmra.mxu0 %v6453_v7 }
 0x20f   :  { %2139 = vmatmul.f32.vlgmr.msrb.gmra.mxu1 %v6453_v7 }
 0x211   :  { %v7225_v45 = vpop.f32.mrf.mxu3 }
 0x212   :  { %v7233_v3 = vpop.f32.mrf.mxu2 }
 0x213   :  { %v7183_v2 = vpop.f32.mrf.mxu0 }
 0x214   :  { %v7185_v56 = vpop.f32.mrf.mxu1 }
 0x216   :  { %1868 = vmatmul.f32.gmra.mxu0 %v6459_v12 }
 0x217   :  { %2143 = vmatmul.f32.gmra.mxu1 %v6459_v12 }
 0x21b   :  { %v7189_v14 = vpop.f32.mrf.mxu0 }
 0x21c   :  { %10186 = vst [vmem:[#allocation76_spill] sm:$0xff] %v7189_v14  ;;  %v7191_v63 = vpop.f32.mrf.mxu1 }
 0x21d   :  { %10187 = vst [vmem:[#allocation77_spill] sm:$0xff] %v7191_v63 }
 0x21e   :  { %1872 = vmatmul.f32.gmra.mxu0 %v6464_v23 }
 0x21f   :  { %2147 = vmatmul.f32.gmra.mxu1 %v6464_v23 }
 0x223   :  { %v7195_v17 = vpop.f32.mrf.mxu0 }
 0x224   :  { %10188 = vst [vmem:[#allocation78_spill] sm:$0xff] %v7195_v17  ;;  %v7197_v7 = vpop.f32.mrf.mxu1 }
 0x225   :  { %10189 = vst [vmem:[#allocation79_spill] sm:$0xff] %v7197_v7 }
 0x226   :  { %1876 = vmatmul.f32.gmra.mxu0 %v6472_v33 }
 0x227   :  { %2151 = vmatmul.f32.gmra.mxu1 %v6472_v33 }
 0x22b   :  { %v7203_v31 = vpop.f32.mrf.mxu0 }
 0x22c   :  { %10190 = vst [vmem:[#allocation80_spill] sm:$0xff] %v7203_v31  ;;  %v7205_v12 = vpop.f32.mrf.mxu1 }
 0x22d   :  { %10191 = vst [vmem:[#allocation81_spill] sm:$0xff] %v7205_v12 }
 0x22e   :  { %1880 = vmatmul.f32.gmra.mxu0 %v6480_v40 }
 0x22f   :  { %2155 = vmatmul.f32.gmra.mxu1 %v6480_v40 }
 0x233   :  { %v7211_v23 = vpop.f32.mrf.mxu0 }
 0x234   :  { %10192 = vst [vmem:[#allocation82_spill] sm:$0xff] %v7211_v23  ;;  %v7215_v24 = vpop.f32.mrf.mxu1 }
 0x235   :  { %10193 = vst [vmem:[#allocation83_spill] sm:$0xff] %v7215_v24 }
 0x236   :  { %1884 = vmatmul.f32.gmra.mxu0 %v6488_v47 }
 0x237   :  { %2159 = vmatmul.f32.gmra.mxu1 %v6488_v47  ;;  %v7236_v47 = vpop.f32.mrf.mxu3 }
 0x23b   :  { %v7219_v33 = vpop.f32.mrf.mxu0 }
 0x23c   :  { %10194 = vst [vmem:[#allocation84_spill] sm:$0xff] %v7219_v33  ;;  %v7223_v35 = vpop.f32.mrf.mxu1  ;;  %v7244_v33 = vpop.f32.mrf.mxu2 }
 0x23d   :  { %10195 = vst [vmem:[#allocation85_spill] sm:$0xff] %v7223_v35 }
 0x23e   :  { %1888 = vmatmul.f32.gmra.mxu0 %v6496_v54 }
 0x23f   :  { %2163 = vmatmul.f32.gmra.mxu1 %v6496_v54  ;;  %v7247_v54 = vpop.f32.mrf.mxu3 }
 0x243   :  { %v7229_v40 = vpop.f32.mrf.mxu0 }
 0x244   :  { %10196 = vst [vmem:[#allocation86_spill] sm:$0xff] %v7229_v40  ;;  %v7231_v43 = vpop.f32.mrf.mxu1 }
 0x245   :  { %10197 = vst [vmem:[#allocation87_spill] sm:$0xff] %v7231_v43 }
 0x246   :  { %1892 = vmatmul.f32.gmra.mxu0 %v6504_v61 }
 0x247   :  { %2167 = vmatmul.f32.gmra.mxu1 %v6504_v61  ;;  %v7255_v61 = vpop.f32.mrf.mxu2 }
 0x24b   :  { %v7239_v39 = vpop.f32.mrf.mxu0 }
 0x24c   :  { %10198 = vst [vmem:[#allocation88_spill] sm:$0xff] %v7239_v39  ;;  %v7241_v35 = vpop.f32.mrf.mxu1 }
 0x24d   :  { %10199 = vst [vmem:[#allocation89_spill] sm:$0xff] %v7241_v35  ;;  %v7259_v35 = vpop.f32.mrf.mxu3 }
 0x24e   :  { %1896 = vmatmul.f32.gmra.mxu0 %v6512_v4 }
 0x24f   :  { %2171 = vmatmul.f32.gmra.mxu1 %v6512_v4 }
 0x253   :  { %v7249_v43 = vpop.f32.mrf.mxu0 }
 0x254   :  { %10200 = vst [vmem:[#allocation90_spill] sm:$0xff] %v7249_v43  ;;  %v7251_v40 = vpop.f32.mrf.mxu1  ;;  %v7267_v43 = vpop.f32.mrf.mxu2 }
 0x255   :  { %10201 = vst [vmem:[#allocation91_spill] sm:$0xff] %v7251_v40  ;;  %v7271_v23 = vpop.f32.mrf.mxu3 }
 0x256   :  { %1900 = vmatmul.f32.gmra.mxu0 %v6520_v13 }
 0x257   :  { %2175 = vmatmul.f32.gmra.mxu1 %v6520_v13 }
 0x25b   :  { %v7257_v39 = vpop.f32.mrf.mxu0 }
 0x25c   :  { %10202 = vst [vmem:[#allocation92_spill] sm:$0xff] %v7257_v39  ;;  %v7261_v24 = vpop.f32.mrf.mxu1 }
 0x25d   :  { %10203 = vst [vmem:[#allocation93_spill] sm:$0xff] %v7261_v24  ;;  %v7279_v24 = vpop.f32.mrf.mxu2 }
 0x25e   :  { %1904 = vmatmul.f32.gmra.mxu0 %v6528_v20 }
 0x25f   :  { %2179 = vmatmul.f32.gmra.mxu1 %v6528_v20  ;;  %v7282_v20 = vpop.f32.mrf.mxu3 }
 0x263   :  { %v7265_v4 = vpop.f32.mrf.mxu0 }
 0x264   :  { %10204 = vst [vmem:[#allocation94_spill] sm:$0xff] %v7265_v4  ;;  %v7269_v40 = vpop.f32.mrf.mxu1 }
 0x265   :  { %10205 = vst [vmem:[#allocation95_spill] sm:$0xff] %v7269_v40  ;;  %v7290_v12 = vpop.f32.mrf.mxu2 }
 0x266   :  { %1908 = vmatmul.f32.gmra.mxu0 %v6536_v28 }
 0x267   :  { %2183 = vmatmul.f32.gmra.mxu1 %v6536_v28  ;;  %v7293_v28 = vpop.f32.mrf.mxu3 }
 0x26b   :  { %v7275_v13 = vpop.f32.mrf.mxu0 }
 0x26c   :  { %10206 = vst [vmem:[#allocation96_spill] sm:$0xff] %v7275_v13  ;;  %v7277_v39 = vpop.f32.mrf.mxu1 }
 0x26d   :  { %10207 = vst [vmem:[#allocation97_spill] sm:$0xff] %v7277_v39 }
 0x26e   :  { %1912 = vmatmul.f32.gmra.mxu0 %v6544_v36 }
 0x26f   :  { %2187 = vmatmul.f32.gmra.mxu1 %v6544_v36  ;;  %v7301_v36 = vpop.f32.mrf.mxu2 }
 0x273   :  { %v7285_v4 = vpop.f32.mrf.mxu0 }
 0x274   :  { %10208 = vst [vmem:[#allocation98_spill] sm:$0xff] %v7285_v4  ;;  %v7287_v40 = vpop.f32.mrf.mxu1 }
 0x275   :  { %10209 = vst [vmem:[#allocation99_spill] sm:$0xff] %v7287_v40  ;;  %v7305_v40 = vpop.f32.mrf.mxu3 }
 0x276   :  { %1916 = vmatmul.f32.gmra.mxu0 %v6552_v44  ;;  %10213 = vst [vmem:[#allocation103_spill] sm:$0xff] %v7305_v40 }
 0x277   :  { %2191 = vmatmul.f32.gmra.mxu1 %v6552_v44 }
 0x27b   :  { %v7295_v39 = vpop.f32.mrf.mxu0 }
 0x27c   :  { %10210 = vst [vmem:[#allocation100_spill] sm:$0xff] %v7295_v39  ;;  %v7297_v13 = vpop.f32.mrf.mxu1  ;;  %v7311_v39 = vpop.f32.mrf.mxu2 }
 0x27d   :  { %10211 = vst [vmem:[#allocation101_spill] sm:$0xff] %v7297_v13  ;;  %v7314_v17 = vpop.f32.mrf.mxu3 }
 0x27e   :  { %1920 = vmatmul.f32.gmra.mxu0 %v6560_v52  ;;  %10215 = vst [vmem:[#allocation105_spill] sm:$0xff] %v7314_v17 }
 0x27f   :  { %2195 = vmatmul.f32.gmra.mxu1 %v6560_v52 }
 0x283   :  { %v7303_v4 = vpop.f32.mrf.mxu0 }
 0x284   :  { %10212 = vst [vmem:[#allocation102_spill] sm:$0xff] %v7303_v4  ;;  %v7307_v31 = vpop.f32.mrf.mxu1 }
 0x285   :  { %10214 = vst [vmem:[#allocation104_spill] sm:$0xff] %v7307_v31 }
 0x286   :  { %1924 = vmatmul.f32.gmra.mxu0 %v6568_v60 }
 0x287   :  { %2199 = vmatmul.f32.gmra.mxu1 %v6568_v60 }
 0x28b   :  { %v1865_v44 = vpop.f32.mrf.mxu0 }
 0x28c   :  { %v1866_v13 = vadd.f32 %v1865_v44, %v6621_v49  ;;  %v2140_v7 = vpop.f32.mrf.mxu1  ;;  %v7330_v44 = vpop.f32.mrf.mxu3 }
 0x28e   :  { %v2141_v52 = vadd.f32 %v2140_v7, %v1866_v13  ;;  %1928 = vmatmul.f32.gmra.mxu0 %v6576_v5  ;;  %v7326_v7 = vpop.f32.mrf.mxu2 }
 0x28f   :  { %2203 = vmatmul.f32.gmra.mxu1 %v6576_v5 }
 0x290   :  { %v2395_v4 = vmax.f32 %v2141_v52, 0.0 }
 0x292   :  { %v2469_v31 = vsel %vm2467_vm1, %v2395_v4, 0 }
 0x293   :  { %v7319_v63 = vand.u32 4294901760, %v2469_v31  ;;  %v1869_v60 = vpop.f32.mrf.mxu0 }
 0x294   :  { %v1870_v40 = vadd.f32 %v1869_v60, %v6632_v6  ;;  %v2144_v49 = vpop.f32.mrf.mxu1 }
 0x295   :  { %10216 = vst [vmem:[#allocation106_spill] sm:$0xff] %v7319_v63  ;;  %v7323_v14 = vsub.f32 %v2469_v31, %v7319_v63  ;;  %3230 = vmatmul.f32.vlgmr.msrb.gmra.mxu3 %v7319_v63 }
 0x296   :  { %v2145_v13 = vadd.f32 %v2144_v49, %v1870_v40  ;;  %1932 = vmatmul.f32.gmra.mxu0 %v6594_v18 }
 0x297   :  { %v9835_v5 = vand.u32 4294901760, %v7323_v14  ;;  %2207 = vmatmul.f32.gmra.mxu1 %v6594_v18 }
 0x298   :  { %v2396_v4 = vmax.f32 %v2145_v13, 0.0 }
 0x299   :  { %v2683_v6 = vsub.f32 %v7323_v14, %v9835_v5  ;;  %v7346_v5 = vpop.f32.mrf.mxu2 }
 0x29a   :  { %v2472_v31 = vsel %vm2467_vm1, %v2396_v4, 0 }
 0x29b   :  { %v7337_v52 = vand.u32 4294901760, %v2472_v31  ;;  %v1873_v60 = vpop.f32.mrf.mxu0  ;;  %v2684_v63 = vand.u32 4294901760, %v2683_v6  ;;  %v7352_v6 = vpop.f32.mrf.mxu3 }
 0x29c   :  { %v1874_v40 = vadd.f32 %v1873_v60, %v6643_v34  ;;  %v2148_v17 = vpop.f32.mrf.mxu1  ;;  %10218 = vst [vmem:[#allocation108_spill] sm:$0xff] %v7352_v6 }
 0x29d   :  { %10217 = vst [vmem:[#allocation107_spill] sm:$0xff] %v7337_v52  ;;  %v7341_v49 = vsub.f32 %v2472_v31, %v7337_v52  ;;  %2685 = vmatmul.f32.vlgmr.msrb.gmra.mxu2 %v2684_v63  ;;  %3234 = vmatmul.f32.gmra.mxu3 %v7337_v52 }
 0x29e   :  { %v2149_v18 = vadd.f32 %v2148_v17, %v1874_v40  ;;  %1936 = vmatmul.f32.gmra.mxu0 %v6612_v32 }
 0x29f   :  { %v9838_v13 = vand.u32 4294901760, %v7341_v49  ;;  %2211 = vmatmul.f32.gmra.mxu1 %v6612_v32 }
 0x2a0   :  { %v2397_v4 = vmax.f32 %v2149_v18, 0.0 }
 0x2a1   :  { %v2691_v34 = vsub.f32 %v7341_v49, %v9838_v13 }
 0x2a2   :  { %v2475_v63 = vsel %vm2467_vm1, %v2397_v4, 0 }
 0x2a3   :  { %v7355_v31 = vand.u32 4294901760, %v2475_v63  ;;  %v1877_v17 = vpop.f32.mrf.mxu0  ;;  %v2692_v60 = vand.u32 4294901760, %v2691_v34 }
 0x2a4   :  { %v1878_v40 = vadd.f32 %v1877_v17, %v6654_v57  ;;  %v2152_v18 = vpop.f32.mrf.mxu1  ;;  %v7368_v57 = vpop.f32.mrf.mxu2 }
 0x2a5   :  { %10219 = vst [vmem:[#allocation109_spill] sm:$0xff] %v7355_v31  ;;  %v7359_v52 = vsub.f32 %v2475_v63, %v7355_v31  ;;  %2693 = vmatmul.f32.gmra.mxu2 %v2692_v60  ;;  %3238 = vmatmul.f32.gmra.mxu3 %v7355_v31 }
 0x2a6   :  { %v2153_v32 = vadd.f32 %v2152_v18, %v1878_v40  ;;  %1940 = vmatmul.f32.gmra.mxu0 %v6623_v53  ;;  %v7373_v40 = vpop.f32.mrf.mxu3 }
 0x2a7   :  { %v9839_v13 = vand.u32 4294901760, %v7359_v52  ;;  %2215 = vmatmul.f32.gmra.mxu1 %v6623_v53  ;;  %10221 = vst [vmem:[#allocation111_spill] sm:$0xff] %v7373_v40 }
 0x2a8   :  { %v2398_v6 = vmax.f32 %v2153_v32, 0.0 }
 0x2a9   :  { %v2699_v4 = vsub.f32 %v7359_v52, %v9839_v13 }
 0x2aa   :  { %v2478_v34 = vsel %vm2467_vm1, %v2398_v6, 0 }
 0x2ab   :  { %v7371_v63 = vand.u32 4294901760, %v2478_v34  ;;  %v1881_v17 = vpop.f32.mrf.mxu0  ;;  %v2700_v60 = vand.u32 4294901760, %v2699_v4 }
 0x2ac   :  { %v1882_v18 = vadd.f32 %v1881_v17, %v6665_v22  ;;  %v2156_v53 = vpop.f32.mrf.mxu1  ;;  %v7389_v40 = vpop.f32.mrf.mxu2 }
 0x2ad   :  { %10220 = vst [vmem:[#allocation110_spill] sm:$0xff] %v7371_v63  ;;  %v7377_v32 = vsub.f32 %v2478_v34, %v7371_v63  ;;  %2701 = vmatmul.f32.gmra.mxu2 %v2700_v60  ;;  %3242 = vmatmul.f32.gmra.mxu3 %v7371_v63 }
 0x2ae   :  { %v2157_v13 = vadd.f32 %v2156_v53, %v1882_v18  ;;  %1944 = vmatmul.f32.gmra.mxu0 %v6634_v10 }
 0x2af   :  { %v9842_v6 = vand.u32 4294901760, %v7377_v32  ;;  %2219 = vmatmul.f32.gmra.mxu1 %v6634_v10  ;;  %v7396_v10 = vpop.f32.mrf.mxu3 }
 0x2b0   :  { %v2399_v31 = vmax.f32 %v2157_v13, 0.0  ;;  %10223 = vst [vmem:[#allocation113_spill] sm:$0xff] %v7396_v10 }
 0x2b1   :  { %v2707_v4 = vsub.f32 %v7377_v32, %v9842_v6 }
 0x2b2   :  { %v2481_v22 = vsel %vm2467_vm1, %v2399_v31, 0 }
 0x2b3   :  { %v7387_v34 = vand.u32 4294901760, %v2481_v22  ;;  %v1885_v17 = vpop.f32.mrf.mxu0  ;;  %v2708_v60 = vand.u32 4294901760, %v2707_v4 }
 0x2b4   :  { %v1886_v18 = vadd.f32 %v1885_v17, %v6676_v48  ;;  %v2160_v13 = vpop.f32.mrf.mxu1 }
 0x2b5   :  { %10222 = vst [vmem:[#allocation112_spill] sm:$0xff] %v7387_v34  ;;  %v7393_v53 = vsub.f32 %v2481_v22, %v7387_v34  ;;  %2709 = vmatmul.f32.gmra.mxu2 %v2708_v60  ;;  %3246 = vmatmul.f32.gmra.mxu3 %v7387_v34 }
 0x2b6   :  { %v2161_v6 = vadd.f32 %v2160_v13, %v1886_v18  ;;  %1948 = vmatmul.f32.gmra.mxu0 %v6645_v38 }
 0x2b7   :  { %v9847_v31 = vand.u32 4294901760, %v7393_v53  ;;  %2223 = vmatmul.f32.gmra.mxu1 %v6645_v38  ;;  %v7412_v38 = vpop.f32.mrf.mxu2 }
 0x2b8   :  { %v2400_v63 = vmax.f32 %v2161_v6, 0.0  ;;  %10226 = vst [vmem:[#allocation116_spill] sm:$0xff] %v7412_v38  ;;  %v10293_v38 = vld [vmem:[#allocation20_spill] sm:$0xff] }
 0x2b9   :  { %v2715_v48 = vsub.f32 %v7393_v53, %v9847_v31  ;;  %v7416_v31 = vpop.f32.mrf.mxu3 }
 0x2ba   :  { %v2484_v4 = vsel %vm2467_vm1, %v2400_v63, 0  ;;  %10227 = vst [vmem:[#allocation117_spill] sm:$0xff] %v7416_v31 }
 0x2bb   :  { %v7405_v22 = vand.u32 4294901760, %v2484_v4  ;;  %v1889_v17 = vpop.f32.mrf.mxu0  ;;  %v2716_v60 = vand.u32 4294901760, %v2715_v48 }
 0x2bc   :  { %v1890_v34 = vadd.f32 %v1889_v17, %v6687_v16  ;;  %v2164_v13 = vpop.f32.mrf.mxu1 }
 0x2bd   :  { %10224 = vst [vmem:[#allocation114_spill] sm:$0xff] %v7405_v22  ;;  %v7409_v18 = vsub.f32 %v2484_v4, %v7405_v22  ;;  %2717 = vmatmul.f32.gmra.mxu2 %v2716_v60  ;;  %3250 = vmatmul.f32.gmra.mxu3 %v7405_v22 }
 0x2be   :  { %v2165_v6 = vadd.f32 %v2164_v13, %v1890_v34  ;;  %1952 = vmatmul.f32.gmra.mxu0 %v6656_v62 }
 0x2bf   :  { %10225 = vst [vmem:[#allocation115_spill] sm:$0xff] %v7409_v18  ;;  %v9850_v63 = vand.u32 4294901760, %v7409_v18  ;;  %2227 = vmatmul.f32.gmra.mxu1 %v6656_v62 }
 0x2c0   :  { %v2401_v10 = vmax.f32 %v2165_v6, 0.0 }
 0x2c1   :  { %v2723_v16 = vsub.f32 %v7409_v18, %v9850_v63  ;;  %v7432_v63 = vpop.f32.mrf.mxu2 }
 0x2c2   :  { %v2487_v48 = vsel %vm2467_vm1, %v2401_v10, 0  ;;  %10230 = vst [vmem:[#allocation120_spill] sm:$0xff] %v7432_v63  ;;  %v10291_v63 = vld [vmem:[#allocation25_spill] sm:$0xff] }
 0x2c3   :  { %v7423_v4 = vand.u32 4294901760, %v2487_v48  ;;  %v1893_v17 = vpop.f32.mrf.mxu0  ;;  %v2724_v60 = vand.u32 4294901760, %v2723_v16  ;;  %v7438_v16 = vpop.f32.mrf.mxu3 }
 0x2c4   :  { %v1894_v34 = vadd.f32 %v1893_v17, %v6698_v46  ;;  %v2168_v22 = vpop.f32.mrf.mxu1  ;;  %10231 = vst [vmem:[#allocation121_spill] sm:$0xff] %v7438_v16 }
 0x2c5   :  { %10228 = vst [vmem:[#allocation118_spill] sm:$0xff] %v7423_v4  ;;  %v7427_v13 = vsub.f32 %v2487_v48, %v7423_v4  ;;  %2725 = vmatmul.f32.gmra.mxu2 %v2724_v60  ;;  %3254 = vmatmul.f32.gmra.mxu3 %v7423_v4 }
 0x2c6   :  { %v2169_v62 = vadd.f32 %v2168_v22, %v1894_v34  ;;  %1956 = vmatmul.f32.gmra.mxu0 %v6667_v26 }
 0x2c7   :  { %10229 = vst [vmem:[#allocation119_spill] sm:$0xff] %v7427_v13  ;;  %v9853_v6 = vand.u32 4294901760, %v7427_v13  ;;  %2231 = vmatmul.f32.gmra.mxu1 %v6667_v26 }
 0x2c8   :  { %v2402_v10 = vmax.f32 %v2169_v62, 0.0 }
 0x2c9   :  { %v2731_v46 = vsub.f32 %v7427_v13, %v9853_v6 }
 0x2ca   :  { %v2490_v48 = vsel %vm2467_vm1, %v2402_v10, 0 }
 0x2cb   :  { %v7441_v17 = vand.u32 4294901760, %v2490_v48  ;;  %v1897_v22 = vpop.f32.mrf.mxu0  ;;  %v2732_v60 = vand.u32 4294901760, %v2731_v46 }
 0x2cc   :  { %v1898_v34 = vadd.f32 %v1897_v22, %v6709_v21  ;;  %v2172_v62 = vpop.f32.mrf.mxu1  ;;  %v7454_v21 = vpop.f32.mrf.mxu2 }
 0x2cd   :  { %10232 = vst [vmem:[#allocation122_spill] sm:$0xff] %v7441_v17  ;;  %v7445_v4 = vsub.f32 %v2490_v48, %v7441_v17  ;;  %2733 = vmatmul.f32.gmra.mxu2 %v2732_v60  ;;  %3258 = vmatmul.f32.gmra.mxu3 %v7441_v17 }
 0x2ce   :  { %v2173_v26 = vadd.f32 %v2172_v62, %v1898_v34  ;;  %1960 = vmatmul.f32.gmra.mxu0 %v6678_v55  ;;  %10234 = vst [vmem:[#allocation124_spill] sm:$0xff] %v7454_v21  ;;  %v7459_v34 = vpop.f32.mrf.mxu3  ;;  %v10237_v62 = vld [vmem:[#allocation5_spill] sm:$0xff] }
 0x2cf   :  { %10233 = vst [vmem:[#allocation123_spill] sm:$0xff] %v7445_v4  ;;  %v9856_v6 = vand.u32 4294901760, %v7445_v4  ;;  %2235 = vmatmul.f32.gmra.mxu1 %v6678_v55 }
 0x2d0   :  { %v2403_v16 = vmax.f32 %v2173_v26, 0.0  ;;  %10236 = vst [vmem:[#allocation126_spill] sm:$0xff] %v7459_v34 }
 0x2d1   :  { %v2739_v10 = vsub.f32 %v7445_v4, %v9856_v6  ;;  %v10239_v4 = vld [vmem:[#allocation2_spill] sm:$0xff] }
 0x2d2   :  { %v2493_v46 = vsel %vm2467_vm1, %v2403_v16, 0 }
 0x2d3   :  { %v7457_v48 = vand.u32 4294901760, %v2493_v46  ;;  %v1901_v22 = vpop.f32.mrf.mxu0  ;;  %v2740_v60 = vand.u32 4294901760, %v2739_v10 }
 0x2d4   :  { %v1902_v17 = vadd.f32 %v1901_v22, %v10237_v62  ;;  %v2176_v55 = vpop.f32.mrf.mxu1  ;;  %v7475_v34 = vpop.f32.mrf.mxu2 }
 0x2d5   :  { %10235 = vst [vmem:[#allocation125_spill] sm:$0xff] %v7457_v48  ;;  %v7463_v26 = vsub.f32 %v2493_v46, %v7457_v48  ;;  %2741 = vmatmul.f32.gmra.mxu2 %v2740_v60  ;;  %3262 = vmatmul.f32.gmra.mxu3 %v7457_v48 }
 0x2d6   :  { %v2177_v6 = vadd.f32 %v2176_v55, %v1902_v17  ;;  %1964 = vmatmul.f32.gmra.mxu0 %v10239_v4  ;;  %10241 = vst [vmem:[#allocation127_spill] sm:$0xff] %v7475_v34  ;;  %v10242_v17 = vld [vmem:[#allocation7_spill] sm:$0xff]  ;;  %v10250_v34 = vld [vmem:[#allocation4_spill] sm:$0xff] }
 0x2d7   :  { %10238 = vst [vmem:[#allocation5_spill] sm:$0xff] %v7463_v26  ;;  %v9861_v16 = vand.u32 4294901760, %v7463_v26  ;;  %2239 = vmatmul.f32.gmra.mxu1 %v10239_v4  ;;  %v7482_v4 = vpop.f32.mrf.mxu3 }
 0x2d8   :  { %v2404_v21 = vmax.f32 %v2177_v6, 0.0  ;;  %10244 = vst [vmem:[#allocation128_spill] sm:$0xff] %v7482_v4 }
 0x2d9   :  { %v2747_v10 = vsub.f32 %v7463_v26, %v9861_v16  ;;  %v10245_v26 = vld [vmem:[#allocation3_spill] sm:$0xff] }
 0x2da   :  { %v2496_v22 = vsel %vm2467_vm1, %v2404_v21, 0 }
 0x2db   :  { %v7473_v46 = vand.u32 4294901760, %v2496_v22  ;;  %v1905_v62 = vpop.f32.mrf.mxu0  ;;  %v2748_v60 = vand.u32 4294901760, %v2747_v10 }
 0x2dc   :  { %v1906_v55 = vadd.f32 %v1905_v62, %v10242_v17  ;;  %v2180_v6 = vpop.f32.mrf.mxu1 }
 0x2dd   :  { %10240 = vst [vmem:[#allocation2_spill] sm:$0xff] %v7473_v46  ;;  %v7479_v48 = vsub.f32 %v2496_v22, %v7473_v46  ;;  %2749 = vmatmul.f32.gmra.mxu2 %v2748_v60  ;;  %3266 = vmatmul.f32.gmra.mxu3 %v7473_v46  ;;  %v10247_v46 = vld [vmem:[#allocation9_spill] sm:$0xff] }
 0x2de   :  { %v2181_v16 = vadd.f32 %v2180_v6, %v1906_v55  ;;  %1968 = vmatmul.f32.gmra.mxu0 %v10245_v26 }
 0x2df   :  { %10243 = vst [vmem:[#allocation7_spill] sm:$0xff] %v7479_v48  ;;  %v9866_v21 = vand.u32 4294901760, %v7479_v48  ;;  %2243 = vmatmul.f32.gmra.mxu1 %v10245_v26  ;;  %v7498_v26 = vpop.f32.mrf.mxu2 }
 0x2e0   :  { %v2405_v31 = vmax.f32 %v2181_v16, 0.0  ;;  %10249 = vst [vmem:[#allocation129_spill] sm:$0xff] %v7498_v26 }
 0x2e1   :  { %v2755_v10 = vsub.f32 %v7479_v48, %v9866_v21  ;;  %v7502_v21 = vpop.f32.mrf.mxu3 }
 0x2e2   :  { %v2499_v22 = vsel %vm2467_vm1, %v2405_v31, 0  ;;  %10251 = vst [vmem:[#allocation4_spill] sm:$0xff] %v7502_v21 }
 0x2e3   :  { %v7491_v62 = vand.u32 4294901760, %v2499_v22  ;;  %v1909_v60 = vpop.f32.mrf.mxu0  ;;  %v2756_v17 = vand.u32 4294901760, %v2755_v10 }
 0x2e4   :  { %v1910_v4 = vadd.f32 %v1909_v60, %v10247_v46  ;;  %v2184_v6 = vpop.f32.mrf.mxu1 }
 0x2e5   :  { %10246 = vst [vmem:[#allocation3_spill] sm:$0xff] %v7491_v62  ;;  %v7495_v55 = vsub.f32 %v2499_v22, %v7491_v62  ;;  %2757 = vmatmul.f32.gmra.mxu2 %v2756_v17  ;;  %3270 = vmatmul.f32.gmra.mxu3 %v7491_v62 }
 0x2e6   :  { %v2185_v16 = vadd.f32 %v2184_v6, %v1910_v4  ;;  %1972 = vmatmul.f32.gmra.mxu0 %v10250_v34  ;;  %v10253_v4 = vld [vmem:[#allocation11_spill] sm:$0xff] }
 0x2e7   :  { %10248 = vst [vmem:[#allocation9_spill] sm:$0xff] %v7495_v55  ;;  %v9871_v31 = vand.u32 4294901760, %v7495_v55  ;;  %2247 = vmatmul.f32.gmra.mxu1 %v10250_v34  ;;  %v7518_v21 = vpop.f32.mrf.mxu2 }
 0x2e8   :  { %v2406_v48 = vmax.f32 %v2185_v16, 0.0  ;;  %v10255_v16 = vld [vmem:[#allocation6_spill] sm:$0xff] }
 0x2e9   :  { %v2763_v46 = vsub.f32 %v7495_v55, %v9871_v31  ;;  %10256 = vst [vmem:[#allocation6_spill] sm:$0xff] %v7518_v21  ;;  %v10261_v21 = vld [vmem:[#allocation8_spill] sm:$0xff] }
 0x2ea   :  { %v2502_v10 = vsel %vm2467_vm1, %v2406_v48, 0 }
 0x2eb   :  { %v7509_v22 = vand.u32 4294901760, %v2502_v10  ;;  %v1913_v60 = vpop.f32.mrf.mxu0  ;;  %v2764_v17 = vand.u32 4294901760, %v2763_v46 }
 0x2ec   :  { %v1914_v6 = vadd.f32 %v1913_v60, %v10253_v4  ;;  %v2188_v26 = vpop.f32.mrf.mxu1 }
 0x2ed   :  { %10252 = vst [vmem:[#allocation130_spill] sm:$0xff] %v7509_v22  ;;  %v7513_v62 = vsub.f32 %v2502_v10, %v7509_v22  ;;  %2765 = vmatmul.f32.gmra.mxu2 %v2764_v17  ;;  %3274 = vmatmul.f32.gmra.mxu3 %v7509_v22  ;;  %v7524_v10 = vpop.f32.mrf.mxu3 }
 0x2ee   :  { %v2189_v34 = vadd.f32 %v2188_v26, %v1914_v6  ;;  %1976 = vmatmul.f32.gmra.mxu0 %v10255_v16  ;;  %10257 = vst [vmem:[#allocation131_spill] sm:$0xff] %v7524_v10  ;;  %v10259_v6 = vld [vmem:[#allocation13_spill] sm:$0xff] }
 0x2ef   :  { %10254 = vst [vmem:[#allocation11_spill] sm:$0xff] %v7513_v62  ;;  %v9876_v31 = vand.u32 4294901760, %v7513_v62  ;;  %2251 = vmatmul.f32.gmra.mxu1 %v10255_v16 }
 0x2f0   :  { %v2407_v48 = vmax.f32 %v2189_v34, 0.0 }
 0x2f1   :  { %v2771_v46 = vsub.f32 %v7513_v62, %v9876_v31 }
 0x2f2   :  { %v2505_v60 = vsel %vm2467_vm1, %v2407_v48, 0 }
 0x2f3   :  { %v7527_v17 = vand.u32 4294901760, %v2505_v60  ;;  %v1917_v26 = vpop.f32.mrf.mxu0  ;;  %v2772_v4 = vand.u32 4294901760, %v2771_v46  ;;  %v7540_v46 = vpop.f32.mrf.mxu2 }
 0x2f4   :  { %v1918_v22 = vadd.f32 %v1917_v26, %v10259_v6  ;;  %v2192_v34 = vpop.f32.mrf.mxu1  ;;  %10262 = vst [vmem:[#allocation8_spill] sm:$0xff] %v7540_v46 }
 0x2f5   :  { %10258 = vst [vmem:[#allocation132_spill] sm:$0xff] %v7527_v17  ;;  %v7531_v55 = vsub.f32 %v2505_v60, %v7527_v17  ;;  %2773 = vmatmul.f32.gmra.mxu2 %v2772_v4  ;;  %3278 = vmatmul.f32.gmra.mxu3 %v7527_v17 }
 0x2f6   :  { %v2193_v16 = vadd.f32 %v2192_v34, %v1918_v22  ;;  %1980 = vmatmul.f32.gmra.mxu0 %v10261_v21  ;;  %v7545_v22 = vpop.f32.mrf.mxu3  ;;  %v10265_v34 = vld [vmem:[#allocation15_spill] sm:$0xff] }
 0x2f7   :  { %10260 = vst [vmem:[#allocation13_spill] sm:$0xff] %v7531_v55  ;;  %v9879_v31 = vand.u32 4294901760, %v7531_v55  ;;  %2255 = vmatmul.f32.gmra.mxu1 %v10261_v21 }
 0x2f8   :  { %v2408_v10 = vmax.f32 %v2193_v16, 0.0  ;;  %10264 = vst [vmem:[#allocation134_spill] sm:$0xff] %v7545_v22 }
 0x2f9   :  { %v2779_v48 = vsub.f32 %v7531_v55, %v9879_v31  ;;  %v10267_v55 = vld [vmem:[#allocation10_spill] sm:$0xff] }
 0x2fa   :  { %v2508_v60 = vsel %vm2467_vm1, %v2408_v10, 0 }
 0x2fb   :  { %v7543_v26 = vand.u32 4294901760, %v2508_v60  ;;  %v1921_v4 = vpop.f32.mrf.mxu0  ;;  %v2780_v6 = vand.u32 4294901760, %v2779_v48  ;;  %v7561_v22 = vpop.f32.mrf.mxu2 }
 0x2fc   :  { %v1922_v17 = vadd.f32 %v1921_v4, %v10265_v34  ;;  %v2196_v21 = vpop.f32.mrf.mxu1  ;;  %10269 = vst [vmem:[#allocation135_spill] sm:$0xff] %v7561_v22  ;;  %v10278_v22 = vld [vmem:[#allocation14_spill] sm:$0xff] }
 0x2fd   :  { %10263 = vst [vmem:[#allocation133_spill] sm:$0xff] %v7543_v26  ;;  %v7549_v16 = vsub.f32 %v2508_v60, %v7543_v26  ;;  %2781 = vmatmul.f32.gmra.mxu2 %v2780_v6  ;;  %3282 = vmatmul.f32.gmra.mxu3 %v7543_v26 }
 0x2fe   :  { %v2197_v31 = vadd.f32 %v2196_v21, %v1922_v17  ;;  %1984 = vmatmul.f32.gmra.mxu0 %v10267_v55  ;;  %v10270_v17 = vld [vmem:[#allocation17_spill] sm:$0xff] }
 0x2ff   :  { %10266 = vst [vmem:[#allocation15_spill] sm:$0xff] %v7549_v16  ;;  %v9886_v10 = vand.u32 4294901760, %v7549_v16  ;;  %2259 = vmatmul.f32.gmra.mxu1 %v10267_v55  ;;  %v7568_v55 = vpop.f32.mrf.mxu3 }
 0x300   :  { %v2409_v62 = vmax.f32 %v2197_v31, 0.0  ;;  %10272 = vst [vmem:[#allocation136_spill] sm:$0xff] %v7568_v55 }
 0x301   :  { %v2787_v48 = vsub.f32 %v7549_v16, %v9886_v10  ;;  %v10273_v16 = vld [vmem:[#allocation12_spill] sm:$0xff] }
 0x302   :  { %v2511_v4 = vsel %vm2467_vm1, %v2409_v62, 0 }
 0x303   :  { %v7559_v60 = vand.u32 4294901760, %v2511_v4  ;;  %v1925_v34 = vpop.f32.mrf.mxu0  ;;  %v2788_v6 = vand.u32 4294901760, %v2787_v48 }
 0x304   :  { %v1926_v21 = vadd.f32 %v1925_v34, %v10270_v17  ;;  %v2200_v31 = vpop.f32.mrf.mxu1 }
 0x305   :  { %10268 = vst [vmem:[#allocation10_spill] sm:$0xff] %v7559_v60  ;;  %v7565_v26 = vsub.f32 %v2511_v4, %v7559_v60  ;;  %2789 = vmatmul.f32.gmra.mxu2 %v2788_v6  ;;  %3286 = vmatmul.f32.gmra.mxu3 %v7559_v60  ;;  %v10275_v60 = vld [vmem:[#allocation19_spill] sm:$0xff] }
 0x306   :  { %v2201_v10 = vadd.f32 %v2200_v31, %v1926_v21  ;;  %1988 = vmatmul.f32.gmra.mxu0 %v10273_v16 }
 0x307   :  { %10271 = vst [vmem:[#allocation17_spill] sm:$0xff] %v7565_v26  ;;  %v9891_v62 = vand.u32 4294901760, %v7565_v26  ;;  %2263 = vmatmul.f32.gmra.mxu1 %v10273_v16  ;;  %v7584_v16 = vpop.f32.mrf.mxu2 }
 0x308   :  { %v2410_v46 = vmax.f32 %v2201_v10, 0.0  ;;  %10277 = vst [vmem:[#allocation137_spill] sm:$0xff] %v7584_v16 }
 0x309   :  { %v2795_v48 = vsub.f32 %v7565_v26, %v9891_v62  ;;  %v7588_v62 = vpop.f32.mrf.mxu3 }
 0x30a   :  { %v2514_v4 = vsel %vm2467_vm1, %v2410_v46, 0  ;;  %10279 = vst [vmem:[#allocation14_spill] sm:$0xff] %v7588_v62 }
 0x30b   :  { %v7577_v34 = vand.u32 4294901760, %v2514_v4  ;;  %v1929_v6 = vpop.f32.mrf.mxu0  ;;  %v2796_v17 = vand.u32 4294901760, %v2795_v48 }
 0x30c   :  { %v1930_v55 = vadd.f32 %v1929_v6, %v10275_v60  ;;  %v2204_v31 = vpop.f32.mrf.mxu1 }
 0x30d   :  { %10274 = vst [vmem:[#allocation12_spill] sm:$0xff] %v7577_v34  ;;  %v7581_v21 = vsub.f32 %v2514_v4, %v7577_v34  ;;  %2797 = vmatmul.f32.gmra.mxu2 %v2796_v17  ;;  %3290 = vmatmul.f32.gmra.mxu3 %v7577_v34 }
 0x30e   :  { %v2205_v10 = vadd.f32 %v2204_v31, %v1930_v55  ;;  %1992 = vmatmul.f32.gmra.mxu0 %v10278_v22  ;;  %v10281_v55 = vld [vmem:[#allocation21_spill] sm:$0xff] }
 0x30f   :  { %10276 = vst [vmem:[#allocation19_spill] sm:$0xff] %v7581_v21  ;;  %v9896_v46 = vand.u32 4294901760, %v7581_v21  ;;  %2267 = vmatmul.f32.gmra.mxu1 %v10278_v22 }
 0x310   :  { %v2411_v26 = vmax.f32 %v2205_v10, 0.0  ;;  %v10283_v10 = vld [vmem:[#allocation16_spill] sm:$0xff] }
 0x311   :  { %v2803_v60 = vsub.f32 %v7581_v21, %v9896_v46  ;;  %v7604_v21 = vpop.f32.mrf.mxu2 }
 0x312   :  { %v2517_v48 = vsel %vm2467_vm1, %v2411_v26, 0  ;;  %10284 = vst [vmem:[#allocation16_spill] sm:$0xff] %v7604_v21 }
 0x313   :  { %v7595_v4 = vand.u32 4294901760, %v2517_v48  ;;  %v1933_v6 = vpop.f32.mrf.mxu0  ;;  %v2804_v17 = vand.u32 4294901760, %v2803_v60 }
 0x314   :  { %v1934_v31 = vadd.f32 %v1933_v6, %v10281_v55  ;;  %v2208_v16 = vpop.f32.mrf.mxu1 }
 0x315   :  { %10280 = vst [vmem:[#allocation138_spill] sm:$0xff] %v7595_v4  ;;  %v7599_v34 = vsub.f32 %v2517_v48, %v7595_v4  ;;  %2805 = vmatmul.f32.gmra.mxu2 %v2804_v17  ;;  %3294 = vmatmul.f32.gmra.mxu3 %v7595_v4 }
 0x316   :  { %v2209_v22 = vadd.f32 %v2208_v16, %v1934_v31  ;;  %1996 = vmatmul.f32.gmra.mxu0 %v10283_v10  ;;  %v10286_v31 = vld [vmem:[#allocation23_spill] sm:$0xff] }
 0x317   :  { %10282 = vst [vmem:[#allocation21_spill] sm:$0xff] %v7599_v34  ;;  %v9901_v46 = vand.u32 4294901760, %v7599_v34  ;;  %2271 = vmatmul.f32.gmra.mxu1 %v10283_v10 }
 0x318   :  { %v2412_v26 = vmax.f32 %v2209_v22, 0.0  ;;  %v3231_v60 = vpop.f32.mrf.mxu3  ;;  %v7621_v22 = vld [vmem:[%s9754_s4] ss:$0 sm:$0xff] }
 0x319   :  { %v2811_v48 = vsub.f32 %v7599_v34, %v9901_v46 }
 0x31a   :  { %v2520_v6 = vsel %vm2467_vm1, %v2412_v26, 0  ;;  %v10288_v26 = vld [vmem:[#allocation18_spill] sm:$0xff] }
 0x31b   :  { %v7611_v17 = vand.u32 4294901760, %v2520_v6  ;;  %v1937_v55 = vpop.f32.mrf.mxu0  ;;  %v2812_v16 = vand.u32 4294901760, %v2811_v48 }
 0x31c   :  { %v1938_v4 = vadd.f32 %v1937_v55, %v10286_v31  ;;  %v2212_v21 = vpop.f32.mrf.mxu1 }
 0x31d   :  { %10285 = vst [vmem:[#allocation139_spill] sm:$0xff] %v7611_v17  ;;  %v7615_v62 = vsub.f32 %v2520_v6, %v7611_v17  ;;  %2813 = vmatmul.f32.gmra.mxu2 %v2812_v16  ;;  %3298 = vmatmul.f32.gmra.mxu3 %v7611_v17 }
 0x31e   :  { %v2213_v10 = vadd.f32 %v2212_v21, %v1938_v4  ;;  %2000 = vmatmul.f32.gmra.mxu0 %v10288_v26 }
 0x31f   :  { %10287 = vst [vmem:[#allocation23_spill] sm:$0xff] %v7615_v62  ;;  %v9910_v46 = vand.u32 4294901760, %v7615_v62  ;;  %2275 = vmatmul.f32.gmra.mxu1 %v10288_v26 }
 0x320   :  { %v2413_v48 = vmax.f32 %v2213_v10, 0.0  ;;  %v2686_v55 = vpop.f32.mrf.mxu2  ;;  %v3235_v6 = vpop.f32.mrf.mxu3 }
 0x321   :  { %v2687_v31 = vadd.f32 %v7621_v22, %v2686_v55  ;;  %v2819_v16 = vsub.f32 %v7615_v62, %v9910_v46  ;;  %v10298_v62 = vld [vmem:[#allocation22_spill] sm:$0xff] }
 0x322   :  { %v2523_v17 = vsel %vm2467_vm1, %v2413_v48, 0 }
 0x323   :  { %v7631_v34 = vand.u32 4294901760, %v2523_v17  ;;  %v1941_v21 = vpop.f32.mrf.mxu0  ;;  %v2820_v4 = vand.u32 4294901760, %v2819_v16  ;;  %v7633_v13 = vadd.f32 %v3231_v60, %v2687_v31 }
 0x324   :  { %v1942_v10 = vadd.f32 %v1941_v21, %v10291_v63  ;;  %v2216_v18 = vpop.f32.mrf.mxu1 }
 0x325   :  { %10289 = vst [vmem:[#allocation18_spill] sm:$0xff] %v7631_v34  ;;  %v7637_v26 = vsub.f32 %v2523_v17, %v7631_v34  ;;  %2821 = vmatmul.f32.gmra.mxu2 %v2820_v4  ;;  %3302 = vmatmul.f32.gmra.mxu3 %v7631_v34  ;;  %v10296_v34 = vld [vmem:[#allocation27_spill] sm:$0xff] }
 0x326   :  { %10290 = vst [vmem:[#allocation140_spill] sm:$0xff] %v7633_v13  ;;  %v2217_v55 = vadd.f32 %v2216_v18, %v1942_v10  ;;  %2004 = vmatmul.f32.gmra.mxu0 %v10293_v38 }
 0x327   :  { %10292 = vst [vmem:[#allocation25_spill] sm:$0xff] %v7637_v26  ;;  %v9915_v48 = vand.u32 4294901760, %v7637_v26  ;;  %2279 = vmatmul.f32.gmra.mxu1 %v10293_v38 }
 0x328   :  { %v2414_v46 = vmax.f32 %v2217_v55, 0.0  ;;  %v2694_v16 = vpop.f32.mrf.mxu2  ;;  %v3239_v60 = vpop.f32.mrf.mxu3 }
 0x329   :  { %v2695_v31 = vadd.f32 %v7621_v22, %v2694_v16  ;;  %v2827_v63 = vsub.f32 %v7637_v26, %v9915_v48  ;;  %v10303_v26 = vld [vmem:[#allocation24_spill] sm:$0xff] }
 0x32a   :  { %v2526_v17 = vsel %vm2467_vm1, %v2414_v46, 0 }
 0x32b   :  { %v7648_v21 = vand.u32 4294901760, %v2526_v17  ;;  %v1945_v18 = vpop.f32.mrf.mxu0  ;;  %v2828_v4 = vand.u32 4294901760, %v2827_v63  ;;  %v7650_v10 = vadd.f32 %v3235_v6, %v2695_v31 }
 0x32c   :  { %v1946_v55 = vadd.f32 %v1945_v18, %v10296_v34  ;;  %v2220_v13 = vpop.f32.mrf.mxu1 }
 0x32d   :  { %10294 = vst [vmem:[#allocation20_spill] sm:$0xff] %v7648_v21  ;;  %v7654_v38 = vsub.f32 %v2526_v17, %v7648_v21  ;;  %2829 = vmatmul.f32.gmra.mxu2 %v2828_v4  ;;  %3306 = vmatmul.f32.gmra.mxu3 %v7648_v21  ;;  %v10301_v21 = vld [vmem:[#allocation29_spill] sm:$0xff] }
 0x32e   :  { %10295 = vst [vmem:[#allocation141_spill] sm:$0xff] %v7650_v10  ;;  %v2221_v16 = vadd.f32 %v2220_v13, %v1946_v55  ;;  %2008 = vmatmul.f32.gmra.mxu0 %v10298_v62 }
 0x32f   :  { %10297 = vst [vmem:[#allocation27_spill] sm:$0xff] %v7654_v38  ;;  %v9920_v46 = vand.u32 4294901760, %v7654_v38  ;;  %2283 = vmatmul.f32.gmra.mxu1 %v10298_v62 }
 0x330   :  { %v2415_v48 = vmax.f32 %v2221_v16, 0.0  ;;  %v2702_v63 = vpop.f32.mrf.mxu2  ;;  %v3243_v6 = vpop.f32.mrf.mxu3 }
 0x331   :  { %v2703_v31 = vadd.f32 %v7621_v22, %v2702_v63  ;;  %v2835_v34 = vsub.f32 %v7654_v38, %v9920_v46  ;;  %v10308_v38 = vld [vmem:[#allocation26_spill] sm:$0xff] }
 0x332   :  { %v2529_v17 = vsel %vm2467_vm1, %v2415_v48, 0 }
 0x333   :  { %v7665_v18 = vand.u32 4294901760, %v2529_v17  ;;  %v1949_v13 = vpop.f32.mrf.mxu0  ;;  %v2836_v4 = vand.u32 4294901760, %v2835_v34  ;;  %v7667_v55 = vadd.f32 %v3239_v60, %v2703_v31 }
 0x334   :  { %v1950_v16 = vadd.f32 %v1949_v13, %v10301_v21  ;;  %v2224_v10 = vpop.f32.mrf.mxu1 }
 0x335   :  { %10299 = vst [vmem:[#allocation22_spill] sm:$0xff] %v7665_v18  ;;  %v7671_v62 = vsub.f32 %v2529_v17, %v7665_v18  ;;  %2837 = vmatmul.f32.gmra.mxu2 %v2836_v4  ;;  %3310 = vmatmul.f32.gmra.mxu3 %v7665_v18  ;;  %v10306_v18 = vld [vmem:[#allocation31_spill] sm:$0xff] }
 0x336   :  { %10300 = vst [vmem:[#allocation142_spill] sm:$0xff] %v7667_v55  ;;  %v2225_v63 = vadd.f32 %v2224_v10, %v1950_v16  ;;  %2012 = vmatmul.f32.gmra.mxu0 %v10303_v26 }
 0x337   :  { %10302 = vst [vmem:[#allocation29_spill] sm:$0xff] %v7671_v62  ;;  %v9925_v48 = vand.u32 4294901760, %v7671_v62  ;;  %2287 = vmatmul.f32.gmra.mxu1 %v10303_v26 }
 0x338   :  { %v2416_v46 = vmax.f32 %v2225_v63, 0.0  ;;  %v2710_v34 = vpop.f32.mrf.mxu2  ;;  %v3247_v60 = vpop.f32.mrf.mxu3 }
 0x339   :  { %v2711_v31 = vadd.f32 %v7621_v22, %v2710_v34  ;;  %v2843_v21 = vsub.f32 %v7671_v62, %v9925_v48  ;;  %v10313_v62 = vld [vmem:[#allocation28_spill] sm:$0xff] }
 0x33a   :  { %v2532_v17 = vsel %vm2467_vm1, %v2416_v46, 0 }
 0x33b   :  { %v7682_v13 = vand.u32 4294901760, %v2532_v17  ;;  %v1953_v10 = vpop.f32.mrf.mxu0  ;;  %v2844_v4 = vand.u32 4294901760, %v2843_v21  ;;  %v7684_v16 = vadd.f32 %v3243_v6, %v2711_v31 }
 0x33c   :  { %v1954_v63 = vadd.f32 %v1953_v10, %v10306_v18  ;;  %v2228_v55 = vpop.f32.mrf.mxu1 }
 0x33d   :  { %10304 = vst [vmem:[#allocation24_spill] sm:$0xff] %v7682_v13  ;;  %v7688_v26 = vsub.f32 %v2532_v17, %v7682_v13  ;;  %2845 = vmatmul.f32.gmra.mxu2 %v2844_v4  ;;  %3314 = vmatmul.f32.gmra.mxu3 %v7682_v13  ;;  %v10311_v13 = vld [vmem:[#allocation33_spill] sm:$0xff] }
 0x33e   :  { %10305 = vst [vmem:[#allocation143_spill] sm:$0xff] %v7684_v16  ;;  %v2229_v34 = vadd.f32 %v2228_v55, %v1954_v63  ;;  %2016 = vmatmul.f32.gmra.mxu0 %v10308_v38 }
 0x33f   :  { %10307 = vst [vmem:[#allocation31_spill] sm:$0xff] %v7688_v26  ;;  %v9930_v46 = vand.u32 4294901760, %v7688_v26  ;;  %2291 = vmatmul.f32.gmra.mxu1 %v10308_v38 }
 0x340   :  { %v2417_v48 = vmax.f32 %v2229_v34, 0.0  ;;  %v2718_v21 = vpop.f32.mrf.mxu2  ;;  %v3251_v6 = vpop.f32.mrf.mxu3 }
 0x341   :  { %v2719_v31 = vadd.f32 %v7621_v22, %v2718_v21  ;;  %v2851_v18 = vsub.f32 %v7688_v26, %v9930_v46  ;;  %v10318_v26 = vld [vmem:[#allocation30_spill] sm:$0xff] }
 0x342   :  { %v2535_v17 = vsel %vm2467_vm1, %v2417_v48, 0 }
 0x343   :  { %v7699_v10 = vand.u32 4294901760, %v2535_v17  ;;  %v1957_v55 = vpop.f32.mrf.mxu0  ;;  %v2852_v4 = vand.u32 4294901760, %v2851_v18  ;;  %v7701_v63 = vadd.f32 %v3247_v60, %v2719_v31 }
 0x344   :  { %v1958_v34 = vadd.f32 %v1957_v55, %v10311_v13  ;;  %v2232_v16 = vpop.f32.mrf.mxu1 }
 0x345   :  { %10309 = vst [vmem:[#allocation26_spill] sm:$0xff] %v7699_v10  ;;  %v7705_v38 = vsub.f32 %v2535_v17, %v7699_v10  ;;  %2853 = vmatmul.f32.gmra.mxu2 %v2852_v4  ;;  %3318 = vmatmul.f32.gmra.mxu3 %v7699_v10  ;;  %v10316_v10 = vld [vmem:[#allocation35_spill] sm:$0xff] }
 0x346   :  { %10310 = vst [vmem:[#allocation144_spill] sm:$0xff] %v7701_v63  ;;  %v2233_v21 = vadd.f32 %v2232_v16, %v1958_v34  ;;  %2020 = vmatmul.f32.gmra.mxu0 %v10313_v62 }
 0x347   :  { %10312 = vst [vmem:[#allocation33_spill] sm:$0xff] %v7705_v38  ;;  %v9935_v48 = vand.u32 4294901760, %v7705_v38  ;;  %2295 = vmatmul.f32.gmra.mxu1 %v10313_v62 }
 0x348   :  { %v2418_v46 = vmax.f32 %v2233_v21, 0.0  ;;  %v2726_v18 = vpop.f32.mrf.mxu2  ;;  %v3255_v60 = vpop.f32.mrf.mxu3 }
 0x349   :  { %v2727_v31 = vadd.f32 %v7621_v22, %v2726_v18  ;;  %v2859_v13 = vsub.f32 %v7705_v38, %v9935_v48  ;;  %v10323_v38 = vld [vmem:[#allocation32_spill] sm:$0xff] }
 0x34a   :  { %v2538_v17 = vsel %vm2467_vm1, %v2418_v46, 0 }
 0x34b   :  { %v7716_v55 = vand.u32 4294901760, %v2538_v17  ;;  %v1961_v16 = vpop.f32.mrf.mxu0  ;;  %v2860_v4 = vand.u32 4294901760, %v2859_v13  ;;  %v7718_v34 = vadd.f32 %v3251_v6, %v2727_v31 }
 0x34c   :  { %v1962_v21 = vadd.f32 %v1961_v16, %v10316_v10  ;;  %v2236_v63 = vpop.f32.mrf.mxu1 }
 0x34d   :  { %10314 = vst [vmem:[#allocation28_spill] sm:$0xff] %v7716_v55  ;;  %v7722_v62 = vsub.f32 %v2538_v17, %v7716_v55  ;;  %2861 = vmatmul.f32.gmra.mxu2 %v2860_v4  ;;  %3322 = vmatmul.f32.gmra.mxu3 %v7716_v55  ;;  %v10321_v55 = vld [vmem:[#allocation37_spill] sm:$0xff] }
 0x34e   :  { %10315 = vst [vmem:[#allocation145_spill] sm:$0xff] %v7718_v34  ;;  %v2237_v18 = vadd.f32 %v2236_v63, %v1962_v21  ;;  %2024 = vmatmul.f32.gmra.mxu0 %v10318_v26 }
 0x34f   :  { %10317 = vst [vmem:[#allocation35_spill] sm:$0xff] %v7722_v62  ;;  %v9940_v46 = vand.u32 4294901760, %v7722_v62  ;;  %2299 = vmatmul.f32.gmra.mxu1 %v10318_v26 }
 0x350   :  { %v2419_v48 = vmax.f32 %v2237_v18, 0.0  ;;  %v2734_v13 = vpop.f32.mrf.mxu2  ;;  %v3259_v6 = vpop.f32.mrf.mxu3 }
 0x351   :  { %v2735_v31 = vadd.f32 %v7621_v22, %v2734_v13  ;;  %v2867_v10 = vsub.f32 %v7722_v62, %v9940_v46  ;;  %v10328_v62 = vld [vmem:[#allocation34_spill] sm:$0xff] }
 0x352   :  { %v2541_v17 = vsel %vm2467_vm1, %v2419_v48, 0 }
 0x353   :  { %v7733_v16 = vand.u32 4294901760, %v2541_v17  ;;  %v1965_v63 = vpop.f32.mrf.mxu0  ;;  %v2868_v4 = vand.u32 4294901760, %v2867_v10  ;;  %v7735_v21 = vadd.f32 %v3255_v60, %v2735_v31 }
 0x354   :  { %v1966_v18 = vadd.f32 %v1965_v63, %v10321_v55  ;;  %v2240_v34 = vpop.f32.mrf.mxu1 }
 0x355   :  { %10319 = vst [vmem:[#allocation30_spill] sm:$0xff] %v7733_v16  ;;  %v7739_v26 = vsub.f32 %v2541_v17, %v7733_v16  ;;  %2869 = vmatmul.f32.gmra.mxu2 %v2868_v4  ;;  %3326 = vmatmul.f32.gmra.mxu3 %v7733_v16  ;;  %v10326_v16 = vld [vmem:[#allocation39_spill] sm:$0xff] }
 0x356   :  { %10320 = vst [vmem:[#allocation146_spill] sm:$0xff] %v7735_v21  ;;  %v2241_v13 = vadd.f32 %v2240_v34, %v1966_v18  ;;  %2028 = vmatmul.f32.gmra.mxu0 %v10323_v38 }
 0x357   :  { %10322 = vst [vmem:[#allocation37_spill] sm:$0xff] %v7739_v26  ;;  %v9945_v48 = vand.u32 4294901760, %v7739_v26  ;;  %2303 = vmatmul.f32.gmra.mxu1 %v10323_v38 }
 0x358   :  { %v2420_v46 = vmax.f32 %v2241_v13, 0.0  ;;  %v2742_v10 = vpop.f32.mrf.mxu2  ;;  %v3263_v60 = vpop.f32.mrf.mxu3 }
 0x359   :  { %v2743_v31 = vadd.f32 %v7621_v22, %v2742_v10  ;;  %v2875_v55 = vsub.f32 %v7739_v26, %v9945_v48  ;;  %v10333_v26 = vld [vmem:[#allocation36_spill] sm:$0xff] }
 0x35a   :  { %v2544_v17 = vsel %vm2467_vm1, %v2420_v46, 0 }
 0x35b   :  { %v7750_v63 = vand.u32 4294901760, %v2544_v17  ;;  %v1969_v34 = vpop.f32.mrf.mxu0  ;;  %v2876_v4 = vand.u32 4294901760, %v2875_v55  ;;  %v7752_v18 = vadd.f32 %v3259_v6, %v2743_v31 }
 0x35c   :  { %v1970_v13 = vadd.f32 %v1969_v34, %v10326_v16  ;;  %v2244_v21 = vpop.f32.mrf.mxu1 }
 0x35d   :  { %10324 = vst [vmem:[#allocation32_spill] sm:$0xff] %v7750_v63  ;;  %v7756_v38 = vsub.f32 %v2544_v17, %v7750_v63  ;;  %2877 = vmatmul.f32.gmra.mxu2 %v2876_v4  ;;  %3330 = vmatmul.f32.gmra.mxu3 %v7750_v63  ;;  %v10331_v63 = vld [vmem:[#allocation41_spill] sm:$0xff] }
 0x35e   :  { %10325 = vst [vmem:[#allocation147_spill] sm:$0xff] %v7752_v18  ;;  %v2245_v10 = vadd.f32 %v2244_v21, %v1970_v13  ;;  %2032 = vmatmul.f32.gmra.mxu0 %v10328_v62 }
 0x35f   :  { %10327 = vst [vmem:[#allocation39_spill] sm:$0xff] %v7756_v38  ;;  %v9950_v46 = vand.u32 4294901760, %v7756_v38  ;;  %2307 = vmatmul.f32.gmra.mxu1 %v10328_v62 }
 0x360   :  { %v2421_v48 = vmax.f32 %v2245_v10, 0.0  ;;  %v2750_v55 = vpop.f32.mrf.mxu2  ;;  %v3267_v6 = vpop.f32.mrf.mxu3 }
 0x361   :  { %v2751_v31 = vadd.f32 %v7621_v22, %v2750_v55  ;;  %v2883_v16 = vsub.f32 %v7756_v38, %v9950_v46  ;;  %v10338_v38 = vld [vmem:[#allocation38_spill] sm:$0xff] }
 0x362   :  { %v2547_v17 = vsel %vm2467_vm1, %v2421_v48, 0 }
 0x363   :  { %v7767_v34 = vand.u32 4294901760, %v2547_v17  ;;  %v1973_v21 = vpop.f32.mrf.mxu0  ;;  %v2884_v4 = vand.u32 4294901760, %v2883_v16  ;;  %v7769_v13 = vadd.f32 %v3263_v60, %v2751_v31 }
 0x364   :  { %v1974_v10 = vadd.f32 %v1973_v21, %v10331_v63  ;;  %v2248_v18 = vpop.f32.mrf.mxu1 }
 0x365   :  { %10329 = vst [vmem:[#allocation34_spill] sm:$0xff] %v7767_v34  ;;  %v7773_v62 = vsub.f32 %v2547_v17, %v7767_v34  ;;  %2885 = vmatmul.f32.gmra.mxu2 %v2884_v4  ;;  %3334 = vmatmul.f32.gmra.mxu3 %v7767_v34  ;;  %v10336_v34 = vld [vmem:[#allocation43_spill] sm:$0xff] }
 0x366   :  { %10330 = vst [vmem:[#allocation148_spill] sm:$0xff] %v7769_v13  ;;  %v2249_v55 = vadd.f32 %v2248_v18, %v1974_v10  ;;  %2036 = vmatmul.f32.gmra.mxu0 %v10333_v26 }
 0x367   :  { %10332 = vst [vmem:[#allocation41_spill] sm:$0xff] %v7773_v62  ;;  %v9955_v48 = vand.u32 4294901760, %v7773_v62  ;;  %2311 = vmatmul.f32.gmra.mxu1 %v10333_v26 }
 0x368   :  { %v2422_v46 = vmax.f32 %v2249_v55, 0.0  ;;  %v2758_v16 = vpop.f32.mrf.mxu2  ;;  %v3271_v60 = vpop.f32.mrf.mxu3 }
 0x369   :  { %v2759_v31 = vadd.f32 %v7621_v22, %v2758_v16  ;;  %v2891_v63 = vsub.f32 %v7773_v62, %v9955_v48  ;;  %v10342_v62 = vld [vmem:[#allocation40_spill] sm:$0xff] }
 0x36a   :  { %v2550_v17 = vsel %vm2467_vm1, %v2422_v46, 0 }
 0x36b   :  { %v7784_v21 = vand.u32 4294901760, %v2550_v17  ;;  %v1977_v18 = vpop.f32.mrf.mxu0  ;;  %v2892_v4 = vand.u32 4294901760, %v2891_v63  ;;  %v7786_v10 = vadd.f32 %v3267_v6, %v2759_v31 }
 0x36c   :  { %v1978_v55 = vadd.f32 %v1977_v18, %v10336_v34  ;;  %v2252_v13 = vpop.f32.mrf.mxu1 }
 0x36d   :  { %10334 = vst [vmem:[#allocation36_spill] sm:$0xff] %v7784_v21  ;;  %v7790_v26 = vsub.f32 %v2550_v17, %v7784_v21  ;;  %2893 = vmatmul.f32.gmra.mxu2 %v2892_v4  ;;  %3338 = vmatmul.f32.gmra.mxu3 %v7784_v21  ;;  %v10341_v21 = vld [vmem:[#allocation45_spill] sm:$0xff] }
 0x36e   :  { %10335 = vst [vmem:[#allocation149_spill] sm:$0xff] %v7786_v10  ;;  %v2253_v16 = vadd.f32 %v2252_v13, %v1978_v55  ;;  %2040 = vmatmul.f32.gmra.mxu0 %v10338_v38 }
 0x36f   :  { %10337 = vst [vmem:[#allocation43_spill] sm:$0xff] %v7790_v26  ;;  %v9960_v46 = vand.u32 4294901760, %v7790_v26  ;;  %2315 = vmatmul.f32.gmra.mxu1 %v10338_v38 }
 0x370   :  { %v2423_v48 = vmax.f32 %v2253_v16, 0.0  ;;  %v2766_v63 = vpop.f32.mrf.mxu2  ;;  %v3275_v6 = vpop.f32.mrf.mxu3 }
 0x371   :  { %v2767_v31 = vadd.f32 %v7621_v22, %v2766_v63  ;;  %v2899_v34 = vsub.f32 %v7790_v26, %v9960_v46  ;;  %v10347_v26 = vld [vmem:[#allocation42_spill] sm:$0xff] }
 0x372   :  { %v2553_v17 = vsel %vm2467_vm1, %v2423_v48, 0 }
 0x373   :  { %v7801_v18 = vand.u32 4294901760, %v2553_v17  ;;  %v1981_v13 = vpop.f32.mrf.mxu0  ;;  %v2900_v4 = vand.u32 4294901760, %v2899_v34  ;;  %v7803_v55 = vadd.f32 %v3271_v60, %v2767_v31 }
 0x374   :  { %v1982_v16 = vadd.f32 %v1981_v13, %v10341_v21  ;;  %v2256_v10 = vpop.f32.mrf.mxu1 }
 0x375   :  { %10339 = vst [vmem:[#allocation38_spill] sm:$0xff] %v7801_v18  ;;  %v7807_v38 = vsub.f32 %v2553_v17, %v7801_v18  ;;  %2901 = vmatmul.f32.gmra.mxu2 %v2900_v4  ;;  %3342 = vmatmul.f32.gmra.mxu3 %v7801_v18  ;;  %v10345_v18 = vld [vmem:[#allocation47_spill] sm:$0xff] }
 0x376   :  { %10340 = vst [vmem:[#allocation150_spill] sm:$0xff] %v7803_v55  ;;  %v2257_v63 = vadd.f32 %v2256_v10, %v1982_v16  ;;  %2044 = vmatmul.f32.gmra.mxu0 %v10342_v62 }
 0x377   :  { %v9965_v48 = vand.u32 4294901760, %v7807_v38  ;;  %2319 = vmatmul.f32.gmra.mxu1 %v10342_v62 }
 0x378   :  { %v2424_v46 = vmax.f32 %v2257_v63, 0.0  ;;  %v2774_v34 = vpop.f32.mrf.mxu2  ;;  %v3279_v60 = vpop.f32.mrf.mxu3 }
 0x379   :  { %v2775_v31 = vadd.f32 %v7621_v22, %v2774_v34  ;;  %v2907_v21 = vsub.f32 %v7807_v38, %v9965_v48 }
 0x37a   :  { %v2556_v17 = vsel %vm2467_vm1, %v2424_v46, 0 }
 0x37b   :  { %v7818_v13 = vand.u32 4294901760, %v2556_v17  ;;  %v1985_v10 = vpop.f32.mrf.mxu0  ;;  %v2908_v4 = vand.u32 4294901760, %v2907_v21  ;;  %v7820_v16 = vadd.f32 %v3275_v6, %v2775_v31 }
 0x37c   :  { %v1986_v63 = vadd.f32 %v1985_v10, %v10345_v18  ;;  %v2260_v55 = vpop.f32.mrf.mxu1 }
 0x37d   :  { %10343 = vst [vmem:[#allocation45_spill] sm:$0xff] %v7818_v13  ;;  %v7824_v62 = vsub.f32 %v2556_v17, %v7818_v13  ;;  %2909 = vmatmul.f32.gmra.mxu2 %v2908_v4  ;;  %3346 = vmatmul.f32.gmra.mxu3 %v7818_v13 }
 0x37e   :  { %10344 = vst [vmem:[#allocation40_spill] sm:$0xff] %v7820_v16  ;;  %v2261_v34 = vadd.f32 %v2260_v55, %v1986_v63  ;;  %2048 = vmatmul.f32.gmra.mxu0 %v10347_v26  ;;  %v10351_v16 = vld [vmem:[#allocation44_spill] sm:$0xff] }
 0x37f   :  { %10346 = vst [vmem:[#allocation47_spill] sm:$0xff] %v7824_v62  ;;  %v9968_v46 = vand.u32 4294901760, %v7824_v62  ;;  %2323 = vmatmul.f32.gmra.mxu1 %v10347_v26 }
 0x380   :  { %v2425_v48 = vmax.f32 %v2261_v34, 0.0  ;;  %v2782_v21 = vpop.f32.mrf.mxu2  ;;  %v3283_v6 = vpop.f32.mrf.mxu3 }
 0x381   :  { %v2783_v31 = vadd.f32 %v7621_v22, %v2782_v21  ;;  %v2915_v18 = vsub.f32 %v7824_v62, %v9968_v46  ;;  %v10356_v62 = vld [vmem:[#allocation46_spill] sm:$0xff] }
 0x382   :  { %v2559_v17 = vsel %vm2467_vm1, %v2425_v48, 0 }
 0x383   :  { %v7835_v10 = vand.u32 4294901760, %v2559_v17  ;;  %v1989_v55 = vpop.f32.mrf.mxu0  ;;  %v2916_v4 = vand.u32 4294901760, %v2915_v18  ;;  %v7837_v63 = vadd.f32 %v3279_v60, %v2783_v31 }
 0x384   :  { %v1990_v34 = vadd.f32 %v1989_v55, %v6997_v25  ;;  %v2264_v13 = vpop.f32.mrf.mxu1 }
 0x385   :  { %10348 = vst [vmem:[#allocation42_spill] sm:$0xff] %v7835_v10  ;;  %v7841_v26 = vsub.f32 %v2559_v17, %v7835_v10  ;;  %2917 = vmatmul.f32.gmra.mxu2 %v2916_v4  ;;  %3350 = vmatmul.f32.gmra.mxu3 %v7835_v10  ;;  %v10354_v10 = vld [vmem:[#allocation50_spill] sm:$0xff] }
 0x386   :  { %10349 = vst [vmem:[#allocation151_spill] sm:$0xff] %v7837_v63  ;;  %v2265_v21 = vadd.f32 %v2264_v13, %v1990_v34  ;;  %2052 = vmatmul.f32.gmra.mxu0 %v10351_v16 }
 0x387   :  { %10350 = vst [vmem:[#allocation152_spill] sm:$0xff] %v7841_v26  ;;  %v9973_v48 = vand.u32 4294901760, %v7841_v26  ;;  %2327 = vmatmul.f32.gmra.mxu1 %v10351_v16 }
 0x388   :  { %v2426_v46 = vmax.f32 %v2265_v21, 0.0  ;;  %v2790_v18 = vpop.f32.mrf.mxu2  ;;  %v3287_v60 = vpop.f32.mrf.mxu3 }
 0x389   :  { %v2791_v31 = vadd.f32 %v7621_v22, %v2790_v18  ;;  %v2923_v25 = vsub.f32 %v7841_v26, %v9973_v48  ;;  %v10361_v26 = vld [vmem:[#allocation48_spill] sm:$0xff] }
 0x38a   :  { %v2562_v17 = vsel %vm2467_vm1, %v2426_v46, 0 }
 0x38b   :  { %v7852_v55 = vand.u32 4294901760, %v2562_v17  ;;  %v1993_v13 = vpop.f32.mrf.mxu0  ;;  %v2924_v4 = vand.u32 4294901760, %v2923_v25  ;;  %v7854_v34 = vadd.f32 %v3283_v6, %v2791_v31 }
 0x38c   :  { %v1994_v21 = vadd.f32 %v1993_v13, %v10354_v10  ;;  %v2268_v63 = vpop.f32.mrf.mxu1 }
 0x38d   :  { %10352 = vst [vmem:[#allocation44_spill] sm:$0xff] %v7852_v55  ;;  %v7858_v16 = vsub.f32 %v2562_v17, %v7852_v55  ;;  %2925 = vmatmul.f32.gmra.mxu2 %v2924_v4  ;;  %3354 = vmatmul.f32.gmra.mxu3 %v7852_v55  ;;  %v10359_v55 = vld [vmem:[#allocation52_spill] sm:$0xff] }
 0x38e   :  { %10353 = vst [vmem:[#allocation153_spill] sm:$0xff] %v7854_v34  ;;  %v2269_v18 = vadd.f32 %v2268_v63, %v1994_v21  ;;  %2056 = vmatmul.f32.gmra.mxu0 %v10356_v62 }
 0x38f   :  { %10355 = vst [vmem:[#allocation50_spill] sm:$0xff] %v7858_v16  ;;  %v9978_v46 = vand.u32 4294901760, %v7858_v16  ;;  %2331 = vmatmul.f32.gmra.mxu1 %v10356_v62 }
 0x390   :  { %v2427_v48 = vmax.f32 %v2269_v18, 0.0  ;;  %v2798_v25 = vpop.f32.mrf.mxu2  ;;  %v3291_v6 = vpop.f32.mrf.mxu3 }
 0x391   :  { %v2799_v31 = vadd.f32 %v7621_v22, %v2798_v25  ;;  %v2931_v10 = vsub.f32 %v7858_v16, %v9978_v46  ;;  %v10366_v16 = vld [vmem:[#allocation49_spill] sm:$0xff] }
 0x392   :  { %v2565_v17 = vsel %vm2467_vm1, %v2427_v48, 0 }
 0x393   :  { %v7869_v13 = vand.u32 4294901760, %v2565_v17  ;;  %v1997_v63 = vpop.f32.mrf.mxu0  ;;  %v2932_v4 = vand.u32 4294901760, %v2931_v10  ;;  %v7871_v21 = vadd.f32 %v3287_v60, %v2799_v31 }
 0x394   :  { %v1998_v18 = vadd.f32 %v1997_v63, %v10359_v55  ;;  %v2272_v34 = vpop.f32.mrf.mxu1 }
 0x395   :  { %10357 = vst [vmem:[#allocation46_spill] sm:$0xff] %v7869_v13  ;;  %v7875_v62 = vsub.f32 %v2565_v17, %v7869_v13  ;;  %2933 = vmatmul.f32.gmra.mxu2 %v2932_v4  ;;  %3358 = vmatmul.f32.gmra.mxu3 %v7869_v13  ;;  %v10364_v13 = vld [vmem:[#allocation54_spill] sm:$0xff] }
 0x396   :  { %10358 = vst [vmem:[#allocation154_spill] sm:$0xff] %v7871_v21  ;;  %v2273_v25 = vadd.f32 %v2272_v34, %v1998_v18  ;;  %2060 = vmatmul.f32.gmra.mxu0 %v10361_v26 }
 0x397   :  { %10360 = vst [vmem:[#allocation52_spill] sm:$0xff] %v7875_v62  ;;  %v9983_v48 = vand.u32 4294901760, %v7875_v62  ;;  %2335 = vmatmul.f32.gmra.mxu1 %v10361_v26 }
 0x398   :  { %v2428_v46 = vmax.f32 %v2273_v25, 0.0  ;;  %v2806_v10 = vpop.f32.mrf.mxu2  ;;  %v3295_v60 = vpop.f32.mrf.mxu3 }
 0x399   :  { %v2807_v31 = vadd.f32 %v7621_v22, %v2806_v10  ;;  %v2939_v55 = vsub.f32 %v7875_v62, %v9983_v48  ;;  %v10371_v62 = vld [vmem:[#allocation51_spill] sm:$0xff] }
 0x39a   :  { %v2568_v17 = vsel %vm2467_vm1, %v2428_v46, 0 }
 0x39b   :  { %v7886_v63 = vand.u32 4294901760, %v2568_v17  ;;  %v2001_v34 = vpop.f32.mrf.mxu0  ;;  %v2940_v4 = vand.u32 4294901760, %v2939_v55  ;;  %v7888_v18 = vadd.f32 %v3291_v6, %v2807_v31 }
 0x39c   :  { %v2002_v25 = vadd.f32 %v2001_v34, %v10364_v13  ;;  %v2276_v21 = vpop.f32.mrf.mxu1 }
 0x39d   :  { %10362 = vst [vmem:[#allocation48_spill] sm:$0xff] %v7886_v63  ;;  %v7892_v26 = vsub.f32 %v2568_v17, %v7886_v63  ;;  %2941 = vmatmul.f32.gmra.mxu2 %v2940_v4  ;;  %3362 = vmatmul.f32.gmra.mxu3 %v7886_v63  ;;  %v10369_v63 = vld [vmem:[#allocation56_spill] sm:$0xff] }
 0x39e   :  { %10363 = vst [vmem:[#allocation155_spill] sm:$0xff] %v7888_v18  ;;  %v2277_v10 = vadd.f32 %v2276_v21, %v2002_v25  ;;  %2064 = vmatmul.f32.gmra.mxu0 %v10366_v16 }
 0x39f   :  { %10365 = vst [vmem:[#allocation54_spill] sm:$0xff] %v7892_v26  ;;  %v9988_v46 = vand.u32 4294901760, %v7892_v26  ;;  %2339 = vmatmul.f32.gmra.mxu1 %v10366_v16 }
 0x3a0   :  { %v2429_v48 = vmax.f32 %v2277_v10, 0.0  ;;  %v2814_v55 = vpop.f32.mrf.mxu2  ;;  %v3299_v6 = vpop.f32.mrf.mxu3 }
 0x3a1   :  { %v2815_v31 = vadd.f32 %v7621_v22, %v2814_v55  ;;  %v2947_v13 = vsub.f32 %v7892_v26, %v9988_v46  ;;  %v10375_v26 = vld [vmem:[#allocation53_spill] sm:$0xff] }
 0x3a2   :  { %v2571_v17 = vsel %vm2467_vm1, %v2429_v48, 0 }
 0x3a3   :  { %v7903_v34 = vand.u32 4294901760, %v2571_v17  ;;  %v2005_v21 = vpop.f32.mrf.mxu0  ;;  %v2948_v4 = vand.u32 4294901760, %v2947_v13  ;;  %v7905_v25 = vadd.f32 %v3295_v60, %v2815_v31 }
 0x3a4   :  { %v2006_v10 = vadd.f32 %v2005_v21, %v10369_v63  ;;  %v2280_v18 = vpop.f32.mrf.mxu1 }
 0x3a5   :  { %10367 = vst [vmem:[#allocation49_spill] sm:$0xff] %v7903_v34  ;;  %v7909_v16 = vsub.f32 %v2571_v17, %v7903_v34  ;;  %2949 = vmatmul.f32.gmra.mxu2 %v2948_v4  ;;  %3366 = vmatmul.f32.gmra.mxu3 %v7903_v34  ;;  %v10374_v34 = vld [vmem:[#allocation58_spill] sm:$0xff] }
 0x3a6   :  { %10368 = vst [vmem:[#allocation156_spill] sm:$0xff] %v7905_v25  ;;  %v2281_v55 = vadd.f32 %v2280_v18, %v2006_v10  ;;  %2068 = vmatmul.f32.gmra.mxu0 %v10371_v62 }
 0x3a7   :  { %10370 = vst [vmem:[#allocation56_spill] sm:$0xff] %v7909_v16  ;;  %v9993_v48 = vand.u32 4294901760, %v7909_v16  ;;  %2343 = vmatmul.f32.gmra.mxu1 %v10371_v62 }
 0x3a8   :  { %v2430_v46 = vmax.f32 %v2281_v55, 0.0  ;;  %v2822_v13 = vpop.f32.mrf.mxu2  ;;  %v3303_v60 = vpop.f32.mrf.mxu3 }
 0x3a9   :  { %v2823_v31 = vadd.f32 %v7621_v22, %v2822_v13  ;;  %v2955_v63 = vsub.f32 %v7909_v16, %v9993_v48  ;;  %v10379_v16 = vld [vmem:[#allocation55_spill] sm:$0xff] }
 0x3aa   :  { %v2574_v17 = vsel %vm2467_vm1, %v2430_v46, 0 }
 0x3ab   :  { %v7920_v21 = vand.u32 4294901760, %v2574_v17  ;;  %v2009_v18 = vpop.f32.mrf.mxu0  ;;  %v2956_v4 = vand.u32 4294901760, %v2955_v63  ;;  %v7922_v10 = vadd.f32 %v3299_v6, %v2823_v31 }
 0x3ac   :  { %v2010_v55 = vadd.f32 %v2009_v18, %v10374_v34  ;;  %v2284_v25 = vpop.f32.mrf.mxu1 }
 0x3ad   :  { %10372 = vst [vmem:[#allocation51_spill] sm:$0xff] %v7920_v21  ;;  %v7926_v62 = vsub.f32 %v2574_v17, %v7920_v21  ;;  %2957 = vmatmul.f32.gmra.mxu2 %v2956_v4  ;;  %3370 = vmatmul.f32.gmra.mxu3 %v7920_v21  ;;  %v10378_v21 = vld [vmem:[#allocation59_spill] sm:$0xff] }
 0x3ae   :  { %10373 = vst [vmem:[#allocation157_spill] sm:$0xff] %v7922_v10  ;;  %v2285_v13 = vadd.f32 %v2284_v25, %v2010_v55  ;;  %2072 = vmatmul.f32.gmra.mxu0 %v10375_v26 }
 0x3af   :  { %v9998_v46 = vand.u32 4294901760, %v7926_v62  ;;  %2347 = vmatmul.f32.gmra.mxu1 %v10375_v26 }
 0x3b0   :  { %v2431_v48 = vmax.f32 %v2285_v13, 0.0  ;;  %v2830_v63 = vpop.f32.mrf.mxu2  ;;  %v3307_v6 = vpop.f32.mrf.mxu3 }
 0x3b1   :  { %v2831_v31 = vadd.f32 %v7621_v22, %v2830_v63  ;;  %v2963_v34 = vsub.f32 %v7926_v62, %v9998_v46 }
 0x3b2   :  { %v2577_v17 = vsel %vm2467_vm1, %v2431_v48, 0 }
 0x3b3   :  { %v7937_v18 = vand.u32 4294901760, %v2577_v17  ;;  %v2013_v25 = vpop.f32.mrf.mxu0  ;;  %v2964_v4 = vand.u32 4294901760, %v2963_v34  ;;  %v7939_v55 = vadd.f32 %v3303_v60, %v2831_v31 }
 0x3b4   :  { %v2014_v13 = vadd.f32 %v2013_v25, %v10378_v21  ;;  %v2288_v10 = vpop.f32.mrf.mxu1 }
 0x3b5   :  { %10376 = vst [vmem:[#allocation58_spill] sm:$0xff] %v7937_v18  ;;  %v7943_v26 = vsub.f32 %v2577_v17, %v7937_v18  ;;  %2965 = vmatmul.f32.gmra.mxu2 %v2964_v4  ;;  %3374 = vmatmul.f32.gmra.mxu3 %v7937_v18 }
 0x3b6   :  { %10377 = vst [vmem:[#allocation53_spill] sm:$0xff] %v7939_v55  ;;  %v2289_v63 = vadd.f32 %v2288_v10, %v2014_v13  ;;  %2076 = vmatmul.f32.gmra.mxu0 %v10379_v16 }
 0x3b7   :  { %v10001_v48 = vand.u32 4294901760, %v7943_v26  ;;  %2351 = vmatmul.f32.gmra.mxu1 %v10379_v16 }
 0x3b8   :  { %v2432_v46 = vmax.f32 %v2289_v63, 0.0  ;;  %v2838_v34 = vpop.f32.mrf.mxu2  ;;  %v3311_v60 = vpop.f32.mrf.mxu3 }
 0x3b9   :  { %v2839_v31 = vadd.f32 %v7621_v22, %v2838_v34  ;;  %v2971_v21 = vsub.f32 %v7943_v26, %v10001_v48  ;;  %v7966_v34 = vld [vmem:[%s9752_s2] ss:$0 sm:$0xff] }
 0x3ba   :  { %v2580_v17 = vsel %vm2467_vm1, %v2432_v46, 0  ;;  %v628_v46 = vadd.f32 %v7966_v34, %v7089_v19 }
 0x3bb   :  { %v7954_v25 = vand.u32 4294901760, %v2580_v17  ;;  %v2017_v10 = vpop.f32.mrf.mxu0  ;;  %v2972_v4 = vand.u32 4294901760, %v2971_v21  ;;  %v7956_v13 = vadd.f32 %v3307_v6, %v2839_v31  ;;  %v10382_v6 = vld [vmem:[#allocation57_spill] sm:$0xff] }
 0x3bc   :  { %v2018_v63 = vadd.f32 %v2017_v10, %v7074_v8  ;;  %v2292_v18 = vpop.f32.mrf.mxu1 }
 0x3bd   :  { %10380 = vst [vmem:[#allocation59_spill] sm:$0xff] %v7954_v25  ;;  %v7960_v16 = vsub.f32 %v2580_v17, %v7954_v25  ;;  %2973 = vmatmul.f32.gmra.mxu2 %v2972_v4  ;;  %3378 = vmatmul.f32.gmra.mxu3 %v7954_v25  ;;  %v1003_v25 = vadd.f32 %v7094_v27, %v628_v46 }
 0x3be   :  { %10381 = vst [vmem:[#allocation55_spill] sm:$0xff] %v7956_v13  ;;  %v2293_v21 = vadd.f32 %v2292_v18, %v2018_v63  ;;  %2080 = vmatmul.f32.gmra.mxu0 %v10382_v6  ;;  %v636_v27 = vadd.f32 %v7966_v34, %v7101_v30 }
 0x3bf   :  { %v10004_v8 = vand.u32 4294901760, %v7960_v16  ;;  %2355 = vmatmul.f32.gmra.mxu1 %v10382_v6 }
 0x3c0   :  { %v2433_v31 = vmax.f32 %v2293_v21, 0.0  ;;  %v2846_v17 = vpop.f32.mrf.mxu2  ;;  %v3315_v10 = vpop.f32.mrf.mxu3 }
 0x3c1   :  { %v2847_v4 = vadd.f32 %v7621_v22, %v2846_v17  ;;  %v2979_v48 = vsub.f32 %v7960_v16, %v10004_v8  ;;  %v1321_v8 = vadd.f32 %v7209_v29, %v1003_v25  ;;  %v10385_v25 = vld [vmem:[#allocation64_spill] sm:$0xff] }
 0x3c2   :  { %v2583_v19 = vsel %vm2467_vm1, %v2433_v31, 0  ;;  %v1007_v30 = vadd.f32 %v10385_v25, %v636_v27  ;;  %v10389_v25 = vld [vmem:[#allocation60_spill] sm:$0xff] }
 0x3c3   :  { %v7979_v18 = vand.u32 4294901760, %v2583_v19  ;;  %v2021_v63 = vpop.f32.mrf.mxu0  ;;  %v2980_v13 = vand.u32 4294901760, %v2979_v48  ;;  %v7981_v55 = vadd.f32 %v3311_v60, %v2847_v4  ;;  %v1701_v29 = vadd.f32 %v7201_v50, %v1321_v8  ;;  %v10388_v8 = vld [vmem:[#allocation66_spill] sm:$0xff] }
 0x3c4   :  { %v2022_v21 = vadd.f32 %v2021_v63, %v7085_v37  ;;  %v2296_v17 = vpop.f32.mrf.mxu1  ;;  %v1326_v50 = vadd.f32 %v7221_v58, %v1007_v30  ;;  %v644_v27 = vadd.f32 %v7966_v34, %v10388_v8  ;;  %v10390_v30 = vld [vmem:[#allocation67_spill] sm:$0xff] }
 0x3c5   :  { %10383 = vst [vmem:[#allocation57_spill] sm:$0xff] %v7979_v18  ;;  %v7985_v6 = vsub.f32 %v2583_v19, %v7979_v18  ;;  %2981 = vmatmul.f32.gmra.mxu2 %v2980_v13  ;;  %3382 = vmatmul.f32.gmra.mxu3 %v7979_v18 }
 0x3c6   :  { %10384 = vst [vmem:[#allocation158_spill] sm:$0xff] %v7981_v55  ;;  %v2297_v46 = vadd.f32 %v2296_v17, %v2022_v21  ;;  %2084 = vmatmul.f32.gmra.mxu0 %v7054_v0  ;;  %v1707_v58 = vadd.f32 %v7213_v9, %v1326_v50  ;;  %v10393_v50 = vld [vmem:[#allocation69_spill] sm:$0xff] }
 0x3c7   :  { %v10007_v48 = vand.u32 4294901760, %v7985_v6  ;;  %2359 = vmatmul.f32.gmra.mxu1 %v7054_v0 }
 0x3c8   :  { %v2434_v60 = vmax.f32 %v2297_v46, 0.0  ;;  %v2854_v37 = vpop.f32.mrf.mxu2  ;;  %v3319_v31 = vpop.f32.mrf.mxu3 }
 0x3c9   :  { %v2855_v4 = vadd.f32 %v7621_v22, %v2854_v37  ;;  %v2987_v13 = vsub.f32 %v7985_v6, %v10007_v48 }
 0x3ca   :  { %v2586_v19 = vsel %vm2467_vm1, %v2434_v60, 0 }
 0x3cb   :  { %v8001_v63 = vand.u32 4294901760, %v2586_v19  ;;  %v2025_v21 = vpop.f32.mrf.mxu0  ;;  %v2988_v17 = vand.u32 4294901760, %v2987_v13  ;;  %v8003_v46 = vadd.f32 %v3315_v10, %v2855_v4 }
 0x3cc   :  { %v2026_v0 = vadd.f32 %v2025_v21, %v1701_v29  ;;  %v2300_v37 = vpop.f32.mrf.mxu1 }
 0x3cd   :  { %10386 = vst [vmem:[#allocation64_spill] sm:$0xff] %v8001_v63  ;;  %v8006_v18 = vsub.f32 %v2586_v19, %v8001_v63  ;;  %2989 = vmatmul.f32.gmra.mxu2 %v2988_v17  ;;  %3386 = vmatmul.f32.gmra.mxu3 %v8001_v63  ;;  %v1011_v17 = vadd.f32 %v10390_v30, %v644_v27  ;;  %v10394_v30 = vld [vmem:[#allocation61_spill] sm:$0xff] }
 0x3ce   :  { %10387 = vst [vmem:[#allocation159_spill] sm:$0xff] %v8003_v46  ;;  %v2301_v60 = vadd.f32 %v2300_v37, %v2026_v0  ;;  %2088 = vmatmul.f32.gmra.mxu0 %v10389_v25  ;;  %v652_v27 = vadd.f32 %v7966_v34, %v10393_v50 }
 0x3cf   :  { %v10010_v13 = vand.u32 4294901760, %v8006_v18  ;;  %2363 = vmatmul.f32.gmra.mxu1 %v10389_v25  ;;  %v1331_v9 = vadd.f32 %v7233_v3, %v1011_v17  ;;  %v10395_v17 = vld [vmem:[#allocation70_spill] sm:$0xff] }
 0x3d0   :  { %v2435_v10 = vmax.f32 %v2301_v60, 0.0  ;;  %v2862_v4 = vpop.f32.mrf.mxu2  ;;  %v3323_v29 = vpop.f32.mrf.mxu3 }
 0x3d1   :  { %v2863_v19 = vadd.f32 %v7621_v22, %v2862_v4  ;;  %v2995_v21 = vsub.f32 %v8006_v18, %v10010_v13  ;;  %v1713_v3 = vadd.f32 %v7225_v45, %v1331_v9  ;;  %v10398_v9 = vld [vmem:[#allocation72_spill] sm:$0xff] }
 0x3d2   :  { %v2589_v0 = vsel %vm2467_vm1, %v2435_v10, 0 }
 0x3d3   :  { %v8022_v37 = vand.u32 4294901760, %v2589_v0  ;;  %v2029_v8 = vpop.f32.mrf.mxu0  ;;  %v2996_v60 = vand.u32 4294901760, %v2995_v21  ;;  %v8024_v48 = vadd.f32 %v3319_v31, %v2863_v19 }
 0x3d4   :  { %v2030_v25 = vadd.f32 %v2029_v8, %v1707_v58  ;;  %v2304_v4 = vpop.f32.mrf.mxu1 }
 0x3d5   :  { %10391 = vst [vmem:[#allocation66_spill] sm:$0xff] %v8022_v37  ;;  %v8027_v63 = vsub.f32 %v2589_v0, %v8022_v37  ;;  %2997 = vmatmul.f32.gmra.mxu2 %v2996_v60  ;;  %3390 = vmatmul.f32.gmra.mxu3 %v8022_v37  ;;  %v1015_v60 = vadd.f32 %v10395_v17, %v652_v27  ;;  %v10399_v17 = vld [vmem:[#allocation62_spill] sm:$0xff] }
 0x3d6   :  { %10392 = vst [vmem:[#allocation60_spill] sm:$0xff] %v8024_v48  ;;  %v2305_v10 = vadd.f32 %v2304_v4, %v2030_v25  ;;  %2092 = vmatmul.f32.gmra.mxu0 %v10394_v30  ;;  %v660_v27 = vadd.f32 %v7966_v34, %v10398_v9 }
 0x3d7   :  { %v10013_v21 = vand.u32 4294901760, %v8027_v63  ;;  %2367 = vmatmul.f32.gmra.mxu1 %v10394_v30  ;;  %v1336_v45 = vadd.f32 %v7244_v33, %v1015_v60  ;;  %v10400_v60 = vld [vmem:[#allocation73_spill] sm:$0xff] }
 0x3d8   :  { %v2436_v31 = vmax.f32 %v2305_v10, 0.0  ;;  %v2870_v19 = vpop.f32.mrf.mxu2  ;;  %v3327_v58 = vpop.f32.mrf.mxu3 }
 0x3d9   :  { %v2871_v0 = vadd.f32 %v7621_v22, %v2870_v19  ;;  %v3003_v8 = vsub.f32 %v8027_v63, %v10013_v21  ;;  %v1719_v33 = vadd.f32 %v7236_v47, %v1336_v45  ;;  %v668_v45 = vadd.f32 %v7966_v34, %v7149_v1 }
 0x3da   :  { %v2592_v25 = vsel %vm2467_vm1, %v2436_v31, 0 }
 0x3db   :  { %v8043_v4 = vand.u32 4294901760, %v2592_v25  ;;  %v2033_v50 = vpop.f32.mrf.mxu0  ;;  %v3004_v10 = vand.u32 4294901760, %v3003_v8  ;;  %v8045_v13 = vadd.f32 %v3323_v29, %v2871_v0  ;;  %v1023_v1 = vadd.f32 %v7151_v51, %v668_v45 }
 0x3dc   :  { %v2034_v30 = vadd.f32 %v2033_v50, %v1713_v3  ;;  %v2308_v19 = vpop.f32.mrf.mxu1 }
 0x3dd   :  { %10396 = vst [vmem:[#allocation67_spill] sm:$0xff] %v8043_v4  ;;  %v8048_v37 = vsub.f32 %v2592_v25, %v8043_v4  ;;  %3005 = vmatmul.f32.gmra.mxu2 %v3004_v10  ;;  %3394 = vmatmul.f32.gmra.mxu3 %v8043_v4  ;;  %v1019_v10 = vadd.f32 %v10400_v60, %v660_v27 }
 0x3de   :  { %10397 = vst [vmem:[#allocation69_spill] sm:$0xff] %v8045_v13  ;;  %v2309_v31 = vadd.f32 %v2308_v19, %v2034_v30  ;;  %2096 = vmatmul.f32.gmra.mxu0 %v10399_v17 }
 0x3df   :  { %v10017_v8 = vand.u32 4294901760, %v8048_v37  ;;  %2371 = vmatmul.f32.gmra.mxu1 %v10399_v17  ;;  %v1341_v47 = vadd.f32 %v7255_v61, %v1019_v10 }
 0x3e0   :  { %v2437_v29 = vmax.f32 %v2309_v31, 0.0  ;;  %v2878_v0 = vpop.f32.mrf.mxu2  ;;  %v3331_v3 = vpop.f32.mrf.mxu3 }
 0x3e1   :  { %v2879_v25 = vadd.f32 %v7621_v22, %v2878_v0  ;;  %v3011_v50 = vsub.f32 %v8048_v37, %v10017_v8  ;;  %v1725_v61 = vadd.f32 %v7247_v54, %v1341_v47  ;;  %v1346_v54 = vadd.f32 %v7267_v43, %v1023_v1  ;;  %v10406_v47 = vld [vmem:[#allocation74_spill] sm:$0xff] }
 0x3e2   :  { %v2595_v30 = vsel %vm2467_vm1, %v2437_v29, 0  ;;  %v10403_v29 = vld [vmem:[#allocation63_spill] sm:$0xff]  ;;  %v676_v51 = vadd.f32 %v7966_v34, %v10406_v47 }
 0x3e3   :  { %v8064_v19 = vand.u32 4294901760, %v2595_v30  ;;  %v2037_v9 = vpop.f32.mrf.mxu0  ;;  %v3012_v31 = vand.u32 4294901760, %v3011_v50  ;;  %v8066_v21 = vadd.f32 %v3327_v58, %v2879_v25 }
 0x3e4   :  { %v2038_v17 = vadd.f32 %v2037_v9, %v1719_v33  ;;  %v2312_v0 = vpop.f32.mrf.mxu1 }
 0x3e5   :  { %10401 = vst [vmem:[#allocation61_spill] sm:$0xff] %v8064_v19  ;;  %v8069_v4 = vsub.f32 %v2595_v30, %v8064_v19  ;;  %3013 = vmatmul.f32.gmra.mxu2 %v3012_v31  ;;  %3398 = vmatmul.f32.gmra.mxu3 %v8064_v19 }
 0x3e6   :  { %10402 = vst [vmem:[#allocation70_spill] sm:$0xff] %v8066_v21  ;;  %v2313_v27 = vadd.f32 %v2312_v0, %v2038_v17  ;;  %2100 = vmatmul.f32.gmra.mxu0 %v10403_v29 }
 0x3e7   :  { %v10016_v50 = vand.u32 4294901760, %v8069_v4  ;;  %2375 = vmatmul.f32.gmra.mxu1 %v10403_v29 }
 0x3e8   :  { %v2438_v58 = vmax.f32 %v2313_v27, 0.0  ;;  %v2886_v25 = vpop.f32.mrf.mxu2  ;;  %v3335_v33 = vpop.f32.mrf.mxu3 }
 0x3e9   :  { %v2887_v60 = vadd.f32 %v7621_v22, %v2886_v25  ;;  %v3019_v30 = vsub.f32 %v8069_v4, %v10016_v50 }
 0x3ea   :  { %v2598_v10 = vsel %vm2467_vm1, %v2438_v58, 0  ;;  %v10407_v58 = vld [vmem:[#allocation65_spill] sm:$0xff] }
 0x3eb   :  { %v8085_v9 = vand.u32 4294901760, %v2598_v10  ;;  %v2041_v31 = vpop.f32.mrf.mxu0  ;;  %v3020_v17 = vand.u32 4294901760, %v3019_v30  ;;  %v8087_v0 = vadd.f32 %v3331_v3, %v2887_v60 }
 0x3ec   :  { %v2042_v27 = vadd.f32 %v2041_v31, %v1725_v61  ;;  %v2316_v22 = vpop.f32.mrf.mxu1  ;;  %v8102_v61 = vld [vmem:[%s9754_s4] ss:$0 sm:$0xff]  ;;  %v10408_v31 = vld [vmem:[#allocation75_spill] sm:$0xff] }
 0x3ed   :  { %10404 = vst [vmem:[#allocation72_spill] sm:$0xff] %v8085_v9  ;;  %v8090_v29 = vsub.f32 %v2598_v10, %v8085_v9  ;;  %3021 = vmatmul.f32.gmra.mxu2 %v3020_v17  ;;  %3402 = vmatmul.f32.gmra.mxu3 %v8085_v9  ;;  %v1731_v10 = vadd.f32 %v7259_v35, %v1346_v54 }
 0x3ee   :  { %10405 = vst [vmem:[#allocation62_spill] sm:$0xff] %v8087_v0  ;;  %v2317_v45 = vadd.f32 %v2316_v22, %v2042_v27  ;;  %2104 = vmatmul.f32.gmra.mxu0 %v10407_v58  ;;  %v1027_v17 = vadd.f32 %v10408_v31, %v676_v51  ;;  %v684_v54 = vadd.f32 %v7966_v34, %v7163_v41 }
 0x3ef   :  { %v10025_v25 = vand.u32 4294901760, %v8090_v29  ;;  %2379 = vmatmul.f32.gmra.mxu1 %v10407_v58 }
 0x3f0   :  { %v2439_v3 = vmax.f32 %v2317_v45, 0.0  ;;  %v2894_v60 = vpop.f32.mrf.mxu2  ;;  %v3339_v30 = vpop.f32.mrf.mxu3  ;;  %v1351_v35 = vadd.f32 %v7279_v24, %v1027_v17  ;;  %v1031_v41 = vadd.f32 %v7167_v59, %v684_v54  ;;  %v692_v59 = vadd.f32 %v7966_v34, %v7175_v15  ;;  %v10414_v54 = vld [vmem:[#allocation71_spill] sm:$0xff] }
 0x3f1   :  { %v2895_v43 = vadd.f32 %v8102_v61, %v2894_v60  ;;  %v3027_v1 = vsub.f32 %v8090_v29, %v10025_v25 }
 0x3f2   :  { %v2601_v27 = vsel %vm2467_vm1, %v2439_v3, 0  ;;  %v10411_v3 = vld [vmem:[#allocation68_spill] sm:$0xff]  ;;  %v1737_v24 = vadd.f32 %v7271_v23, %v1351_v35  ;;  %v1356_v23 = vadd.f32 %v7290_v12, %v1031_v41  ;;  %v1035_v15 = vadd.f32 %v7178_v42, %v692_v59 }
 0x3f3   :  { %v8111_v22 = vand.u32 4294901760, %v2601_v27  ;;  %v2045_v47 = vpop.f32.mrf.mxu0  ;;  %v3028_v45 = vand.u32 4294901760, %v3027_v1  ;;  %v8113_v58 = vadd.f32 %v3335_v33, %v2895_v43  ;;  %v700_v42 = vadd.f32 %v7966_v34, %v7183_v2 }
 0x3f4   :  { %v2046_v50 = vadd.f32 %v2045_v47, %v1731_v10  ;;  %v2320_v60 = vpop.f32.mrf.mxu1  ;;  %v1743_v12 = vadd.f32 %v7282_v20, %v1356_v23  ;;  %v1361_v20 = vadd.f32 %v7301_v36, %v1035_v15 }
 0x3f5   :  { %10409 = vst [vmem:[#allocation73_spill] sm:$0xff] %v8111_v22  ;;  %v8116_v8 = vsub.f32 %v2601_v27, %v8111_v22  ;;  %3029 = vmatmul.f32.gmra.mxu2 %v3028_v45  ;;  %3406 = vmatmul.f32.gmra.mxu3 %v8111_v22  ;;  %v1039_v2 = vadd.f32 %v7185_v56, %v700_v42 }
 0x3f6   :  { %10410 = vst [vmem:[#allocation63_spill] sm:$0xff] %v8113_v58  ;;  %v2321_v51 = vadd.f32 %v2320_v60, %v2046_v50  ;;  %2108 = vmatmul.f32.gmra.mxu0 %v10411_v3  ;;  %v1749_v36 = vadd.f32 %v7293_v28, %v1361_v20  ;;  %v10419_v20 = vld [vmem:[#allocation76_spill] sm:$0xff] }
 0x3f7   :  { %v10023_v1 = vand.u32 4294901760, %v8116_v8  ;;  %2383 = vmatmul.f32.gmra.mxu1 %v10411_v3  ;;  %v1366_v28 = vadd.f32 %v7311_v39, %v1039_v2  ;;  %v708_v56 = vadd.f32 %v7966_v34, %v10419_v20  ;;  %v10421_v2 = vld [vmem:[#allocation103_spill] sm:$0xff] }
 0x3f8   :  { %v2440_v33 = vmax.f32 %v2321_v51, 0.0  ;;  %v2902_v43 = vpop.f32.mrf.mxu2  ;;  %v3343_v10 = vpop.f32.mrf.mxu3 }
 0x3f9   :  { %v2903_v31 = vadd.f32 %v8102_v61, %v2902_v43  ;;  %v3035_v27 = vsub.f32 %v8116_v8, %v10023_v1 }
 0x3fa   :  { %v2604_v50 = vsel %vm2467_vm1, %v2440_v33, 0 }
 0x3fb   :  { %v8132_v17 = vand.u32 4294901760, %v2604_v50  ;;  %v2049_v47 = vpop.f32.mrf.mxu0  ;;  %v3036_v45 = vand.u32 4294901760, %v3035_v27  ;;  %v8134_v60 = vadd.f32 %v3339_v30, %v2903_v31 }
 0x3fc   :  { %v2050_v51 = vadd.f32 %v2049_v47, %v1737_v24  ;;  %v2324_v43 = vpop.f32.mrf.mxu1 }
 0x3fd   :  { %10412 = vst [vmem:[#allocation74_spill] sm:$0xff] %v8132_v17  ;;  %v8137_v3 = vsub.f32 %v2604_v50, %v8132_v17  ;;  %3037 = vmatmul.f32.gmra.mxu2 %v3036_v45  ;;  %3410 = vmatmul.f32.gmra.mxu3 %v8132_v17 }
 0x3fe   :  { %10413 = vst [vmem:[#allocation65_spill] sm:$0xff] %v8134_v60  ;;  %v2325_v35 = vadd.f32 %v2324_v43, %v2050_v51  ;;  %2112 = vmatmul.f32.gmra.mxu0 %v10414_v54 }
 0x3ff   :  { %v10020_v33 = vand.u32 4294901760, %v8137_v3  ;;  %2387 = vmatmul.f32.gmra.mxu1 %v10414_v54 }
 0x400   :  { %v2441_v30 = vmax.f32 %v2325_v35, 0.0  ;;  %v2910_v31 = vpop.f32.mrf.mxu2  ;;  %v3347_v27 = vpop.f32.mrf.mxu3 }
 0x401   :  { %v2911_v24 = vadd.f32 %v8102_v61, %v2910_v31  ;;  %v3043_v50 = vsub.f32 %v8137_v3, %v10020_v33 }
 0x402   :  { %v2607_v41 = vsel %vm2467_vm1, %v2441_v30, 0 }
 0x403   :  { %v8153_v47 = vand.u32 4294901760, %v2607_v41  ;;  %v2053_v45 = vpop.f32.mrf.mxu0  ;;  %v3044_v51 = vand.u32 4294901760, %v3043_v50  ;;  %v8155_v43 = vadd.f32 %v3343_v10, %v2911_v24 }
 0x404   :  { %v2054_v35 = vadd.f32 %v2053_v45, %v1743_v12  ;;  %v2328_v31 = vpop.f32.mrf.mxu1 }
 0x405   :  { %10415 = vst [vmem:[#allocation75_spill] sm:$0xff] %v8153_v47  ;;  %v8158_v54 = vsub.f32 %v2607_v41, %v8153_v47  ;;  %3045 = vmatmul.f32.gmra.mxu2 %v3044_v51  ;;  %3414 = vmatmul.f32.gmra.mxu3 %v8153_v47 }
 0x406   :  { %10416 = vst [vmem:[#allocation68_spill] sm:$0xff] %v8155_v43  ;;  %v2329_v23 = vadd.f32 %v2328_v31, %v2054_v35  ;;  %2116 = vmatmul.f32.gmra.mxu0 %v7147_v11 }
 0x407   :  { %v10018_v59 = vand.u32 4294901760, %v8158_v54  ;;  %2391 = vmatmul.f32.gmra.mxu1 %v7147_v11 }
 0x408   :  { %v2442_v10 = vmax.f32 %v2329_v23, 0.0  ;;  %v2918_v30 = vpop.f32.mrf.mxu2  ;;  %v3351_v24 = vpop.f32.mrf.mxu3 }
 0x409   :  { %v2919_v50 = vadd.f32 %v8102_v61, %v2918_v30  ;;  %v3051_v12 = vsub.f32 %v8158_v54, %v10018_v59 }
 0x40a   :  { %v2610_v15 = vsel %vm2467_vm1, %v2442_v10, 0 }
 0x40b   :  { %v8174_v41 = vand.u32 4294901760, %v2610_v15  ;;  %v2057_v45 = vpop.f32.mrf.mxu0  ;;  %v3052_v51 = vand.u32 4294901760, %v3051_v12  ;;  %v8176_v35 = vadd.f32 %v3347_v27, %v2919_v50  ;;  %v10420_v12 = vand.u32 4294901760, %v7323_v14 }
 0x40c   :  { %v2058_v11 = vadd.f32 %v2057_v45, %v1749_v36  ;;  %v2332_v23 = vpop.f32.mrf.mxu1  ;;  %v10422_v45 = vld [vmem:[#allocation77_spill] sm:$0xff] }
 0x40d   :  { %10417 = vst [vmem:[#allocation71_spill] sm:$0xff] %v8174_v41  ;;  %v8179_v31 = vsub.f32 %v2610_v15, %v8174_v41  ;;  %3053 = vmatmul.f32.gmra.mxu2 %v3052_v51  ;;  %3418 = vmatmul.f32.gmra.mxu3 %v8174_v41  ;;  %v1755_v15 = vadd.f32 %v10421_v2, %v1366_v28  ;;  %v10425_v2 = vld [vmem:[#allocation78_spill] sm:$0xff] }
 0x40e   :  { %10418 = vst [vmem:[#allocation160_spill] sm:$0xff] %v8176_v35  ;;  %v2333_v42 = vadd.f32 %v2332_v23, %v2058_v11  ;;  %3512 = vmatmul.f32.vlgmr.msra.gmra.mxu0 %v7323_v14  ;;  %v1043_v51 = vadd.f32 %v10422_v45, %v708_v56  ;;  %v716_v56 = vadd.f32 %v7966_v34, %v10425_v2  ;;  %v10426_v45 = vand.u32 4294901760, %v7341_v49 }
 0x40f   :  { %v10019_v10 = vand.u32 4294901760, %v8179_v31  ;;  %3854 = vmatmul.f32.vlgmr.msra.gmra.mxu1 %v10420_v12 }
 0x410   :  { %v2443_v27 = vmax.f32 %v2333_v42, 0.0  ;;  %v2926_v30 = vpop.f32.mrf.mxu2  ;;  %v3355_v50 = vpop.f32.mrf.mxu3  ;;  %v1371_v28 = vadd.f32 %v7326_v7, %v1043_v51  ;;  %v10427_v51 = vld [vmem:[#allocation105_spill] sm:$0xff] }
 0x411   :  { %v2927_v36 = vadd.f32 %v8102_v61, %v2926_v30  ;;  %v3059_v39 = vsub.f32 %v8179_v31, %v10019_v10 }
 0x412   :  { %v2613_v11 = vsel %vm2467_vm1, %v2443_v27, 0 }
 0x413   :  { %v8196_v23 = vand.u32 4294901760, %v2613_v11  ;;  %v2061_v20 = vpop.f32.mrf.mxu0  ;;  %v3060_v42 = vand.u32 4294901760, %v3059_v39  ;;  %v8198_v59 = vadd.f32 %v3351_v24, %v2927_v36 }
 0x414   :  { %v2062_v14 = vadd.f32 %v2061_v20, %v1755_v15  ;;  %v2336_v30 = vpop.f32.mrf.mxu1  ;;  %v1761_v20 = vadd.f32 %v10427_v51, %v1371_v28  ;;  %v10431_v51 = vld [vmem:[#allocation80_spill] sm:$0xff] }
 0x415   :  { %10423 = vst [vmem:[#allocation76_spill] sm:$0xff] %v8196_v23  ;;  %v8201_v12 = vsub.f32 %v2613_v11, %v8196_v23  ;;  %3061 = vmatmul.f32.gmra.mxu2 %v3060_v42  ;;  %3422 = vmatmul.f32.gmra.mxu3 %v8196_v23  ;;  %v10428_v42 = vld [vmem:[#allocation79_spill] sm:$0xff] }
 0x416   :  { %10424 = vst [vmem:[#allocation103_spill] sm:$0xff] %v8198_v59  ;;  %v2337_v27 = vadd.f32 %v2336_v30, %v2062_v14  ;;  %3517 = vmatmul.f32.gmra.mxu0 %v7341_v49  ;;  %v1047_v14 = vadd.f32 %v10428_v42, %v716_v56  ;;  %v724_v56 = vadd.f32 %v7966_v34, %v10431_v51  ;;  %v10432_v42 = vand.u32 4294901760, %v7359_v52 }
 0x417   :  { %v10021_v39 = vand.u32 4294901760, %v8201_v12  ;;  %3860 = vmatmul.f32.gmra.mxu1 %v10426_v45 }
 0x418   :  { %v2444_v24 = vmax.f32 %v2337_v27, 0.0  ;;  %v2934_v36 = vpop.f32.mrf.mxu2  ;;  %v3359_v15 = vpop.f32.mrf.mxu3  ;;  %v1376_v28 = vadd.f32 %v7346_v5, %v1047_v14 }
 0x419   :  { %v2935_v11 = vadd.f32 %v8102_v61, %v2934_v36  ;;  %v3067_v7 = vsub.f32 %v8201_v12, %v10021_v39 }
 0x41a   :  { %v2616_v30 = vsel %vm2467_vm1, %v2444_v24, 0  ;;  %v1767_v14 = vadd.f32 %v7330_v44, %v1376_v28  ;;  %v10436_v28 = vld [vmem:[#allocation82_spill] sm:$0xff] }
 0x41b   :  { %v8218_v2 = vand.u32 4294901760, %v2616_v30  ;;  %v2065_v27 = vpop.f32.mrf.mxu0  ;;  %v3068_v10 = vand.u32 4294901760, %v3067_v7  ;;  %v8220_v33 = vadd.f32 %v3355_v50, %v2935_v11 }
 0x41c   :  { %v2066_v49 = vadd.f32 %v2065_v27, %v1761_v20  ;;  %v2340_v36 = vpop.f32.mrf.mxu1 }
 0x41d   :  { %10429 = vst [vmem:[#allocation77_spill] sm:$0xff] %v8218_v2  ;;  %v8223_v45 = vsub.f32 %v2616_v30, %v8218_v2  ;;  %3069 = vmatmul.f32.gmra.mxu2 %v3068_v10  ;;  %3426 = vmatmul.f32.gmra.mxu3 %v8218_v2  ;;  %v10433_v30 = vld [vmem:[#allocation81_spill] sm:$0xff] }
 0x41e   :  { %10430 = vst [vmem:[#allocation78_spill] sm:$0xff] %v8220_v33  ;;  %v2341_v24 = vadd.f32 %v2340_v36, %v2066_v49  ;;  %3522 = vmatmul.f32.gmra.mxu0 %v7359_v52  ;;  %v1051_v27 = vadd.f32 %v10433_v30, %v724_v56  ;;  %v732_v56 = vadd.f32 %v7966_v34, %v10436_v28  ;;  %v10437_v30 = vand.u32 4294901760, %v7377_v32 }
 0x41f   :  { %v10022_v7 = vand.u32 4294901760, %v8223_v45  ;;  %3866 = vmatmul.f32.gmra.mxu1 %v10432_v42 }
 0x420   :  { %v2445_v50 = vmax.f32 %v2341_v24, 0.0  ;;  %v2942_v11 = vpop.f32.mrf.mxu2  ;;  %v3363_v20 = vpop.f32.mrf.mxu3  ;;  %v1381_v44 = vadd.f32 %v7368_v57, %v1051_v27  ;;  %v10438_v27 = vld [vmem:[#allocation108_spill] sm:$0xff] }
 0x421   :  { %v2943_v10 = vadd.f32 %v8102_v61, %v2942_v11  ;;  %v3075_v5 = vsub.f32 %v8223_v45, %v10022_v7 }
 0x422   :  { %v2619_v49 = vsel %vm2467_vm1, %v2445_v50, 0 }
 0x423   :  { %v8240_v36 = vand.u32 4294901760, %v2619_v49  ;;  %v2069_v51 = vpop.f32.mrf.mxu0  ;;  %v3076_v24 = vand.u32 4294901760, %v3075_v5  ;;  %v8242_v39 = vadd.f32 %v3359_v15, %v2943_v10 }
 0x424   :  { %v2070_v52 = vadd.f32 %v2069_v51, %v1767_v14  ;;  %v2344_v11 = vpop.f32.mrf.mxu1  ;;  %v1773_v51 = vadd.f32 %v10438_v27, %v1381_v44  ;;  %v10443_v27 = vld [vmem:[#allocation84_spill] sm:$0xff] }
 0x425   :  { %10434 = vst [vmem:[#allocation105_spill] sm:$0xff] %v8240_v36  ;;  %v8245_v42 = vsub.f32 %v2619_v49, %v8240_v36  ;;  %3077 = vmatmul.f32.gmra.mxu2 %v3076_v24  ;;  %3430 = vmatmul.f32.gmra.mxu3 %v8240_v36  ;;  %v10439_v24 = vld [vmem:[#allocation83_spill] sm:$0xff] }
 0x426   :  { %10435 = vst [vmem:[#allocation79_spill] sm:$0xff] %v8242_v39  ;;  %v2345_v50 = vadd.f32 %v2344_v11, %v2070_v52  ;;  %3527 = vmatmul.f32.gmra.mxu0 %v7377_v32  ;;  %v1055_v52 = vadd.f32 %v10439_v24, %v732_v56  ;;  %v740_v56 = vadd.f32 %v7966_v34, %v10443_v27  ;;  %v10444_v24 = vand.u32 4294901760, %v7393_v53 }
 0x427   :  { %v10024_v5 = vand.u32 4294901760, %v8245_v42  ;;  %3872 = vmatmul.f32.gmra.mxu1 %v10437_v30 }
 0x428   :  { %v2446_v15 = vmax.f32 %v2345_v50, 0.0  ;;  %v2950_v10 = vpop.f32.mrf.mxu2  ;;  %v3367_v14 = vpop.f32.mrf.mxu3  ;;  %v1386_v44 = vadd.f32 %v7389_v40, %v1055_v52  ;;  %v10445_v52 = vld [vmem:[#allocation111_spill] sm:$0xff] }
 0x429   :  { %v2951_v49 = vadd.f32 %v8102_v61, %v2950_v10  ;;  %v3083_v57 = vsub.f32 %v8245_v42, %v10024_v5 }
 0x42a   :  { %v2622_v11 = vsel %vm2467_vm1, %v2446_v15, 0 }
 0x42b   :  { %v8262_v28 = vand.u32 4294901760, %v2622_v11  ;;  %v2073_v50 = vpop.f32.mrf.mxu0  ;;  %v3084_v7 = vand.u32 4294901760, %v3083_v57  ;;  %v8264_v1 = vadd.f32 %v3363_v20, %v2951_v49 }
 0x42c   :  { %v2074_v32 = vadd.f32 %v2073_v50, %v1773_v51  ;;  %v2348_v10 = vpop.f32.mrf.mxu1  ;;  %v10446_v50 = vld [vmem:[#allocation85_spill] sm:$0xff] }
 0x42d   :  { %10440 = vst [vmem:[#allocation80_spill] sm:$0xff] %v8262_v28  ;;  %v8267_v30 = vsub.f32 %v2622_v11, %v8262_v28  ;;  %3085 = vmatmul.f32.gmra.mxu2 %v3084_v7  ;;  %3434 = vmatmul.f32.gmra.mxu3 %v8262_v28  ;;  %v1779_v11 = vadd.f32 %v10445_v52, %v1386_v44  ;;  %v10451_v52 = vld [vmem:[#allocation86_spill] sm:$0xff] }
 0x42e   :  { %10441 = vst [vmem:[#allocation81_spill] sm:$0xff] %v8264_v1  ;;  %v2349_v15 = vadd.f32 %v2348_v10, %v2074_v32  ;;  %3532 = vmatmul.f32.gmra.mxu0 %v7393_v53  ;;  %v1059_v32 = vadd.f32 %v10446_v50, %v740_v56  ;;  %v748_v56 = vadd.f32 %v7966_v34, %v10451_v52  ;;  %v10452_v50 = vld [vmem:[#allocation115_spill] sm:$0xff] }
 0x42f   :  { %10442 = vst [vmem:[#allocation82_spill] sm:$0xff] %v8267_v30  ;;  %v10026_v57 = vand.u32 4294901760, %v8267_v30  ;;  %3878 = vmatmul.f32.gmra.mxu1 %v10444_v24  ;;  %v10455_v52 = vld [vmem:[#allocation87_spill] sm:$0xff] }
 0x430   :  { %v2447_v20 = vmax.f32 %v2349_v15, 0.0  ;;  %v2958_v49 = vpop.f32.mrf.mxu2  ;;  %v3371_v51 = vpop.f32.mrf.mxu3 }
 0x431   :  { %v2959_v7 = vadd.f32 %v8102_v61, %v2958_v49  ;;  %v3091_v40 = vsub.f32 %v8267_v30, %v10026_v57  ;;  %v10450_v57 = vld [vmem:[#allocation116_spill] sm:$0xff] }
 0x432   :  { %v2625_v10 = vsel %vm2467_vm1, %v2447_v20, 0  ;;  %v1391_v44 = vadd.f32 %v10450_v57, %v1059_v32  ;;  %v10454_v32 = vld [vmem:[#allocation113_spill] sm:$0xff] }
 0x433   :  { %v8284_v27 = vand.u32 4294901760, %v2625_v10  ;;  %v2077_v15 = vpop.f32.mrf.mxu0  ;;  %v3092_v5 = vand.u32 4294901760, %v3091_v40  ;;  %v8286_v25 = vadd.f32 %v3367_v14, %v2959_v7 }
 0x434   :  { %v2078_v53 = vadd.f32 %v2077_v15, %v1779_v11  ;;  %v2352_v49 = vpop.f32.mrf.mxu1  ;;  %v1785_v15 = vadd.f32 %v10454_v32, %v1391_v44  ;;  %v10460_v32 = vld [vmem:[#allocation88_spill] sm:$0xff] }
 0x435   :  { %10447 = vst [vmem:[#allocation108_spill] sm:$0xff] %v8284_v27  ;;  %v8289_v24 = vsub.f32 %v2625_v10, %v8284_v27  ;;  %3093 = vmatmul.f32.gmra.mxu2 %v3092_v5  ;;  %3438 = vmatmul.f32.gmra.mxu3 %v8284_v27  ;;  %v10453_v10 = vand.u32 4294901760, %v10452_v50 }
 0x436   :  { %10448 = vst [vmem:[#allocation83_spill] sm:$0xff] %v8286_v25  ;;  %v2353_v20 = vadd.f32 %v2352_v49, %v2078_v53  ;;  %3537 = vmatmul.f32.gmra.mxu0 %v10452_v50  ;;  %v1063_v53 = vadd.f32 %v10455_v52, %v748_v56  ;;  %v756_v56 = vadd.f32 %v7966_v34, %v10460_v32  ;;  %v10461_v52 = vld [vmem:[#allocation119_spill] sm:$0xff]  ;;  %v10464_v32 = vld [vmem:[#allocation89_spill] sm:$0xff] }
 0x437   :  { %10449 = vst [vmem:[#allocation84_spill] sm:$0xff] %v8289_v24  ;;  %v10031_v40 = vand.u32 4294901760, %v8289_v24  ;;  %3884 = vmatmul.f32.gmra.mxu1 %v10453_v10 }
 0x438   :  { %v2448_v14 = vmax.f32 %v2353_v20, 0.0  ;;  %v2966_v7 = vpop.f32.mrf.mxu2  ;;  %v3375_v11 = vpop.f32.mrf.mxu3 }
 0x439   :  { %v2967_v5 = vadd.f32 %v8102_v61, %v2966_v7  ;;  %v3099_v57 = vsub.f32 %v8289_v24, %v10031_v40  ;;  %v10459_v40 = vld [vmem:[#allocation120_spill] sm:$0xff] }
 0x43a   :  { %v2628_v49 = vsel %vm2467_vm1, %v2448_v14, 0  ;;  %v1396_v44 = vadd.f32 %v10459_v40, %v1063_v53  ;;  %v10463_v53 = vld [vmem:[#allocation117_spill] sm:$0xff] }
 0x43b   :  { %v8306_v27 = vand.u32 4294901760, %v2628_v49  ;;  %v2081_v20 = vpop.f32.mrf.mxu0  ;;  %v3100_v28 = vand.u32 4294901760, %v3099_v57  ;;  %v8308_v25 = vadd.f32 %v3371_v51, %v2967_v5 }
 0x43c   :  { %v2082_v50 = vadd.f32 %v2081_v20, %v1785_v15  ;;  %v2356_v7 = vpop.f32.mrf.mxu1  ;;  %v1791_v20 = vadd.f32 %v10463_v53, %v1396_v44  ;;  %v10469_v53 = vld [vmem:[#allocation90_spill] sm:$0xff] }
 0x43d   :  { %10456 = vst [vmem:[#allocation111_spill] sm:$0xff] %v8306_v27  ;;  %v8311_v10 = vsub.f32 %v2628_v49, %v8306_v27  ;;  %3101 = vmatmul.f32.gmra.mxu2 %v3100_v28  ;;  %3442 = vmatmul.f32.gmra.mxu3 %v8306_v27  ;;  %v10462_v49 = vand.u32 4294901760, %v10461_v52 }
 0x43e   :  { %10457 = vst [vmem:[#allocation85_spill] sm:$0xff] %v8308_v25  ;;  %v2357_v14 = vadd.f32 %v2356_v7, %v2082_v50  ;;  %3542 = vmatmul.f32.gmra.mxu0 %v10461_v52  ;;  %v1067_v50 = vadd.f32 %v10464_v32, %v756_v56  ;;  %v764_v56 = vadd.f32 %v7966_v34, %v10469_v53  ;;  %v10470_v32 = vld [vmem:[#allocation123_spill] sm:$0xff] }
 0x43f   :  { %10458 = vst [vmem:[#allocation116_spill] sm:$0xff] %v8311_v10  ;;  %v10036_v57 = vand.u32 4294901760, %v8311_v10  ;;  %3890 = vmatmul.f32.gmra.mxu1 %v10462_v49  ;;  %v10473_v53 = vld [vmem:[#allocation91_spill] sm:$0xff] }
 0x440   :  { %v2449_v51 = vmax.f32 %v2357_v14, 0.0  ;;  %v2974_v5 = vpop.f32.mrf.mxu2  ;;  %v3379_v15 = vpop.f32.mrf.mxu3 }
 0x441   :  { %v2975_v28 = vadd.f32 %v8102_v61, %v2974_v5  ;;  %v3107_v40 = vsub.f32 %v8311_v10, %v10036_v57  ;;  %v10468_v57 = vld [vmem:[#allocation124_spill] sm:$0xff] }
 0x442   :  { %v2631_v7 = vsel %vm2467_vm1, %v2449_v51, 0  ;;  %v1401_v44 = vadd.f32 %v10468_v57, %v1067_v50  ;;  %v10472_v50 = vld [vmem:[#allocation121_spill] sm:$0xff] }
 0x443   :  { %v8328_v27 = vand.u32 4294901760, %v2631_v7  ;;  %v2085_v14 = vpop.f32.mrf.mxu0  ;;  %v3108_v25 = vand.u32 4294901760, %v3107_v40  ;;  %v8330_v36 = vadd.f32 %v3375_v11, %v2975_v28 }
 0x444   :  { %v2086_v52 = vadd.f32 %v2085_v14, %v1791_v20  ;;  %v2360_v5 = vpop.f32.mrf.mxu1  ;;  %v1797_v14 = vadd.f32 %v10472_v50, %v1401_v44  ;;  %v10478_v50 = vld [vmem:[#allocation92_spill] sm:$0xff] }
 0x445   :  { %10465 = vst [vmem:[#allocation86_spill] sm:$0xff] %v8328_v27  ;;  %v8333_v49 = vsub.f32 %v2631_v7, %v8328_v27  ;;  %3109 = vmatmul.f32.gmra.mxu2 %v3108_v25  ;;  %3446 = vmatmul.f32.gmra.mxu3 %v8328_v27  ;;  %v10471_v7 = vand.u32 4294901760, %v10470_v32 }
 0x446   :  { %10466 = vst [vmem:[#allocation115_spill] sm:$0xff] %v8330_v36  ;;  %v2361_v51 = vadd.f32 %v2360_v5, %v2086_v52  ;;  %3547 = vmatmul.f32.gmra.mxu0 %v10470_v32  ;;  %v1071_v52 = vadd.f32 %v10473_v53, %v764_v56  ;;  %v772_v56 = vadd.f32 %v7966_v34, %v10478_v50  ;;  %v10479_v53 = vld [vmem:[#allocation5_spill] sm:$0xff] }
 0x447   :  { %10467 = vst [vmem:[#allocation113_spill] sm:$0xff] %v8333_v49  ;;  %v10039_v40 = vand.u32 4294901760, %v8333_v49  ;;  %3896 = vmatmul.f32.gmra.mxu1 %v10471_v7  ;;  %v10482_v50 = vld [vmem:[#allocation93_spill] sm:$0xff] }
 0x448   :  { %v2450_v11 = vmax.f32 %v2361_v51, 0.0  ;;  %v2982_v28 = vpop.f32.mrf.mxu2  ;;  %v3383_v20 = vpop.f32.mrf.mxu3 }
 0x449   :  { %v2983_v25 = vadd.f32 %v8102_v61, %v2982_v28  ;;  %v3115_v57 = vsub.f32 %v8333_v49, %v10039_v40  ;;  %v10477_v40 = vld [vmem:[#allocation127_spill] sm:$0xff] }
 0x44a   :  { %v2634_v5 = vsel %vm2467_vm1, %v2450_v11, 0  ;;  %v1406_v44 = vadd.f32 %v10477_v40, %v1071_v52  ;;  %v10481_v52 = vld [vmem:[#allocation126_spill] sm:$0xff] }
 0x44b   :  { %v8350_v27 = vand.u32 4294901760, %v2634_v5  ;;  %v2089_v51 = vpop.f32.mrf.mxu0  ;;  %v3116_v36 = vand.u32 4294901760, %v3115_v57  ;;  %v8352_v1 = vadd.f32 %v3379_v15, %v2983_v25 }
 0x44c   :  { %v2090_v32 = vadd.f32 %v2089_v51, %v1797_v14  ;;  %v2364_v28 = vpop.f32.mrf.mxu1  ;;  %v1803_v51 = vadd.f32 %v10481_v52, %v1406_v44  ;;  %v10487_v52 = vld [vmem:[#allocation94_spill] sm:$0xff] }
 0x44d   :  { %10474 = vst [vmem:[#allocation87_spill] sm:$0xff] %v8350_v27  ;;  %v8355_v7 = vsub.f32 %v2634_v5, %v8350_v27  ;;  %3117 = vmatmul.f32.gmra.mxu2 %v3116_v36  ;;  %3450 = vmatmul.f32.gmra.mxu3 %v8350_v27  ;;  %v10480_v5 = vand.u32 4294901760, %v10479_v53 }
 0x44e   :  { %10475 = vst [vmem:[#allocation120_spill] sm:$0xff] %v8352_v1  ;;  %v2365_v11 = vadd.f32 %v2364_v28, %v2090_v32  ;;  %3552 = vmatmul.f32.gmra.mxu0 %v10479_v53  ;;  %v1075_v32 = vadd.f32 %v10482_v50, %v772_v56  ;;  %v780_v56 = vadd.f32 %v7966_v34, %v10487_v52  ;;  %v10488_v50 = vld [vmem:[#allocation7_spill] sm:$0xff] }
 0x44f   :  { %10476 = vst [vmem:[#allocation88_spill] sm:$0xff] %v8355_v7  ;;  %v10044_v57 = vand.u32 4294901760, %v8355_v7  ;;  %3902 = vmatmul.f32.gmra.mxu1 %v10480_v5  ;;  %v10491_v52 = vld [vmem:[#allocation95_spill] sm:$0xff] }
 0x450   :  { %v2451_v15 = vmax.f32 %v2365_v11, 0.0  ;;  %v2990_v25 = vpop.f32.mrf.mxu2  ;;  %v3387_v14 = vpop.f32.mrf.mxu3 }
 0x451   :  { %v2991_v36 = vadd.f32 %v8102_v61, %v2990_v25  ;;  %v3123_v40 = vsub.f32 %v8355_v7, %v10044_v57  ;;  %v10486_v57 = vld [vmem:[#allocation129_spill] sm:$0xff] }
 0x452   :  { %v2637_v28 = vsel %vm2467_vm1, %v2451_v15, 0  ;;  %v1411_v44 = vadd.f32 %v10486_v57, %v1075_v32  ;;  %v10490_v32 = vld [vmem:[#allocation128_spill] sm:$0xff] }
 0x453   :  { %v8372_v27 = vand.u32 4294901760, %v2637_v28  ;;  %v2093_v11 = vpop.f32.mrf.mxu0  ;;  %v3124_v1 = vand.u32 4294901760, %v3123_v40  ;;  %v8374_v2 = vadd.f32 %v3383_v20, %v2991_v36 }
 0x454   :  { %v2094_v53 = vadd.f32 %v2093_v11, %v1803_v51  ;;  %v2368_v25 = vpop.f32.mrf.mxu1  ;;  %v1809_v11 = vadd.f32 %v10490_v32, %v1411_v44  ;;  %v10496_v32 = vld [vmem:[#allocation96_spill] sm:$0xff] }
 0x455   :  { %10483 = vst [vmem:[#allocation119_spill] sm:$0xff] %v8372_v27  ;;  %v8377_v5 = vsub.f32 %v2637_v28, %v8372_v27  ;;  %3125 = vmatmul.f32.gmra.mxu2 %v3124_v1  ;;  %3454 = vmatmul.f32.gmra.mxu3 %v8372_v27  ;;  %v10489_v28 = vand.u32 4294901760, %v10488_v50 }
 0x456   :  { %10484 = vst [vmem:[#allocation117_spill] sm:$0xff] %v8374_v2  ;;  %v2369_v15 = vadd.f32 %v2368_v25, %v2094_v53  ;;  %3557 = vmatmul.f32.gmra.mxu0 %v10488_v50  ;;  %v1079_v53 = vadd.f32 %v10491_v52, %v780_v56  ;;  %v788_v56 = vadd.f32 %v7966_v34, %v10496_v32  ;;  %v10497_v52 = vld [vmem:[#allocation9_spill] sm:$0xff] }
 0x457   :  { %10485 = vst [vmem:[#allocation89_spill] sm:$0xff] %v8377_v5  ;;  %v10047_v40 = vand.u32 4294901760, %v8377_v5  ;;  %3908 = vmatmul.f32.gmra.mxu1 %v10489_v28  ;;  %v10500_v32 = vld [vmem:[#allocation97_spill] sm:$0xff] }
 0x458   :  { %v2452_v20 = vmax.f32 %v2369_v15, 0.0  ;;  %v2998_v36 = vpop.f32.mrf.mxu2  ;;  %v3391_v51 = vpop.f32.mrf.mxu3 }
 0x459   :  { %v2999_v1 = vadd.f32 %v8102_v61, %v2998_v36  ;;  %v3131_v57 = vsub.f32 %v8377_v5, %v10047_v40  ;;  %v10495_v40 = vld [vmem:[#allocation6_spill] sm:$0xff] }
 0x45a   :  { %v2640_v25 = vsel %vm2467_vm1, %v2452_v20, 0  ;;  %v1416_v44 = vadd.f32 %v10495_v40, %v1079_v53  ;;  %v10499_v53 = vld [vmem:[#allocation4_spill] sm:$0xff] }
 0x45b   :  { %v8394_v27 = vand.u32 4294901760, %v2640_v25  ;;  %v2097_v15 = vpop.f32.mrf.mxu0  ;;  %v3132_v2 = vand.u32 4294901760, %v3131_v57  ;;  %v8396_v39 = vadd.f32 %v3387_v14, %v2999_v1 }
 0x45c   :  { %v2098_v50 = vadd.f32 %v2097_v15, %v1809_v11  ;;  %v2372_v36 = vpop.f32.mrf.mxu1  ;;  %v1815_v15 = vadd.f32 %v10499_v53, %v1416_v44  ;;  %v10505_v53 = vld [vmem:[#allocation98_spill] sm:$0xff] }
 0x45d   :  { %10492 = vst [vmem:[#allocation124_spill] sm:$0xff] %v8394_v27  ;;  %v8399_v28 = vsub.f32 %v2640_v25, %v8394_v27  ;;  %3133 = vmatmul.f32.gmra.mxu2 %v3132_v2  ;;  %3458 = vmatmul.f32.gmra.mxu3 %v8394_v27  ;;  %v10498_v25 = vand.u32 4294901760, %v10497_v52 }
 0x45e   :  { %10493 = vst [vmem:[#allocation90_spill] sm:$0xff] %v8396_v39  ;;  %v2373_v20 = vadd.f32 %v2372_v36, %v2098_v50  ;;  %3562 = vmatmul.f32.gmra.mxu0 %v10497_v52  ;;  %v1083_v50 = vadd.f32 %v10500_v32, %v788_v56  ;;  %v796_v56 = vadd.f32 %v7966_v34, %v10505_v53  ;;  %v10506_v32 = vld [vmem:[#allocation11_spill] sm:$0xff] }
 0x45f   :  { %10494 = vst [vmem:[#allocation123_spill] sm:$0xff] %v8399_v28  ;;  %v10052_v57 = vand.u32 4294901760, %v8399_v28  ;;  %3914 = vmatmul.f32.gmra.mxu1 %v10498_v25  ;;  %v10509_v53 = vld [vmem:[#allocation99_spill] sm:$0xff] }
 0x460   :  { %v2453_v14 = vmax.f32 %v2373_v20, 0.0  ;;  %v3006_v1 = vpop.f32.mrf.mxu2  ;;  %v3395_v11 = vpop.f32.mrf.mxu3 }
 0x461   :  { %v3007_v2 = vadd.f32 %v8102_v61, %v3006_v1  ;;  %v3139_v40 = vsub.f32 %v8399_v28, %v10052_v57  ;;  %v10504_v57 = vld [vmem:[#allocation8_spill] sm:$0xff]  ;;  %v10591_v28 = vand.u32 4294901760, %v7807_v38 }
 0x462   :  { %v2643_v36 = vsel %vm2467_vm1, %v2453_v14, 0  ;;  %v1421_v44 = vadd.f32 %v10504_v57, %v1083_v50  ;;  %v10508_v50 = vld [vmem:[#allocation131_spill] sm:$0xff] }
 0x463   :  { %v8416_v27 = vand.u32 4294901760, %v2643_v36  ;;  %v2101_v20 = vpop.f32.mrf.mxu0  ;;  %v3140_v39 = vand.u32 4294901760, %v3139_v40  ;;  %v8418_v23 = vadd.f32 %v3391_v51, %v3007_v2 }
 0x464   :  { %v2102_v52 = vadd.f32 %v2101_v20, %v1815_v15  ;;  %v2376_v1 = vpop.f32.mrf.mxu1  ;;  %v1821_v20 = vadd.f32 %v10508_v50, %v1421_v44  ;;  %v10514_v50 = vld [vmem:[#allocation100_spill] sm:$0xff] }
 0x465   :  { %10501 = vst [vmem:[#allocation121_spill] sm:$0xff] %v8416_v27  ;;  %v8421_v25 = vsub.f32 %v2643_v36, %v8416_v27  ;;  %3141 = vmatmul.f32.gmra.mxu2 %v3140_v39  ;;  %3462 = vmatmul.f32.gmra.mxu3 %v8416_v27  ;;  %v10507_v36 = vand.u32 4294901760, %v10506_v32 }
 0x466   :  { %10502 = vst [vmem:[#allocation91_spill] sm:$0xff] %v8418_v23  ;;  %v2377_v14 = vadd.f32 %v2376_v1, %v2102_v52  ;;  %3567 = vmatmul.f32.gmra.mxu0 %v10506_v32  ;;  %v1087_v52 = vadd.f32 %v10509_v53, %v796_v56  ;;  %v804_v56 = vadd.f32 %v7966_v34, %v10514_v50  ;;  %v10515_v53 = vld [vmem:[#allocation13_spill] sm:$0xff] }
 0x467   :  { %10503 = vst [vmem:[#allocation127_spill] sm:$0xff] %v8421_v25  ;;  %v10055_v40 = vand.u32 4294901760, %v8421_v25  ;;  %3920 = vmatmul.f32.gmra.mxu1 %v10507_v36  ;;  %v10518_v34 = vld [vmem:[#allocation101_spill] sm:$0xff] }
 0x468   :  { %v2454_v51 = vmax.f32 %v2377_v14, 0.0  ;;  %v3014_v2 = vpop.f32.mrf.mxu2  ;;  %v3399_v15 = vpop.f32.mrf.mxu3 }
 0x469   :  { %v3015_v39 = vadd.f32 %v8102_v61, %v3014_v2  ;;  %v3147_v57 = vsub.f32 %v8421_v25, %v10055_v40  ;;  %v10513_v40 = vld [vmem:[#allocation135_spill] sm:$0xff] }
 0x46a   :  { %v2646_v1 = vsel %vm2467_vm1, %v2454_v51, 0  ;;  %v1426_v44 = vadd.f32 %v10513_v40, %v1087_v52  ;;  %v10517_v52 = vld [vmem:[#allocation134_spill] sm:$0xff] }
 0x46b   :  { %v8438_v27 = vand.u32 4294901760, %v2646_v1  ;;  %v2105_v14 = vpop.f32.mrf.mxu0  ;;  %v3148_v23 = vand.u32 4294901760, %v3147_v57  ;;  %v8440_v33 = vadd.f32 %v3395_v11, %v3015_v39 }
 0x46c   :  { %v2106_v32 = vadd.f32 %v2105_v14, %v1821_v20  ;;  %v2380_v2 = vpop.f32.mrf.mxu1  ;;  %v1827_v14 = vadd.f32 %v10517_v52, %v1426_v44 }
 0x46d   :  { %10510 = vst [vmem:[#allocation92_spill] sm:$0xff] %v8438_v27  ;;  %v8443_v36 = vsub.f32 %v2646_v1, %v8438_v27  ;;  %3149 = vmatmul.f32.gmra.mxu2 %v3148_v23  ;;  %3466 = vmatmul.f32.gmra.mxu3 %v8438_v27  ;;  %v10516_v1 = vand.u32 4294901760, %v10515_v53 }
 0x46e   :  { %10511 = vst [vmem:[#allocation5_spill] sm:$0xff] %v8440_v33  ;;  %v2381_v51 = vadd.f32 %v2380_v2, %v2106_v32  ;;  %3572 = vmatmul.f32.gmra.mxu0 %v10515_v53  ;;  %v1091_v32 = vadd.f32 %v10518_v34, %v804_v56  ;;  %v6408_v56 = vld [vmem:[%s9752_s2] ss:$0 sm:$0xff] }
 0x46f   :  { %10512 = vst [vmem:[#allocation126_spill] sm:$0xff] %v8443_v36  ;;  %v10058_v57 = vand.u32 4294901760, %v8443_v36  ;;  %3926 = vmatmul.f32.gmra.mxu1 %v10516_v1 }
 0x470   :  { %v2455_v11 = vmax.f32 %v2381_v51, 0.0  ;;  %v3022_v39 = vpop.f32.mrf.mxu2  ;;  %v3403_v20 = vpop.f32.mrf.mxu3 }
 0x471   :  { %v3023_v23 = vadd.f32 %v8102_v61, %v3022_v39  ;;  %v3155_v40 = vsub.f32 %v8443_v36, %v10058_v57  ;;  %v10522_v57 = vld [vmem:[#allocation137_spill] sm:$0xff] }
 0x472   :  { %v2649_v2 = vsel %vm2467_vm1, %v2455_v11, 0  ;;  %v1431_v44 = vadd.f32 %v10522_v57, %v1091_v32  ;;  %v10523_v11 = vld [vmem:[#allocation102_spill] sm:$0xff]  ;;  %v10526_v32 = vld [vmem:[#allocation136_spill] sm:$0xff] }
 0x473   :  { %v8460_v50 = vand.u32 4294901760, %v2649_v2  ;;  %v2109_v51 = vpop.f32.mrf.mxu0  ;;  %v3156_v27 = vand.u32 4294901760, %v3155_v40  ;;  %v8462_v33 = vadd.f32 %v3399_v15, %v3023_v23  ;;  %v812_v52 = vadd.f32 %v6408_v56, %v10523_v11  ;;  %v10524_v40 = vld [vmem:[#allocation15_spill] sm:$0xff]  ;;  %v10527_v56 = vld [vmem:[#allocation104_spill] sm:$0xff] }
 0x474   :  { %v2110_v53 = vadd.f32 %v2109_v51, %v1827_v14  ;;  %v2384_v39 = vpop.f32.mrf.mxu1 }
 0x475   :  { %10519 = vst [vmem:[#allocation93_spill] sm:$0xff] %v8460_v50  ;;  %v8465_v1 = vsub.f32 %v2649_v2, %v8460_v50  ;;  %3157 = vmatmul.f32.gmra.mxu2 %v3156_v27  ;;  %3470 = vmatmul.f32.gmra.mxu3 %v8460_v50  ;;  %v10525_v27 = vand.u32 4294901760, %v10524_v40  ;;  %v1833_v50 = vadd.f32 %v10526_v32, %v1431_v44 }
 0x476   :  { %10520 = vst [vmem:[#allocation129_spill] sm:$0xff] %v8462_v33  ;;  %v2385_v34 = vadd.f32 %v2384_v39, %v2110_v53  ;;  %3577 = vmatmul.f32.gmra.mxu0 %v10524_v40  ;;  %v1095_v53 = vadd.f32 %v10527_v56, %v812_v52  ;;  %v10532_v52 = vld [vmem:[#allocation17_spill] sm:$0xff] }
 0x477   :  { %10521 = vst [vmem:[#allocation94_spill] sm:$0xff] %v8465_v1  ;;  %v10063_v15 = vand.u32 4294901760, %v8465_v1  ;;  %3932 = vmatmul.f32.gmra.mxu1 %v10525_v27 }
 0x478   :  { %v2456_v23 = vmax.f32 %v2385_v34, 0.0  ;;  %v3030_v14 = vpop.f32.mrf.mxu2  ;;  %v3407_v2 = vpop.f32.mrf.mxu3 }
 0x479   :  { %v3031_v51 = vadd.f32 %v8102_v61, %v3030_v14  ;;  %v3163_v57 = vsub.f32 %v8465_v1, %v10063_v15  ;;  %v10531_v15 = vld [vmem:[#allocation16_spill] sm:$0xff] }
 0x47a   :  { %v2652_v39 = vsel %vm2467_vm1, %v2456_v23, 0  ;;  %v1436_v44 = vadd.f32 %v10531_v15, %v1095_v53 }
 0x47b   :  { %v8484_v11 = vand.u32 4294901760, %v2652_v39  ;;  %v2113_v34 = vpop.f32.mrf.mxu0  ;;  %v3164_v33 = vand.u32 4294901760, %v3163_v57  ;;  %v8486_v41 = vadd.f32 %v3403_v20, %v3031_v51  ;;  %v10533_v20 = vand.u32 4294901760, %v10532_v52  ;;  %v10534_v51 = vld [vmem:[#allocation14_spill] sm:$0xff] }
 0x47c   :  { %v2114_v40 = vadd.f32 %v2113_v34, %v1833_v50  ;;  %v2388_v14 = vpop.f32.mrf.mxu1 }
 0x47d   :  { %10528 = vst [vmem:[#allocation7_spill] sm:$0xff] %v8484_v11  ;;  %v8489_v27 = vsub.f32 %v2652_v39, %v8484_v11  ;;  %3165 = vmatmul.f32.gmra.mxu2 %v3164_v33  ;;  %3474 = vmatmul.f32.gmra.mxu3 %v8484_v11  ;;  %v1839_v39 = vadd.f32 %v10534_v51, %v1436_v44 }
 0x47e   :  { %10529 = vst [vmem:[#allocation128_spill] sm:$0xff] %v8486_v41  ;;  %v2389_v32 = vadd.f32 %v2388_v14, %v2114_v40  ;;  %3582 = vmatmul.f32.gmra.mxu0 %v10532_v52 }
 0x47f   :  { %10530 = vst [vmem:[#allocation95_spill] sm:$0xff] %v8489_v27  ;;  %v10064_v23 = vand.u32 4294901760, %v8489_v27  ;;  %3938 = vmatmul.f32.gmra.mxu1 %v10533_v20 }
 0x480   :  { %v2457_v56 = vmax.f32 %v2389_v32, 0.0  ;;  %v3038_v59 = vpop.f32.mrf.mxu2  ;;  %v3411_v57 = vpop.f32.mrf.mxu3 }
 0x481   :  { %v3039_v50 = vadd.f32 %v8102_v61, %v3038_v59  ;;  %v3171_v33 = vsub.f32 %v8489_v27, %v10064_v23  ;;  %v10538_v23 = vld [vmem:[#allocation19_spill] sm:$0xff] }
 0x482   :  { %v2655_v15 = vsel %vm2467_vm1, %v2457_v56, 0 }
 0x483   :  { %v8503_v53 = vand.u32 4294901760, %v2655_v15  ;;  %v2117_v34 = vpop.f32.mrf.mxu0  ;;  %v3172_v40 = vand.u32 4294901760, %v3171_v33  ;;  %v8505_v14 = vadd.f32 %v3407_v2, %v3039_v50  ;;  %v10539_v33 = vand.u32 4294901760, %v10538_v23 }
 0x484   :  { %v2118_v32 = vadd.f32 %v2117_v34, %v1839_v39  ;;  %v2392_v20 = vpop.f32.mrf.mxu1 }
 0x485   :  { %10535 = vst [vmem:[#allocation6_spill] sm:$0xff] %v8503_v53  ;;  %v8508_v52 = vsub.f32 %v2655_v15, %v8503_v53  ;;  %3173 = vmatmul.f32.gmra.mxu2 %v3172_v40  ;;  %3478 = vmatmul.f32.gmra.mxu3 %v8503_v53  ;;  %v10546_v53 = vld [vmem:[#allocation106_spill] sm:$0xff] }
 0x486   :  { %10536 = vst [vmem:[#allocation96_spill] sm:$0xff] %v8505_v14  ;;  %v2393_v59 = vadd.f32 %v2392_v20, %v2118_v32  ;;  %3587 = vmatmul.f32.gmra.mxu0 %v10538_v23 }
 0x487   :  { %10537 = vst [vmem:[#allocation9_spill] sm:$0xff] %v8508_v52  ;;  %v10067_v44 = vand.u32 4294901760, %v8508_v52  ;;  %3944 = vmatmul.f32.gmra.mxu1 %v10539_v33 }
 0x488   :  { %v2458_v56 = vmax.f32 %v2393_v59, 0.0  ;;  %v3046_v51 = vpop.f32.mrf.mxu2  ;;  %v3415_v11 = vpop.f32.mrf.mxu3  ;;  %v10543_v59 = vld [vmem:[#allocation21_spill] sm:$0xff] }
 0x489   :  { %v3047_v2 = vadd.f32 %v8102_v61, %v3046_v51  ;;  %v3179_v50 = vsub.f32 %v8508_v52, %v10067_v44  ;;  %v10544_v44 = vand.u32 4294901760, %v10543_v59 }
 0x48a   :  { %v2658_v39 = vsel %vm2467_vm1, %v2458_v56, 0 }
 0x48b   :  { %v8520_v15 = vand.u32 4294901760, %v2658_v39  ;;  %v8522_v34 = vpop.f32.mrf.mxu0  ;;  %v3180_v40 = vand.u32 4294901760, %v3179_v50  ;;  %v8524_v32 = vadd.f32 %v3411_v57, %v3047_v2 }
 0x48c   :  { %v8530_v23 = vpop.f32.mrf.mxu1 }
 0x48d   :  { %10540 = vst [vmem:[#allocation4_spill] sm:$0xff] %v8520_v15  ;;  %v8527_v20 = vsub.f32 %v2658_v39, %v8520_v15  ;;  %3181 = vmatmul.f32.gmra.mxu2 %v3180_v40  ;;  %3482 = vmatmul.f32.gmra.mxu3 %v8520_v15 }
 0x48e   :  { %10541 = vst [vmem:[#allocation97_spill] sm:$0xff] %v8524_v32  ;;  %3592 = vmatmul.f32.gmra.mxu0 %v10543_v59  ;;  %v10547_v32 = vld [vmem:[#allocation23_spill] sm:$0xff] }
 0x48f   :  { %10542 = vst [vmem:[#allocation8_spill] sm:$0xff] %v8527_v20  ;;  %v10072_v51 = vand.u32 4294901760, %v8527_v20  ;;  %3950 = vmatmul.f32.gmra.mxu1 %v10544_v44 }
 0x490   :  { %v3054_v56 = vpop.f32.mrf.mxu2  ;;  %v3419_v33 = vpop.f32.mrf.mxu3 }
 0x491   :  { %v3055_v57 = vadd.f32 %v8102_v61, %v3054_v56  ;;  %v3187_v2 = vsub.f32 %v8527_v20, %v10072_v51  ;;  %v10548_v56 = vand.u32 4294901760, %v10547_v32 }
 0x493   :  { %v8540_v50 = vpop.f32.mrf.mxu0  ;;  %v3188_v39 = vand.u32 4294901760, %v3187_v2  ;;  %v8542_v40 = vadd.f32 %v3415_v11, %v3055_v57  ;;  %v10550_v57 = vld [vmem:[#allocation107_spill] sm:$0xff]  ;;  %v10551_v2 = vld [vmem:[#allocation25_spill] sm:$0xff] }
 0x494   :  { %v8544_v15 = vpop.f32.mrf.mxu1  ;;  %v10552_v20 = vand.u32 4294901760, %v10551_v2 }
 0x495   :  { %10545 = vst [vmem:[#allocation98_spill] sm:$0xff] %v8542_v40  ;;  %3189 = vmatmul.f32.gmra.mxu2 %v3188_v39  ;;  %4542 = vmatmul.f32.vlgmr.msra.gmra.mxu3 %v10546_v53 }
 0x496   :  { %3597 = vmatmul.f32.gmra.mxu0 %v10547_v32 }
 0x497   :  { %3956 = vmatmul.f32.gmra.mxu1 %v10548_v56 }
 0x498   :  { %v3062_v59 = vpop.f32.mrf.mxu2  ;;  %v3423_v44 = vpop.f32.mrf.mxu3 }
 0x499   :  { %v3063_v14 = vadd.f32 %v8102_v61, %v3062_v59 }
 0x49b   :  { %v8551_v51 = vpop.f32.mrf.mxu0  ;;  %v8553_v41 = vadd.f32 %v3419_v33, %v3063_v14  ;;  %v10555_v33 = vld [vmem:[#allocation27_spill] sm:$0xff] }
 0x49c   :  { %v8555_v11 = vpop.f32.mrf.mxu1  ;;  %v10556_v35 = vand.u32 4294901760, %v10555_v33 }
 0x49d   :  { %10549 = vst [vmem:[#allocation11_spill] sm:$0xff] %v8553_v41  ;;  %4265 = vmatmul.f32.vlgmr.msra.gmra.mxu2 %v10546_v53  ;;  %4546 = vmatmul.f32.gmra.mxu3 %v10550_v57  ;;  %v10554_v53 = vld [vmem:[#allocation109_spill] sm:$0xff] }
 0x49e   :  { %3602 = vmatmul.f32.gmra.mxu0 %v10551_v2 }
 0x49f   :  { %3962 = vmatmul.f32.gmra.mxu1 %v10552_v20 }
 0x4a0   :  { %v3070_v39 = vpop.f32.mrf.mxu2  ;;  %v3427_v40 = vpop.f32.mrf.mxu3 }
 0x4a1   :  { %v3071_v32 = vadd.f32 %v8102_v61, %v3070_v39 }
 0x4a3   :  { %v8563_v59 = vpop.f32.mrf.mxu0  ;;  %v8565_v56 = vadd.f32 %v3423_v44, %v3071_v32  ;;  %v10559_v32 = vld [vmem:[#allocation29_spill] sm:$0xff] }
 0x4a4   :  { %v8567_v14 = vpop.f32.mrf.mxu1  ;;  %v10560_v17 = vand.u32 4294901760, %v10559_v32 }
 0x4a5   :  { %10553 = vst [vmem:[#allocation131_spill] sm:$0xff] %v8565_v56  ;;  %4269 = vmatmul.f32.gmra.mxu2 %v10550_v57  ;;  %4550 = vmatmul.f32.gmra.mxu3 %v10554_v53  ;;  %v10558_v57 = vld [vmem:[#allocation110_spill] sm:$0xff] }
 0x4a6   :  { %3607 = vmatmul.f32.gmra.mxu0 %v10555_v33 }
 0x4a7   :  { %3968 = vmatmul.f32.gmra.mxu1 %v10556_v35 }
 0x4a8   :  { %v3078_v41 = vpop.f32.mrf.mxu2  ;;  %v3431_v47 = vpop.f32.mrf.mxu3 }
 0x4a9   :  { %v3079_v20 = vadd.f32 %v8102_v61, %v3078_v41 }
 0x4ab   :  { %v8575_v2 = vpop.f32.mrf.mxu0  ;;  %v8577_v39 = vadd.f32 %v3427_v40, %v3079_v20  ;;  %v10563_v20 = vld [vmem:[#allocation31_spill] sm:$0xff] }
 0x4ac   :  { %v8579_v44 = vpop.f32.mrf.mxu1  ;;  %v10564_v27 = vand.u32 4294901760, %v10563_v20 }
 0x4ad   :  { %10557 = vst [vmem:[#allocation99_spill] sm:$0xff] %v8577_v39  ;;  %4273 = vmatmul.f32.gmra.mxu2 %v10554_v53  ;;  %4554 = vmatmul.f32.gmra.mxu3 %v10558_v57  ;;  %v10562_v53 = vld [vmem:[#allocation112_spill] sm:$0xff] }
 0x4ae   :  { %3612 = vmatmul.f32.gmra.mxu0 %v10559_v32 }
 0x4af   :  { %3974 = vmatmul.f32.gmra.mxu1 %v10560_v17 }
 0x4b0   :  { %v3086_v56 = vpop.f32.mrf.mxu2  ;;  %v3435_v52 = vpop.f32.mrf.mxu3 }
 0x4b1   :  { %v3087_v35 = vadd.f32 %v8102_v61, %v3086_v56 }
 0x4b3   :  { %v8587_v41 = vpop.f32.mrf.mxu0  ;;  %v8589_v33 = vadd.f32 %v3431_v47, %v3087_v35  ;;  %v10567_v35 = vld [vmem:[#allocation33_spill] sm:$0xff] }
 0x4b4   :  { %v8591_v40 = vpop.f32.mrf.mxu1  ;;  %v10568_v60 = vand.u32 4294901760, %v10567_v35 }
 0x4b5   :  { %10561 = vst [vmem:[#allocation135_spill] sm:$0xff] %v8589_v33  ;;  %4277 = vmatmul.f32.gmra.mxu2 %v10558_v57  ;;  %4558 = vmatmul.f32.gmra.mxu3 %v10562_v53  ;;  %v10566_v57 = vld [vmem:[#allocation114_spill] sm:$0xff] }
 0x4b6   :  { %3617 = vmatmul.f32.gmra.mxu0 %v10563_v20 }
 0x4b7   :  { %3980 = vmatmul.f32.gmra.mxu1 %v10564_v27 }
 0x4b8   :  { %v3094_v39 = vpop.f32.mrf.mxu2  ;;  %v3439_v43 = vpop.f32.mrf.mxu3 }
 0x4b9   :  { %v3095_v17 = vadd.f32 %v8102_v61, %v3094_v39 }
 0x4bb   :  { %v8599_v56 = vpop.f32.mrf.mxu0  ;;  %v8601_v32 = vadd.f32 %v3435_v52, %v3095_v17  ;;  %v10570_v52 = vld [vmem:[#allocation118_spill] sm:$0xff] }
 0x4bc   :  { %v8603_v47 = vpop.f32.mrf.mxu1 }
 0x4bd   :  { %10565 = vst [vmem:[#allocation100_spill] sm:$0xff] %v8601_v32  ;;  %4281 = vmatmul.f32.gmra.mxu2 %v10562_v53  ;;  %4562 = vmatmul.f32.gmra.mxu3 %v10566_v57  ;;  %v10571_v53 = vld [vmem:[#allocation35_spill] sm:$0xff] }
 0x4be   :  { %3622 = vmatmul.f32.gmra.mxu0 %v10567_v35  ;;  %v10572_v9 = vand.u32 4294901760, %v10571_v53 }
 0x4bf   :  { %3986 = vmatmul.f32.gmra.mxu1 %v10568_v60 }
 0x4c0   :  { %v3102_v33 = vpop.f32.mrf.mxu2  ;;  %v3443_v22 = vpop.f32.mrf.mxu3 }
 0x4c1   :  { %v3103_v27 = vadd.f32 %v8102_v61, %v3102_v33  ;;  %v8625_v61 = vld [vmem:[%s9754_s4] ss:$0 sm:$0xff] }
 0x4c2   :  { %v10574_v33 = vld [vmem:[#allocation122_spill] sm:$0xff] }
 0x4c3   :  { %v8611_v39 = vadd.f32 %v3439_v43, %v3103_v27  ;;  %v8613_v20 = vpop.f32.mrf.mxu0 }
 0x4c4   :  { %v8618_v17 = vpop.f32.mrf.mxu1 }
 0x4c5   :  { %10569 = vst [vmem:[#allocation13_spill] sm:$0xff] %v8611_v39  ;;  %4285 = vmatmul.f32.gmra.mxu2 %v10566_v57  ;;  %4566 = vmatmul.f32.gmra.mxu3 %v10570_v52  ;;  %v10575_v57 = vld [vmem:[#allocation37_spill] sm:$0xff] }
 0x4c6   :  { %3627 = vmatmul.f32.gmra.mxu0 %v10571_v53 }
 0x4c7   :  { %3992 = vmatmul.f32.gmra.mxu1 %v10572_v9  ;;  %v10576_v9 = vand.u32 4294901760, %v10575_v57 }
 0x4c8   :  { %v3110_v32 = vpop.f32.mrf.mxu2  ;;  %v3447_v1 = vpop.f32.mrf.mxu3 }
 0x4c9   :  { %v3111_v60 = vadd.f32 %v8625_v61, %v3110_v32 }
 0x4cb   :  { %v8628_v43 = vadd.f32 %v3443_v22, %v3111_v60  ;;  %v8633_v35 = vpop.f32.mrf.mxu0  ;;  %v10578_v22 = vld [vmem:[#allocation125_spill] sm:$0xff] }
 0x4cc   :  { %v8637_v39 = vpop.f32.mrf.mxu1 }
 0x4cd   :  { %10573 = vst [vmem:[#allocation134_spill] sm:$0xff] %v8628_v43  ;;  %4289 = vmatmul.f32.gmra.mxu2 %v10570_v52  ;;  %4570 = vmatmul.f32.gmra.mxu3 %v10574_v33  ;;  %v10579_v52 = vld [vmem:[#allocation39_spill] sm:$0xff] }
 0x4ce   :  { %3632 = vmatmul.f32.gmra.mxu0 %v10575_v57  ;;  %v10580_v36 = vand.u32 4294901760, %v10579_v52 }
 0x4cf   :  { %3998 = vmatmul.f32.gmra.mxu1 %v10576_v9 }
 0x4d0   :  { %v3118_v27 = vpop.f32.mrf.mxu2  ;;  %v3451_v53 = vpop.f32.mrf.mxu3 }
 0x4d1   :  { %v3119_v58 = vadd.f32 %v8625_v61, %v3118_v27 }
 0x4d3   :  { %v8640_v32 = vadd.f32 %v3447_v1, %v3119_v58  ;;  %v8647_v19 = vpop.f32.mrf.mxu0  ;;  %v10582_v58 = vld [vmem:[#allocation2_spill] sm:$0xff]  ;;  %v10583_v1 = vld [vmem:[#allocation41_spill] sm:$0xff] }
 0x4d4   :  { %v8650_v9 = vpop.f32.mrf.mxu1  ;;  %v10584_v0 = vand.u32 4294901760, %v10583_v1 }
 0x4d5   :  { %10577 = vst [vmem:[#allocation101_spill] sm:$0xff] %v8640_v32  ;;  %4293 = vmatmul.f32.gmra.mxu2 %v10574_v33  ;;  %4574 = vmatmul.f32.gmra.mxu3 %v10578_v22 }
 0x4d6   :  { %3637 = vmatmul.f32.gmra.mxu0 %v10579_v52 }
 0x4d7   :  { %4004 = vmatmul.f32.gmra.mxu1 %v10580_v36 }
 0x4d8   :  { %v3126_v60 = vpop.f32.mrf.mxu2  ;;  %v3455_v43 = vpop.f32.mrf.mxu3 }
 0x4d9   :  { %v3127_v57 = vadd.f32 %v8625_v61, %v3126_v60 }
 0x4db   :  { %v8652_v27 = vadd.f32 %v3451_v53, %v3127_v57  ;;  %v8660_v52 = vpop.f32.mrf.mxu0  ;;  %v10586_v53 = vld [vmem:[#allocation3_spill] sm:$0xff] }
 0x4dc   :  { %v8664_v25 = vpop.f32.mrf.mxu1 }
 0x4dd   :  { %10581 = vst [vmem:[#allocation137_spill] sm:$0xff] %v8652_v27  ;;  %4297 = vmatmul.f32.gmra.mxu2 %v10578_v22  ;;  %4578 = vmatmul.f32.gmra.mxu3 %v10582_v58  ;;  %v10587_v22 = vld [vmem:[#allocation43_spill] sm:$0xff] }
 0x4de   :  { %3642 = vmatmul.f32.gmra.mxu0 %v10583_v1  ;;  %v10588_v21 = vand.u32 4294901760, %v10587_v22 }
 0x4df   :  { %4010 = vmatmul.f32.gmra.mxu1 %v10584_v0 }
 0x4e0   :  { %v3134_v33 = vpop.f32.mrf.mxu2  ;;  %v3459_v32 = vpop.f32.mrf.mxu3 }
 0x4e1   :  { %v3135_v36 = vadd.f32 %v8625_v61, %v3134_v33 }
 0x4e3   :  { %v8662_v60 = vadd.f32 %v3455_v43, %v3135_v36  ;;  %v8674_v33 = vpop.f32.mrf.mxu0  ;;  %v10590_v43 = vld [vmem:[#allocation130_spill] sm:$0xff] }
 0x4e5   :  { %10585 = vst [vmem:[#allocation102_spill] sm:$0xff] %v8662_v60  ;;  %4301 = vmatmul.f32.gmra.mxu2 %v10582_v58  ;;  %4582 = vmatmul.f32.gmra.mxu3 %v10586_v53  ;;  %v8679_v58 = vpop.f32.mrf.mxu1 }
 0x4e6   :  { %3647 = vmatmul.f32.gmra.mxu0 %v10587_v22 }
 0x4e7   :  { %4016 = vmatmul.f32.gmra.mxu1 %v10588_v21 }
 0x4e8   :  { %v3142_v57 = vpop.f32.mrf.mxu2  ;;  %v3463_v27 = vpop.f32.mrf.mxu3 }
 0x4e9   :  { %v3143_v0 = vadd.f32 %v8625_v61, %v3142_v57 }
 0x4eb   :  { %v8672_v1 = vadd.f32 %v3459_v32, %v3143_v0  ;;  %v10593_v32 = vld [vmem:[#allocation132_spill] sm:$0xff]  ;;  %v8689_v57 = vpop.f32.mrf.mxu0 }
 0x4ed   :  { %10589 = vst [vmem:[#allocation15_spill] sm:$0xff] %v8672_v1  ;;  %4305 = vmatmul.f32.gmra.mxu2 %v10586_v53  ;;  %4586 = vmatmul.f32.gmra.mxu3 %v10590_v43  ;;  %v10594_v53 = vld [vmem:[#allocation47_spill] sm:$0xff]  ;;  %v8693_v5 = vpop.f32.mrf.mxu1 }
 0x4ee   :  { %3652 = vmatmul.f32.gmra.mxu0 %v7807_v38  ;;  %v10595_v13 = vand.u32 4294901760, %v10594_v53 }
 0x4ef   :  { %4022 = vmatmul.f32.gmra.mxu1 %v10591_v28 }
 0x4f0   :  { %v3150_v36 = vpop.f32.mrf.mxu2  ;;  %v3467_v60 = vpop.f32.mrf.mxu3 }
 0x4f1   :  { %v3151_v21 = vadd.f32 %v8625_v61, %v3150_v36 }
 0x4f3   :  { %v8684_v22 = vadd.f32 %v3463_v27, %v3151_v21  ;;  %v10597_v27 = vld [vmem:[#allocation133_spill] sm:$0xff]  ;;  %v8703_v48 = vpop.f32.mrf.mxu0 }
 0x4f5   :  { %10592 = vst [vmem:[#allocation136_spill] sm:$0xff] %v8684_v22  ;;  %4309 = vmatmul.f32.gmra.mxu2 %v10590_v43  ;;  %4590 = vmatmul.f32.gmra.mxu3 %v10593_v32  ;;  %v10598_v43 = vld [vmem:[#allocation152_spill] sm:$0xff] }
 0x4f6   :  { %3657 = vmatmul.f32.gmra.mxu0 %v10594_v53  ;;  %v10599_v22 = vand.u32 4294901760, %v10598_v43  ;;  %v8706_v53 = vpop.f32.mrf.mxu1 }
 0x4f7   :  { %4028 = vmatmul.f32.gmra.mxu1 %v10595_v13 }
 0x4f8   :  { %v3158_v0 = vpop.f32.mrf.mxu2  ;;  %v3471_v1 = vpop.f32.mrf.mxu3 }
 0x4f9   :  { %v3159_v38 = vadd.f32 %v8625_v61, %v3158_v0 }
 0x4fb   :  { %v8696_v28 = vadd.f32 %v3467_v60, %v3159_v38  ;;  %v10601_v60 = vld [vmem:[#allocation10_spill] sm:$0xff] }
 0x4fd   :  { %10596 = vst [vmem:[#allocation104_spill] sm:$0xff] %v8696_v28  ;;  %4313 = vmatmul.f32.gmra.mxu2 %v10593_v32  ;;  %4594 = vmatmul.f32.gmra.mxu3 %v10597_v27  ;;  %v10602_v32 = vld [vmem:[#allocation50_spill] sm:$0xff] }
 0x4fe   :  { %3662 = vmatmul.f32.gmra.mxu0 %v10598_v43  ;;  %v10603_v7 = vand.u32 4294901760, %v10602_v32  ;;  %v8716_v43 = vpop.f32.mrf.mxu0  ;;  %v8720_v46 = vpop.f32.mrf.mxu1 }
 0x4ff   :  { %4034 = vmatmul.f32.gmra.mxu1 %v10599_v22 }
 0x500   :  { %v3166_v36 = vpop.f32.mrf.mxu2  ;;  %v3475_v21 = vpop.f32.mrf.mxu3 }
 0x501   :  { %v3167_v13 = vadd.f32 %v8625_v61, %v3166_v36 }
 0x503   :  { %v8708_v0 = vadd.f32 %v3471_v1, %v3167_v13  ;;  %v10605_v1 = vld [vmem:[#allocation12_spill] sm:$0xff] }
 0x505   :  { %10600 = vst [vmem:[#allocation16_spill] sm:$0xff] %v8708_v0  ;;  %4317 = vmatmul.f32.gmra.mxu2 %v10597_v27  ;;  %4598 = vmatmul.f32.gmra.mxu3 %v10601_v60  ;;  %v10606_v27 = vld [vmem:[#allocation52_spill] sm:$0xff] }
 0x506   :  { %3667 = vmatmul.f32.gmra.mxu0 %v10602_v32  ;;  %v10607_v49 = vand.u32 4294901760, %v10606_v27 }
 0x507   :  { %4040 = vmatmul.f32.gmra.mxu1 %v10603_v7 }
 0x508   :  { %v3174_v38 = vpop.f32.mrf.mxu2  ;;  %v3479_v28 = vpop.f32.mrf.mxu3 }
 0x509   :  { %v3175_v22 = vadd.f32 %v8625_v61, %v3174_v38  ;;  %v8730_v38 = vpop.f32.mrf.mxu0 }
 0x50b   :  { %v8718_v36 = vadd.f32 %v3475_v21, %v3175_v22  ;;  %v10609_v21 = vld [vmem:[#allocation138_spill] sm:$0xff]  ;;  %v8735_v22 = vpop.f32.mrf.mxu1 }
 0x50d   :  { %10604 = vst [vmem:[#allocation17_spill] sm:$0xff] %v8718_v36  ;;  %4321 = vmatmul.f32.gmra.mxu2 %v10601_v60  ;;  %4602 = vmatmul.f32.gmra.mxu3 %v10605_v1  ;;  %v10610_v60 = vld [vmem:[#allocation54_spill] sm:$0xff] }
 0x50e   :  { %3672 = vmatmul.f32.gmra.mxu0 %v10606_v27  ;;  %v10611_v55 = vand.u32 4294901760, %v10610_v60 }
 0x50f   :  { %4046 = vmatmul.f32.gmra.mxu1 %v10607_v49 }
 0x510   :  { %v3182_v13 = vpop.f32.mrf.mxu2  ;;  %v3483_v0 = vpop.f32.mrf.mxu3 }
 0x511   :  { %v3183_v7 = vadd.f32 %v8625_v61, %v3182_v13  ;;  %v10612_v13 = vld [vmem:[#allocation140_spill] sm:$0xff]  ;;  %v8748_v24 = vpop.f32.mrf.mxu0 }
 0x513   :  { %v8728_v32 = vadd.f32 %v3479_v28, %v3183_v7  ;;  %v3514_v28 = vadd.f32 %v8522_v34, %v10612_v13 }
 0x515   :  { %10608 = vst [vmem:[#allocation14_spill] sm:$0xff] %v8728_v32  ;;  %4325 = vmatmul.f32.gmra.mxu2 %v10605_v1  ;;  %4606 = vmatmul.f32.gmra.mxu3 %v10609_v21  ;;  %v10614_v1 = vld [vmem:[#allocation139_spill] sm:$0xff]  ;;  %v10615_v32 = vld [vmem:[#allocation56_spill] sm:$0xff]  ;;  %v3856_v10 = vadd.f32 %v8530_v23, %v3514_v28 }
 0x516   :  { %3677 = vmatmul.f32.gmra.mxu0 %v10610_v60 }
 0x517   :  { %4052 = vmatmul.f32.gmra.mxu1 %v10611_v55  ;;  %v10616_v55 = vand.u32 4294901760, %v10615_v32 }
 0x518   :  { %v3190_v36 = vpop.f32.mrf.mxu2  ;;  %v4543_v27 = vpop.f32.mrf.mxu3 }
 0x519   :  { %v3191_v49 = vadd.f32 %v8625_v61, %v3190_v36  ;;  %v8752_v36 = vpop.f32.mrf.mxu1 }
 0x51b   :  { %v8742_v7 = vadd.f32 %v3483_v0, %v3191_v49  ;;  %v10617_v0 = vld [vmem:[#allocation141_spill] sm:$0xff] }
 0x51c   :  { %v3519_v49 = vadd.f32 %v8540_v50, %v10617_v0  ;;  %v10620_v50 = vld [vmem:[#allocation142_spill] sm:$0xff] }
 0x51d   :  { %10613 = vst [vmem:[#allocation19_spill] sm:$0xff] %v8742_v7  ;;  %4329 = vmatmul.f32.gmra.mxu2 %v10609_v21  ;;  %4610 = vmatmul.f32.gmra.mxu3 %v10614_v1  ;;  %v10618_v7 = vld [vmem:[#allocation18_spill] sm:$0xff] }
 0x51e   :  { %3682 = vmatmul.f32.gmra.mxu0 %v10615_v32  ;;  %v3862_v23 = vadd.f32 %v8544_v15, %v3519_v49  ;;  %v10619_v32 = vand.u32 4294901760, %v7926_v62  ;;  %v10621_v15 = vld [vmem:[#allocation20_spill] sm:$0xff] }
 0x51f   :  { %4058 = vmatmul.f32.gmra.mxu1 %v10616_v55 }
 0x520   :  { %v4266_v60 = vpop.f32.mrf.mxu2  ;;  %v4547_v61 = vpop.f32.mrf.mxu3 }
 0x521   :  { %v4267_v34 = vadd.f32 %v4266_v60, %v3856_v10  ;;  %v8762_v10 = vpop.f32.mrf.mxu0 }
 0x523   :  { %v4544_v21 = vadd.f32 %v4543_v27, %v4267_v34  ;;  %v3524_v27 = vadd.f32 %v8551_v51, %v10620_v50  ;;  %v8766_v34 = vpop.f32.mrf.mxu1 }
 0x525   :  { %v6083_v13 = vmul.f32 -1.442695, %v4544_v21  ;;  %4333 = vmatmul.f32.gmra.mxu2 %v10614_v1  ;;  %4614 = vmatmul.f32.gmra.mxu3 %v10618_v7 }
 0x526   :  { %3687 = vmatmul.f32.gmra.mxu0 %v7926_v62  ;;  %v3868_v62 = vadd.f32 %v8555_v11, %v3524_v27  ;;  %v10626_v11 = vld [vmem:[#allocation22_spill] sm:$0xff] }
 0x527   :  { %6149 = vpow2.f32 %v6083_v13  ;;  %4064 = vmatmul.f32.gmra.mxu1 %v10619_v32  ;;  %v10622_v13 = vand.u32 4294901760, %v7943_v26 }
 0x528   :  { %v4270_v28 = vpop.f32.mrf.mxu2  ;;  %v4551_v55 = vpop.f32.mrf.mxu3 }
 0x529   :  { %v4271_v60 = vadd.f32 %v4270_v28, %v3862_v23 }
 0x52b   :  { %v4548_v1 = vadd.f32 %v4547_v61, %v4271_v60  ;;  %v10623_v61 = vld [vmem:[#allocation143_spill] sm:$0xff]  ;;  %v8776_v60 = vpop.f32.mrf.mxu0 }
 0x52c   :  { %v3529_v28 = vadd.f32 %v8563_v59, %v10623_v61  ;;  %10624 = vst [vmem:[#allocation21_spill] sm:$0xff] %v8776_v60  ;;  %v10627_v59 = vand.u32 4294901760, %v7960_v16 }
 0x52d   :  { %v6150_v0 = vpop.eup %6149  ;;  %v6084_v21 = vmul.f32 -1.442695, %v4548_v1  ;;  %4337 = vmatmul.f32.gmra.mxu2 %v10618_v7  ;;  %4618 = vmatmul.f32.gmra.mxu3 %v10621_v15  ;;  %v8778_v1 = vpop.f32.mrf.mxu1 }
 0x52e   :  { %v4990_v49 = vadd.f32 1.0, %v6150_v0  ;;  %3692 = vmatmul.f32.gmra.mxu0 %v7943_v26  ;;  %10625 = vst [vmem:[#allocation106_spill] sm:$0xff] %v8778_v1 }
 0x52f   :  { %6151 = vpow2.f32 %v6084_v21  ;;  %4070 = vmatmul.f32.gmra.mxu1 %v10622_v13  ;;  %v3874_v21 = vadd.f32 %v8567_v14, %v3529_v28 }
 0x530   :  { %6153 = vrcp.f32 %v4990_v49  ;;  %v4274_v51 = vpop.f32.mrf.mxu2  ;;  %v4555_v23 = vpop.f32.mrf.mxu3  ;;  %v5063_v1 = vand.u32 2147483647, %v4990_v49  ;;  %vm5059_vm3 = vweird.f32 %v4990_v49 }
 0x531   :  { %v4275_v32 = vadd.f32 %v4274_v51, %v3868_v62 }
 0x532   :  { %vm5064_vm6 = vcmp.eq.f32.partialorder %v5063_v1, 8.507059e+37 }
 0x533   :  { %v4552_v7 = vadd.f32 %v4551_v55, %v4275_v32  ;;  %v10628_v32 = vld [vmem:[#allocation144_spill] sm:$0xff] }
 0x534   :  { %v3534_v61 = vadd.f32 %v8575_v2, %v10628_v32 }
 0x535   :  { %v6152_v50 = vpop.eup %6151  ;;  %v6085_v0 = vmul.f32 -1.442695, %v4552_v7  ;;  %4341 = vmatmul.f32.gmra.mxu2 %v10621_v15  ;;  %4622 = vmatmul.f32.gmra.mxu3 %v10626_v11  ;;  %v5065_v7 = vand.u32 2147483648, %v4990_v49 }
 0x536   :  { %v6154_v27 = vpop.eup %6153  ;;  %v8782_v26 = vadd.f32 1.0, %v6152_v50  ;;  %3697 = vmatmul.f32.gmra.mxu0 %v7960_v16  ;;  %v10629_v16 = vld [vmem:[#allocation24_spill] sm:$0xff] }
 0x537   :  { %v5055_v62 = vmul.f32 %v6154_v27, %v4990_v49  ;;  %6155 = vpow2.f32 %v6085_v0  ;;  %4076 = vmatmul.f32.gmra.mxu1 %v10627_v59  ;;  %vm5060_vm2 = vweird.f32 %v6154_v27  ;;  %v8791_v0 = vpop.f32.mrf.mxu0  ;;  %v5066_v2 = vor.u32 1.1754944e-38, %v5065_v7  ;;  %v8799_v49 = vpop.f32.mrf.mxu1 }
 0x538   :  { %6157 = vrcp.f32 %v8782_v26  ;;  %v4278_v55 = vpop.f32.mrf.mxu2  ;;  %v4559_v13 = vpop.f32.mrf.mxu3  ;;  %vm5061_vm4 = vmor %vm5059_vm3, %vm5060_vm2  ;;  %v5078_v7 = vand.u32 2147483647, %v8782_v26  ;;  %vm5074_vm8 = vweird.f32 %v8782_v26 }
 0x539   :  { %v5056_v51 = vsub.f32 1.0, %v5055_v62  ;;  %v4279_v15 = vadd.f32 %v4278_v55, %v3874_v21  ;;  %v3880_v21 = vadd.f32 %v8579_v44, %v3534_v61  ;;  %v10630_v55 = vand.u32 4294901760, %v7985_v6 }
 0x53a   :  { %vm5079_vm10 = vcmp.eq.f32.partialorder %v5078_v7, 8.507059e+37 }
 0x53b   :  { %v5057_v50 = vmul.f32 %v6154_v27, %v5056_v51  ;;  %v4556_v60 = vadd.f32 %v4555_v23, %v4279_v15  ;;  %v10631_v15 = vld [vmem:[#allocation145_spill] sm:$0xff] }
 0x53c   :  { %v3539_v32 = vadd.f32 %v8587_v41, %v10631_v15  ;;  %v10634_v15 = vld [vmem:[#allocation146_spill] sm:$0xff] }
 0x53d   :  { %v6156_v14 = vpop.eup %6155  ;;  %v5058_v28 = vadd.f32 %v6154_v27, %v5057_v50  ;;  %v6086_v30 = vmul.f32 -1.442695, %v4556_v60  ;;  %4345 = vmatmul.f32.gmra.mxu2 %v10626_v11  ;;  %4626 = vmatmul.f32.gmra.mxu3 %v10629_v16 }
 0x53e   :  { %v6158_v62 = vpop.eup %6157  ;;  %v8796_v59 = vadd.f32 1.0, %v6156_v14  ;;  %3702 = vmatmul.f32.gmra.mxu0 %v7985_v6 }
 0x53f   :  { %v5062_v23 = vsel %vm5061_vm4, %v6154_v27, %v5058_v28  ;;  %v5070_v60 = vmul.f32 %v6158_v62, %v8782_v26  ;;  %6159 = vpow2.f32 %v6086_v30  ;;  %4082 = vmatmul.f32.gmra.mxu1 %v10630_v55  ;;  %v5080_v30 = vand.u32 2147483648, %v8782_v26 }
 0x540   :  { %v5067_v11 = vsel %vm5064_vm6, %v5066_v2, %v5062_v23  ;;  %6161 = vrcp.f32 %v8796_v59  ;;  %v4282_v44 = vpop.f32.mrf.mxu2  ;;  %v4563_v51 = vpop.f32.mrf.mxu3  ;;  %vm5075_vm7 = vweird.f32 %v6158_v62  ;;  %v10632_v2 = vld [vmem:[#allocation26_spill] sm:$0xff]  ;;  %v3886_v23 = vadd.f32 %v8591_v40, %v3539_v32 }
 0x541   :  { %6015 = vst.msk [vmem:[%s9755_s5] sm:$0xff] %vm6014_vm5, %v5067_v11  ;;  %v5071_v27 = vsub.f32 1.0, %v5070_v60  ;;  %v4283_v1 = vadd.f32 %v4282_v44, %v3880_v21  ;;  %vm5076_vm9 = vmor %vm5074_vm8, %vm5075_vm7  ;;  %v5081_v41 = vor.u32 1.1754944e-38, %v5080_v30  ;;  %v3544_v32 = vadd.f32 %v8599_v56, %v10634_v15 }
 0x542   :  { %v5095_v30 = vand.u32 2147483648, %v8796_v59  ;;  %vm5089_vm12 = vweird.f32 %v8796_v59 }
 0x543   :  { %v5072_v61 = vmul.f32 %v6158_v62, %v5071_v27  ;;  %v4560_v6 = vadd.f32 %v4559_v13, %v4283_v1  ;;  %v8820_v13 = vpop.f32.mrf.mxu0 }
 0x544   :  { %v5096_v56 = vor.u32 1.1754944e-38, %v5095_v30 }
 0x545   :  { %v6160_v50 = vpop.eup %6159  ;;  %v5073_v14 = vadd.f32 %v6158_v62, %v5072_v61  ;;  %v6087_v28 = vmul.f32 -1.442695, %v4560_v6  ;;  %4349 = vmatmul.f32.gmra.mxu2 %v10629_v16  ;;  %4630 = vmatmul.f32.gmra.mxu3 %v10632_v2  ;;  %v10633_v16 = vand.u32 4294901760, %v8006_v18 }
 0x546   :  { %v6162_v21 = vpop.eup %6161  ;;  %v8817_v60 = vadd.f32 1.0, %v6160_v50  ;;  %3707 = vmatmul.f32.gmra.mxu0 %v8006_v18  ;;  %v5093_v18 = vand.u32 2147483647, %v8796_v59 }
 0x547   :  { %v5077_v11 = vsel %vm5076_vm9, %v6158_v62, %v5073_v14  ;;  %v5085_v26 = vmul.f32 %v6162_v21, %v8796_v59  ;;  %6163 = vpow2.f32 %v6087_v28  ;;  %4088 = vmatmul.f32.gmra.mxu1 %v10633_v16  ;;  %v8830_v62 = vpop.f32.mrf.mxu1  ;;  %vm5090_vm11 = vweird.f32 %v6162_v21  ;;  %v10635_v28 = vld [vmem:[#allocation28_spill] sm:$0xff] }
 0x548   :  { %v5082_v55 = vsel %vm5079_vm10, %v5081_v41, %v5077_v11  ;;  %6165 = vrcp.f32 %v8817_v60  ;;  %v4286_v40 = vpop.f32.mrf.mxu2  ;;  %v4567_v44 = vpop.f32.mrf.mxu3  ;;  %v3892_v41 = vadd.f32 %v8603_v47, %v3544_v32  ;;  %vm5091_vm13 = vmor %vm5089_vm12, %vm5090_vm11  ;;  %vm5094_vm14 = vcmp.eq.f32.partialorder %v5093_v18, 8.507059e+37 }
 0x549   :  { %6016 = vst.msk [vmem:[%s9755_s5 + $0x8] sm:$0xff] %vm6014_vm5, %v5082_v55  ;;  %v5086_v27 = vsub.f32 1.0, %v5085_v26  ;;  %v4287_v1 = vadd.f32 %v4286_v40, %v3886_v23  ;;  %v5110_v15 = vand.u32 2147483648, %v8817_v60  ;;  %v5108_v30 = vand.u32 2147483647, %v8817_v60 }
 0x54a   :  { %vm5104_vm0 = vweird.f32 %v8817_v60 }
 0x54b   :  { %v5087_v61 = vmul.f32 %v6162_v21, %v5086_v27  ;;  %v4564_v7 = vadd.f32 %v4563_v51, %v4287_v1  ;;  %v8851_v47 = vpop.f32.mrf.mxu0  ;;  %v10637_v27 = vld [vmem:[#allocation147_spill] sm:$0xff]  ;;  %vm5109_vm2 = vcmp.eq.f32.partialorder %v5108_v30, 8.507059e+37 }
 0x54c   :  { %v3549_v1 = vadd.f32 %v8613_v20, %v10637_v27 }
 0x54d   :  { %v6164_v6 = vpop.eup %6163  ;;  %v5088_v50 = vadd.f32 %v6162_v21, %v5087_v61  ;;  %v6088_v14 = vmul.f32 -1.442695, %v4564_v7  ;;  %4353 = vmatmul.f32.gmra.mxu2 %v10632_v2  ;;  %4634 = vmatmul.f32.gmra.mxu3 %v10635_v28  ;;  %v10636_v2 = vand.u32 4294901760, %v8027_v63 }
 0x54e   :  { %v6166_v23 = vpop.eup %6165  ;;  %v8840_v11 = vadd.f32 1.0, %v6164_v6  ;;  %3712 = vmatmul.f32.gmra.mxu0 %v8027_v63  ;;  %v3898_v20 = vadd.f32 %v8618_v17, %v3549_v1 }
 0x54f   :  { %v5092_v26 = vsel %vm5091_vm13, %v6162_v21, %v5088_v50  ;;  %v5100_v51 = vmul.f32 %v6166_v23, %v8817_v60  ;;  %6167 = vpow2.f32 %v6088_v14  ;;  %4094 = vmatmul.f32.gmra.mxu1 %v10636_v2  ;;  %v8856_v32 = vpop.f32.mrf.mxu1  ;;  %vm5105_vm15 = vweird.f32 %v6166_v23  ;;  %v10638_v50 = vld [vmem:[#allocation30_spill] sm:$0xff] }
 0x550   :  { %v5097_v59 = vsel %vm5094_vm14, %v5096_v56, %v5092_v26  ;;  %6169 = vrcp.f32 %v8840_v11  ;;  %v4290_v55 = vpop.f32.mrf.mxu2  ;;  %v4571_v16 = vpop.f32.mrf.mxu3  ;;  %vm5106_vm1 = vmor %vm5104_vm0, %vm5105_vm15  ;;  %vm5119_vm4 = vweird.f32 %v8840_v11 }
 0x551   :  { %6017 = vst.msk [vmem:[%s9755_s5 + $0x10] sm:$0xff] %vm6014_vm5, %v5097_v59  ;;  %v5101_v21 = vsub.f32 1.0, %v5100_v51  ;;  %v4291_v40 = vadd.f32 %v4290_v55, %v3892_v41  ;;  %v5111_v41 = vor.u32 1.1754944e-38, %v5110_v15 }
 0x553   :  { %v5102_v63 = vmul.f32 %v6166_v23, %v5101_v21  ;;  %v4568_v61 = vadd.f32 %v4567_v44, %v4291_v40  ;;  %v5125_v21 = vand.u32 2147483648, %v8840_v11  ;;  %v8877_v40 = vpop.f32.mrf.mxu0 }
 0x555   :  { %v6168_v18 = vpop.eup %6167  ;;  %v5103_v7 = vadd.f32 %v6166_v23, %v5102_v63  ;;  %v6089_v6 = vmul.f32 -1.442695, %v4568_v61  ;;  %4357 = vmatmul.f32.gmra.mxu2 %v10635_v28  ;;  %4638 = vmatmul.f32.gmra.mxu3 %v10638_v50  ;;  %v10639_v28 = vand.u32 4294901760, %v8048_v37 }
 0x556   :  { %v6170_v14 = vpop.eup %6169  ;;  %v8863_v56 = vadd.f32 1.0, %v6168_v18  ;;  %3717 = vmatmul.f32.gmra.mxu0 %v8048_v37  ;;  %v5123_v37 = vand.u32 2147483647, %v8840_v11  ;;  %v10641_v18 = vld [vmem:[#allocation32_spill] sm:$0xff] }
 0x557   :  { %v5107_v26 = vsel %vm5106_vm1, %v6166_v23, %v5103_v7  ;;  %v5115_v44 = vmul.f32 %v6170_v14, %v8840_v11  ;;  %6171 = vpow2.f32 %v6089_v6  ;;  %4100 = vmatmul.f32.gmra.mxu1 %v10639_v28  ;;  %v10640_v23 = vld [vmem:[#allocation148_spill] sm:$0xff]  ;;  %vm5120_vm3 = vweird.f32 %v6170_v14  ;;  %v8880_v63 = vpop.f32.mrf.mxu1 }
 0x558   :  { %v5112_v60 = vsel %vm5109_vm2, %v5111_v41, %v5107_v26  ;;  %6173 = vrcp.f32 %v8863_v56  ;;  %v4294_v51 = vpop.f32.mrf.mxu2  ;;  %v4575_v59 = vpop.f32.mrf.mxu3  ;;  %v3554_v55 = vadd.f32 %v8633_v35, %v10640_v23  ;;  %vm5121_vm6 = vmor %vm5119_vm4, %vm5120_vm3  ;;  %v5126_v6 = vor.u32 1.1754944e-38, %v5125_v21 }
 0x559   :  { %6018 = vst.msk [vmem:[%s9755_s5 + $0x18] sm:$0xff] %vm6014_vm5, %v5112_v60  ;;  %v5116_v17 = vsub.f32 1.0, %v5115_v44  ;;  %v4295_v2 = vadd.f32 %v4294_v51, %v3898_v20  ;;  %vm5124_vm7 = vcmp.eq.f32.partialorder %v5123_v37, 8.507059e+37  ;;  %v5140_v51 = vand.u32 2147483648, %v8863_v56  ;;  %v10644_v37 = vld [vmem:[#allocation34_spill] sm:$0xff] }
 0x55a   :  { %v3904_v7 = vadd.f32 %v8637_v39, %v3554_v55  ;;  %vm5134_vm9 = vweird.f32 %v8863_v56 }
 0x55b   :  { %v5117_v27 = vmul.f32 %v6170_v14, %v5116_v17  ;;  %v4572_v1 = vadd.f32 %v4571_v16, %v4295_v2  ;;  %v5138_v2 = vand.u32 2147483647, %v8863_v56  ;;  %v8901_v55 = vpop.f32.mrf.mxu0 }
 0x55d   :  { %v6172_v15 = vpop.eup %6171  ;;  %v5118_v30 = vadd.f32 %v6170_v14, %v5117_v27  ;;  %v6090_v61 = vmul.f32 -1.442695, %v4572_v1  ;;  %4361 = vmatmul.f32.gmra.mxu2 %v10638_v50  ;;  %4642 = vmatmul.f32.gmra.mxu3 %v10641_v18  ;;  %v10642_v50 = vand.u32 4294901760, %v8069_v4  ;;  %vm5139_vm11 = vcmp.eq.f32.partialorder %v5138_v2, 8.507059e+37 }
 0x55e   :  { %v6174_v35 = vpop.eup %6173  ;;  %v8886_v20 = vadd.f32 1.0, %v6172_v15  ;;  %3722 = vmatmul.f32.gmra.mxu0 %v8069_v4  ;;  %v5141_v15 = vor.u32 1.1754944e-38, %v5140_v51  ;;  %v10647_v51 = vld [vmem:[#allocation36_spill] sm:$0xff] }
 0x55f   :  { %v5122_v16 = vsel %vm5121_vm6, %v6170_v14, %v5118_v30  ;;  %v5130_v41 = vmul.f32 %v6174_v35, %v8863_v56  ;;  %6175 = vpow2.f32 %v6090_v61  ;;  %4106 = vmatmul.f32.gmra.mxu1 %v10642_v50  ;;  %v10643_v14 = vld [vmem:[#allocation149_spill] sm:$0xff]  ;;  %vm5135_vm8 = vweird.f32 %v6174_v35 }
 0x560   :  { %v5127_v11 = vsel %vm5124_vm7, %v5126_v6, %v5122_v16  ;;  %6177 = vrcp.f32 %v8886_v20  ;;  %v4298_v26 = vpop.f32.mrf.mxu2  ;;  %v4579_v44 = vpop.f32.mrf.mxu3  ;;  %v3559_v28 = vadd.f32 %v8647_v19, %v10643_v14  ;;  %vm5136_vm10 = vmor %vm5134_vm9, %vm5135_vm8  ;;  %v5155_v50 = vand.u32 2147483648, %v8886_v20 }
 0x561   :  { %6019 = vst.msk [vmem:[%s9755_s5 + $0x20] sm:$0xff] %vm6014_vm5, %v5127_v11  ;;  %v5131_v39 = vsub.f32 1.0, %v5130_v41  ;;  %v4299_v60 = vadd.f32 %v4298_v26, %v3904_v7  ;;  %vm5149_vm13 = vweird.f32 %v8886_v20 }
 0x562   :  { %v3910_v19 = vadd.f32 %v8650_v9, %v3559_v28 }
 0x563   :  { %v5132_v17 = vmul.f32 %v6174_v35, %v5131_v39  ;;  %v4576_v4 = vadd.f32 %v4575_v59, %v4299_v60  ;;  %v8910_v59 = vpop.f32.mrf.mxu1  ;;  %v5153_v39 = vand.u32 2147483647, %v8886_v20 }
 0x565   :  { %v6176_v23 = vpop.eup %6175  ;;  %v5133_v21 = vadd.f32 %v6174_v35, %v5132_v17  ;;  %v6091_v27 = vmul.f32 -1.442695, %v4576_v4  ;;  %4365 = vmatmul.f32.gmra.mxu2 %v10641_v18  ;;  %4646 = vmatmul.f32.gmra.mxu3 %v10644_v37  ;;  %v10645_v18 = vand.u32 4294901760, %v8090_v29  ;;  %vm5154_vm15 = vcmp.eq.f32.partialorder %v5153_v39, 8.507059e+37 }
 0x566   :  { %v6178_v1 = vpop.eup %6177  ;;  %v8907_v30 = vadd.f32 1.0, %v6176_v23  ;;  %3727 = vmatmul.f32.gmra.mxu0 %v8090_v29  ;;  %v8931_v23 = vpop.f32.mrf.mxu0 }
 0x567   :  { %v5137_v61 = vsel %vm5136_vm10, %v6174_v35, %v5133_v21  ;;  %v5145_v56 = vmul.f32 %v6178_v1, %v8886_v20  ;;  %6179 = vpow2.f32 %v6091_v27  ;;  %4112 = vmatmul.f32.gmra.mxu1 %v10645_v18  ;;  %v10646_v35 = vld [vmem:[#allocation150_spill] sm:$0xff]  ;;  %vm5150_vm12 = vweird.f32 %v6178_v1 }
 0x568   :  { %v5142_v7 = vsel %vm5139_vm11, %v5141_v15, %v5137_v61  ;;  %6181 = vrcp.f32 %v8907_v30  ;;  %v4302_v9 = vpop.f32.mrf.mxu2  ;;  %v4583_v6 = vpop.f32.mrf.mxu3  ;;  %v3564_v11 = vadd.f32 %v8660_v52, %v10646_v35  ;;  %vm5151_vm14 = vmor %vm5149_vm13, %vm5150_vm12  ;;  %v5156_v52 = vor.u32 1.1754944e-38, %v5155_v50  ;;  %v10649_v61 = vld [vmem:[#allocation40_spill] sm:$0xff] }
 0x569   :  { %6020 = vst.msk [vmem:[%s9755_s5 + $0x28] sm:$0xff] %vm6014_vm5, %v5142_v7  ;;  %v5146_v16 = vsub.f32 1.0, %v5145_v56  ;;  %v4303_v41 = vadd.f32 %v4302_v9, %v3910_v19  ;;  %v10648_v27 = vand.u32 4294901760, %v8116_v8  ;;  %v3569_v56 = vadd.f32 %v8674_v33, %v10649_v61  ;;  %v10653_v61 = vld [vmem:[#allocation45_spill] sm:$0xff] }
 0x56a   :  { %v3916_v2 = vadd.f32 %v8664_v25, %v3564_v11  ;;  %v5170_v7 = vand.u32 2147483648, %v8907_v30  ;;  %vm5164_vm1 = vweird.f32 %v8907_v30  ;;  %v10650_v11 = vld [vmem:[#allocation38_spill] sm:$0xff] }
 0x56b   :  { %v5147_v26 = vmul.f32 %v6178_v1, %v5146_v16  ;;  %v4580_v29 = vadd.f32 %v4579_v44, %v4303_v41  ;;  %v8937_v19 = vpop.f32.mrf.mxu1 }
 0x56c   :  { %v5171_v33 = vor.u32 1.1754944e-38, %v5170_v7 }
 0x56d   :  { %v6180_v60 = vpop.eup %6179  ;;  %v5148_v14 = vadd.f32 %v6178_v1, %v5147_v26  ;;  %v6092_v28 = vmul.f32 -1.442695, %v4580_v29  ;;  %4369 = vmatmul.f32.gmra.mxu2 %v10644_v37  ;;  %4650 = vmatmul.f32.gmra.mxu3 %v10647_v51  ;;  %v3922_v26 = vadd.f32 %v8679_v58, %v3569_v56 }
 0x56e   :  { %v6182_v17 = vpop.eup %6181  ;;  %v8928_v4 = vadd.f32 1.0, %v6180_v60  ;;  %3732 = vmatmul.f32.gmra.mxu0 %v8116_v8  ;;  %v5168_v8 = vand.u32 2147483647, %v8907_v30  ;;  %v10651_v60 = vand.u32 4294901760, %v8137_v3  ;;  %v8958_v58 = vpop.f32.mrf.mxu0 }
 0x56f   :  { %v5152_v44 = vsel %vm5151_vm14, %v6178_v1, %v5148_v14  ;;  %v5160_v20 = vmul.f32 %v6182_v17, %v8907_v30  ;;  %6183 = vpow2.f32 %v6092_v28  ;;  %4118 = vmatmul.f32.gmra.mxu1 %v10648_v27  ;;  %vm5165_vm0 = vweird.f32 %v6182_v17 }
 0x570   :  { %v5157_v21 = vsel %vm5154_vm15, %v5156_v52, %v5152_v44  ;;  %6185 = vrcp.f32 %v8928_v4  ;;  %v4306_v25 = vpop.f32.mrf.mxu2  ;;  %v4587_v37 = vpop.f32.mrf.mxu3  ;;  %vm5166_vm2 = vmor %vm5164_vm1, %vm5165_vm0  ;;  %vm5169_vm3 = vcmp.eq.f32.partialorder %v5168_v8, 8.507059e+37  ;;  %v5185_v44 = vand.u32 2147483648, %v8928_v4 }
 0x571   :  { %6021 = vst.msk [vmem:[%s9755_s5 + $0x30] sm:$0xff] %vm6014_vm5, %v5157_v21  ;;  %v5161_v1 = vsub.f32 1.0, %v5160_v20  ;;  %v4307_v15 = vadd.f32 %v4306_v25, %v3916_v2  ;;  %v10652_v2 = vld [vmem:[#allocation151_spill] sm:$0xff]  ;;  %v5183_v21 = vand.u32 2147483647, %v8928_v4  ;;  %vm5179_vm6 = vweird.f32 %v8928_v4 }
 0x572   :  { %v3574_v52 = vadd.f32 %v8689_v57, %v10652_v2  ;;  %v5186_v7 = vor.u32 1.1754944e-38, %v5185_v44 }
 0x573   :  { %v5162_v18 = vmul.f32 %v6182_v17, %v5161_v1  ;;  %v4584_v9 = vadd.f32 %v4583_v6, %v4307_v15  ;;  %v8967_v20 = vpop.f32.mrf.mxu1  ;;  %vm5184_vm8 = vcmp.eq.f32.partialorder %v5183_v21, 8.507059e+37  ;;  %v10657_v21 = vand.u32 4294901760, %v8179_v31 }
 0x574   :  { %v3928_v57 = vadd.f32 %v8693_v5, %v3574_v52 }
 0x575   :  { %v6184_v16 = vpop.eup %6183  ;;  %v5163_v41 = vadd.f32 %v6182_v17, %v5162_v18  ;;  %v6093_v35 = vmul.f32 -1.442695, %v4584_v9  ;;  %4373 = vmatmul.f32.gmra.mxu2 %v10647_v51  ;;  %4654 = vmatmul.f32.gmra.mxu3 %v10650_v11  ;;  %v10654_v9 = vand.u32 4294901760, %v8158_v54 }
 0x576   :  { %v6186_v50 = vpop.eup %6185  ;;  %v8951_v39 = vadd.f32 1.0, %v6184_v16  ;;  %3737 = vmatmul.f32.gmra.mxu0 %v8137_v3 }
 0x577   :  { %v5167_v29 = vsel %vm5166_vm2, %v6182_v17, %v5163_v41  ;;  %v5175_v6 = vmul.f32 %v6186_v50, %v8928_v4  ;;  %6187 = vpow2.f32 %v6093_v35  ;;  %4124 = vmatmul.f32.gmra.mxu1 %v10651_v60  ;;  %vm5180_vm4 = vweird.f32 %v6186_v50 }
 0x578   :  { %v5172_v30 = vsel %vm5169_vm3, %v5171_v33, %v5167_v29  ;;  %6189 = vrcp.f32 %v8951_v39  ;;  %v4310_v14 = vpop.f32.mrf.mxu2  ;;  %v4591_v28 = vpop.f32.mrf.mxu3  ;;  %vm5181_vm7 = vmor %vm5179_vm6, %vm5180_vm4  ;;  %vm5194_vm10 = vweird.f32 %v8951_v39 }
 0x579   :  { %6022 = vst.msk [vmem:[%s9755_s5 + $0x38] sm:$0xff] %vm6014_vm5, %v5172_v30  ;;  %v5176_v51 = vsub.f32 1.0, %v5175_v6  ;;  %v4311_v17 = vadd.f32 %v4310_v14, %v3922_v26  ;;  %v5200_v26 = vand.u32 2147483648, %v8951_v39  ;;  %v8988_v33 = vpop.f32.mrf.mxu0 }
 0x57b   :  { %v5177_v3 = vmul.f32 %v6186_v50, %v5176_v51  ;;  %v4588_v27 = vadd.f32 %v4587_v37, %v4311_v17  ;;  %v8991_v60 = vpop.f32.mrf.mxu1  ;;  %v10656_v17 = vld [vmem:[#allocation42_spill] sm:$0xff]  ;;  %v5201_v52 = vor.u32 1.1754944e-38, %v5200_v26 }
 0x57d   :  { %v6188_v25 = vpop.eup %6187  ;;  %v5178_v1 = vadd.f32 %v6186_v50, %v5177_v3  ;;  %v6094_v15 = vmul.f32 -1.442695, %v4588_v27  ;;  %4377 = vmatmul.f32.gmra.mxu2 %v10650_v11  ;;  %4658 = vmatmul.f32.gmra.mxu3 %v10653_v61  ;;  %v10655_v11 = vld [vmem:[#allocation153_spill] sm:$0xff] }
 0x57e   :  { %v6190_v56 = vpop.eup %6189  ;;  %v8974_v18 = vadd.f32 1.0, %v6188_v25  ;;  %3742 = vmatmul.f32.gmra.mxu0 %v8158_v54  ;;  %v5198_v54 = vand.u32 2147483647, %v8951_v39 }
 0x57f   :  { %v5182_v8 = vsel %vm5181_vm7, %v6186_v50, %v5178_v1  ;;  %v5190_v37 = vmul.f32 %v6190_v56, %v8951_v39  ;;  %6191 = vpow2.f32 %v6094_v15  ;;  %4130 = vmatmul.f32.gmra.mxu1 %v10654_v9  ;;  %v3579_v50 = vadd.f32 %v8703_v48, %v10655_v11  ;;  %v10658_v15 = vld [vmem:[#allocation154_spill] sm:$0xff] }
 0x580   :  { %v5187_v4 = vsel %vm5184_vm8, %v5186_v7, %v5182_v8  ;;  %6193 = vrcp.f32 %v8974_v18  ;;  %v4314_v16 = vpop.f32.mrf.mxu2  ;;  %v4595_v41 = vpop.f32.mrf.mxu3  ;;  %vm5195_vm9 = vweird.f32 %v6190_v56  ;;  %vm5199_vm12 = vcmp.eq.f32.partialorder %v5198_v54, 8.507059e+37 }
 0x581   :  { %6023 = vst.msk [vmem:[%s9755_s5 + $0x40] sm:$0xff] %vm6014_vm5, %v5187_v4  ;;  %v5191_v5 = vsub.f32 1.0, %v5190_v37  ;;  %v4315_v35 = vadd.f32 %v4314_v16, %v3928_v57  ;;  %v3934_v2 = vadd.f32 %v8706_v53, %v3579_v50  ;;  %vm5196_vm11 = vmor %vm5194_vm10, %vm5195_vm9  ;;  %v5213_v7 = vand.u32 2147483647, %v8974_v18  ;;  %v9012_v37 = vpop.f32.mrf.mxu0  ;;  %v10659_v16 = vld [vmem:[#allocation44_spill] sm:$0xff] }
 0x582   :  { %vm5209_vm14 = vweird.f32 %v8974_v18 }
 0x583   :  { %v5192_v29 = vmul.f32 %v6190_v56, %v5191_v5  ;;  %v4592_v6 = vadd.f32 %v4591_v28, %v4315_v35  ;;  %vm5214_vm0 = vcmp.eq.f32.partialorder %v5213_v7, 8.507059e+37 }
 0x585   :  { %v6192_v30 = vpop.eup %6191  ;;  %v5193_v14 = vadd.f32 %v6190_v56, %v5192_v29  ;;  %v6095_v51 = vmul.f32 -1.442695, %v4592_v6  ;;  %4381 = vmatmul.f32.gmra.mxu2 %v10653_v61  ;;  %4662 = vmatmul.f32.gmra.mxu3 %v10656_v17  ;;  %v3584_v61 = vadd.f32 %v8716_v43, %v10658_v15  ;;  %v10660_v29 = vand.u32 4294901760, %v8201_v12 }
 0x586   :  { %v6194_v48 = vpop.eup %6193  ;;  %v8997_v44 = vadd.f32 1.0, %v6192_v30  ;;  %3747 = vmatmul.f32.gmra.mxu0 %v8179_v31 }
 0x587   :  { %v5197_v28 = vsel %vm5196_vm11, %v6190_v56, %v5193_v14  ;;  %v5205_v3 = vmul.f32 %v6194_v48, %v8974_v18  ;;  %6195 = vpow2.f32 %v6095_v51  ;;  %4136 = vmatmul.f32.gmra.mxu1 %v10657_v21  ;;  %v5215_v56 = vand.u32 2147483648, %v8974_v18  ;;  %v10661_v14 = vld [vmem:[#allocation155_spill] sm:$0xff] }
 0x588   :  { %v5202_v39 = vsel %vm5199_vm12, %v5201_v52, %v5197_v28  ;;  %6197 = vrcp.f32 %v8997_v44  ;;  %v4318_v27 = vpop.f32.mrf.mxu2  ;;  %v4599_v25 = vpop.f32.mrf.mxu3  ;;  %vm5210_vm13 = vweird.f32 %v6194_v48  ;;  %v3940_v43 = vadd.f32 %v8720_v46, %v3584_v61 }
 0x589   :  { %6024 = vst.msk [vmem:[%s9755_s5 + $0x48] sm:$0xff] %vm6014_vm5, %v5202_v39  ;;  %v5206_v53 = vsub.f32 1.0, %v5205_v3  ;;  %v4319_v1 = vadd.f32 %v4318_v27, %v3934_v2  ;;  %vm5211_vm15 = vmor %vm5209_vm14, %vm5210_vm13  ;;  %v5216_v35 = vor.u32 1.1754944e-38, %v5215_v56  ;;  %v3589_v51 = vadd.f32 %v8730_v38, %v10661_v14  ;;  %v10662_v39 = vld [vmem:[#allocation46_spill] sm:$0xff] }
 0x58a   :  { %v5228_v2 = vand.u32 2147483647, %v8997_v44  ;;  %vm5224_vm2 = vweird.f32 %v8997_v44  ;;  %v10663_v61 = vand.u32 4294901760, %v8223_v45 }
 0x58b   :  { %v5207_v57 = vmul.f32 %v6194_v48, %v5206_v53  ;;  %v4596_v31 = vadd.f32 %v4595_v41, %v4319_v1  ;;  %v9021_v41 = vpop.f32.mrf.mxu1  ;;  %v3946_v27 = vadd.f32 %v8735_v22, %v3589_v51  ;;  %v9042_v1 = vpop.f32.mrf.mxu0 }
 0x58c   :  { %vm5229_vm4 = vcmp.eq.f32.partialorder %v5228_v2, 8.507059e+37  ;;  %v10667_v2 = vld [vmem:[#allocation157_spill] sm:$0xff] }
 0x58d   :  { %v6196_v8 = vpop.eup %6195  ;;  %v5208_v4 = vadd.f32 %v6194_v48, %v5207_v57  ;;  %v6096_v9 = vmul.f32 -1.442695, %v4596_v31  ;;  %4385 = vmatmul.f32.gmra.mxu2 %v10656_v17  ;;  %4666 = vmatmul.f32.gmra.mxu3 %v10659_v16  ;;  %v5230_v17 = vand.u32 2147483648, %v8997_v44 }
 0x58e   :  { %v6198_v5 = vpop.eup %6197  ;;  %v9018_v11 = vadd.f32 1.0, %v6196_v8  ;;  %3752 = vmatmul.f32.gmra.mxu0 %v8201_v12  ;;  %v10664_v8 = vld [vmem:[#allocation156_spill] sm:$0xff] }
 0x58f   :  { %v5212_v50 = vsel %vm5211_vm15, %v6194_v48, %v5208_v4  ;;  %v5220_v18 = vmul.f32 %v6198_v5, %v8997_v44  ;;  %6199 = vpow2.f32 %v6096_v9  ;;  %4142 = vmatmul.f32.gmra.mxu1 %v10660_v29  ;;  %vm5225_vm1 = vweird.f32 %v6198_v5 }
 0x590   :  { %v5217_v26 = vsel %vm5214_vm0, %v5216_v35, %v5212_v50  ;;  %6201 = vrcp.f32 %v9018_v11  ;;  %v4322_v46 = vpop.f32.mrf.mxu2  ;;  %v4603_v54 = vpop.f32.mrf.mxu3  ;;  %vm5226_vm3 = vmor %vm5224_vm2, %vm5225_vm1  ;;  %v5231_v38 = vor.u32 1.1754944e-38, %v5230_v17  ;;  %v3594_v4 = vadd.f32 %v8748_v24, %v10664_v8 }
 0x591   :  { %6025 = vst.msk [vmem:[%s9755_s5 + $0x50] sm:$0xff] %vm6014_vm5, %v5217_v26  ;;  %v5221_v6 = vsub.f32 1.0, %v5220_v18  ;;  %v4323_v30 = vadd.f32 %v4322_v46, %v3940_v43  ;;  %v5245_v9 = vand.u32 2147483648, %v9018_v11  ;;  %vm5239_vm7 = vweird.f32 %v9018_v11  ;;  %v10665_v18 = vld [vmem:[#allocation48_spill] sm:$0xff] }
 0x592   :  { %v3952_v29 = vadd.f32 %v8752_v36, %v3594_v4 }
 0x593   :  { %v5222_v48 = vmul.f32 %v6198_v5, %v5221_v6  ;;  %v4600_v12 = vadd.f32 %v4599_v25, %v4323_v30  ;;  %v9048_v57 = vpop.f32.mrf.mxu1  ;;  %v5246_v24 = vor.u32 1.1754944e-38, %v5245_v9  ;;  %v10666_v30 = vand.u32 4294901760, %v8245_v42  ;;  %v9069_v36 = vpop.f32.mrf.mxu0 }
 0x595   :  { %v6200_v52 = vpop.eup %6199  ;;  %v5223_v28 = vadd.f32 %v6198_v5, %v5222_v48  ;;  %v6097_v3 = vmul.f32 -1.442695, %v4600_v12  ;;  %4389 = vmatmul.f32.gmra.mxu2 %v10659_v16  ;;  %4670 = vmatmul.f32.gmra.mxu3 %v10662_v39  ;;  %v3599_v12 = vadd.f32 %v8762_v10, %v10667_v2 }
 0x596   :  { %v6202_v21 = vpop.eup %6201  ;;  %v9039_v53 = vadd.f32 1.0, %v6200_v52  ;;  %3757 = vmatmul.f32.gmra.mxu0 %v8223_v45  ;;  %v5243_v45 = vand.u32 2147483647, %v9018_v11 }
 0x597   :  { %v5227_v25 = vsel %vm5226_vm3, %v6198_v5, %v5223_v28  ;;  %v5235_v44 = vmul.f32 %v6202_v21, %v9018_v11  ;;  %6203 = vpow2.f32 %v6097_v3  ;;  %4148 = vmatmul.f32.gmra.mxu1 %v10663_v61  ;;  %vm5240_vm6 = vweird.f32 %v6202_v21 }
 0x598   :  { %v5232_v15 = vsel %vm5229_vm4, %v5231_v38, %v5227_v25  ;;  %6205 = vrcp.f32 %v9039_v53  ;;  %v4326_v22 = vpop.f32.mrf.mxu2  ;;  %v4607_v56 = vpop.f32.mrf.mxu3  ;;  %vm5241_vm8 = vmor %vm5239_vm7, %vm5240_vm6  ;;  %vm5244_vm9 = vcmp.eq.f32.partialorder %v5243_v45, 8.507059e+37  ;;  %v5260_v52 = vand.u32 2147483648, %v9039_v53  ;;  %v10668_v25 = vld [vmem:[#allocation49_spill] sm:$0xff] }
 0x599   :  { %6026 = vst.msk [vmem:[%s9755_s5 + $0x58] sm:$0xff] %vm6014_vm5, %v5232_v15  ;;  %v5236_v7 = vsub.f32 1.0, %v5235_v44  ;;  %v4327_v31 = vadd.f32 %v4326_v22, %v3946_v27  ;;  %v5258_v3 = vand.u32 2147483647, %v9039_v53  ;;  %vm5254_vm11 = vweird.f32 %v9039_v53  ;;  %v10669_v22 = vld [vmem:[#allocation82_spill] sm:$0xff]  ;;  %v10672_v45 = vld [vmem:[#allocation21_spill] sm:$0xff] }
 0x59a   :  { %v3958_v10 = vadd.f32 %v8766_v34, %v3599_v12  ;;  %v5261_v15 = vor.u32 1.1754944e-38, %v5260_v52  ;;  %v10675_v12 = vld [vmem:[#allocation84_spill] sm:$0xff] }
 0x59b   :  { %v5237_v16 = vmul.f32 %v6202_v21, %v5236_v7  ;;  %v4604_v5 = vadd.f32 %v4603_v54, %v4327_v31  ;;  %v9078_v28 = vpop.f32.mrf.mxu1  ;;  %vm5259_vm13 = vcmp.eq.f32.partialorder %v5258_v3, 8.507059e+37  ;;  %v10670_v31 = vand.u32 4294901760, %v10669_v22 }
 0x59d   :  { %v6204_v43 = vpop.eup %6203  ;;  %v5238_v35 = vadd.f32 %v6202_v21, %v5237_v16  ;;  %v6098_v50 = vmul.f32 -1.442695, %v4604_v5  ;;  %4393 = vmatmul.f32.gmra.mxu2 %v10662_v39  ;;  %4674 = vmatmul.f32.gmra.mxu3 %v10665_v18  ;;  %v10671_v16 = vld [vmem:[#allocation53_spill] sm:$0xff] }
 0x59e   :  { %v6206_v26 = vpop.eup %6205  ;;  %v9062_v46 = vadd.f32 1.0, %v6204_v43  ;;  %3762 = vmatmul.f32.gmra.mxu0 %v8245_v42  ;;  %v3604_v5 = vadd.f32 %v10672_v45, %v10671_v16  ;;  %v10679_v45 = vld [vmem:[#allocation116_spill] sm:$0xff] }
 0x59f   :  { %v5242_v6 = vsel %vm5241_vm8, %v6202_v21, %v5238_v35  ;;  %v5250_v54 = vmul.f32 %v6206_v26, %v9039_v53  ;;  %6207 = vpow2.f32 %v6098_v50  ;;  %4154 = vmatmul.f32.gmra.mxu1 %v10666_v30  ;;  %vm5255_vm10 = vweird.f32 %v6206_v26  ;;  %v9099_v35 = vpop.f32.mrf.mxu0 }
 0x5a0   :  { %v5247_v11 = vsel %vm5244_vm9, %v5246_v24, %v5242_v6  ;;  %6209 = vrcp.f32 %v9062_v46  ;;  %v4330_v14 = vpop.f32.mrf.mxu2  ;;  %v4611_v51 = vpop.f32.mrf.mxu3  ;;  %vm5256_vm12 = vmor %vm5254_vm11, %vm5255_vm10  ;;  %v5275_v43 = vand.u32 2147483648, %v9062_v46  ;;  %vm5269_vm15 = vweird.f32 %v9062_v46 }
 0x5a1   :  { %6027 = vst.msk [vmem:[%s9755_s5 + $0x60] sm:$0xff] %vm6014_vm5, %v5247_v11  ;;  %v5251_v17 = vsub.f32 1.0, %v5250_v54  ;;  %v4331_v48 = vadd.f32 %v4330_v14, %v3952_v29  ;;  %v10673_v11 = vld [vmem:[#allocation51_spill] sm:$0xff]  ;;  %v10674_v14 = vld [vmem:[#allocation106_spill] sm:$0xff] }
 0x5a3   :  { %v5252_v42 = vmul.f32 %v6206_v26, %v5251_v17  ;;  %v4608_v39 = vadd.f32 %v4607_v56, %v4331_v48  ;;  %v9102_v24 = vpop.f32.mrf.mxu1  ;;  %v3964_v17 = vadd.f32 %v10674_v14, %v3604_v5  ;;  %v5276_v48 = vor.u32 1.1754944e-38, %v5275_v43 }
 0x5a5   :  { %v6208_v21 = vpop.eup %6207  ;;  %v5253_v27 = vadd.f32 %v6206_v26, %v5252_v42  ;;  %v6099_v38 = vmul.f32 -1.442695, %v4608_v39  ;;  %4397 = vmatmul.f32.gmra.mxu2 %v10665_v18  ;;  %4678 = vmatmul.f32.gmra.mxu3 %v10668_v25  ;;  %v5273_v18 = vand.u32 2147483647, %v9062_v46  ;;  %v10676_v42 = vand.u32 4294901760, %v10675_v12 }
 0x5a6   :  { %v6210_v44 = vpop.eup %6209  ;;  %v9085_v61 = vadd.f32 1.0, %v6208_v21  ;;  %3767 = vmatmul.f32.gmra.mxu0 %v10669_v22 }
 0x5a7   :  { %v5257_v7 = vsel %vm5256_vm12, %v6206_v26, %v5253_v27  ;;  %v5265_v56 = vmul.f32 %v6210_v44, %v9062_v46  ;;  %6211 = vpow2.f32 %v6099_v38  ;;  %4160 = vmatmul.f32.gmra.mxu1 %v10670_v31  ;;  %vm5270_vm14 = vweird.f32 %v6210_v44  ;;  %v10677_v38 = vld [vmem:[#allocation55_spill] sm:$0xff] }
 0x5a8   :  { %v5262_v53 = vsel %vm5259_vm13, %v5261_v15, %v5257_v7  ;;  %6213 = vrcp.f32 %v9085_v61  ;;  %v4334_v8 = vpop.f32.mrf.mxu2  ;;  %v4615_v4 = vpop.f32.mrf.mxu3  ;;  %vm5271_vm0 = vmor %vm5269_vm15, %vm5270_vm14  ;;  %vm5274_vm1 = vcmp.eq.f32.partialorder %v5273_v18, 8.507059e+37  ;;  %v5288_v15 = vand.u32 2147483647, %v9085_v61 }
 0x5a9   :  { %6028 = vst.msk [vmem:[%s9755_s5 + $0x68] sm:$0xff] %vm6014_vm5, %v5262_v53  ;;  %v5266_v34 = vsub.f32 1.0, %v5265_v56  ;;  %v4335_v9 = vadd.f32 %v4334_v8, %v3958_v10  ;;  %v9123_v56 = vpop.f32.mrf.mxu0  ;;  %vm5284_vm3 = vweird.f32 %v9085_v61  ;;  %v10678_v8 = vld [vmem:[#allocation58_spill] sm:$0xff] }
 0x5aa   :  { %vm5289_vm6 = vcmp.eq.f32.partialorder %v5288_v15, 8.507059e+37 }
 0x5ab   :  { %v5267_v50 = vmul.f32 %v6210_v44, %v5266_v34  ;;  %v4612_v26 = vadd.f32 %v4611_v51, %v4335_v9 }
 0x5ad   :  { %v6212_v29 = vpop.eup %6211  ;;  %v5268_v6 = vadd.f32 %v6210_v44, %v5267_v50  ;;  %v6100_v54 = vmul.f32 -1.442695, %v4612_v26  ;;  %4401 = vmatmul.f32.gmra.mxu2 %v10668_v25  ;;  %4682 = vmatmul.f32.gmra.mxu3 %v10673_v11  ;;  %v3609_v25 = vadd.f32 %v8791_v0, %v10677_v38  ;;  %v10680_v50 = vand.u32 4294901760, %v10679_v45 }
 0x5ae   :  { %v6214_v30 = vpop.eup %6213  ;;  %v9108_v2 = vadd.f32 1.0, %v6212_v29  ;;  %3772 = vmatmul.f32.gmra.mxu0 %v10675_v12 }
 0x5af   :  { %v5272_v51 = vsel %vm5271_vm0, %v6210_v44, %v5268_v6  ;;  %v5280_v52 = vmul.f32 %v6214_v30, %v9085_v61  ;;  %6215 = vpow2.f32 %v6100_v54  ;;  %4166 = vmatmul.f32.gmra.mxu1 %v10676_v42  ;;  %v5290_v44 = vand.u32 2147483648, %v9085_v61  ;;  %v10681_v6 = vld [vmem:[#allocation158_spill] sm:$0xff] }
 0x5b0   :  { %v5277_v46 = vsel %vm5274_vm1, %v5276_v48, %v5272_v51  ;;  %6217 = vrcp.f32 %v9108_v2  ;;  %v4338_v3 = vpop.f32.mrf.mxu2  ;;  %v4619_v39 = vpop.f32.mrf.mxu3  ;;  %vm5285_vm2 = vweird.f32 %v6214_v30  ;;  %v3970_v0 = vadd.f32 %v8799_v49, %v3609_v25 }
 0x5b1   :  { %6029 = vst.msk [vmem:[%s9755_s5 + $0x70] sm:$0xff] %vm6014_vm5, %v5277_v46  ;;  %v5281_v21 = vsub.f32 1.0, %v5280_v52  ;;  %v4339_v27 = vadd.f32 %v4338_v3, %v3964_v17  ;;  %vm5286_vm4 = vmor %vm5284_vm3, %vm5285_vm2  ;;  %v5291_v9 = vor.u32 1.1754944e-38, %v5290_v44  ;;  %v3614_v54 = vadd.f32 %v8820_v13, %v10681_v6  ;;  %v10682_v52 = vld [vmem:[#allocation59_spill] sm:$0xff] }
 0x5b2   :  { %v5303_v14 = vand.u32 2147483647, %v9108_v2  ;;  %vm5299_vm8 = vweird.f32 %v9108_v2 }
 0x5b3   :  { %v5282_v10 = vmul.f32 %v6214_v30, %v5281_v21  ;;  %v4616_v22 = vadd.f32 %v4615_v4, %v4339_v27  ;;  %v9132_v4 = vpop.f32.mrf.mxu1  ;;  %v3976_v42 = vadd.f32 %v8830_v62, %v3614_v54  ;;  %v10683_v21 = vld [vmem:[#allocation113_spill] sm:$0xff]  ;;  %v9153_v27 = vpop.f32.mrf.mxu0 }
 0x5b4   :  { %vm5304_vm10 = vcmp.eq.f32.partialorder %v5303_v14, 8.507059e+37  ;;  %v10684_v25 = vand.u32 4294901760, %v10683_v21 }
 0x5b5   :  { %v6216_v7 = vpop.eup %6215  ;;  %v5283_v53 = vadd.f32 %v6214_v30, %v5282_v10  ;;  %v6101_v31 = vmul.f32 -1.442695, %v4616_v22  ;;  %4405 = vmatmul.f32.gmra.mxu2 %v10673_v11  ;;  %4686 = vmatmul.f32.gmra.mxu3 %v10678_v8  ;;  %v5305_v11 = vand.u32 2147483648, %v9108_v2 }
 0x5b6   :  { %v6218_v34 = vpop.eup %6217  ;;  %v9129_v16 = vadd.f32 1.0, %v6216_v7  ;;  %3777 = vmatmul.f32.gmra.mxu0 %v10679_v45  ;;  %v10685_v7 = vld [vmem:[#allocation159_spill] sm:$0xff] }
 0x5b7   :  { %v5287_v5 = vsel %vm5286_vm4, %v6214_v30, %v5283_v53  ;;  %v5295_v61 = vmul.f32 %v6218_v34, %v9108_v2  ;;  %6219 = vpow2.f32 %v6101_v31  ;;  %4172 = vmatmul.f32.gmra.mxu1 %v10680_v50  ;;  %vm5300_vm7 = vweird.f32 %v6218_v34 }
 0x5b8   :  { %v5292_v43 = vsel %vm5289_vm6, %v5291_v9, %v5287_v5  ;;  %6221 = vrcp.f32 %v9129_v16  ;;  %v4342_v49 = vpop.f32.mrf.mxu2  ;;  %v4623_v18 = vpop.f32.mrf.mxu3  ;;  %vm5301_vm9 = vmor %vm5299_vm8, %vm5300_vm7  ;;  %v5306_v13 = vor.u32 1.1754944e-38, %v5305_v11  ;;  %v3619_v53 = vadd.f32 %v8851_v47, %v10685_v7 }
 0x5b9   :  { %6030 = vst.msk [vmem:[%s9755_s5 + $0x78] sm:$0xff] %vm6014_vm5, %v5292_v43  ;;  %v5296_v26 = vsub.f32 1.0, %v5295_v61  ;;  %v4343_v29 = vadd.f32 %v4342_v49, %v3970_v0  ;;  %v5320_v31 = vand.u32 2147483648, %v9129_v16  ;;  %vm5314_vm12 = vweird.f32 %v9129_v16  ;;  %v10686_v61 = vld [vmem:[#allocation57_spill] sm:$0xff] }
 0x5ba   :  { %v3982_v50 = vadd.f32 %v8856_v32, %v3619_v53 }
 0x5bb   :  { %v5297_v30 = vmul.f32 %v6218_v34, %v5296_v26  ;;  %v4620_v17 = vadd.f32 %v4619_v39, %v4343_v29  ;;  %v9159_v10 = vpop.f32.mrf.mxu1  ;;  %v5321_v47 = vor.u32 1.1754944e-38, %v5320_v31  ;;  %v10687_v26 = vld [vmem:[#allocation88_spill] sm:$0xff]  ;;  %v9180_v32 = vpop.f32.mrf.mxu0 }
 0x5bc   :  { %v10688_v6 = vand.u32 4294901760, %v10687_v26 }
 0x5bd   :  { %v6220_v48 = vpop.eup %6219  ;;  %v5298_v12 = vadd.f32 %v6218_v34, %v5297_v30  ;;  %v6102_v51 = vmul.f32 -1.442695, %v4620_v17  ;;  %4409 = vmatmul.f32.gmra.mxu2 %v10678_v8  ;;  %4690 = vmatmul.f32.gmra.mxu3 %v10682_v52  ;;  %v10689_v17 = vld [vmem:[#allocation60_spill] sm:$0xff] }
 0x5be   :  { %v6222_v46 = vpop.eup %6221  ;;  %v9150_v3 = vadd.f32 1.0, %v6220_v48  ;;  %3782 = vmatmul.f32.gmra.mxu0 %v10683_v21  ;;  %v3624_v48 = vadd.f32 %v8877_v40, %v10689_v17 }
 0x5bf   :  { %v5302_v39 = vsel %vm5301_vm9, %v6218_v34, %v5298_v12  ;;  %v5310_v2 = vmul.f32 %v6222_v46, %v9129_v16  ;;  %6223 = vpow2.f32 %v6102_v51  ;;  %4178 = vmatmul.f32.gmra.mxu1 %v10684_v25  ;;  %vm5315_vm11 = vweird.f32 %v6222_v46 }
 0x5c0   :  { %v5307_v38 = vsel %vm5304_vm10, %v5306_v13, %v5302_v39  ;;  %6225 = vrcp.f32 %v9150_v3  ;;  %v4346_v62 = vpop.f32.mrf.mxu2  ;;  %v4627_v44 = vpop.f32.mrf.mxu3  ;;  %v5318_v34 = vand.u32 2147483647, %v9129_v16  ;;  %vm5316_vm13 = vmor %vm5314_vm12, %vm5315_vm11  ;;  %v5335_v12 = vand.u32 2147483648, %v9150_v3 }
 0x5c1   :  { %6031 = vst.msk [vmem:[%s9755_s5 + $0x80] sm:$0xff] %vm6014_vm5, %v5307_v38  ;;  %v5311_v15 = vsub.f32 1.0, %v5310_v2  ;;  %v4347_v22 = vadd.f32 %v4346_v62, %v3976_v42  ;;  %vm5329_vm0 = vweird.f32 %v9150_v3  ;;  %v10690_v2 = vld [vmem:[#allocation64_spill] sm:$0xff]  ;;  %v3988_v40 = vadd.f32 %v8880_v63, %v3624_v48 }
 0x5c2   :  { %vm5319_vm14 = vcmp.eq.f32.partialorder %v5318_v34, 8.507059e+37  ;;  %v5336_v25 = vor.u32 1.1754944e-38, %v5335_v12  ;;  %v10693_v34 = vld [vmem:[#allocation69_spill] sm:$0xff] }
 0x5c3   :  { %v5312_v8 = vmul.f32 %v6222_v46, %v5311_v15  ;;  %v4624_v0 = vadd.f32 %v4623_v18, %v4347_v22  ;;  %v9189_v51 = vpop.f32.mrf.mxu1  ;;  %v10691_v15 = vld [vmem:[#allocation89_spill] sm:$0xff] }
 0x5c4   :  { %v10692_v7 = vand.u32 4294901760, %v10691_v15 }
 0x5c5   :  { %v6224_v9 = vpop.eup %6223  ;;  %v5313_v45 = vadd.f32 %v6222_v46, %v5312_v8  ;;  %v6103_v5 = vmul.f32 -1.442695, %v4624_v0  ;;  %4413 = vmatmul.f32.gmra.mxu2 %v10682_v52  ;;  %4694 = vmatmul.f32.gmra.mxu3 %v10686_v61  ;;  %v3629_v0 = vadd.f32 %v8901_v55, %v10693_v34 }
 0x5c6   :  { %v6226_v43 = vpop.eup %6225  ;;  %v9173_v49 = vadd.f32 1.0, %v6224_v9  ;;  %3787 = vmatmul.f32.gmra.mxu0 %v10687_v26 }
 0x5c7   :  { %v5317_v29 = vsel %vm5316_vm13, %v6222_v46, %v5313_v45  ;;  %v5325_v18 = vmul.f32 %v6226_v43, %v9150_v3  ;;  %6227 = vpow2.f32 %v6103_v5  ;;  %4184 = vmatmul.f32.gmra.mxu1 %v10688_v6  ;;  %vm5330_vm15 = vweird.f32 %v6226_v43  ;;  %v9210_v45 = vpop.f32.mrf.mxu0 }
 0x5c8   :  { %v5322_v16 = vsel %vm5319_vm14, %v5321_v47, %v5317_v29  ;;  %6229 = vrcp.f32 %v9173_v49  ;;  %v4350_v54 = vpop.f32.mrf.mxu2  ;;  %v4631_v11 = vpop.f32.mrf.mxu3  ;;  %v5333_v46 = vand.u32 2147483647, %v9150_v3  ;;  %vm5331_vm1 = vmor %vm5329_vm0, %vm5330_vm15  ;;  %v5350_v9 = vand.u32 2147483648, %v9173_v49 }
 0x5c9   :  { %6032 = vst.msk [vmem:[%s9755_s5 + $0x88] sm:$0xff] %vm6014_vm5, %v5322_v16  ;;  %v5326_v30 = vsub.f32 1.0, %v5325_v18  ;;  %v4351_v14 = vadd.f32 %v4350_v54, %v3982_v50  ;;  %vm5344_vm4 = vweird.f32 %v9173_v49  ;;  %v10694_v18 = vld [vmem:[#allocation66_spill] sm:$0xff]  ;;  %v3994_v16 = vadd.f32 %v8910_v59, %v3629_v0 }
 0x5ca   :  { %vm5334_vm2 = vcmp.eq.f32.partialorder %v5333_v46, 8.507059e+37  ;;  %v5351_v6 = vor.u32 1.1754944e-38, %v5350_v9  ;;  %v10697_v46 = vld [vmem:[#allocation70_spill] sm:$0xff] }
 0x5cb   :  { %v5327_v52 = vmul.f32 %v6226_v43, %v5326_v30  ;;  %v4628_v42 = vadd.f32 %v4627_v44, %v4351_v14  ;;  %v9213_v47 = vpop.f32.mrf.mxu1  ;;  %v10695_v30 = vld [vmem:[#allocation123_spill] sm:$0xff] }
 0x5cc   :  { %v10696_v17 = vand.u32 4294901760, %v10695_v30 }
 0x5cd   :  { %v6228_v13 = vpop.eup %6227  ;;  %v5328_v21 = vadd.f32 %v6226_v43, %v5327_v52  ;;  %v6104_v39 = vmul.f32 -1.442695, %v4628_v42  ;;  %4417 = vmatmul.f32.gmra.mxu2 %v10686_v61  ;;  %4698 = vmatmul.f32.gmra.mxu3 %v10690_v2  ;;  %v5348_v61 = vand.u32 2147483647, %v9173_v49  ;;  %v3634_v42 = vadd.f32 %v8931_v23, %v10697_v46 }
 0x5ce   :  { %v6230_v38 = vpop.eup %6229  ;;  %v9196_v62 = vadd.f32 1.0, %v6228_v13  ;;  %3792 = vmatmul.f32.gmra.mxu0 %v10691_v15 }
 0x5cf   :  { %v5332_v22 = vsel %vm5331_vm1, %v6226_v43, %v5328_v21  ;;  %v5340_v44 = vmul.f32 %v6230_v38, %v9173_v49  ;;  %6231 = vpow2.f32 %v6104_v39  ;;  %4190 = vmatmul.f32.gmra.mxu1 %v10692_v7  ;;  %vm5345_vm3 = vweird.f32 %v6230_v38 }
 0x5d0   :  { %v5337_v3 = vsel %vm5334_vm2, %v5336_v25, %v5332_v22  ;;  %6233 = vrcp.f32 %v9196_v62  ;;  %v4354_v53 = vpop.f32.mrf.mxu2  ;;  %v4635_v31 = vpop.f32.mrf.mxu3  ;;  %vm5346_vm6 = vmor %vm5344_vm4, %vm5345_vm3  ;;  %vm5349_vm7 = vcmp.eq.f32.partialorder %v5348_v61, 8.507059e+37  ;;  %v5365_v13 = vand.u32 2147483648, %v9196_v62  ;;  %v10698_v22 = vld [vmem:[#allocation67_spill] sm:$0xff]  ;;  %v10701_v61 = vld [vmem:[#allocation62_spill] sm:$0xff] }
 0x5d1   :  { %6033 = vst.msk [vmem:[%s9755_s5 + $0x90] sm:$0xff] %vm6014_vm5, %v5337_v3  ;;  %v5341_v63 = vsub.f32 1.0, %v5340_v44  ;;  %v4355_v8 = vadd.f32 %v4354_v53, %v3988_v40  ;;  %v5363_v39 = vand.u32 2147483647, %v9196_v62  ;;  %v9234_v40 = vpop.f32.mrf.mxu0  ;;  %vm5359_vm9 = vweird.f32 %v9196_v62  ;;  %v10699_v53 = vld [vmem:[#allocation127_spill] sm:$0xff] }
 0x5d2   :  { %v4000_v23 = vadd.f32 %v8937_v19, %v3634_v42  ;;  %v5366_v3 = vor.u32 1.1754944e-38, %v5365_v13  ;;  %v10700_v34 = vand.u32 4294901760, %v10699_v53 }
 0x5d3   :  { %v5342_v5 = vmul.f32 %v6230_v38, %v5341_v63  ;;  %v4632_v43 = vadd.f32 %v4631_v11, %v4355_v8  ;;  %vm5364_vm11 = vcmp.eq.f32.partialorder %v5363_v39, 8.507059e+37  ;;  %v10705_v39 = vld [vmem:[#allocation63_spill] sm:$0xff] }
 0x5d5   :  { %v6232_v50 = vpop.eup %6231  ;;  %v5343_v26 = vadd.f32 %v6230_v38, %v5342_v5  ;;  %v6105_v29 = vmul.f32 -1.442695, %v4632_v43  ;;  %4421 = vmatmul.f32.gmra.mxu2 %v10690_v2  ;;  %4702 = vmatmul.f32.gmra.mxu3 %v10694_v18  ;;  %v3639_v43 = vadd.f32 %v8958_v58, %v10701_v61 }
 0x5d6   :  { %v6234_v55 = vpop.eup %6233  ;;  %v9219_v54 = vadd.f32 1.0, %v6232_v50  ;;  %3797 = vmatmul.f32.gmra.mxu0 %v10695_v30  ;;  %v10702_v30 = vld [vmem:[#allocation61_spill] sm:$0xff] }
 0x5d7   :  { %v5347_v11 = vsel %vm5346_vm6, %v6230_v38, %v5343_v26  ;;  %v5355_v14 = vmul.f32 %v6234_v55, %v9196_v62  ;;  %6235 = vpow2.f32 %v6105_v29  ;;  %4196 = vmatmul.f32.gmra.mxu1 %v10696_v17  ;;  %vm5360_vm8 = vweird.f32 %v6234_v55  ;;  %v10703_v17 = vld [vmem:[#allocation126_spill] sm:$0xff] }
 0x5d8   :  { %v5352_v49 = vsel %vm5349_vm7, %v5351_v6, %v5347_v11  ;;  %6237 = vrcp.f32 %v9219_v54  ;;  %v4358_v48 = vpop.f32.mrf.mxu2  ;;  %v4639_v12 = vpop.f32.mrf.mxu3  ;;  %vm5361_vm10 = vmor %vm5359_vm9, %vm5360_vm8  ;;  %v5380_v50 = vand.u32 2147483648, %v9219_v54  ;;  %v5378_v29 = vand.u32 2147483647, %v9219_v54 }
 0x5d9   :  { %6034 = vst.msk [vmem:[%s9755_s5 + $0x98] sm:$0xff] %vm6014_vm5, %v5352_v49  ;;  %v5356_v59 = vsub.f32 1.0, %v5355_v14  ;;  %v4359_v52 = vadd.f32 %v4358_v48, %v3994_v16  ;;  %vm5374_vm13 = vweird.f32 %v9219_v54  ;;  %v4006_v14 = vadd.f32 %v8967_v20, %v3639_v43  ;;  %v9264_v48 = vpop.f32.mrf.mxu0 }
 0x5da   :  { %v5381_v58 = vor.u32 1.1754944e-38, %v5380_v50  ;;  %vm5379_vm15 = vcmp.eq.f32.partialorder %v5378_v29, 8.507059e+37  ;;  %v10709_v50 = vld [vmem:[#allocation65_spill] sm:$0xff] }
 0x5db   :  { %v5357_v21 = vmul.f32 %v6234_v55, %v5356_v59  ;;  %v4636_v2 = vadd.f32 %v4635_v31, %v4359_v52  ;;  %v9243_v31 = vpop.f32.mrf.mxu1  ;;  %v10704_v52 = vand.u32 4294901760, %v10703_v17 }
 0x5dd   :  { %v6236_v38 = vpop.eup %6235  ;;  %v5358_v25 = vadd.f32 %v6234_v55, %v5357_v21  ;;  %v6106_v15 = vmul.f32 -1.442695, %v4636_v2  ;;  %4425 = vmatmul.f32.gmra.mxu2 %v10694_v18  ;;  %4706 = vmatmul.f32.gmra.mxu3 %v10698_v22  ;;  %v3644_v2 = vadd.f32 %v8988_v33, %v10705_v39 }
 0x5de   :  { %v6238_v44 = vpop.eup %6237  ;;  %v9240_v7 = vadd.f32 1.0, %v6236_v38  ;;  %3802 = vmatmul.f32.gmra.mxu0 %v10699_v53  ;;  %v10706_v53 = vld [vmem:[#allocation72_spill] sm:$0xff] }
 0x5df   :  { %v5362_v63 = vsel %vm5361_vm10, %v6234_v55, %v5358_v25  ;;  %v5370_v62 = vmul.f32 %v6238_v44, %v9219_v54  ;;  %6239 = vpow2.f32 %v6106_v15  ;;  %4202 = vmatmul.f32.gmra.mxu1 %v10700_v34  ;;  %vm5375_vm12 = vweird.f32 %v6238_v44  ;;  %v10707_v34 = vld [vmem:[#allocation94_spill] sm:$0xff] }
 0x5e0   :  { %v5367_v8 = vsel %vm5364_vm11, %v5366_v3, %v5362_v63  ;;  %6241 = vrcp.f32 %v9240_v7  ;;  %v4362_v19 = vpop.f32.mrf.mxu2  ;;  %v4643_v0 = vpop.f32.mrf.mxu3  ;;  %vm5376_vm14 = vmor %vm5374_vm13, %vm5375_vm12  ;;  %v5395_v38 = vand.u32 2147483648, %v9240_v7  ;;  %v5393_v15 = vand.u32 2147483647, %v9240_v7 }
 0x5e1   :  { %6035 = vst.msk [vmem:[%s9755_s5 + $0xa0] sm:$0xff] %vm6014_vm5, %v5367_v8  ;;  %v5371_v9 = vsub.f32 1.0, %v5370_v62  ;;  %v4363_v5 = vadd.f32 %v4362_v19, %v4000_v23  ;;  %vm5389_vm1 = vweird.f32 %v9240_v7  ;;  %v4012_v62 = vadd.f32 %v8991_v60, %v3644_v2  ;;  %v9297_v29 = vpop.f32.mrf.mxu0 }
 0x5e2   :  { %v5396_v33 = vor.u32 1.1754944e-38, %v5395_v38  ;;  %vm5394_vm3 = vcmp.eq.f32.partialorder %v5393_v15, 8.507059e+37  ;;  %v10713_v38 = vld [vmem:[#allocation68_spill] sm:$0xff] }
 0x5e3   :  { %v5372_v26 = vmul.f32 %v6238_v44, %v5371_v9  ;;  %v4640_v18 = vadd.f32 %v4639_v12, %v4363_v5  ;;  %v9270_v42 = vpop.f32.mrf.mxu1  ;;  %v10708_v9 = vand.u32 4294901760, %v10707_v34 }
 0x5e5   :  { %v6240_v55 = vpop.eup %6239  ;;  %v5373_v16 = vadd.f32 %v6238_v44, %v5372_v26  ;;  %v6107_v6 = vmul.f32 -1.442695, %v4640_v18  ;;  %4429 = vmatmul.f32.gmra.mxu2 %v10698_v22  ;;  %4710 = vmatmul.f32.gmra.mxu3 %v10702_v30  ;;  %v3649_v26 = vadd.f32 %v9012_v37, %v10709_v50 }
 0x5e6   :  { %v6242_v11 = vpop.eup %6241  ;;  %v9261_v49 = vadd.f32 1.0, %v6240_v55  ;;  %3807 = vmatmul.f32.gmra.mxu0 %v10703_v17  ;;  %v10710_v17 = vld [vmem:[#allocation73_spill] sm:$0xff] }
 0x5e7   :  { %v5377_v12 = vsel %vm5376_vm14, %v6238_v44, %v5373_v16  ;;  %v5385_v54 = vmul.f32 %v6242_v11, %v9240_v7  ;;  %6243 = vpow2.f32 %v6107_v6  ;;  %4208 = vmatmul.f32.gmra.mxu1 %v10704_v52  ;;  %vm5390_vm0 = vweird.f32 %v6242_v11  ;;  %v10711_v52 = vld [vmem:[#allocation95_spill] sm:$0xff] }
 0x5e8   :  { %v5382_v59 = vsel %vm5379_vm15, %v5381_v58, %v5377_v12  ;;  %6245 = vrcp.f32 %v9261_v49  ;;  %v4366_v20 = vpop.f32.mrf.mxu2  ;;  %v4647_v46 = vpop.f32.mrf.mxu3  ;;  %vm5391_vm2 = vmor %vm5389_vm1, %vm5390_vm0  ;;  %v5410_v18 = vand.u32 2147483648, %v9261_v49  ;;  %v5408_v6 = vand.u32 2147483647, %v9261_v49 }
 0x5e9   :  { %6036 = vst.msk [vmem:[%s9755_s5 + $0xa8] sm:$0xff] %vm6014_vm5, %v5382_v59  ;;  %v5386_v13 = vsub.f32 1.0, %v5385_v54  ;;  %v4367_v21 = vadd.f32 %v4366_v20, %v4006_v14  ;;  %vm5404_vm6 = vweird.f32 %v9261_v49  ;;  %v4018_v12 = vadd.f32 %v9021_v41, %v3649_v26 }
 0x5ea   :  { %v5411_v54 = vor.u32 1.1754944e-38, %v5410_v18  ;;  %vm5409_vm8 = vcmp.eq.f32.partialorder %v5408_v6, 8.507059e+37  ;;  %v10717_v18 = vld [vmem:[#allocation160_spill] sm:$0xff] }
 0x5eb   :  { %v5387_v25 = vmul.f32 %v6242_v11, %v5386_v13  ;;  %v4644_v22 = vadd.f32 %v4643_v0, %v4367_v21  ;;  %v9300_v55 = vpop.f32.mrf.mxu1  ;;  %v10712_v13 = vand.u32 4294901760, %v10711_v52 }
 0x5ed   :  { %v6244_v44 = vpop.eup %6243  ;;  %v5388_v23 = vadd.f32 %v6242_v11, %v5387_v25  ;;  %v6108_v3 = vmul.f32 -1.442695, %v4644_v22  ;;  %4433 = vmatmul.f32.gmra.mxu2 %v10702_v30  ;;  %4714 = vmatmul.f32.gmra.mxu3 %v10706_v53  ;;  %v3654_v25 = vadd.f32 %v9042_v1, %v10713_v38 }
 0x5ee   :  { %v6246_v63 = vpop.eup %6245  ;;  %v9284_v8 = vadd.f32 1.0, %v6244_v44  ;;  %3812 = vmatmul.f32.gmra.mxu0 %v10707_v34  ;;  %v10714_v34 = vld [vmem:[#allocation74_spill] sm:$0xff] }
 0x5ef   :  { %v5392_v19 = vsel %vm5391_vm2, %v6242_v11, %v5388_v23  ;;  %v5400_v0 = vmul.f32 %v6246_v63, %v9261_v49  ;;  %6247 = vpow2.f32 %v6108_v3  ;;  %4214 = vmatmul.f32.gmra.mxu1 %v10708_v9  ;;  %vm5405_vm4 = vweird.f32 %v6246_v63  ;;  %v9322_v3 = vpop.f32.mrf.mxu0  ;;  %v10715_v9 = vld [vmem:[#allocation9_spill] sm:$0xff] }
 0x5f0   :  { %v5397_v7 = vsel %vm5394_vm3, %v5396_v33, %v5392_v19  ;;  %6249 = vrcp.f32 %v9284_v8  ;;  %v4370_v5 = vpop.f32.mrf.mxu2  ;;  %v4651_v61 = vpop.f32.mrf.mxu3  ;;  %vm5406_vm7 = vmor %vm5404_vm6, %vm5405_vm4  ;;  %v5425_v15 = vand.u32 2147483648, %v9284_v8  ;;  %v5423_v44 = vand.u32 2147483647, %v9284_v8 }
 0x5f1   :  { %6037 = vst.msk [vmem:[%s9755_s5 + $0xb0] sm:$0xff] %vm6014_vm5, %v5397_v7  ;;  %v5401_v60 = vsub.f32 1.0, %v5400_v0  ;;  %v4371_v43 = vadd.f32 %v4370_v5, %v4012_v62  ;;  %vm5419_vm10 = vweird.f32 %v9284_v8  ;;  %v4024_v19 = vadd.f32 %v9048_v57, %v3654_v25 }
 0x5f2   :  { %v5426_v0 = vor.u32 1.1754944e-38, %v5425_v15  ;;  %vm5424_vm12 = vcmp.eq.f32.partialorder %v5423_v44, 8.507059e+37  ;;  %v10721_v15 = vld [vmem:[#allocation103_spill] sm:$0xff] }
 0x5f3   :  { %v5402_v16 = vmul.f32 %v6246_v63, %v5401_v60  ;;  %v4648_v30 = vadd.f32 %v4647_v46, %v4371_v43  ;;  %v10716_v60 = vand.u32 4294901760, %v10715_v9 }
 0x5f5   :  { %v6248_v11 = vpop.eup %6247  ;;  %v5403_v14 = vadd.f32 %v6246_v63, %v5402_v16  ;;  %v6109_v58 = vmul.f32 -1.442695, %v4648_v30  ;;  %4437 = vmatmul.f32.gmra.mxu2 %v10706_v53  ;;  %4718 = vmatmul.f32.gmra.mxu3 %v10710_v17  ;;  %v3659_v16 = vadd.f32 %v9069_v36, %v10717_v18 }
 0x5f6   :  { %v6250_v37 = vpop.eup %6249  ;;  %v9307_v59 = vadd.f32 1.0, %v6248_v11  ;;  %3817 = vmatmul.f32.gmra.mxu0 %v10711_v52 }
 0x5f7   :  { %v5407_v20 = vsel %vm5406_vm7, %v6246_v63, %v5403_v14  ;;  %v5415_v46 = vmul.f32 %v6250_v37, %v9284_v8  ;;  %6251 = vpow2.f32 %v6109_v58  ;;  %4220 = vmatmul.f32.gmra.mxu1 %v10712_v13  ;;  %vm5420_vm9 = vweird.f32 %v6250_v37  ;;  %v9324_v63 = vpop.f32.mrf.mxu1  ;;  %v9349_v36 = vpop.f32.mrf.mxu0 }
 0x5f8   :  { %v5412_v49 = vsel %vm5409_vm8, %v5411_v54, %v5407_v20  ;;  %6253 = vrcp.f32 %v9307_v59  ;;  %v4374_v21 = vpop.f32.mrf.mxu2  ;;  %v4655_v39 = vpop.f32.mrf.mxu3  ;;  %vm5421_vm11 = vmor %vm5419_vm10, %vm5420_vm9  ;;  %v5440_v6 = vand.u32 2147483648, %v9307_v59  ;;  %v5438_v11 = vand.u32 2147483647, %v9307_v59 }
 0x5f9   :  { %6038 = vst.msk [vmem:[%s9755_s5 + $0xb8] sm:$0xff] %vm6014_vm5, %v5412_v49  ;;  %v5416_v41 = vsub.f32 1.0, %v5415_v46  ;;  %v4375_v2 = vadd.f32 %v4374_v21, %v4018_v12  ;;  %vm5434_vm14 = vweird.f32 %v9307_v59  ;;  %v10718_v12 = vld [vmem:[#allocation75_spill] sm:$0xff]  ;;  %v4030_v52 = vadd.f32 %v9078_v28, %v3659_v16  ;;  %v10719_v49 = vld [vmem:[#allocation8_spill] sm:$0xff] }
 0x5fa   :  { %v5441_v20 = vor.u32 1.1754944e-38, %v5440_v6  ;;  %vm5439_vm0 = vcmp.eq.f32.partialorder %v5438_v11, 8.507059e+37 }
 0x5fb   :  { %v5417_v22 = vmul.f32 %v6250_v37, %v5416_v41  ;;  %v4652_v23 = vadd.f32 %v4651_v61, %v4375_v2  ;;  %v10720_v41 = vand.u32 4294901760, %v10719_v49 }
 0x5fd   :  { %v6252_v53 = vpop.eup %6251  ;;  %v5418_v62 = vadd.f32 %v6250_v37, %v5417_v22  ;;  %v6110_v33 = vmul.f32 -1.442695, %v4652_v23  ;;  %4441 = vmatmul.f32.gmra.mxu2 %v10710_v17  ;;  %4722 = vmatmul.f32.gmra.mxu3 %v10714_v34  ;;  %v3664_v22 = vadd.f32 %v9099_v35, %v10721_v15 }
 0x5fe   :  { %v6254_v1 = vpop.eup %6253  ;;  %v9330_v7 = vadd.f32 1.0, %v6252_v53  ;;  %3822 = vmatmul.f32.gmra.mxu0 %v10715_v9 }
 0x5ff   :  { %v5422_v5 = vsel %vm5421_vm11, %v6250_v37, %v5418_v62  ;;  %v5430_v61 = vmul.f32 %v6254_v1, %v9307_v59  ;;  %6255 = vpow2.f32 %v6110_v33  ;;  %4226 = vmatmul.f32.gmra.mxu1 %v10716_v60  ;;  %vm5435_vm13 = vweird.f32 %v6254_v1  ;;  %v9352_v13 = vpop.f32.mrf.mxu1 }
 0x600   :  { %v5427_v8 = vsel %vm5424_vm12, %v5426_v0, %v5422_v5  ;;  %6257 = vrcp.f32 %v9330_v7  ;;  %v4378_v43 = vpop.f32.mrf.mxu2  ;;  %v4659_v50 = vpop.f32.mrf.mxu3  ;;  %vm5436_vm15 = vmor %vm5434_vm14, %vm5435_vm13  ;;  %v5455_v44 = vand.u32 2147483648, %v9330_v7  ;;  %v5453_v53 = vand.u32 2147483647, %v9330_v7 }
 0x601   :  { %6039 = vst.msk [vmem:[%s9755_s5 + $0xc0] sm:$0xff] %vm6014_vm5, %v5427_v8  ;;  %v5431_v57 = vsub.f32 1.0, %v5430_v61  ;;  %v4379_v26 = vadd.f32 %v4378_v43, %v4024_v19  ;;  %vm5449_vm2 = vweird.f32 %v9330_v7  ;;  %v10722_v19 = vld [vmem:[#allocation71_spill] sm:$0xff]  ;;  %v4036_v9 = vadd.f32 %v9102_v24, %v3664_v22 }
 0x602   :  { %v5456_v35 = vor.u32 1.1754944e-38, %v5455_v44  ;;  %vm5454_vm4 = vcmp.eq.f32.partialorder %v5453_v53, 8.507059e+37 }
 0x603   :  { %v5432_v30 = vmul.f32 %v6254_v1, %v5431_v57  ;;  %v4656_v14 = vadd.f32 %v4655_v39, %v4379_v26  ;;  %v10723_v26 = vld [vmem:[#allocation78_spill] sm:$0xff] }
 0x604   :  { %v3669_v24 = vadd.f32 %v9123_v56, %v10723_v26 }
 0x605   :  { %v6256_v58 = vpop.eup %6255  ;;  %v5433_v17 = vadd.f32 %v6254_v1, %v5432_v30  ;;  %v6111_v37 = vmul.f32 -1.442695, %v4656_v14  ;;  %4445 = vmatmul.f32.gmra.mxu2 %v10714_v34  ;;  %4726 = vmatmul.f32.gmra.mxu3 %v10718_v12 }
 0x606   :  { %v6258_v54 = vpop.eup %6257  ;;  %v5017_v46 = vadd.f32 1.0, %v6256_v58  ;;  %3827 = vmatmul.f32.gmra.mxu0 %v10719_v49 }
 0x607   :  { %v5437_v21 = vsel %vm5436_vm15, %v6254_v1, %v5433_v17  ;;  %v5445_v59 = vmul.f32 %v6258_v54, %v9330_v7  ;;  %6259 = vpow2.f32 %v6111_v37  ;;  %4232 = vmatmul.f32.gmra.mxu1 %v10720_v41  ;;  %vm5450_vm1 = vweird.f32 %v6258_v54  ;;  %v10724_v17 = vld [vmem:[#allocation76_spill] sm:$0xff]  ;;  %v10725_v41 = vld [vmem:[#allocation79_spill] sm:$0xff] }
 0x608   :  { %v5442_v39 = vsel %vm5439_vm0, %v5441_v20, %v5437_v21  ;;  %6261 = vrcp.f32 %v5017_v46  ;;  %v4382_v28 = vpop.f32.mrf.mxu2  ;;  %v4663_v2 = vpop.f32.mrf.mxu3  ;;  %vm5451_vm3 = vmor %vm5449_vm2, %vm5450_vm1  ;;  %v5470_v18 = vand.u32 2147483648, %v5017_v46  ;;  %v5468_v6 = vand.u32 2147483647, %v5017_v46 }
 0x609   :  { %6040 = vst.msk [vmem:[%s9755_s5 + $0xc8] sm:$0xff] %vm6014_vm5, %v5442_v39  ;;  %v5446_v38 = vsub.f32 1.0, %v5445_v59  ;;  %v4383_v25 = vadd.f32 %v4382_v28, %v4030_v52  ;;  %vm5464_vm7 = vweird.f32 %v5017_v46 }
 0x60a   :  { %vm5469_vm9 = vcmp.eq.f32.partialorder %v5468_v6, 8.507059e+37 }
 0x60b   :  { %v5447_v23 = vmul.f32 %v6258_v54, %v5446_v38  ;;  %v4660_v62 = vadd.f32 %v4659_v50, %v4383_v25 }
 0x60d   :  { %v6260_v33 = vpop.eup %6259  ;;  %v5448_v34 = vadd.f32 %v6258_v54, %v5447_v23  ;;  %v6112_v1 = vmul.f32 -1.442695, %v4660_v62  ;;  %4449 = vmatmul.f32.gmra.mxu2 %v10718_v12  ;;  %4730 = vmatmul.f32.gmra.mxu3 %v10722_v19  ;;  %v4042_v12 = vadd.f32 %v9132_v4, %v3669_v24  ;;  %v3674_v4 = vadd.f32 %v9153_v27, %v10725_v41  ;;  %v10726_v23 = vld [vmem:[#allocation77_spill] sm:$0xff] }
 0x60e   :  { %v6262_v0 = vpop.eup %6261  ;;  %v5018_v5 = vadd.f32 1.0, %v6260_v33  ;;  %v10728_v24 = vld [vmem:[#allocation105_spill] sm:$0xff] }
 0x60f   :  { %v5452_v61 = vsel %vm5451_vm3, %v6258_v54, %v5448_v34  ;;  %v5460_v8 = vmul.f32 %v6262_v0, %v5017_v46  ;;  %6263 = vpow2.f32 %v6112_v1  ;;  %vm5465_vm6 = vweird.f32 %v6262_v0 }
 0x610   :  { %v5457_v60 = vsel %vm5454_vm4, %v5456_v35, %v5452_v61  ;;  %6265 = vrcp.f32 %v5018_v5  ;;  %v4386_v43 = vpop.f32.mrf.mxu2  ;;  %v4667_v50 = vpop.f32.mrf.mxu3  ;;  %vm5466_vm8 = vmor %vm5464_vm7, %vm5465_vm6  ;;  %v5471_v54 = vor.u32 1.1754944e-38, %v5470_v18  ;;  %v5485_v28 = vand.u32 2147483648, %v5018_v5  ;;  %v10727_v61 = vld [vmem:[#allocation81_spill] sm:$0xff] }
 0x611   :  { %6041 = vst.msk [vmem:[%s9755_s5 + $0xd0] sm:$0xff] %vm6014_vm5, %v5457_v60  ;;  %v5461_v7 = vsub.f32 1.0, %v5460_v8  ;;  %v4387_v57 = vadd.f32 %v4386_v43, %v4036_v9  ;;  %v5483_v38 = vand.u32 2147483647, %v5018_v5  ;;  %vm5479_vm11 = vweird.f32 %v5018_v5 }
 0x612   :  { %v4048_v62 = vadd.f32 %v9159_v10, %v3674_v4  ;;  %v5486_v33 = vor.u32 1.1754944e-38, %v5485_v28  ;;  %v3679_v10 = vadd.f32 %v9180_v32, %v10727_v61  ;;  %v10730_v4 = vld [vmem:[#allocation80_spill] sm:$0xff] }
 0x613   :  { %v5462_v16 = vmul.f32 %v6262_v0, %v5461_v7  ;;  %v4664_v30 = vadd.f32 %v4663_v2, %v4387_v57  ;;  %vm5484_vm13 = vcmp.eq.f32.partialorder %v5483_v38, 8.507059e+37  ;;  %v10732_v61 = vld [vmem:[#allocation108_spill] sm:$0xff] }
 0x615   :  { %v6264_v11 = vpop.eup %6263  ;;  %v5463_v14 = vadd.f32 %v6262_v0, %v5462_v16  ;;  %v6113_v58 = vmul.f32 -1.442695, %v4664_v30  ;;  %4453 = vmatmul.f32.gmra.mxu2 %v10722_v19  ;;  %4734 = vmatmul.f32.gmra.mxu3 %v10724_v17  ;;  %v4054_v16 = vadd.f32 %v9189_v51, %v3679_v10 }
 0x616   :  { %v6266_v37 = vpop.eup %6265  ;;  %v5019_v52 = vadd.f32 1.0, %v6264_v11 }
 0x617   :  { %v5467_v56 = vsel %vm5466_vm8, %v6262_v0, %v5463_v14  ;;  %v5475_v20 = vmul.f32 %v6266_v37, %v5018_v5  ;;  %6267 = vpow2.f32 %v6113_v58  ;;  %vm5480_vm10 = vweird.f32 %v6266_v37 }
 0x618   :  { %v5472_v49 = vsel %vm5469_vm9, %v5471_v54, %v5467_v56  ;;  %6269 = vrcp.f32 %v5019_v52  ;;  %v4390_v21 = vpop.f32.mrf.mxu2  ;;  %v4671_v59 = vpop.f32.mrf.mxu3  ;;  %vm5481_vm12 = vmor %vm5479_vm11, %vm5480_vm10  ;;  %v5500_v8 = vand.u32 2147483648, %v5019_v52  ;;  %v5498_v43 = vand.u32 2147483647, %v5019_v52  ;;  %v10729_v54 = vld [vmem:[#allocation83_spill] sm:$0xff] }
 0x619   :  { %6042 = vst.msk [vmem:[%s9755_s5 + $0xd8] sm:$0xff] %vm6014_vm5, %v5472_v49  ;;  %v5476_v46 = vsub.f32 1.0, %v5475_v20  ;;  %v4391_v39 = vadd.f32 %v4390_v21, %v4042_v12  ;;  %vm5494_vm15 = vweird.f32 %v5019_v52 }
 0x61a   :  { %v5501_v6 = vor.u32 1.1754944e-38, %v5500_v8  ;;  %vm5499_vm1 = vcmp.eq.f32.partialorder %v5498_v43, 8.507059e+37 }
 0x61b   :  { %v5477_v2 = vmul.f32 %v6266_v37, %v5476_v46  ;;  %v4668_v25 = vadd.f32 %v4667_v50, %v4391_v39  ;;  %v9407_v46 = vpop.f32.mrf.mxu1 }
 0x61d   :  { %v6268_v15 = vpop.eup %6267  ;;  %v5478_v22 = vadd.f32 %v6266_v37, %v5477_v2  ;;  %v6114_v44 = vmul.f32 -1.442695, %v4668_v25  ;;  %4457 = vmatmul.f32.gmra.mxu2 %v10724_v17  ;;  %4738 = vmatmul.f32.gmra.mxu3 %v10726_v23 }
 0x61e   :  { %v6270_v53 = vpop.eup %6269  ;;  %v5020_v34 = vadd.f32 1.0, %v6268_v15 }
 0x61f   :  { %v5482_v27 = vsel %vm5481_vm12, %v6266_v37, %v5478_v22  ;;  %v5490_v1 = vmul.f32 %v6270_v53, %v5019_v52  ;;  %6271 = vpow2.f32 %v6114_v44  ;;  %vm5495_vm14 = vweird.f32 %v6270_v53  ;;  %v9399_v37 = vpop.f32.mrf.mxu0 }
 0x620   :  { %v5487_v19 = vsel %vm5484_vm13, %v5486_v33, %v5482_v27  ;;  %6273 = vrcp.f32 %v5020_v34  ;;  %v4394_v0 = vpop.f32.mrf.mxu2  ;;  %v4675_v9 = vpop.f32.mrf.mxu3  ;;  %vm5496_vm0 = vmor %vm5494_vm15, %vm5495_vm14  ;;  %v3684_v52 = vadd.f32 %v9210_v45, %v10729_v54  ;;  %v5515_v56 = vand.u32 2147483648, %v5020_v34  ;;  %v10734_v54 = vld [vmem:[#allocation111_spill] sm:$0xff] }
 0x621   :  { %6043 = vst.msk [vmem:[%s9755_s5 + $0xe0] sm:$0xff] %vm6014_vm5, %v5487_v19  ;;  %v5491_v35 = vsub.f32 1.0, %v5490_v1  ;;  %v4395_v5 = vadd.f32 %v4394_v0, %v4048_v62  ;;  %v5513_v49 = vand.u32 2147483647, %v5020_v34  ;;  %vm5509_vm3 = vweird.f32 %v5020_v34 }
 0x622   :  { %v4060_v2 = vadd.f32 %v9213_v47, %v3684_v52  ;;  %v5516_v45 = vor.u32 1.1754944e-38, %v5515_v56  ;;  %v10731_v47 = vld [vmem:[#allocation85_spill] sm:$0xff] }
 0x623   :  { %v5492_v60 = vmul.f32 %v6270_v53, %v5491_v35  ;;  %v4672_v50 = vadd.f32 %v4671_v59, %v4395_v5  ;;  %vm5514_vm6 = vcmp.eq.f32.partialorder %v5513_v49, 8.507059e+37  ;;  %v3689_v33 = vadd.f32 %v9234_v40, %v10731_v47  ;;  %v9429_v43 = vpop.f32.mrf.mxu1 }
 0x625   :  { %v6272_v7 = vpop.eup %6271  ;;  %v5493_v57 = vadd.f32 %v6270_v53, %v5492_v60  ;;  %v6115_v26 = vmul.f32 -1.442695, %v4672_v50  ;;  %4461 = vmatmul.f32.gmra.mxu2 %v10726_v23  ;;  %4742 = vmatmul.f32.gmra.mxu3 %v10728_v24  ;;  %v4066_v40 = vadd.f32 %v9243_v31, %v3689_v33 }
 0x626   :  { %v6274_v18 = vpop.eup %6273  ;;  %v9396_v30 = vadd.f32 1.0, %v6272_v7 }
 0x627   :  { %v5497_v32 = vsel %vm5496_vm0, %v6270_v53, %v5493_v57  ;;  %v5505_v11 = vmul.f32 %v6274_v18, %v5020_v34  ;;  %6275 = vpow2.f32 %v6115_v26  ;;  %vm5510_vm2 = vweird.f32 %v6274_v18  ;;  %v9420_v27 = vpop.f32.mrf.mxu0 }
 0x628   :  { %v5502_v14 = vsel %vm5499_vm1, %v5501_v6, %v5497_v32  ;;  %6277 = vrcp.f32 %v9396_v30  ;;  %v4398_v58 = vpop.f32.mrf.mxu2  ;;  %v4679_v17 = vpop.f32.mrf.mxu3  ;;  %vm5511_vm4 = vmor %vm5509_vm3, %vm5510_vm2  ;;  %v5530_v34 = vand.u32 2147483648, %v9396_v30  ;;  %v5528_v19 = vand.u32 2147483647, %v9396_v30 }
 0x629   :  { %6044 = vst.msk [vmem:[%s9755_s5 + $0xe8] sm:$0xff] %vm6014_vm5, %v5502_v14  ;;  %v5506_v51 = vsub.f32 1.0, %v5505_v11  ;;  %v4399_v12 = vadd.f32 %v4398_v58, %v4054_v16  ;;  %vm5524_vm8 = vweird.f32 %v9396_v30  ;;  %v10733_v16 = vld [vmem:[#allocation115_spill] sm:$0xff] }
 0x62a   :  { %v5531_v8 = vor.u32 1.1754944e-38, %v5530_v34  ;;  %vm5529_vm10 = vcmp.eq.f32.partialorder %v5528_v19, 8.507059e+37  ;;  %v3694_v6 = vadd.f32 %v9264_v48, %v10733_v16 }
 0x62b   :  { %v5507_v20 = vmul.f32 %v6274_v18, %v5506_v51  ;;  %v4676_v21 = vadd.f32 %v4675_v9, %v4399_v12 }
 0x62c   :  { %v4072_v56 = vadd.f32 %v9270_v42, %v3694_v6 }
 0x62d   :  { %v6276_v59 = vpop.eup %6275  ;;  %v5508_v39 = vadd.f32 %v6274_v18, %v5507_v20  ;;  %v6116_v41 = vmul.f32 -1.442695, %v4676_v21  ;;  %4465 = vmatmul.f32.gmra.mxu2 %v10728_v24  ;;  %4746 = vmatmul.f32.gmra.mxu3 %v10730_v4 }
 0x62e   :  { %v6278_v28 = vpop.eup %6277  ;;  %v5022_v38 = vadd.f32 1.0, %v6276_v59 }
 0x62f   :  { %v5512_v25 = vsel %vm5511_vm4, %v6274_v18, %v5508_v39  ;;  %v5520_v15 = vmul.f32 %v6278_v28, %v9396_v30  ;;  %6279 = vpow2.f32 %v6116_v41  ;;  %vm5525_vm7 = vweird.f32 %v6278_v28 }
 0x630   :  { %v5517_v22 = vsel %vm5514_vm6, %v5516_v45, %v5512_v25  ;;  %6281 = vrcp.f32 %v5022_v38  ;;  %v4402_v44 = vpop.f32.mrf.mxu2  ;;  %v4683_v23 = vpop.f32.mrf.mxu3  ;;  %vm5526_vm9 = vmor %vm5524_vm8, %vm5525_vm7  ;;  %v5545_v30 = vand.u32 2147483648, %v5022_v38  ;;  %v5543_v11 = vand.u32 2147483647, %v5022_v38 }
 0x631   :  { %6045 = vst.msk [vmem:[%s9755_s5 + $0xf0] sm:$0xff] %vm6014_vm5, %v5517_v22  ;;  %v5521_v53 = vsub.f32 1.0, %v5520_v15  ;;  %v4403_v62 = vadd.f32 %v4402_v44, %v4060_v2  ;;  %vm5539_vm12 = vweird.f32 %v5022_v38  ;;  %v10735_v2 = vld [vmem:[#allocation120_spill] sm:$0xff] }
 0x632   :  { %v5546_v48 = vor.u32 1.1754944e-38, %v5545_v30  ;;  %vm5544_vm14 = vcmp.eq.f32.partialorder %v5543_v11, 8.507059e+37  ;;  %v3699_v45 = vadd.f32 %v9297_v29, %v10735_v2 }
 0x633   :  { %v5522_v1 = vmul.f32 %v6278_v28, %v5521_v53  ;;  %v4680_v0 = vadd.f32 %v4679_v17, %v4403_v62  ;;  %v9438_v17 = vpop.f32.mrf.mxu0  ;;  %v10736_v62 = vld [vmem:[#allocation86_spill] sm:$0xff] }
 0x634   :  { %v4078_v33 = vadd.f32 %v9300_v55, %v3699_v45 }
 0x635   :  { %v6280_v9 = vpop.eup %6279  ;;  %v5523_v35 = vadd.f32 %v6278_v28, %v5522_v1  ;;  %v6117_v5 = vmul.f32 -1.442695, %v4680_v0  ;;  %4469 = vmatmul.f32.gmra.mxu2 %v10730_v4  ;;  %4750 = vmatmul.f32.gmra.mxu3 %v10732_v61  ;;  %v9444_v4 = vpop.f32.mrf.mxu1 }
 0x636   :  { %v6282_v10 = vpop.eup %6281  ;;  %v9427_v60 = vadd.f32 1.0, %v6280_v9 }
 0x637   :  { %v5527_v50 = vsel %vm5526_vm9, %v6278_v28, %v5523_v35  ;;  %v5535_v7 = vmul.f32 %v6282_v10, %v5022_v38  ;;  %6283 = vpow2.f32 %v6117_v5  ;;  %vm5540_vm11 = vweird.f32 %v6282_v10 }
 0x638   :  { %v5532_v57 = vsel %vm5529_vm10, %v5531_v8, %v5527_v50  ;;  %6285 = vrcp.f32 %v9427_v60  ;;  %v4406_v26 = vpop.f32.mrf.mxu2  ;;  %v4687_v24 = vpop.f32.mrf.mxu3  ;;  %vm5541_vm13 = vmor %vm5539_vm12, %vm5540_vm11  ;;  %v5560_v38 = vand.u32 2147483648, %v9427_v60  ;;  %v5558_v15 = vand.u32 2147483647, %v9427_v60 }
 0x639   :  { %6046 = vst.msk [vmem:[%s9755_s5 + $0xf8] sm:$0xff] %vm6014_vm5, %v5532_v57  ;;  %v5536_v31 = vsub.f32 1.0, %v5535_v7  ;;  %v4407_v18 = vadd.f32 %v4406_v26, %v4066_v40  ;;  %vm5554_vm0 = vweird.f32 %v9427_v60 }
 0x63a   :  { %v5561_v29 = vor.u32 1.1754944e-38, %v5560_v38  ;;  %vm5559_vm2 = vcmp.eq.f32.partialorder %v5558_v15, 8.507059e+37 }
 0x63b   :  { %v5537_v32 = vmul.f32 %v6282_v10, %v5536_v31  ;;  %v4684_v14 = vadd.f32 %v4683_v23, %v4407_v18  ;;  %v9460_v1 = vpop.f32.mrf.mxu0  ;;  %v10738_v18 = vld [vmem:[#allocation87_spill] sm:$0xff] }
 0x63d   :  { %v6284_v58 = vpop.eup %6283  ;;  %v5538_v51 = vadd.f32 %v6282_v10, %v5537_v32  ;;  %v6118_v12 = vmul.f32 -1.442695, %v4684_v14  ;;  %4473 = vmatmul.f32.gmra.mxu2 %v10732_v61  ;;  %4754 = vmatmul.f32.gmra.mxu3 %v10734_v54 }
 0x63e   :  { %v6286_v52 = vpop.eup %6285  ;;  %v5024_v20 = vadd.f32 1.0, %v6284_v58 }
 0x63f   :  { %v5542_v49 = vsel %vm5541_vm13, %v6282_v10, %v5538_v51  ;;  %v5550_v21 = vmul.f32 %v6286_v52, %v9427_v60  ;;  %6287 = vpow2.f32 %v6118_v12  ;;  %vm5555_vm15 = vweird.f32 %v6286_v52  ;;  %v10737_v10 = vld [vmem:[#allocation117_spill] sm:$0xff]  ;;  %v9469_v60 = vpop.f32.mrf.mxu1 }
 0x640   :  { %v5547_v59 = vsel %vm5544_vm14, %v5546_v48, %v5542_v49  ;;  %6289 = vrcp.f32 %v5024_v20  ;;  %v4410_v39 = vpop.f32.mrf.mxu2  ;;  %v4691_v41 = vpop.f32.mrf.mxu3  ;;  %vm5556_vm1 = vmor %vm5554_vm0, %vm5555_vm15  ;;  %v3704_v40 = vadd.f32 %v9322_v3, %v10737_v10  ;;  %v5575_v8 = vand.u32 2147483648, %v5024_v20 }
 0x641   :  { %6047 = vst.msk [vmem:[%s9755_s5 + $0x100] sm:$0xff] %vm6014_vm5, %v5547_v59  ;;  %v5551_v42 = vsub.f32 1.0, %v5550_v21  ;;  %v4411_v28 = vadd.f32 %v4410_v39, %v4072_v56  ;;  %v5573_v7 = vand.u32 2147483647, %v5024_v20  ;;  %vm5569_vm4 = vweird.f32 %v5024_v20 }
 0x642   :  { %v4084_v6 = vadd.f32 %v9324_v63, %v3704_v40  ;;  %v5576_v3 = vor.u32 1.1754944e-38, %v5575_v8 }
 0x643   :  { %v5552_v25 = vmul.f32 %v6286_v52, %v5551_v42  ;;  %v4688_v22 = vadd.f32 %v4687_v24, %v4411_v28  ;;  %vm5574_vm7 = vcmp.eq.f32.partialorder %v5573_v7, 8.507059e+37  ;;  %v9478_v12 = vpop.f32.mrf.mxu0  ;;  %v10740_v28 = vld [vmem:[#allocation119_spill] sm:$0xff] }
 0x645   :  { %v6288_v44 = vpop.eup %6287  ;;  %v5553_v23 = vadd.f32 %v6286_v52, %v5552_v25  ;;  %v6119_v53 = vmul.f32 -1.442695, %v4688_v22  ;;  %4477 = vmatmul.f32.gmra.mxu2 %v10734_v54  ;;  %4758 = vmatmul.f32.gmra.mxu3 %v10736_v62 }
 0x646   :  { %v6290_v47 = vpop.eup %6289  ;;  %v9458_v34 = vadd.f32 1.0, %v6288_v44 }
 0x647   :  { %v5557_v19 = vsel %vm5556_vm1, %v6286_v52, %v5553_v23  ;;  %v5565_v0 = vmul.f32 %v6290_v47, %v5024_v20  ;;  %6291 = vpow2.f32 %v6119_v53  ;;  %vm5570_vm3 = vweird.f32 %v6290_v47  ;;  %v10739_v52 = vld [vmem:[#allocation90_spill] sm:$0xff]  ;;  %v9488_v39 = vpop.f32.mrf.mxu1 }
 0x648   :  { %v5562_v9 = vsel %vm5559_vm2, %v5561_v29, %v5557_v19  ;;  %6293 = vrcp.f32 %v9458_v34  ;;  %v4414_v35 = vpop.f32.mrf.mxu2  ;;  %v4695_v5 = vpop.f32.mrf.mxu3  ;;  %vm5571_vm6 = vmor %vm5569_vm4, %vm5570_vm3  ;;  %v3709_v56 = vadd.f32 %v9349_v36, %v10739_v52  ;;  %v5590_v48 = vand.u32 2147483648, %v9458_v34 }
 0x649   :  { %6048 = vst.msk [vmem:[%s9755_s5 + $0x108] sm:$0xff] %vm6014_vm5, %v5562_v9  ;;  %v5566_v55 = vsub.f32 1.0, %v5565_v0  ;;  %v4415_v61 = vadd.f32 %v4414_v35, %v4078_v33  ;;  %v5588_v49 = vand.u32 2147483647, %v9458_v34  ;;  %vm5584_vm9 = vweird.f32 %v9458_v34 }
 0x64a   :  { %v4090_v36 = vadd.f32 %v9352_v13, %v3709_v56  ;;  %v5591_v45 = vor.u32 1.1754944e-38, %v5590_v48  ;;  %v10741_v13 = vld [vmem:[#allocation91_spill] sm:$0xff] }
 0x64b   :  { %v5567_v50 = vmul.f32 %v6290_v47, %v5566_v55  ;;  %v4692_v57 = vadd.f32 %v4691_v41, %v4415_v61  ;;  %vm5589_vm11 = vcmp.eq.f32.partialorder %v5588_v49, 8.507059e+37  ;;  %v9502_v29 = vpop.f32.mrf.mxu0  ;;  %v10742_v55 = vld [vmem:[#allocation124_spill] sm:$0xff] }
 0x64d   :  { %v6292_v26 = vpop.eup %6291  ;;  %v5568_v24 = vadd.f32 %v6290_v47, %v5567_v50  ;;  %v6120_v31 = vmul.f32 -1.442695, %v4692_v57  ;;  %4481 = vmatmul.f32.gmra.mxu2 %v10736_v62  ;;  %4762 = vmatmul.f32.gmra.mxu3 %v10738_v18 }
 0x64e   :  { %v6294_v16 = vpop.eup %6293  ;;  %v9474_v30 = vadd.f32 1.0, %v6292_v26 }
 0x64f   :  { %v5572_v32 = vsel %vm5571_vm6, %v6290_v47, %v5568_v24  ;;  %v5580_v11 = vmul.f32 %v6294_v16, %v9458_v34  ;;  %6295 = vpow2.f32 %v6120_v31  ;;  %vm5585_vm8 = vweird.f32 %v6294_v16  ;;  %v9511_v8 = vpop.f32.mrf.mxu1 }
 0x650   :  { %v5577_v14 = vsel %vm5574_vm7, %v5576_v3, %v5572_v32  ;;  %6297 = vrcp.f32 %v9474_v30  ;;  %v4418_v58 = vpop.f32.mrf.mxu2  ;;  %v4699_v51 = vpop.f32.mrf.mxu3  ;;  %vm5586_vm10 = vmor %vm5584_vm9, %vm5585_vm8  ;;  %v3714_v47 = vadd.f32 %v9399_v37, %v10741_v13  ;;  %v5605_v33 = vand.u32 2147483648, %v9474_v30 }
 0x651   :  { %6049 = vst.msk [vmem:[%s9755_s5 + $0x110] sm:$0xff] %vm6014_vm5, %v5577_v14  ;;  %v5581_v63 = vsub.f32 1.0, %v5580_v11  ;;  %v4419_v54 = vadd.f32 %v4418_v58, %v4084_v6  ;;  %v5603_v19 = vand.u32 2147483647, %v9474_v30  ;;  %vm5599_vm13 = vweird.f32 %v9474_v30 }
 0x652   :  { %v4096_v37 = vadd.f32 %v9407_v46, %v3714_v47  ;;  %v5606_v10 = vor.u32 1.1754944e-38, %v5605_v33 }
 0x653   :  { %v5582_v20 = vmul.f32 %v6294_v16, %v5581_v63  ;;  %v4696_v21 = vadd.f32 %v4695_v5, %v4419_v54  ;;  %vm5604_vm15 = vcmp.eq.f32.partialorder %v5603_v19, 8.507059e+37  ;;  %v9520_v14 = vpop.f32.mrf.mxu0  ;;  %v10744_v63 = vld [vmem:[#allocation121_spill] sm:$0xff] }
 0x655   :  { %v6296_v59 = vpop.eup %6295  ;;  %v5583_v41 = vadd.f32 %v6294_v16, %v5582_v20  ;;  %v6121_v42 = vmul.f32 -1.442695, %v4696_v21  ;;  %4485 = vmatmul.f32.gmra.mxu2 %v10738_v18  ;;  %4766 = vmatmul.f32.gmra.mxu3 %v10740_v28  ;;  %v10743_v18 = vld [vmem:[#allocation5_spill] sm:$0xff] }
 0x656   :  { %v6298_v2 = vpop.eup %6297  ;;  %v5027_v38 = vadd.f32 1.0, %v6296_v59 }
 0x657   :  { %v5587_v25 = vsel %vm5586_vm10, %v6294_v16, %v5583_v41  ;;  %v5595_v15 = vmul.f32 %v6298_v2, %v9474_v30  ;;  %6299 = vpow2.f32 %v6121_v42  ;;  %vm5600_vm12 = vweird.f32 %v6298_v2  ;;  %v9526_v41 = vpop.f32.mrf.mxu1 }
 0x658   :  { %v5592_v22 = vsel %vm5589_vm11, %v5591_v45, %v5587_v25  ;;  %6301 = vrcp.f32 %v5027_v38  ;;  %v4422_v44 = vpop.f32.mrf.mxu2  ;;  %v4703_v23 = vpop.f32.mrf.mxu3  ;;  %vm5601_vm14 = vmor %vm5599_vm13, %vm5600_vm12  ;;  %v3719_v16 = vadd.f32 %v9420_v27, %v10743_v18  ;;  %v5620_v6 = vand.u32 2147483648, %v5027_v38 }
 0x659   :  { %6050 = vst.msk [vmem:[%s9755_s5 + $0x118] sm:$0xff] %vm6014_vm5, %v5592_v22  ;;  %v5596_v53 = vsub.f32 1.0, %v5595_v15  ;;  %v4423_v62 = vadd.f32 %v4422_v44, %v4090_v36  ;;  %v5618_v30 = vand.u32 2147483647, %v5027_v38  ;;  %vm5614_vm1 = vweird.f32 %v5027_v38 }
 0x65a   :  { %v4102_v52 = vadd.f32 %v9429_v43, %v3719_v16  ;;  %v5621_v27 = vor.u32 1.1754944e-38, %v5620_v6 }
 0x65b   :  { %v5597_v34 = vmul.f32 %v6298_v2, %v5596_v53  ;;  %v4700_v0 = vadd.f32 %v4699_v51, %v4423_v62  ;;  %vm5619_vm3 = vcmp.eq.f32.partialorder %v5618_v30, 8.507059e+37  ;;  %v9542_v47 = vpop.f32.mrf.mxu0 }
 0x65d   :  { %v6300_v9 = vpop.eup %6299  ;;  %v5598_v35 = vadd.f32 %v6298_v2, %v5597_v34  ;;  %v6122_v5 = vmul.f32 -1.442695, %v4700_v0  ;;  %4489 = vmatmul.f32.gmra.mxu2 %v10740_v28  ;;  %4770 = vmatmul.f32.gmra.mxu3 %v10742_v55  ;;  %v10745_v28 = vld [vmem:[#allocation129_spill] sm:$0xff] }
 0x65e   :  { %v6302_v61 = vpop.eup %6301  ;;  %v9509_v40 = vadd.f32 1.0, %v6300_v9 }
 0x65f   :  { %v5602_v50 = vsel %vm5601_vm14, %v6298_v2, %v5598_v35  ;;  %v5610_v7 = vmul.f32 %v6302_v61, %v5027_v38  ;;  %6303 = vpow2.f32 %v6122_v5  ;;  %vm5615_vm0 = vweird.f32 %v6302_v61  ;;  %v10747_v5 = vld [vmem:[#allocation128_spill] sm:$0xff] }
 0x660   :  { %v5607_v57 = vsel %vm5604_vm15, %v5606_v10, %v5602_v50  ;;  %6305 = vrcp.f32 %v9509_v40  ;;  %v4426_v26 = vpop.f32.mrf.mxu2  ;;  %v4707_v24 = vpop.f32.mrf.mxu3  ;;  %vm5616_vm2 = vmor %vm5614_vm1, %vm5615_vm0  ;;  %v3724_v2 = vadd.f32 %v9438_v17, %v10745_v28  ;;  %v5635_v36 = vand.u32 2147483648, %v9509_v40 }
 0x661   :  { %6051 = vst.msk [vmem:[%s9755_s5 + $0x120] sm:$0xff] %vm6014_vm5, %v5607_v57  ;;  %v5611_v46 = vsub.f32 1.0, %v5610_v7  ;;  %v4427_v31 = vadd.f32 %v4426_v26, %v4096_v37  ;;  %v5633_v38 = vand.u32 2147483647, %v9509_v40  ;;  %vm5629_vm6 = vweird.f32 %v9509_v40  ;;  %v9551_v37 = vpop.f32.mrf.mxu1 }
 0x662   :  { %v4108_v62 = vadd.f32 %v9444_v4, %v3724_v2  ;;  %v5636_v17 = vor.u32 1.1754944e-38, %v5635_v36 }
 0x663   :  { %v5612_v3 = vmul.f32 %v6302_v61, %v5611_v46  ;;  %v4704_v32 = vadd.f32 %v4703_v23, %v4427_v31  ;;  %v10746_v23 = vld [vmem:[#allocation92_spill] sm:$0xff]  ;;  %vm5634_vm8 = vcmp.eq.f32.partialorder %v5633_v38, 8.507059e+37 }
 0x665   :  { %v6304_v11 = vpop.eup %6303  ;;  %v5613_v58 = vadd.f32 %v6302_v61, %v5612_v3  ;;  %v6123_v51 = vmul.f32 -1.442695, %v4704_v32  ;;  %4493 = vmatmul.f32.gmra.mxu2 %v10742_v55  ;;  %4774 = vmatmul.f32.gmra.mxu3 %v10744_v63  ;;  %v3729_v55 = vadd.f32 %v9460_v1, %v10747_v5 }
 0x666   :  { %v6306_v54 = vpop.eup %6305  ;;  %v5029_v56 = vadd.f32 1.0, %v6304_v11  ;;  %v9560_v11 = vpop.f32.mrf.mxu0 }
 0x667   :  { %v5617_v48 = vsel %vm5616_vm2, %v6302_v61, %v5613_v58  ;;  %v5625_v20 = vmul.f32 %v6306_v54, %v9509_v40  ;;  %6307 = vpow2.f32 %v6123_v51  ;;  %vm5630_vm4 = vweird.f32 %v6306_v54  ;;  %v10749_v51 = vld [vmem:[#allocation96_spill] sm:$0xff] }
 0x668   :  { %v5622_v49 = vsel %vm5619_vm3, %v5621_v27, %v5617_v48  ;;  %6309 = vrcp.f32 %v5029_v56  ;;  %v4430_v21 = vpop.f32.mrf.mxu2  ;;  %v4711_v59 = vpop.f32.mrf.mxu3  ;;  %vm5631_vm7 = vmor %vm5629_vm6, %vm5630_vm4  ;;  %v5650_v61 = vand.u32 2147483648, %v5029_v56  ;;  %v5648_v40 = vand.u32 2147483647, %v5029_v56 }
 0x669   :  { %6052 = vst.msk [vmem:[%s9755_s5 + $0x128] sm:$0xff] %vm6014_vm5, %v5622_v49  ;;  %v5626_v43 = vsub.f32 1.0, %v5625_v20  ;;  %v4431_v42 = vadd.f32 %v4430_v21, %v4102_v52  ;;  %vm5644_vm10 = vweird.f32 %v5029_v56  ;;  %v4114_v31 = vadd.f32 %v9469_v60, %v3729_v55  ;;  %v9570_v20 = vpop.f32.mrf.mxu1 }
 0x66a   :  { %v5651_v1 = vor.u32 1.1754944e-38, %v5650_v61  ;;  %vm5649_vm12 = vcmp.eq.f32.partialorder %v5648_v40, 8.507059e+37 }
 0x66b   :  { %v5627_v45 = vmul.f32 %v6306_v54, %v5626_v43  ;;  %v4708_v25 = vadd.f32 %v4707_v24, %v4431_v42  ;;  %v10748_v24 = vld [vmem:[#allocation93_spill] sm:$0xff] }
 0x66d   :  { %v6308_v15 = vpop.eup %6307  ;;  %v5628_v22 = vadd.f32 %v6306_v54, %v5627_v45  ;;  %v6124_v44 = vmul.f32 -1.442695, %v4708_v25  ;;  %4497 = vmatmul.f32.gmra.mxu2 %v10744_v63  ;;  %4778 = vmatmul.f32.gmra.mxu3 %v10746_v23  ;;  %v3734_v63 = vadd.f32 %v9478_v12, %v10749_v51 }
 0x66e   :  { %v6310_v53 = vpop.eup %6309  ;;  %v9540_v13 = vadd.f32 1.0, %v6308_v15 }
 0x66f   :  { %v5632_v33 = vsel %vm5631_vm7, %v6306_v54, %v5628_v22  ;;  %v5640_v34 = vmul.f32 %v6310_v53, %v5029_v56  ;;  %6311 = vpow2.f32 %v6124_v44  ;;  %vm5645_vm9 = vweird.f32 %v6310_v53 }
 0x670   :  { %v5637_v19 = vsel %vm5634_vm8, %v5636_v17, %v5632_v33  ;;  %6313 = vrcp.f32 %v9540_v13  ;;  %v4434_v0 = vpop.f32.mrf.mxu2  ;;  %v4715_v9 = vpop.f32.mrf.mxu3  ;;  %vm5646_vm11 = vmor %vm5644_vm10, %vm5645_vm9  ;;  %v5665_v54 = vand.u32 2147483648, %v9540_v13  ;;  %v5663_v27 = vand.u32 2147483647, %v9540_v13 }
 0x671   :  { %6053 = vst.msk [vmem:[%s9755_s5 + $0x130] sm:$0xff] %vm6014_vm5, %v5637_v19  ;;  %v5641_v4 = vsub.f32 1.0, %v5640_v34  ;;  %v4435_v35 = vadd.f32 %v4434_v0, %v4108_v62  ;;  %vm5659_vm14 = vweird.f32 %v9540_v13  ;;  %v4120_v12 = vadd.f32 %v9488_v39, %v3734_v63  ;;  %v10751_v39 = vld [vmem:[#allocation97_spill] sm:$0xff]  ;;  %v10752_v0 = vld [vmem:[#allocation6_spill] sm:$0xff]  ;;  %v9591_v5 = vpop.f32.mrf.mxu1 }
 0x672   :  { %v5666_v42 = vor.u32 1.1754944e-38, %v5665_v54  ;;  %vm5664_vm0 = vcmp.eq.f32.partialorder %v5663_v27, 8.507059e+37  ;;  %v3739_v44 = vadd.f32 %v9502_v29, %v10751_v39 }
 0x673   :  { %v5642_v10 = vmul.f32 %v6310_v53, %v5641_v4  ;;  %v4712_v50 = vadd.f32 %v4711_v59, %v4435_v35  ;;  %v10750_v59 = vld [vmem:[#allocation7_spill] sm:$0xff] }
 0x674   :  { %v4126_v29 = vadd.f32 %v9511_v8, %v3739_v44 }
 0x675   :  { %v6312_v7 = vpop.eup %6311  ;;  %v5643_v57 = vadd.f32 %v6310_v53, %v5642_v10  ;;  %v6125_v26 = vmul.f32 -1.442695, %v4712_v50  ;;  %4501 = vmatmul.f32.gmra.mxu2 %v10746_v23  ;;  %4782 = vmatmul.f32.gmra.mxu3 %v10748_v24 }
 0x676   :  { %v6314_v46 = vpop.eup %6313  ;;  %v9556_v18 = vadd.f32 1.0, %v6312_v7 }
 0x677   :  { %v5647_v16 = vsel %vm5646_vm11, %v6310_v53, %v5643_v57  ;;  %v5655_v6 = vmul.f32 %v6314_v46, %v9540_v13  ;;  %6315 = vpow2.f32 %v6125_v26  ;;  %vm5660_vm13 = vweird.f32 %v6314_v46  ;;  %v9584_v53 = vpop.f32.mrf.mxu0  ;;  %v10753_v57 = vld [vmem:[#allocation98_spill] sm:$0xff] }
 0x678   :  { %v5652_v3 = vsel %vm5649_vm12, %v5651_v1, %v5647_v16  ;;  %6317 = vrcp.f32 %v9556_v18  ;;  %v4438_v30 = vpop.f32.mrf.mxu2  ;;  %v4719_v32 = vpop.f32.mrf.mxu3  ;;  %vm5661_vm15 = vmor %vm5659_vm14, %vm5660_vm13  ;;  %v5680_v23 = vand.u32 2147483648, %v9556_v18  ;;  %v5678_v17 = vand.u32 2147483647, %v9556_v18 }
 0x679   :  { %6054 = vst.msk [vmem:[%s9755_s5 + $0x138] sm:$0xff] %vm6014_vm5, %v5652_v3  ;;  %v5656_v60 = vsub.f32 1.0, %v5655_v6  ;;  %v4439_v58 = vadd.f32 %v4438_v30, %v4114_v31  ;;  %vm5674_vm2 = vweird.f32 %v9556_v18  ;;  %v3744_v26 = vadd.f32 %v9520_v14, %v10753_v57  ;;  %v10754_v30 = vld [vmem:[#allocation4_spill] sm:$0xff] }
 0x67a   :  { %v5681_v4 = vor.u32 1.1754944e-38, %v5680_v23  ;;  %vm5679_vm4 = vcmp.eq.f32.partialorder %v5678_v17, 8.507059e+37 }
 0x67b   :  { %v5657_v52 = vmul.f32 %v6314_v46, %v5656_v60  ;;  %v4716_v56 = vadd.f32 %v4715_v9, %v4439_v58  ;;  %v4132_v60 = vadd.f32 %v9526_v41, %v3744_v26 }
 0x67d   :  { %v6316_v48 = vpop.eup %6315  ;;  %v5658_v49 = vadd.f32 %v6314_v46, %v5657_v52  ;;  %v6126_v21 = vmul.f32 -1.442695, %v4716_v56  ;;  %4505 = vmatmul.f32.gmra.mxu2 %v10748_v24  ;;  %4786 = vmatmul.f32.gmra.mxu3 %v10750_v59  ;;  %v9604_v56 = vpop.f32.mrf.mxu1 }
 0x67e   :  { %v6318_v43 = vpop.eup %6317  ;;  %v5032_v28 = vadd.f32 1.0, %v6316_v48 }
 0x67f   :  { %v5662_v2 = vsel %vm5661_vm15, %v6314_v46, %v5658_v49  ;;  %v5670_v36 = vmul.f32 %v6318_v43, %v9556_v18  ;;  %6319 = vpow2.f32 %v6126_v21  ;;  %vm5675_vm1 = vweird.f32 %v6318_v43  ;;  %v9599_v16 = vpop.f32.mrf.mxu0  ;;  %v10755_v49 = vld [vmem:[#allocation11_spill] sm:$0xff] }
 0x680   :  { %v5667_v45 = vsel %vm5664_vm0, %v5666_v42, %v5662_v2  ;;  %6321 = vrcp.f32 %v5032_v28  ;;  %v4442_v38 = vpop.f32.mrf.mxu2  ;;  %v4723_v25 = vpop.f32.mrf.mxu3  ;;  %vm5676_vm3 = vmor %vm5674_vm2, %vm5675_vm1  ;;  %v5695_v24 = vand.u32 2147483648, %v5032_v28  ;;  %v5693_v31 = vand.u32 2147483647, %v5032_v28 }
 0x681   :  { %6055 = vst.msk [vmem:[%s9755_s5 + $0x140] sm:$0xff] %vm6014_vm5, %v5667_v45  ;;  %v5671_v15 = vsub.f32 1.0, %v5670_v36  ;;  %v4443_v22 = vadd.f32 %v4442_v38, %v4120_v12  ;;  %vm5689_vm7 = vweird.f32 %v5032_v28  ;;  %v3749_v21 = vadd.f32 %v9542_v47, %v10755_v49 }
 0x682   :  { %v5696_v14 = vor.u32 1.1754944e-38, %v5695_v24  ;;  %vm5694_vm9 = vcmp.eq.f32.partialorder %v5693_v31, 8.507059e+37  ;;  %v10757_v31 = vld [vmem:[#allocation99_spill] sm:$0xff] }
 0x683   :  { %v5672_v62 = vmul.f32 %v6318_v43, %v5671_v15  ;;  %v4720_v13 = vadd.f32 %v4719_v32, %v4443_v22  ;;  %v4138_v38 = vadd.f32 %v9551_v37, %v3749_v21 }
 0x685   :  { %v6320_v33 = vpop.eup %6319  ;;  %v5673_v34 = vadd.f32 %v6318_v43, %v5672_v62  ;;  %v6127_v19 = vmul.f32 -1.442695, %v4720_v13  ;;  %4509 = vmatmul.f32.gmra.mxu2 %v10750_v59  ;;  %4790 = vmatmul.f32.gmra.mxu3 %v10752_v0  ;;  %v10756_v13 = vld [vmem:[#allocation131_spill] sm:$0xff] }
 0x686   :  { %v6322_v9 = vpop.eup %6321  ;;  %v5033_v35 = vadd.f32 1.0, %v6320_v33  ;;  %v3754_v33 = vadd.f32 %v9560_v11, %v10756_v13 }
 0x687   :  { %v5677_v55 = vsel %vm5676_vm3, %v6318_v43, %v5673_v34  ;;  %v5685_v61 = vmul.f32 %v6322_v9, %v5032_v28  ;;  %6323 = vpow2.f32 %v6127_v19  ;;  %vm5690_vm6 = vweird.f32 %v6322_v9  ;;  %v9614_v22 = vpop.f32.mrf.mxu0  ;;  %v9622_v19 = vpop.f32.mrf.mxu1 }
 0x688   :  { %v5682_v10 = vsel %vm5679_vm4, %v5681_v4, %v5677_v55  ;;  %6325 = vrcp.f32 %v5033_v35  ;;  %v4446_v40 = vpop.f32.mrf.mxu2  ;;  %v4727_v50 = vpop.f32.mrf.mxu3  ;;  %vm5691_vm8 = vmor %vm5689_vm7, %vm5690_vm6  ;;  %v5710_v59 = vand.u32 2147483648, %v5033_v35  ;;  %v5708_v12 = vand.u32 2147483647, %v5033_v35 }
 0x689   :  { %6056 = vst.msk [vmem:[%s9755_s5 + $0x148] sm:$0xff] %vm6014_vm5, %v5682_v10  ;;  %v5686_v7 = vsub.f32 1.0, %v5685_v61  ;;  %v4447_v8 = vadd.f32 %v4446_v40, %v4126_v29  ;;  %vm5704_vm11 = vweird.f32 %v5033_v35  ;;  %v4144_v10 = vadd.f32 %v9570_v20, %v3754_v33 }
 0x68a   :  { %vm5709_vm13 = vcmp.eq.f32.partialorder %v5708_v12, 8.507059e+37 }
 0x68b   :  { %v5687_v46 = vmul.f32 %v6322_v9, %v5686_v7  ;;  %v4724_v1 = vadd.f32 %v4723_v25, %v4447_v8  ;;  %v5711_v25 = vor.u32 1.1754944e-38, %v5710_v59 }
 0x68d   :  { %v6324_v18 = vpop.eup %6323  ;;  %v5688_v6 = vadd.f32 %v6322_v9, %v5687_v46  ;;  %v6128_v3 = vmul.f32 -1.442695, %v4724_v1  ;;  %4513 = vmatmul.f32.gmra.mxu2 %v10752_v0  ;;  %4794 = vmatmul.f32.gmra.mxu3 %v10754_v30  ;;  %v3759_v1 = vadd.f32 %v9584_v53, %v10757_v31 }
 0x68e   :  { %v6326_v32 = vpop.eup %6325  ;;  %v5034_v58 = vadd.f32 1.0, %v6324_v18 }
 0x68f   :  { %v5692_v51 = vsel %vm5691_vm8, %v6322_v9, %v5688_v6  ;;  %v5700_v63 = vmul.f32 %v6326_v32, %v5033_v35  ;;  %6327 = vpow2.f32 %v6128_v3  ;;  %vm5705_vm10 = vweird.f32 %v6326_v32  ;;  %v9625_v24 = vpop.f32.mrf.mxu0 }
 0x690   :  { %v5697_v54 = vsel %vm5694_vm9, %v5696_v14, %v5692_v51  ;;  %6329 = vrcp.f32 %v5034_v58  ;;  %v4450_v52 = vpop.f32.mrf.mxu2  ;;  %v4731_v27 = vpop.f32.mrf.mxu3  ;;  %vm5706_vm12 = vmor %vm5704_vm11, %vm5705_vm10  ;;  %v5725_v34 = vand.u32 2147483648, %v5034_v58  ;;  %v5723_v9 = vand.u32 2147483647, %v5034_v58 }
 0x691   :  { %6057 = vst.msk [vmem:[%s9755_s5 + $0x150] sm:$0xff] %vm6014_vm5, %v5697_v54  ;;  %v5701_v48 = vsub.f32 1.0, %v5700_v63  ;;  %v4451_v41 = vadd.f32 %v4450_v52, %v4132_v60  ;;  %vm5719_vm15 = vweird.f32 %v5034_v58  ;;  %v9633_v60 = vpop.f32.mrf.mxu1  ;;  %v4150_v63 = vadd.f32 %v9591_v5, %v3759_v1 }
 0x692   :  { %v5726_v40 = vor.u32 1.1754944e-38, %v5725_v34  ;;  %vm5724_vm1 = vcmp.eq.f32.partialorder %v5723_v9, 8.507059e+37  ;;  %v10759_v34 = vld [vmem:[#allocation100_spill] sm:$0xff] }
 0x693   :  { %v5702_v43 = vmul.f32 %v6326_v32, %v5701_v48  ;;  %v4728_v42 = vadd.f32 %v4727_v50, %v4451_v41 }
 0x695   :  { %v6328_v28 = vpop.eup %6327  ;;  %v5703_v2 = vadd.f32 %v6326_v32, %v5702_v43  ;;  %v6129_v36 = vmul.f32 -1.442695, %v4728_v42  ;;  %4517 = vmatmul.f32.gmra.mxu2 %v10754_v30  ;;  %v10758_v43 = vld [vmem:[#allocation135_spill] sm:$0xff] }
 0x696   :  { %v6330_v45 = vpop.eup %6329  ;;  %v5035_v15 = vadd.f32 1.0, %v6328_v28  ;;  %v3764_v5 = vadd.f32 %v9599_v16, %v10758_v43 }
 0x697   :  { %v5707_v47 = vsel %vm5706_vm12, %v6326_v32, %v5703_v2  ;;  %v5715_v39 = vmul.f32 %v6330_v45, %v5034_v58  ;;  %6331 = vpow2.f32 %v6129_v36  ;;  %vm5720_vm14 = vweird.f32 %v6330_v45  ;;  %v9642_v42 = vpop.f32.mrf.mxu0 }
 0x698   :  { %v5712_v44 = vsel %vm5709_vm13, %v5711_v25, %v5707_v47  ;;  %6333 = vrcp.f32 %v5035_v15  ;;  %v4454_v23 = vpop.f32.mrf.mxu2  ;;  %v4735_v62 = vpop.f32.mrf.mxu3  ;;  %vm5721_vm0 = vmor %vm5719_vm15, %vm5720_vm14  ;;  %v5740_v18 = vand.u32 2147483648, %v5035_v15  ;;  %v5738_v3 = vand.u32 2147483647, %v5035_v15 }
 0x699   :  { %6058 = vst.msk [vmem:[%s9755_s5 + $0x158] sm:$0xff] %vm6014_vm5, %v5712_v44  ;;  %v5716_v17 = vsub.f32 1.0, %v5715_v39  ;;  %v4455_v37 = vadd.f32 %v4454_v23, %v4138_v38  ;;  %vm5734_vm3 = vweird.f32 %v5035_v15  ;;  %v4156_v47 = vadd.f32 %v9604_v56, %v3764_v5  ;;  %v9645_v23 = vpop.f32.mrf.mxu1  ;;  %v10761_v5 = vld [vmem:[#allocation134_spill] sm:$0xff] }
 0x69a   :  { %v5741_v54 = vor.u32 1.1754944e-38, %v5740_v18  ;;  %vm5739_vm6 = vcmp.eq.f32.partialorder %v5738_v3, 8.507059e+37  ;;  %v10760_v18 = vld [vmem:[#allocation13_spill] sm:$0xff] }
 0x69b   :  { %v5717_v0 = vmul.f32 %v6330_v45, %v5716_v17  ;;  %v4732_v29 = vadd.f32 %v4731_v27, %v4455_v37 }
 0x69d   :  { %v6332_v4 = vpop.eup %6331  ;;  %v5718_v35 = vadd.f32 %v6330_v45, %v5717_v0  ;;  %v6130_v55 = vmul.f32 -1.442695, %v4732_v29  ;;  %v3769_v0 = vadd.f32 %v9614_v22, %v10759_v34 }
 0x69e   :  { %v6334_v61 = vpop.eup %6333  ;;  %v5036_v50 = vadd.f32 1.0, %v6332_v4 }
 0x69f   :  { %v5722_v7 = vsel %vm5721_vm0, %v6330_v45, %v5718_v35  ;;  %v5730_v11 = vmul.f32 %v6334_v61, %v5035_v15  ;;  %6335 = vpow2.f32 %v6130_v55  ;;  %vm5735_vm2 = vweird.f32 %v6334_v61 }
 0x6a0   :  { %v5727_v8 = vsel %vm5724_vm1, %v5726_v40, %v5722_v7  ;;  %6337 = vrcp.f32 %v5036_v50  ;;  %v4458_v57 = vpop.f32.mrf.mxu2  ;;  %v4739_v26 = vpop.f32.mrf.mxu3  ;;  %vm5736_vm4 = vmor %vm5734_vm3, %vm5735_vm2  ;;  %v5755_v12 = vand.u32 2147483648, %v5036_v50  ;;  %v5753_v2 = vand.u32 2147483647, %v5036_v50 }
 0x6a1   :  { %6059 = vst.msk [vmem:[%s9755_s5 + $0x160] sm:$0xff] %vm6014_vm5, %v5727_v8  ;;  %v5731_v46 = vsub.f32 1.0, %v5730_v11  ;;  %v4459_v20 = vadd.f32 %v4458_v57, %v4144_v10  ;;  %vm5749_vm8 = vweird.f32 %v5036_v50  ;;  %v4162_v7 = vadd.f32 %v9622_v19, %v3769_v0  ;;  %v9656_v31 = vpop.f32.mrf.mxu1 }
 0x6a2   :  { %v5756_v39 = vor.u32 1.1754944e-38, %v5755_v12  ;;  %vm5754_vm10 = vcmp.eq.f32.partialorder %v5753_v2, 8.507059e+37  ;;  %v3779_v12 = vadd.f32 %v9642_v42, %v10761_v5 }
 0x6a3   :  { %v5732_v6 = vmul.f32 %v6334_v61, %v5731_v46  ;;  %v4736_v30 = vadd.f32 %v4735_v62, %v4459_v20 }
 0x6a5   :  { %v6336_v32 = vpop.eup %6335  ;;  %v5733_v14 = vadd.f32 %v6334_v61, %v5732_v6  ;;  %v6131_v58 = vmul.f32 -1.442695, %v4736_v30  ;;  %v3774_v6 = vadd.f32 %v9625_v24, %v10760_v18 }
 0x6a6   :  { %v6338_v51 = vpop.eup %6337  ;;  %v5037_v52 = vadd.f32 1.0, %v6336_v32 }
 0x6a7   :  { %v5737_v27 = vsel %vm5736_vm4, %v6334_v61, %v5733_v14  ;;  %v5745_v53 = vmul.f32 %v6338_v51, %v5036_v50  ;;  %6339 = vpow2.f32 %v6131_v58  ;;  %vm5750_vm7 = vweird.f32 %v6338_v51  ;;  %v9653_v61 = vpop.f32.mrf.mxu0 }
 0x6a8   :  { %v5742_v48 = vsel %vm5739_vm6, %v5741_v54, %v5737_v27  ;;  %6341 = vrcp.f32 %v5037_v52  ;;  %v4462_v41 = vpop.f32.mrf.mxu2  ;;  %v4743_v49 = vpop.f32.mrf.mxu3  ;;  %vm5751_vm9 = vmor %vm5749_vm8, %vm5750_vm7  ;;  %v5770_v9 = vand.u32 2147483648, %v5037_v52  ;;  %v5768_v4 = vand.u32 2147483647, %v5037_v52 }
 0x6a9   :  { %6060 = vst.msk [vmem:[%s9755_s5 + $0x168] sm:$0xff] %vm6014_vm5, %v5742_v48  ;;  %v5746_v21 = vsub.f32 1.0, %v5745_v53  ;;  %v4463_v59 = vadd.f32 %v4462_v41, %v4150_v63  ;;  %vm5764_vm12 = vweird.f32 %v5037_v52  ;;  %v9673_v2 = vpop.f32.mrf.mxu1 }
 0x6aa   :  { %v5771_v11 = vor.u32 1.1754944e-38, %v5770_v9  ;;  %vm5769_vm14 = vcmp.eq.f32.partialorder %v5768_v4, 8.507059e+37 }
 0x6ab   :  { %v5747_v28 = vmul.f32 %v6338_v51, %v5746_v21  ;;  %v4740_v36 = vadd.f32 %v4739_v26, %v4463_v59 }
 0x6ad   :  { %v6340_v45 = vpop.eup %6339  ;;  %v5748_v38 = vadd.f32 %v6338_v51, %v5747_v28  ;;  %v6132_v25 = vmul.f32 -1.442695, %v4740_v36 }
 0x6ae   :  { %v6342_v15 = vpop.eup %6341  ;;  %v5038_v44 = vadd.f32 1.0, %v6340_v45 }
 0x6af   :  { %v5752_v16 = vsel %vm5751_vm9, %v6338_v51, %v5748_v38  ;;  %v5760_v62 = vmul.f32 %v6342_v15, %v5037_v52  ;;  %6343 = vpow2.f32 %v6132_v25  ;;  %vm5765_vm11 = vweird.f32 %v6342_v15  ;;  %v9665_v48 = vpop.f32.mrf.mxu0 }
 0x6b0   :  { %v5757_v17 = vsel %vm5754_vm10, %v5756_v39, %v5752_v16  ;;  %6345 = vrcp.f32 %v5038_v44  ;;  %v4466_v37 = vpop.f32.mrf.mxu2  ;;  %v4747_v13 = vpop.f32.mrf.mxu3  ;;  %vm5766_vm13 = vmor %vm5764_vm12, %vm5765_vm11  ;;  %v5785_v3 = vand.u32 2147483648, %v5038_v44  ;;  %v5783_v32 = vand.u32 2147483647, %v5038_v44 }
 0x6b1   :  { %6061 = vst.msk [vmem:[%s9755_s5 + $0x170] sm:$0xff] %vm6014_vm5, %v5757_v17  ;;  %v5761_v33 = vsub.f32 1.0, %v5760_v62  ;;  %v4467_v56 = vadd.f32 %v4466_v37, %v4156_v47  ;;  %vm5779_vm0 = vweird.f32 %v5038_v44  ;;  %v4168_v52 = vadd.f32 %v9633_v60, %v3774_v6  ;;  %v10763_v6 = vld [vmem:[#allocation137_spill] sm:$0xff] }
 0x6b2   :  { %v5786_v27 = vor.u32 1.1754944e-38, %v5785_v3  ;;  %vm5784_vm2 = vcmp.eq.f32.partialorder %v5783_v32, 8.507059e+37 }
 0x6b3   :  { %v5762_v29 = vmul.f32 %v6342_v15, %v5761_v33  ;;  %v4744_v35 = vadd.f32 %v4743_v49, %v4467_v56 }
 0x6b5   :  { %v6344_v55 = vpop.eup %6343  ;;  %v5763_v10 = vadd.f32 %v6342_v15, %v5762_v29  ;;  %v6133_v40 = vmul.f32 -1.442695, %v4744_v35 }
 0x6b6   :  { %v6346_v50 = vpop.eup %6345  ;;  %v5039_v8 = vadd.f32 1.0, %v6344_v55 }
 0x6b7   :  { %v5767_v57 = vsel %vm5766_vm13, %v6342_v15, %v5763_v10  ;;  %v5775_v22 = vmul.f32 %v6346_v50, %v5038_v44  ;;  %6347 = vpow2.f32 %v6133_v40  ;;  %vm5780_vm15 = vweird.f32 %v6346_v50  ;;  %v3793_v56 = vpop.f32.mrf.mxu0  ;;  %v4191_v40 = vpop.f32.mrf.mxu1 }
 0x6b8   :  { %v5772_v26 = vsel %vm5769_vm14, %v5771_v11, %v5767_v57  ;;  %6349 = vrcp.f32 %v5039_v8  ;;  %v4470_v46 = vpop.f32.mrf.mxu2  ;;  %v4751_v20 = vpop.f32.mrf.mxu3  ;;  %vm5781_vm1 = vmor %vm5779_vm0, %vm5780_vm15  ;;  %v5800_v28 = vand.u32 2147483648, %v5039_v8  ;;  %v5798_v45 = vand.u32 2147483647, %v5039_v8 }
 0x6b9   :  { %6062 = vst.msk [vmem:[%s9755_s5 + $0x178] sm:$0xff] %vm6014_vm5, %v5772_v26  ;;  %v5776_v1 = vsub.f32 1.0, %v5775_v22  ;;  %v4471_v19 = vadd.f32 %v4470_v46, %v4162_v7  ;;  %vm5794_vm4 = vweird.f32 %v5039_v8  ;;  %v4174_v44 = vadd.f32 %v9645_v23, %v3779_v12  ;;  %v10762_v23 = vld [vmem:[#allocation101_spill] sm:$0xff]  ;;  %v10764_v12 = vld [vmem:[#allocation102_spill] sm:$0xff] }
 0x6ba   :  { %v5801_v16 = vor.u32 1.1754944e-38, %v5800_v28  ;;  %vm5799_vm7 = vcmp.eq.f32.partialorder %v5798_v45, 8.507059e+37  ;;  %v3784_v9 = vadd.f32 %v9653_v61, %v10762_v23  ;;  %v3794_v28 = vadd.f32 %v3793_v56, %v10764_v12  ;;  %v10767_v12 = vld [vmem:[#allocation104_spill] sm:$0xff] }
 0x6bb   :  { %v5777_v30 = vmul.f32 %v6346_v50, %v5776_v1  ;;  %v4748_v14 = vadd.f32 %v4747_v13, %v4471_v19 }
 0x6bd   :  { %v6348_v58 = vpop.eup %6347  ;;  %v5778_v51 = vadd.f32 %v6346_v50, %v5777_v30  ;;  %v6134_v63 = vmul.f32 -1.442695, %v4748_v14 }
 0x6be   :  { %v6350_v54 = vpop.eup %6349  ;;  %v5040_v53 = vadd.f32 1.0, %v6348_v58 }
 0x6bf   :  { %v5782_v41 = vsel %vm5781_vm1, %v6346_v50, %v5778_v51  ;;  %v5790_v24 = vmul.f32 %v6350_v54, %v5039_v8  ;;  %6351 = vpow2.f32 %v6134_v63  ;;  %vm5795_vm3 = vweird.f32 %v6350_v54  ;;  %v3798_v30 = vpop.f32.mrf.mxu0 }
 0x6c0   :  { %v5787_v49 = vsel %vm5784_vm2, %v5786_v27, %v5782_v41  ;;  %6353 = vrcp.f32 %v5040_v53  ;;  %v4474_v21 = vpop.f32.mrf.mxu2  ;;  %v4755_v59 = vpop.f32.mrf.mxu3  ;;  %vm5796_vm6 = vmor %vm5794_vm4, %vm5795_vm3  ;;  %v5815_v29 = vand.u32 2147483648, %v5040_v53  ;;  %v5813_v35 = vand.u32 2147483647, %v5040_v53 }
 0x6c1   :  { %6063 = vst.msk [vmem:[%s9755_s5 + $0x180] sm:$0xff] %vm6014_vm5, %v5787_v49  ;;  %v5791_v43 = vsub.f32 1.0, %v5790_v24  ;;  %v4475_v60 = vadd.f32 %v4474_v21, %v4168_v52  ;;  %vm5809_vm9 = vweird.f32 %v5040_v53  ;;  %v4180_v8 = vadd.f32 %v9656_v31, %v3784_v9  ;;  %v4197_v24 = vpop.f32.mrf.mxu1  ;;  %v10765_v9 = vld [vmem:[#allocation15_spill] sm:$0xff] }
 0x6c2   :  { %v5816_v57 = vor.u32 1.1754944e-38, %v5815_v29  ;;  %vm5814_vm11 = vcmp.eq.f32.partialorder %v5813_v35, 8.507059e+37  ;;  %v3789_v31 = vadd.f32 %v9665_v48, %v10763_v6  ;;  %v3799_v29 = vadd.f32 %v3798_v30, %v10765_v9 }
 0x6c3   :  { %v5792_v36 = vmul.f32 %v6350_v54, %v5791_v43  ;;  %v4752_v38 = vadd.f32 %v4751_v20, %v4475_v60 }
 0x6c4   :  { %v4186_v27 = vadd.f32 %v9673_v2, %v3789_v31  ;;  %v10766_v31 = vld [vmem:[#allocation136_spill] sm:$0xff] }
 0x6c5   :  { %v6352_v25 = vpop.eup %6351  ;;  %v5793_v15 = vadd.f32 %v6350_v54, %v5792_v36  ;;  %v6135_v47 = vmul.f32 -1.442695, %v4752_v38 }
 0x6c6   :  { %v6354_v39 = vpop.eup %6353  ;;  %v5041_v62 = vadd.f32 1.0, %v6352_v25 }
 0x6c7   :  { %v5797_v17 = vsel %vm5796_vm6, %v6350_v54, %v5793_v15  ;;  %v5805_v42 = vmul.f32 %v6354_v39, %v5040_v53  ;;  %6355 = vpow2.f32 %v6135_v47  ;;  %vm5810_vm8 = vweird.f32 %v6354_v39  ;;  %v3803_v15 = vpop.f32.mrf.mxu0 }
 0x6c8   :  { %v5802_v37 = vsel %vm5799_vm7, %v5801_v16, %v5797_v17  ;;  %6357 = vrcp.f32 %v5041_v62  ;;  %v4478_v13 = vpop.f32.mrf.mxu2  ;;  %v4759_v33 = vpop.f32.mrf.mxu3  ;;  %vm5811_vm10 = vmor %vm5809_vm9, %vm5810_vm8  ;;  %v5830_v3 = vand.u32 2147483648, %v5041_v62  ;;  %v5828_v14 = vand.u32 2147483647, %v5041_v62 }
 0x6c9   :  { %6064 = vst.msk [vmem:[%s9755_s5 + $0x188] sm:$0xff] %vm6014_vm5, %v5802_v37  ;;  %v5806_v34 = vsub.f32 1.0, %v5805_v42  ;;  %v4479_v0 = vadd.f32 %v4478_v13, %v4174_v44  ;;  %vm5824_vm13 = vweird.f32 %v5041_v62  ;;  %v4192_v16 = vadd.f32 %v4191_v40, %v3794_v28 }
 0x6ca   :  { %v5831_v53 = vor.u32 1.1754944e-38, %v5830_v3  ;;  %vm5829_vm15 = vcmp.eq.f32.partialorder %v5828_v14, 8.507059e+37  ;;  %v3804_v3 = vadd.f32 %v3803_v15, %v10766_v31  ;;  %v10769_v31 = vld [vmem:[#allocation17_spill] sm:$0xff] }
 0x6cb   :  { %v5807_v4 = vmul.f32 %v6354_v39, %v5806_v34  ;;  %v4756_v55 = vadd.f32 %v4755_v59, %v4479_v0  ;;  %v4203_v34 = vpop.f32.mrf.mxu1 }
 0x6cd   :  { %v6356_v10 = vpop.eup %6355  ;;  %v5808_v50 = vadd.f32 %v6354_v39, %v5807_v4  ;;  %v6136_v7 = vmul.f32 -1.442695, %v4756_v55 }
 0x6ce   :  { %v6358_v11 = vpop.eup %6357  ;;  %v5042_v22 = vadd.f32 1.0, %v6356_v10 }
 0x6cf   :  { %v5812_v26 = vsel %vm5811_vm10, %v6354_v39, %v5808_v50  ;;  %v5820_v46 = vmul.f32 %v6358_v11, %v5041_v62  ;;  %6359 = vpow2.f32 %v6136_v7  ;;  %vm5825_vm12 = vweird.f32 %v6358_v11 }
 0x6d0   :  { %v5817_v61 = vsel %vm5814_vm11, %v5816_v57, %v5812_v26  ;;  %6361 = vrcp.f32 %v5042_v22  ;;  %v4482_v20 = vpop.f32.mrf.mxu2  ;;  %v4763_v1 = vpop.f32.mrf.mxu3  ;;  %vm5826_vm14 = vmor %vm5824_vm13, %vm5825_vm12  ;;  %v5845_v2 = vand.u32 2147483648, %v5042_v22  ;;  %v5843_v45 = vand.u32 2147483647, %v5042_v22 }
 0x6d1   :  { %6065 = vst.msk [vmem:[%s9755_s5 + $0x190] sm:$0xff] %vm6014_vm5, %v5817_v61  ;;  %v5821_v19 = vsub.f32 1.0, %v5820_v46  ;;  %v4483_v18 = vadd.f32 %v4482_v20, %v4180_v8  ;;  %vm5839_vm1 = vweird.f32 %v5042_v22  ;;  %v4198_v8 = vadd.f32 %v4197_v24, %v3799_v29  ;;  %v3808_v26 = vpop.f32.mrf.mxu0 }
 0x6d2   :  { %v5846_v62 = vor.u32 1.1754944e-38, %v5845_v2  ;;  %vm5844_vm3 = vcmp.eq.f32.partialorder %v5843_v45, 8.507059e+37  ;;  %v3809_v28 = vadd.f32 %v3808_v26, %v10767_v12 }
 0x6d3   :  { %v5822_v32 = vmul.f32 %v6358_v11, %v5821_v19  ;;  %v4760_v58 = vadd.f32 %v4759_v33, %v4483_v18 }
 0x6d5   :  { %v6360_v51 = vpop.eup %6359  ;;  %v5823_v63 = vadd.f32 %v6358_v11, %v5822_v32  ;;  %v6137_v54 = vmul.f32 -1.442695, %v4760_v58  ;;  %v4209_v32 = vpop.f32.mrf.mxu1 }
 0x6d6   :  { %v6362_v52 = vpop.eup %6361  ;;  %v5043_v41 = vadd.f32 1.0, %v6360_v51 }
 0x6d7   :  { %v5827_v49 = vsel %vm5826_vm14, %v6358_v11, %v5823_v63  ;;  %v5835_v48 = vmul.f32 %v6362_v52, %v5042_v22  ;;  %6363 = vpow2.f32 %v6137_v54  ;;  %vm5840_vm0 = vweird.f32 %v6362_v52 }
 0x6d8   :  { %v5832_v21 = vsel %vm5829_vm15, %v5831_v53, %v5827_v49  ;;  %6365 = vrcp.f32 %v5043_v41  ;;  %v4486_v59 = vpop.f32.mrf.mxu2  ;;  %v4767_v43 = vpop.f32.mrf.mxu3  ;;  %vm5841_vm2 = vmor %vm5839_vm1, %vm5840_vm0  ;;  %v5860_v4 = vand.u32 2147483648, %v5043_v41  ;;  %v5858_v55 = vand.u32 2147483647, %v5043_v41 }
 0x6d9   :  { %6066 = vst.msk [vmem:[%s9755_s5 + $0x198] sm:$0xff] %vm6014_vm5, %v5832_v21  ;;  %v5836_v60 = vsub.f32 1.0, %v5835_v48  ;;  %v4487_v5 = vadd.f32 %v4486_v59, %v4186_v27  ;;  %vm5854_vm6 = vweird.f32 %v5043_v41  ;;  %v4204_v53 = vadd.f32 %v4203_v34, %v3804_v3 }
 0x6da   :  { %v5861_v57 = vor.u32 1.1754944e-38, %v5860_v4  ;;  %vm5859_vm8 = vcmp.eq.f32.partialorder %v5858_v55, 8.507059e+37 }
 0x6db   :  { %v5837_v36 = vmul.f32 %v6362_v52, %v5836_v60  ;;  %v4764_v38 = vadd.f32 %v4763_v1, %v4487_v5 }
 0x6dd   :  { %v6364_v25 = vpop.eup %6363  ;;  %v5838_v47 = vadd.f32 %v6362_v52, %v5837_v36  ;;  %v6138_v39 = vmul.f32 -1.442695, %v4764_v38 }
 0x6de   :  { %v6366_v44 = vpop.eup %6365  ;;  %v5044_v17 = vadd.f32 1.0, %v6364_v25 }
 0x6df   :  { %v5842_v42 = vsel %vm5841_vm2, %v6362_v52, %v5838_v47  ;;  %v5850_v37 = vmul.f32 %v6366_v44, %v5043_v41  ;;  %6367 = vpow2.f32 %v6138_v39  ;;  %vm5855_vm4 = vweird.f32 %v6366_v44  ;;  %v4215_v47 = vpop.f32.mrf.mxu1 }
 0x6e0   :  { %v5847_v13 = vsel %vm5844_vm3, %v5846_v62, %v5842_v42  ;;  %6369 = vrcp.f32 %v5044_v17  ;;  %v4490_v33 = vpop.f32.mrf.mxu2  ;;  %v4771_v56 = vpop.f32.mrf.mxu3  ;;  %vm5856_vm7 = vmor %vm5854_vm6, %vm5855_vm4  ;;  %v5875_v30 = vand.u32 2147483648, %v5044_v17  ;;  %v5873_v58 = vand.u32 2147483647, %v5044_v17 }
 0x6e1   :  { %6067 = vst.msk [vmem:[%s9755_s5 + $0x1a0] sm:$0xff] %vm6014_vm5, %v5847_v13  ;;  %v5851_v0 = vsub.f32 1.0, %v5850_v37  ;;  %v4491_v23 = vadd.f32 %v4490_v33, %v4192_v16  ;;  %vm5869_vm10 = vweird.f32 %v5044_v17  ;;  %v4210_v62 = vadd.f32 %v4209_v32, %v3809_v28  ;;  %v10770_v28 = vld [vmem:[#allocation14_spill] sm:$0xff] }
 0x6e2   :  { %v5876_v41 = vor.u32 1.1754944e-38, %v5875_v30  ;;  %vm5874_vm12 = vcmp.eq.f32.partialorder %v5873_v58, 8.507059e+37 }
 0x6e3   :  { %v5852_v35 = vmul.f32 %v6366_v44, %v5851_v0  ;;  %v4768_v10 = vadd.f32 %v4767_v43, %v4491_v23  ;;  %v3813_v43 = vpop.f32.mrf.mxu0  ;;  %v10768_v23 = vld [vmem:[#allocation16_spill] sm:$0xff] }
 0x6e4   :  { %v3814_v9 = vadd.f32 %v3813_v43, %v10768_v23 }
 0x6e5   :  { %v6368_v40 = vpop.eup %6367  ;;  %v5853_v50 = vadd.f32 %v6366_v44, %v5852_v35  ;;  %v6139_v7 = vmul.f32 -1.442695, %v4768_v10 }
 0x6e6   :  { %v6370_v11 = vpop.eup %6369  ;;  %v5045_v22 = vadd.f32 1.0, %v6368_v40 }
 0x6e7   :  { %v5857_v46 = vsel %vm5856_vm7, %v6366_v44, %v5853_v50  ;;  %v5865_v61 = vmul.f32 %v6370_v11, %v5044_v17  ;;  %6371 = vpow2.f32 %v6139_v7  ;;  %vm5870_vm9 = vweird.f32 %v6370_v11 }
 0x6e8   :  { %v5862_v20 = vsel %vm5859_vm8, %v5861_v57, %v5857_v46  ;;  %6373 = vrcp.f32 %v5045_v22  ;;  %v4494_v1 = vpop.f32.mrf.mxu2  ;;  %v4775_v19 = vpop.f32.mrf.mxu3  ;;  %vm5871_vm11 = vmor %vm5869_vm10, %vm5870_vm9  ;;  %v5890_v2 = vand.u32 2147483648, %v5045_v22  ;;  %v5888_v38 = vand.u32 2147483647, %v5045_v22 }
 0x6e9   :  { %6068 = vst.msk [vmem:[%s9755_s5 + $0x1a8] sm:$0xff] %vm6014_vm5, %v5862_v20  ;;  %v5866_v18 = vsub.f32 1.0, %v5865_v61  ;;  %v4495_v6 = vadd.f32 %v4494_v1, %v4198_v8  ;;  %vm5884_vm14 = vweird.f32 %v5045_v22  ;;  %v4216_v57 = vadd.f32 %v4215_v47, %v3814_v9  ;;  %v4221_v46 = vpop.f32.mrf.mxu1  ;;  %v10771_v9 = vld [vmem:[#allocation19_spill] sm:$0xff] }
 0x6ea   :  { %v5891_v17 = vor.u32 1.1754944e-38, %v5890_v2  ;;  %vm5889_vm0 = vcmp.eq.f32.partialorder %v5888_v38, 8.507059e+37 }
 0x6eb   :  { %v5867_v14 = vmul.f32 %v6370_v11, %v5866_v18  ;;  %v4772_v51 = vadd.f32 %v4771_v56, %v4495_v6  ;;  %v3818_v4 = vpop.f32.mrf.mxu0 }
 0x6ec   :  { %v3819_v3 = vadd.f32 %v3818_v4, %v10769_v31 }
 0x6ed   :  { %v6372_v63 = vpop.eup %6371  ;;  %v5868_v54 = vadd.f32 %v6370_v11, %v5867_v14  ;;  %v6140_v52 = vmul.f32 -1.442695, %v4772_v51 }
 0x6ee   :  { %v6374_v27 = vpop.eup %6373  ;;  %v5046_v24 = vadd.f32 1.0, %v6372_v63 }
 0x6ef   :  { %v5872_v49 = vsel %vm5871_vm11, %v6370_v11, %v5868_v54  ;;  %v5880_v48 = vmul.f32 %v6374_v27, %v5045_v22  ;;  %6375 = vpow2.f32 %v6140_v52  ;;  %vm5885_vm13 = vweird.f32 %v6374_v27 }
 0x6f0   :  { %v5877_v21 = vsel %vm5874_vm12, %v5876_v41, %v5872_v49  ;;  %6377 = vrcp.f32 %v5046_v24  ;;  %v4498_v59 = vpop.f32.mrf.mxu2  ;;  %v4779_v36 = vpop.f32.mrf.mxu3  ;;  %vm5886_vm15 = vmor %vm5884_vm14, %vm5885_vm13  ;;  %v5905_v29 = vand.u32 2147483648, %v5046_v24  ;;  %v5903_v55 = vand.u32 2147483647, %v5046_v24 }
 0x6f1   :  { %6069 = vst.msk [vmem:[%s9755_s5 + $0x1b0] sm:$0xff] %vm6014_vm5, %v5877_v21  ;;  %v5881_v60 = vsub.f32 1.0, %v5880_v48  ;;  %v4499_v5 = vadd.f32 %v4498_v59, %v4204_v53  ;;  %vm5899_vm2 = vweird.f32 %v5046_v24  ;;  %v4222_v53 = vadd.f32 %v4221_v46, %v3819_v3 }
 0x6f2   :  { %v5906_v22 = vor.u32 1.1754944e-38, %v5905_v29  ;;  %vm5904_vm4 = vcmp.eq.f32.partialorder %v5903_v55, 8.507059e+37 }
 0x6f3   :  { %v5882_v45 = vmul.f32 %v6374_v27, %v5881_v60  ;;  %v4776_v25 = vadd.f32 %v4775_v19, %v4499_v5  ;;  %v3823_v63 = vpop.f32.mrf.mxu0  ;;  %v4227_v60 = vpop.f32.mrf.mxu1 }
 0x6f4   :  { %v3824_v2 = vadd.f32 %v3823_v63, %v10770_v28 }
 0x6f5   :  { %v6376_v15 = vpop.eup %6375  ;;  %v5883_v39 = vadd.f32 %v6374_v27, %v5882_v45  ;;  %v6141_v44 = vmul.f32 -1.442695, %v4776_v25 }
 0x6f6   :  { %v6378_v16 = vpop.eup %6377  ;;  %v5047_v42 = vadd.f32 1.0, %v6376_v15 }
 0x6f7   :  { %v5887_v37 = vsel %vm5886_vm15, %v6374_v27, %v5883_v39  ;;  %v5895_v13 = vmul.f32 %v6378_v16, %v5046_v24  ;;  %6379 = vpow2.f32 %v6141_v44  ;;  %vm5900_vm1 = vweird.f32 %v6378_v16 }
 0x6f8   :  { %v5892_v33 = vsel %vm5889_vm0, %v5891_v17, %v5887_v37  ;;  %6381 = vrcp.f32 %v5047_v42  ;;  %v4502_v56 = vpop.f32.mrf.mxu2  ;;  %v4783_v40 = vpop.f32.mrf.mxu3  ;;  %vm5901_vm3 = vmor %vm5899_vm2, %vm5900_vm1  ;;  %v5920_v30 = vand.u32 2147483648, %v5047_v42  ;;  %v5918_v14 = vand.u32 2147483647, %v5047_v42 }
 0x6f9   :  { %6070 = vst.msk [vmem:[%s9755_s5 + $0x1b8] sm:$0xff] %vm6014_vm5, %v5892_v33  ;;  %v5896_v34 = vsub.f32 1.0, %v5895_v13  ;;  %v4503_v0 = vadd.f32 %v4502_v56, %v4210_v62  ;;  %vm5914_vm7 = vweird.f32 %v5047_v42 }
 0x6fa   :  { %v5921_v41 = vor.u32 1.1754944e-38, %v5920_v30  ;;  %vm5919_vm9 = vcmp.eq.f32.partialorder %v5918_v14, 8.507059e+37 }
 0x6fb   :  { %v5897_v35 = vmul.f32 %v6378_v16, %v5896_v34  ;;  %v4780_v10 = vadd.f32 %v4779_v36, %v4503_v0 }
 0x6fd   :  { %v6380_v50 = vpop.eup %6379  ;;  %v5898_v7 = vadd.f32 %v6378_v16, %v5897_v35  ;;  %v6142_v11 = vmul.f32 -1.442695, %v4780_v10  ;;  %v4233_v35 = vpop.f32.mrf.mxu1 }
 0x6fe   :  { %v6382_v8 = vpop.eup %6381  ;;  %v5048_v26 = vadd.f32 1.0, %v6380_v50 }
 0x6ff   :  { %v5902_v61 = vsel %vm5901_vm3, %v6378_v16, %v5898_v7  ;;  %v5910_v20 = vmul.f32 %v6382_v8, %v5047_v42  ;;  %6383 = vpow2.f32 %v6142_v11  ;;  %vm5915_vm6 = vweird.f32 %v6382_v8  ;;  %v3828_v42 = vpop.f32.mrf.mxu0 }
 0x700   :  { %v5907_v1 = vsel %vm5904_vm4, %v5906_v22, %v5902_v61  ;;  %6385 = vrcp.f32 %v5048_v26  ;;  %v4506_v19 = vpop.f32.mrf.mxu2  ;;  %vm5916_vm8 = vmor %vm5914_vm7, %vm5915_vm6  ;;  %v4787_v49 = vpop.f32.mrf.mxu3  ;;  %v5935_v36 = vand.u32 2147483648, %v5048_v26  ;;  %v5933_v38 = vand.u32 2147483647, %v5048_v26 }
 0x701   :  { %6071 = vst.msk [vmem:[%s9755_s5 + $0x1c0] sm:$0xff] %vm6014_vm5, %v5907_v1  ;;  %v5911_v18 = vsub.f32 1.0, %v5910_v20  ;;  %v4507_v6 = vadd.f32 %v4506_v19, %v4216_v57  ;;  %vm5929_vm11 = vweird.f32 %v5048_v26  ;;  %v4228_v16 = vadd.f32 %v4227_v60, %v3824_v2 }
 0x702   :  { %v5936_v62 = vor.u32 1.1754944e-38, %v5935_v36  ;;  %vm5934_vm13 = vcmp.eq.f32.partialorder %v5933_v38, 8.507059e+37  ;;  %v3829_v29 = vadd.f32 %v3828_v42, %v10771_v9 }
 0x703   :  { %v5912_v32 = vmul.f32 %v6382_v8, %v5911_v18  ;;  %v4784_v58 = vadd.f32 %v4783_v40, %v4507_v6 }
 0x704   :  { %v4234_v57 = vadd.f32 %v4233_v35, %v3829_v29 }
 0x705   :  { %v6384_v51 = vpop.eup %6383  ;;  %v5913_v54 = vadd.f32 %v6382_v8, %v5912_v32  ;;  %v6143_v52 = vmul.f32 -1.442695, %v4784_v58 }
 0x706   :  { %v6386_v27 = vpop.eup %6385  ;;  %v5049_v24 = vadd.f32 1.0, %v6384_v51 }
 0x707   :  { %v5917_v48 = vsel %vm5916_vm8, %v6382_v8, %v5913_v54  ;;  %v5925_v21 = vmul.f32 %v6386_v27, %v5048_v26  ;;  %6387 = vpow2.f32 %v6143_v52  ;;  %vm5930_vm10 = vweird.f32 %v6386_v27 }
 0x708   :  { %v5922_v59 = vsel %vm5919_vm9, %v5921_v41, %v5917_v48  ;;  %6389 = vrcp.f32 %v5049_v24  ;;  %v4510_v43 = vpop.f32.mrf.mxu2  ;;  %vm5931_vm12 = vmor %vm5929_vm11, %vm5930_vm10  ;;  %v4791_v56 = vpop.f32.mrf.mxu3  ;;  %v5950_v4 = vand.u32 2147483648, %v5049_v24  ;;  %v5948_v10 = vand.u32 2147483647, %v5049_v24 }
 0x709   :  { %6072 = vst.msk [vmem:[%s9755_s5 + $0x1c8] sm:$0xff] %vm6014_vm5, %v5922_v59  ;;  %v5926_v5 = vsub.f32 1.0, %v5925_v21  ;;  %v4511_v12 = vadd.f32 %v4510_v43, %v4222_v53  ;;  %vm5944_vm15 = vweird.f32 %v5049_v24 }
 0x70a   :  { %v5951_v22 = vor.u32 1.1754944e-38, %v5950_v4  ;;  %vm5949_vm1 = vcmp.eq.f32.partialorder %v5948_v10, 8.507059e+37 }
 0x70b   :  { %v5927_v45 = vmul.f32 %v6386_v27, %v5926_v5  ;;  %v4788_v25 = vadd.f32 %v4787_v49, %v4511_v12 }
 0x70d   :  { %v6388_v15 = vpop.eup %6387  ;;  %v5928_v47 = vadd.f32 %v6386_v27, %v5927_v45  ;;  %v6144_v39 = vmul.f32 -1.442695, %v4788_v25 }
 0x70e   :  { %v6390_v44 = vpop.eup %6389  ;;  %v5050_v17 = vadd.f32 1.0, %v6388_v15 }
 0x70f   :  { %v5932_v37 = vsel %vm5931_vm12, %v6386_v27, %v5928_v47  ;;  %v5940_v13 = vmul.f32 %v6390_v44, %v5049_v24  ;;  %6391 = vpow2.f32 %v6144_v39  ;;  %vm5945_vm14 = vweird.f32 %v6390_v44 }
 0x710   :  { %v5937_v33 = vsel %vm5934_vm13, %v5936_v62, %v5932_v37  ;;  %6393 = vrcp.f32 %v5050_v17  ;;  %v4514_v34 = vpop.f32.mrf.mxu2  ;;  %vm5946_vm0 = vmor %vm5944_vm15, %vm5945_vm14  ;;  %v5965_v6 = vand.u32 2147483648, %v5050_v17  ;;  %v4795_v31 = vpop.f32.mrf.mxu3  ;;  %v5963_v30 = vand.u32 2147483647, %v5050_v17 }
 0x711   :  { %6073 = vst.msk [vmem:[%s9755_s5 + $0x1d0] sm:$0xff] %vm6014_vm5, %v5937_v33  ;;  %v5941_v0 = vsub.f32 1.0, %v5940_v13  ;;  %v4515_v23 = vadd.f32 %v4514_v34, %v4228_v16  ;;  %vm5959_vm3 = vweird.f32 %v5050_v17 }
 0x712   :  { %v5966_v54 = vor.u32 1.1754944e-38, %v5965_v6  ;;  %vm5964_vm6 = vcmp.eq.f32.partialorder %v5963_v30, 8.507059e+37 }
 0x713   :  { %v5942_v55 = vmul.f32 %v6390_v44, %v5941_v0  ;;  %v4792_v40 = vadd.f32 %v4791_v56, %v4515_v23 }
 0x715   :  { %v6392_v50 = vpop.eup %6391  ;;  %v5943_v7 = vadd.f32 %v6390_v44, %v5942_v55  ;;  %v6145_v11 = vmul.f32 -1.442695, %v4792_v40 }
 0x716   :  { %v6394_v8 = vpop.eup %6393  ;;  %v5051_v26 = vadd.f32 1.0, %v6392_v50 }
 0x717   :  { %v5947_v46 = vsel %vm5946_vm0, %v6390_v44, %v5943_v7  ;;  %v5955_v61 = vmul.f32 %v6394_v8, %v5050_v17  ;;  %6395 = vpow2.f32 %v6145_v11  ;;  %vm5960_vm2 = vweird.f32 %v6394_v8 }
 0x718   :  { %v5952_v20 = vsel %vm5949_vm1, %v5951_v22, %v5947_v46  ;;  %6397 = vrcp.f32 %v5051_v26  ;;  %v4518_v1 = vpop.f32.mrf.mxu2  ;;  %vm5961_vm4 = vmor %vm5959_vm3, %vm5960_vm2  ;;  %v5980_v49 = vand.u32 2147483648, %v5051_v26  ;;  %v5978_v21 = vand.u32 2147483647, %v5051_v26 }
 0x719   :  { %6074 = vst.msk [vmem:[%s9755_s5 + $0x1d8] sm:$0xff] %vm6014_vm5, %v5952_v20  ;;  %v5956_v19 = vsub.f32 1.0, %v5955_v61  ;;  %v4519_v18 = vadd.f32 %v4518_v1, %v4234_v57  ;;  %vm5974_vm8 = vweird.f32 %v5051_v26 }
 0x71a   :  { %v5981_v5 = vor.u32 1.1754944e-38, %v5980_v49  ;;  %vm5979_vm10 = vcmp.eq.f32.partialorder %v5978_v21, 8.507059e+37 }
 0x71b   :  { %v5957_v3 = vmul.f32 %v6394_v8, %v5956_v19  ;;  %v4796_v32 = vadd.f32 %v4795_v31, %v4519_v18 }
 0x71d   :  { %v6396_v14 = vpop.eup %6395  ;;  %v5958_v58 = vadd.f32 %v6394_v8, %v5957_v3  ;;  %v6146_v51 = vmul.f32 -1.442695, %v4796_v32 }
 0x71e   :  { %v6398_v63 = vpop.eup %6397  ;;  %v5052_v52 = vadd.f32 1.0, %v6396_v14 }
 0x71f   :  { %v5962_v27 = vsel %vm5961_vm4, %v6394_v8, %v5958_v58  ;;  %v5970_v53 = vmul.f32 %v6398_v63, %v5051_v26  ;;  %6399 = vpow2.f32 %v6146_v51  ;;  %vm5975_vm7 = vweird.f32 %v6398_v63 }
 0x720   :  { %v5967_v41 = vsel %vm5964_vm6, %v5966_v54, %v5962_v27  ;;  %6401 = vrcp.f32 %v5052_v52  ;;  %vm5976_vm9 = vmor %vm5974_vm8, %vm5975_vm7  ;;  %v5995_v38 = vand.u32 2147483648, %v5052_v52  ;;  %v5993_v15 = vand.u32 2147483647, %v5052_v52 }
 0x721   :  { %6075 = vst.msk [vmem:[%s9755_s5 + $0x1e0] sm:$0xff] %vm6014_vm5, %v5967_v41  ;;  %v5971_v24 = vsub.f32 1.0, %v5970_v53  ;;  %vm5989_vm12 = vweird.f32 %v5052_v52 }
 0x722   :  { %v5996_v44 = vor.u32 1.1754944e-38, %v5995_v38  ;;  %vm5994_vm14 = vcmp.eq.f32.partialorder %v5993_v15, 8.507059e+37 }
 0x723   :  { %v5972_v48 = vmul.f32 %v6398_v63, %v5971_v24 }
 0x725   :  { %v6400_v59 = vpop.eup %6399  ;;  %v5973_v43 = vadd.f32 %v6398_v63, %v5972_v48 }
 0x726   :  { %v6402_v60 = vpop.eup %6401  ;;  %v5053_v12 = vadd.f32 1.0, %v6400_v59 }
 0x727   :  { %v5977_v28 = vsel %vm5976_vm9, %v6398_v63, %v5973_v43  ;;  %v5985_v2 = vmul.f32 %v6402_v60, %v5052_v52  ;;  %vm5990_vm11 = vweird.f32 %v6402_v60 }
 0x728   :  { %v5982_v36 = vsel %vm5979_vm10, %v5981_v5, %v5977_v28  ;;  %6403 = vrcp.f32 %v5053_v12  ;;  %vm5991_vm13 = vmor %vm5989_vm12, %vm5990_vm11  ;;  %v6010_v37 = vand.u32 2147483648, %v5053_v12  ;;  %v6008_v33 = vand.u32 2147483647, %v5053_v12 }
 0x729   :  { %6076 = vst.msk [vmem:[%s9755_s5 + $0x1e8] sm:$0xff] %vm6014_vm5, %v5982_v36  ;;  %v5986_v45 = vsub.f32 1.0, %v5985_v2  ;;  %vm6004_vm0 = vweird.f32 %v5053_v12 }
 0x72a   :  { %v6011_v34 = vor.u32 1.1754944e-38, %v6010_v37  ;;  %vm6009_vm2 = vcmp.eq.f32.partialorder %v6008_v33, 8.507059e+37 }
 0x72b   :  { %v5987_v25 = vmul.f32 %v6402_v60, %v5986_v45 }
 0x72d   :  { %v5988_v47 = vadd.f32 %v6402_v60, %v5987_v25 }
 0x72e   :  { %v6404_v39 = vpop.eup %6403 }
 0x72f   :  { %v5992_v16 = vsel %vm5991_vm13, %v6402_v60, %v5988_v47  ;;  %v6000_v62 = vmul.f32 %v6404_v39, %v5053_v12  ;;  %vm6005_vm15 = vweird.f32 %v6404_v39 }
 0x730   :  { %v5997_v17 = vsel %vm5994_vm14, %v5996_v44, %v5992_v16  ;;  %vm6006_vm1 = vmor %vm6004_vm0, %vm6005_vm15 }
 0x731   :  { %6077 = vst.msk [vmem:[%s9755_s5 + $0x1f0] sm:$0xff] %vm6014_vm5, %v5997_v17  ;;  %v6001_v42 = vsub.f32 1.0, %v6000_v62 }
 0x733   :  { %v6002_v13 = vmul.f32 %v6404_v39, %v6001_v42 }
 0x735   :  { %v6003_v56 = vadd.f32 %v6404_v39, %v6002_v13 }
 0x737   :  { %v6007_v0 = vsel %vm6006_vm1, %v6404_v39, %v6003_v56 }
 0x738   :  { %v6012_v23 = vsel %vm6009_vm2, %v6011_v34, %v6007_v0 }
 0x739   :  { %6078 = vst.msk [vmem:[%s9755_s5 + $0x1f8] sm:$0xff] %vm6014_vm5, %v6012_v23 }

</bundles_post_ra>
